<compile_context>
chip_gen: v5e
topology: v5e:2x2
jax: 0.10.0
libtpu: 0.0.40
codegen_flags: <defaults>
</compile_context>

<pallas_src>
import functools

import jax
import jax.numpy as jnp
from jax import lax
from jax.experimental import pallas as pl
from jax.experimental.pallas import tpu as pltpu


_LANE = 128      # final Linear output lane-padded to this width -> unmasked stores
_SUBLANE = 8     # f32 sublane count: batch block size


# ----------------------------------------------------------------------------
# Fused kernel: 3-layer LSTM (chunked projection + time loop) + MLP head.
# ----------------------------------------------------------------------------
def _fused_kernel(*refs, num_layers, seq_len, time_chunk, batch_block):
    """refs = (x, [wih_l, whh_l, b_l]*num_layers, w1,b1,w2,b2,w3,b3,w4,b4,
               o_ref, gates_sc, seq_sc)

    x:        (T, Bb, Dp) f32   time-major block of the padded input
    wih_l:    (Din_l, 4H) bf16  whh_l: (H, 4H) bf16   b_l: (1, 4H) f32
              gate columns permuted to (i, f, o | g)
    head:     w1 (H,256) ... w4 (64, 128-padded), weights bf16 / biases f32
    o_ref:    (Bb, 128) f32     only column 0 carries the real output
    gates_sc: (Tc*Bb, 4H) f32   per-chunk input projection (hoisted out of the loop)
    seq_sc:   (T*Bb, H)  f32    per-layer output sequence (input to next layer)
    """
    x_ref = refs[0]
    lstm_refs = refs[1:1 + 3 * num_layers]
    head_refs = refs[1 + 3 * num_layers:1 + 3 * num_layers + 8]
    o_ref, gates_sc, seq_sc = refs[-3:]

    T, Tc, Bb = seq_len, time_chunk, batch_block
    n_chunks = T // Tc
    H = lstm_refs[1].shape[0]          # whh_0 is (H, 4H)
    f32 = jnp.float32
    bf16 = jnp.bfloat16
    # Bounded unroll: keep LLO scheduling visibility without code-size blow-up.
    step_unroll = min(Tc, 8)

    def run_layer(read_src_chunk, wih_ref, whh_ref, b_ref, write_seq):
        """Chunked input projection + recurrence for one layer."""
        wih = wih_ref[...]             # bf16 (K, 4H)
        whh = whh_ref[...]             # bf16 (H, 4H), hoisted out of the time loop
        b = b_ref[...]                 # f32  (1, 4H)

        def chunk_body(ci, carry):
            h0, c0 = carry
            src = read_src_chunk(ci)   # (Tc*Bb, K) bf16
            # Chunked hoisted projection: one (Tc*Bb,K)x(K,4H) bf16 MXU matmul
            # instead of Tc tiny M=Bb matmuls inside the serial recurrence.
            gates_sc[...] = jnp.dot(src, wih, preferred_element_type=f32) + b

            def step(t, hc):
                h, c = hc
                row = pl.multiple_of(t * Bb, Bb)          # sublane-aligned slice
                g = gates_sc[pl.ds(row, Bb), :] + jnp.dot(
                    h.astype(bf16), whh, preferred_element_type=f32)
                # Prep-time permuted gate order (i, f, o | g): one wide sigmoid
                # over 3H lanes + one tanh over H lanes (fewer EUP dispatches).
                sig = jax.nn.sigmoid(g[:, :3 * H])
                i_g = sig[:, 0 * H:1 * H]
                f_g = sig[:, 1 * H:2 * H]
                o_g = sig[:, 2 * H:3 * H]
                g_g = jnp.tanh(g[:, 3 * H:4 * H])
                c_new = f_g * c + i_g * g_g
                h_new = o_g * jnp.tanh(c_new)
                if write_seq:
                    seq_row = pl.multiple_of(ci * (Tc * Bb) + t * Bb, Bb)
                    seq_sc[pl.ds(seq_row, Bb), :] = h_new
                return h_new, c_new

            return lax.fori_loop(0, Tc, step, (h0, c0), unroll=step_unroll)

        zero = jnp.zeros((Bb, H), f32)
        return lax.fori_loop(0, n_chunks, chunk_body, (zero, zero))

    def x_chunk(ci):
        t0 = pl.multiple_of(ci * Tc, Tc)
        blk = x_ref[pl.ds(t0, Tc), :, :]               # (Tc, Bb, Dp) f32
        return blk.reshape(Tc * Bb, x_ref.shape[2]).astype(bf16)

    def seq_chunk(ci):
        r0 = pl.multiple_of(ci * (Tc * Bb), Tc * Bb)
        return seq_sc[pl.ds(r0, Tc * Bb), :].astype(bf16)

    h_last = None
    for layer in range(num_layers):
        wih_ref, whh_ref, b_ref = lstm_refs[3 * layer:3 * (layer + 1)]
        src_fn = x_chunk if layer == 0 else seq_chunk
        # Only the last timestep of the last layer feeds the head, so the final
        # layer never writes its sequence back.
        h_last, _ = run_layer(src_fn, wih_ref, whh_ref, b_ref,
                              write_seq=(layer < num_layers - 1))

    # --- MLP head: Linear(H,256)+ReLU -> (256,128)+ReLU -> (128,64)+ReLU -> (64,1)
    w1, b1, w2, b2, w3, b3, w4, b4 = head_refs
    h = jnp.maximum(jnp.dot(h_last.astype(bf16), w1[...],
                            preferred_element_type=f32) + b1[...], 0.0)
    h = jnp.maximum(jnp.dot(h.astype(bf16), w2[...],
                            preferred_element_type=f32) + b2[...], 0.0)
    h = jnp.maximum(jnp.dot(h.astype(bf16), w3[...],
                            preferred_element_type=f32) + b3[...], 0.0)
    # Final Linear lane-padded to 128 outputs (wrapper slices column 0) -> full vst.
    o_ref[...] = jnp.dot(h.astype(bf16), w4[...],
                         preferred_element_type=f32) + b4[...]


# ----------------------------------------------------------------------------
# Wrapper: one pallas_call with a batch-block "parallel" grid axis, jitted.
# ----------------------------------------------------------------------------
@functools.partial(jax.jit,
                   static_argnames=("output_size", "batch_block", "time_chunk"))
def lstm_model_forward(x_btd, prepared_lstm, prepared_fc, *, output_size=1,
                       batch_block=_SUBLANE, time_chunk=64):
    """x_btd: (B, T, input_size), batch_first like PyTorch."""
    B, T, Din = x_btd.shape
    num_layers = len(prepared_lstm)
    H = prepared_lstm[0][1].shape[0]            # whh_0 is (H, 4H)
    Dp = prepared_lstm[0][0].shape[0]           # lane-padded layer-0 input width

    Bb = batch_block
    num_blocks = max(1, -(-B // Bb))
    Bp = num_blocks * Bb

    tc = max(1, min(time_chunk, T))
    Tc = tc if T % tc == 0 else T               # chunk must divide T

    # Time-major, pad batch to the block grid and features to the lane-padded width.
    x_tm = jnp.transpose(x_btd, (1, 0, 2)).astype(jnp.float32)      # (T, B, Din)
    x_tm = jnp.pad(x_tm, ((0, 0), (0, Bp - B), (0, Dp - Din)))      # (T, Bp, Dp)

    flat = []
    for triple in prepared_lstm:
        flat.extend(triple)
    for pair in prepared_fc:
        flat.extend(pair)

    def _const_spec(a):
        return pl.BlockSpec(a.shape, lambda nb, _n=a.ndim: (0,) * _n)

    in_specs = [pl.BlockSpec((T, Bb, Dp), lambda nb: (0, nb, 0))]
    in_specs += [_const_spec(a) for a in flat]

    # Explicit scoped-VMEM limit sized from resident weights + scratch + I/O blocks.
    bytes_x = T * Bb * Dp * 4
    bytes_out = Bb * _LANE * 4
    bytes_w = sum(int(a.size) * jnp.dtype(a.dtype).itemsize for a in flat)
    bytes_scr = Tc * Bb * 4 * H * 4 + T * Bb * H * 4
    est = 2 * (bytes_x + bytes_out) + 2 * bytes_w + bytes_scr + (2 << 20)
    vmem_limit = int(max(16 << 20, min(56 << 20, 2 * est)))

    out_padded = pl.pallas_call(
        functools.partial(_fused_kernel, num_layers=num_layers, seq_len=T,
                          time_chunk=Tc, batch_block=Bb),
        grid=(num_blocks,),
        out_shape=jax.ShapeDtypeStruct((Bp, _LANE), jnp.float32),
        in_specs=in_specs,
        out_specs=pl.BlockSpec((Bb, _LANE), lambda nb: (nb, 0)),
        scratch_shapes=[
            pltpu.VMEM((Tc * Bb, 4 * H), jnp.float32),   # per-chunk gate pre-acts
            pltpu.VMEM((T * Bb, H), jnp.float32),        # per-layer output sequence
        ],
        compiler_params=pltpu.CompilerParams(
            dimension_semantics=("parallel",),
            vmem_limit_bytes=vmem_limit),
    )(x_tm, *flat)

    return out_padded[:B, :output_size]


# ----------------------------------------------------------------------------
# Parameter handling: PyTorch-convention params + one-time host-side prep
# (gate permutation, transpose, bias fold, layer-0 lane pad, bf16 weight cast).
# ----------------------------------------------------------------------------
def init_params(key, input_size, hidden_size, num_layers, output_size):
    keys = jax.random.split(key, num_layers * 4 + 8)
    k = iter(keys)
    scale = 0.08

    lstm_params = []
    for layer in range(num_layers):
        din = input_size if layer == 0 else hidden_size
        w_ih = scale * jax.random.normal(next(k), (4 * hidden_size, din), jnp.float32)
        w_hh = scale * jax.random.normal(next(k), (4 * hidden_size, hidden_size), jnp.float32)
        b_ih = scale * jax.random.normal(next(k), (4 * hidden_size,), jnp.float32)
        b_hh = scale * jax.random.normal(next(k), (4 * hidden_size,), jnp.float32)
        lstm_params.append((w_ih, w_hh, b_ih, b_hh))

    dims = [hidden_size, 256, 128, 64, output_size]
    fc_params = []
    for i in range(4):
        w = scale * jax.random.normal(next(k), (dims[i + 1], dims[i]), jnp.float32)
        b = scale * jax.random.normal(next(k), (dims[i + 1],), jnp.float32)
        fc_params.append((w, b))
    return lstm_params, fc_params


def _permute_gate_rows(w):
    """PyTorch gate order (i,f,g,o) -> (i,f,o,g) along axis 0 (works for 1-D bias)."""
    H = w.shape[0] // 4
    return jnp.concatenate([w[:2 * H], w[3 * H:4 * H], w[2 * H:3 * H]], axis=0)


def prepare_params(lstm_params, fc_params, lane_pad=_LANE):
    """One-time prep so no transposes / permutes / casts sit on the hot path."""
    lstm_prep = []
    for li, (w_ih, w_hh, b_ih, b_hh) in enumerate(lstm_params):
        wt_ih = jnp.transpose(_permute_gate_rows(w_ih))        # (Din_l, 4H)
        wt_hh = jnp.transpose(_permute_gate_rows(w_hh))        # (H, 4H)
        b = _permute_gate_rows(b_ih + b_hh).reshape(1, -1)     # (1, 4H)
        if li == 0:                                            # lane-pad layer-0 K dim
            din = wt_ih.shape[0]
            dp = -(-din // lane_pad) * lane_pad
            wt_ih = jnp.pad(wt_ih, ((0, dp - din), (0, 0)))
        lstm_prep.append((wt_ih.astype(jnp.bfloat16),
                          wt_hh.astype(jnp.bfloat16),
                          b.astype(jnp.float32)))

    fc_prep = []
    for i, (w, b) in enumerate(fc_params):
        wt = jnp.transpose(w)                                  # (in, out)
        bt = b.reshape(1, -1)
        if i == len(fc_params) - 1:                            # lane-pad last Linear
            pad = lane_pad - wt.shape[1]
            wt = jnp.pad(wt, ((0, 0), (0, pad)))
            bt = jnp.pad(bt, ((0, 0), (0, pad)))
        fc_prep.append((wt.astype(jnp.bfloat16), bt.astype(jnp.float32)))
    return tuple(lstm_prep), tuple(fc_prep)


# ----------------------------------------------------------------------------
# Pure-JAX reference (for sanity check).
# ----------------------------------------------------------------------------
def reference_forward(x_btd, lstm_params, fc_params):
    B = x_btd.shape[0]
    x = jnp.transpose(x_btd, (1, 0, 2)).astype(jnp.float32)
    for (w_ih, w_hh, b_ih, b_hh) in lstm_params:
        H = w_hh.shape[1]
        h = jnp.zeros((B, H), jnp.float32)
        c = jnp.zeros((B, H), jnp.float32)
        outs = []
        for t in range(x.shape[0]):
            g = x[t] @ w_ih.T + h @ w_hh.T + b_ih + b_hh
            i = jax.nn.sigmoid(g[:, 0 * H:1 * H])
            f = jax.nn.sigmoid(g[:, 1 * H:2 * H])
            gg = jnp.tanh(g[:, 2 * H:3 * H])
            o = jax.nn.sigmoid(g[:, 3 * H:4 * H])
            c = f * c + i * gg
            h = o * jnp.tanh(c)
            outs.append(h)
        x = jnp.stack(outs, 0)
    z = x[-1]
    for idx, (w, b) in enumerate(fc_params):
        z = z @ w.T + b
        if idx < len(fc_params) - 1:
            z = jnp.maximum(z, 0.0)
    return z


if __name__ == "__main__":
    # Small shapes consistent with the module: input_size=13 fixed by the model,
    # reduced hidden/seq for a quick run (hidden stays a multiple of 128).
    # B=10 -> two batch blocks of 8 (exercises the parallel grid axis);
    # time_chunk=4 with T=8 -> two time chunks (exercises the chunked projection).
    B, T = 10, 8
    INPUT_SIZE, HIDDEN_SIZE, NUM_LAYERS, OUTPUT_SIZE = 13, 128, 3, 1

    key = jax.random.PRNGKey(0)
    kx, kp = jax.random.split(key)
    x = jax.random.normal(kx, (B, T, INPUT_SIZE), jnp.float32)

    lstm_params, fc_params = init_params(kp, INPUT_SIZE, HIDDEN_SIZE,
                                         NUM_LAYERS, OUTPUT_SIZE)
    prepared_lstm, prepared_fc = prepare_params(lstm_params, fc_params)

    out = lstm_model_forward(x, prepared_lstm, prepared_fc,
                             output_size=OUTPUT_SIZE, time_chunk=4)
    out = jax.block_until_ready(out)

    # Reference uses the same bf16-rounded weights the kernel consumes (biases f32),
    # all arithmetic in f32; tolerance re-baselined for bf16 matmul inputs.
    def _q(p):
        return p.astype(jnp.bfloat16).astype(jnp.float32)

    lstm_q = [(_q(wi), _q(wh), bi, bh) for (wi, wh, bi, bh) in lstm_params]
    fc_q = [(_q(w), b) for (w, b) in fc_params]
    ref = reference_forward(x, lstm_q, fc_q)

    assert out.shape == (B, OUTPUT_SIZE), out.shape
    assert jnp.allclose(out, ref, atol=2e-2, rtol=2e-2), (out, ref)

    print("KERNEL_OK")
</pallas_src>

<mosaic_0001>
module attributes {stable_mosaic.version = 11 : i64} {
  func.func @_fused_kernel(%arg0: i32, %arg1: memref<8x8x128xf32, #tpu.memory_space<vmem>>, %arg2: memref<128x512xbf16, #tpu.memory_space<vmem>>, %arg3: memref<128x512xbf16, #tpu.memory_space<vmem>>, %arg4: memref<1x512xf32, #tpu.memory_space<vmem>>, %arg5: memref<128x512xbf16, #tpu.memory_space<vmem>>, %arg6: memref<128x512xbf16, #tpu.memory_space<vmem>>, %arg7: memref<1x512xf32, #tpu.memory_space<vmem>>, %arg8: memref<128x512xbf16, #tpu.memory_space<vmem>>, %arg9: memref<128x512xbf16, #tpu.memory_space<vmem>>, %arg10: memref<1x512xf32, #tpu.memory_space<vmem>>, %arg11: memref<128x256xbf16, #tpu.memory_space<vmem>>, %arg12: memref<1x256xf32, #tpu.memory_space<vmem>>, %arg13: memref<256x128xbf16, #tpu.memory_space<vmem>>, %arg14: memref<1x128xf32, #tpu.memory_space<vmem>>, %arg15: memref<128x64xbf16, #tpu.memory_space<vmem>>, %arg16: memref<1x64xf32, #tpu.memory_space<vmem>>, %arg17: memref<64x128xbf16, #tpu.memory_space<vmem>>, %arg18: memref<1x128xf32, #tpu.memory_space<vmem>>, %arg19: memref<8x128xf32, #tpu.memory_space<vmem>>, %arg20: memref<32x512xf32, #tpu.memory_space<vmem>>, %arg21: memref<64x128xf32, #tpu.memory_space<vmem>>) attributes {dimension_semantics = [#tpu.dimension_semantics<parallel>], iteration_bounds = array<i64: 2>, scalar_prefetch = 0 : i64, scratch_operands = 2 : i64, tpu.core_type = #tpu.core_type<tc>, window_params = [{transform_indices = @transform_0, window_bounds = array<i64: 8, 8, 128>}, {pipeline_mode = #tpu.pipeline_mode<synchronous>, transform_indices = @transform_1, window_bounds = array<i64: 128, 512>}, {pipeline_mode = #tpu.pipeline_mode<synchronous>, transform_indices = @transform_2, window_bounds = array<i64: 128, 512>}, {pipeline_mode = #tpu.pipeline_mode<synchronous>, transform_indices = @transform_3, window_bounds = array<i64: 1, 512>}, {pipeline_mode = #tpu.pipeline_mode<synchronous>, transform_indices = @transform_4, window_bounds = array<i64: 128, 512>}, {pipeline_mode = #tpu.pipeline_mode<synchronous>, transform_indices = @transform_5, window_bounds = array<i64: 128, 512>}, {pipeline_mode = #tpu.pipeline_mode<synchronous>, transform_indices = @transform_6, window_bounds = array<i64: 1, 512>}, {pipeline_mode = #tpu.pipeline_mode<synchronous>, transform_indices = @transform_7, window_bounds = array<i64: 128, 512>}, {pipeline_mode = #tpu.pipeline_mode<synchronous>, transform_indices = @transform_8, window_bounds = array<i64: 128, 512>}, {pipeline_mode = #tpu.pipeline_mode<synchronous>, transform_indices = @transform_9, window_bounds = array<i64: 1, 512>}, {pipeline_mode = #tpu.pipeline_mode<synchronous>, transform_indices = @transform_10, window_bounds = array<i64: 128, 256>}, {pipeline_mode = #tpu.pipeline_mode<synchronous>, transform_indices = @transform_11, window_bounds = array<i64: 1, 256>}, {pipeline_mode = #tpu.pipeline_mode<synchronous>, transform_indices = @transform_12, window_bounds = array<i64: 256, 128>}, {pipeline_mode = #tpu.pipeline_mode<synchronous>, transform_indices = @transform_13, window_bounds = array<i64: 1, 128>}, {pipeline_mode = #tpu.pipeline_mode<synchronous>, transform_indices = @transform_14, window_bounds = array<i64: 128, 64>}, {pipeline_mode = #tpu.pipeline_mode<synchronous>, transform_indices = @transform_15, window_bounds = array<i64: 1, 64>}, {pipeline_mode = #tpu.pipeline_mode<synchronous>, transform_indices = @transform_16, window_bounds = array<i64: 64, 128>}, {pipeline_mode = #tpu.pipeline_mode<synchronous>, transform_indices = @transform_17, window_bounds = array<i64: 1, 128>}, {transform_indices = @transform_18, window_bounds = array<i64: 8, 128>}]} {
    %c0 = arith.constant 0 : index
    %c0_0 = arith.constant 0 : index
    %0 = vector.load %arg2[%c0, %c0_0] : memref<128x512xbf16, #tpu.memory_space<vmem>>, vector<128x512xbf16>
    %c0_1 = arith.constant 0 : index
    %c0_2 = arith.constant 0 : index
    %1 = vector.load %arg3[%c0_1, %c0_2] : memref<128x512xbf16, #tpu.memory_space<vmem>>, vector<128x512xbf16>
    %c0_3 = arith.constant 0 : index
    %c0_4 = arith.constant 0 : index
    %2 = vector.load %arg4[%c0_3, %c0_4] : memref<1x512xf32, #tpu.memory_space<vmem>>, vector<1x512xf32>
    %cst = arith.constant 0.000000e+00 : f32
    %3 = vector.broadcast %cst : f32 to vector<8x128xf32>
    %c0_i32 = arith.constant 0 : i32
    %c2_i32 = arith.constant 2 : i32
    %4 = arith.addi %c0_i32, %c2_i32 : i32
    %c1_i32 = arith.constant 1 : i32
    %5:2 = scf.for %arg22 = %c0_i32 to %4 step %c1_i32 iter_args(%arg23 = %3, %arg24 = %3) -> (vector<8x128xf32>, vector<8x128xf32>)  : i32 {
      %c4_i32 = arith.constant 4 : i32
      %49 = arith.muli %arg22, %c4_i32 : i32
      %50 = tpu.assume_multiple %49, 4 : i32
      %51 = arith.index_cast %50 : i32 to index
      %c0_53 = arith.constant 0 : index
      %c0_54 = arith.constant 0 : index
      %52 = vector.load %arg1[%51, %c0_53, %c0_54] : memref<8x8x128xf32, #tpu.memory_space<vmem>>, vector<4x8x128xf32>
      %53 = vector.shape_cast %52 : vector<4x8x128xf32> to vector<32x128xf32>
      %54 = arith.truncf %53 : vector<32x128xf32> to vector<32x128xbf16>
      %cst_55 = arith.constant dense<0.000000e+00> : vector<32x512xf32>
      %55 = tpu.matmul %54, %0, %cst_55 {dimension_numbers = #tpu.dot_dimension_numbers<[1], [0], [0], [1], [0, 0, 1, 1], [], []>} : vector<32x128xbf16>, vector<128x512xbf16>, vector<32x512xf32> -> vector<32x512xf32>
      %56 = vector.broadcast %2 : vector<1x512xf32> to vector<32x512xf32>
      %57 = arith.addf %55, %56 : vector<32x512xf32>
      %c0_56 = arith.constant 0 : index
      %c0_57 = arith.constant 0 : index
      %58 = vector.load %arg20[%c0_56, %c0_57] : memref<32x512xf32, #tpu.memory_space<vmem>>, vector<32x512xf32>
      tpu.vector_store %arg20[%c0_56, %c0_57], %57 {strides = array<i32>} : memref<32x512xf32, #tpu.memory_space<vmem>>, vector<32x512xf32>,
      %c0_i32_58 = arith.constant 0 : i32
      %c8_i32 = arith.constant 8 : i32
      %59 = arith.muli %c0_i32_58, %c8_i32 : i32
      %60 = tpu.assume_multiple %59, 8 : i32
      %61 = arith.index_cast %60 : i32 to index
      %c0_59 = arith.constant 0 : index
      %62 = vector.load %arg20[%61, %c0_59] : memref<32x512xf32, #tpu.memory_space<vmem>>, vector<8x512xf32>
      %63 = arith.truncf %arg23 : vector<8x128xf32> to vector<8x128xbf16>
      %cst_60 = arith.constant dense<0.000000e+00> : vector<8x512xf32>
      %64 = tpu.matmul %63, %1, %cst_60 {dimension_numbers = #tpu.dot_dimension_numbers<[1], [0], [0], [1], [0, 0, 1, 1], [], []>} : vector<8x128xbf16>, vector<128x512xbf16>, vector<8x512xf32> -> vector<8x512xf32>
      %65 = arith.addf %62, %64 : vector<8x512xf32>
      %66 = vector.extract_strided_slice %65 {offsets = [0, 0], sizes = [8, 384], strides = [1, 1]} : vector<8x512xf32> to vector<8x384xf32>
      %67 = arith.negf %66 : vector<8x384xf32>
      %68 = math.exp %67 : vector<8x384xf32>
      %cst_61 = arith.constant 1.000000e+00 : f32
      %69 = vector.broadcast %cst_61 : f32 to vector<8x384xf32>
      %70 = arith.addf %69, %68 : vector<8x384xf32>
      %71 = arith.divf %69, %70 : vector<8x384xf32>
      %72 = vector.extract_strided_slice %71 {offsets = [0, 0], sizes = [8, 128], strides = [1, 1]} : vector<8x384xf32> to vector<8x128xf32>
      %73 = vector.extract_strided_slice %71 {offsets = [0, 128], sizes = [8, 128], strides = [1, 1]} : vector<8x384xf32> to vector<8x128xf32>
      %74 = vector.extract_strided_slice %71 {offsets = [0, 256], sizes = [8, 128], strides = [1, 1]} : vector<8x384xf32> to vector<8x128xf32>
      %75 = vector.extract_strided_slice %65 {offsets = [0, 384], sizes = [8, 128], strides = [1, 1]} : vector<8x512xf32> to vector<8x128xf32>
      %76 = math.tanh %75 : vector<8x128xf32>
      %77 = arith.mulf %73, %arg24 : vector<8x128xf32>
      %78 = arith.mulf %72, %76 : vector<8x128xf32>
      %79 = arith.addf %77, %78 : vector<8x128xf32>
      %80 = math.tanh %79 : vector<8x128xf32>
      %81 = arith.mulf %74, %80 : vector<8x128xf32>
      %c32_i32 = arith.constant 32 : i32
      %82 = arith.muli %arg22, %c32_i32 : i32
      %c8_i32_62 = arith.constant 8 : i32
      %83 = arith.muli %c0_i32_58, %c8_i32_62 : i32
      %84 = arith.addi %82, %83 : i32
      %85 = tpu.assume_multiple %84, 8 : i32
      %86 = arith.index_cast %85 : i32 to index
      %c0_63 = arith.constant 0 : index
      %87 = vector.load %arg21[%86, %c0_63] : memref<64x128xf32, #tpu.memory_space<vmem>>, vector<8x128xf32>
      tpu.vector_store %arg21[%86, %c0_63], %81 {strides = array<i32>} : memref<64x128xf32, #tpu.memory_space<vmem>>, vector<8x128xf32>,
      %c1_i32_64 = arith.constant 1 : i32
      %c8_i32_65 = arith.constant 8 : i32
      %88 = arith.muli %c1_i32_64, %c8_i32_65 : i32
      %89 = tpu.assume_multiple %88, 8 : i32
      %90 = arith.index_cast %89 : i32 to index
      %c0_66 = arith.constant 0 : index
      %91 = vector.load %arg20[%90, %c0_66] : memref<32x512xf32, #tpu.memory_space<vmem>>, vector<8x512xf32>
      %92 = arith.truncf %81 : vector<8x128xf32> to vector<8x128xbf16>
      %cst_67 = arith.constant dense<0.000000e+00> : vector<8x512xf32>
      %93 = tpu.matmul %92, %1, %cst_67 {dimension_numbers = #tpu.dot_dimension_numbers<[1], [0], [0], [1], [0, 0, 1, 1], [], []>} : vector<8x128xbf16>, vector<128x512xbf16>, vector<8x512xf32> -> vector<8x512xf32>
      %94 = arith.addf %91, %93 : vector<8x512xf32>
      %95 = vector.extract_strided_slice %94 {offsets = [0, 0], sizes = [8, 384], strides = [1, 1]} : vector<8x512xf32> to vector<8x384xf32>
      %96 = arith.negf %95 : vector<8x384xf32>
      %97 = math.exp %96 : vector<8x384xf32>
      %cst_68 = arith.constant 1.000000e+00 : f32
      %98 = vector.broadcast %cst_68 : f32 to vector<8x384xf32>
      %99 = arith.addf %98, %97 : vector<8x384xf32>
      %100 = arith.divf %98, %99 : vector<8x384xf32>
      %101 = vector.extract_strided_slice %100 {offsets = [0, 0], sizes = [8, 128], strides = [1, 1]} : vector<8x384xf32> to vector<8x128xf32>
      %102 = vector.extract_strided_slice %100 {offsets = [0, 128], sizes = [8, 128], strides = [1, 1]} : vector<8x384xf32> to vector<8x128xf32>
      %103 = vector.extract_strided_slice %100 {offsets = [0, 256], sizes = [8, 128], strides = [1, 1]} : vector<8x384xf32> to vector<8x128xf32>
      %104 = vector.extract_strided_slice %94 {offsets = [0, 384], sizes = [8, 128], strides = [1, 1]} : vector<8x512xf32> to vector<8x128xf32>
      %105 = math.tanh %104 : vector<8x128xf32>
      %106 = arith.mulf %102, %79 : vector<8x128xf32>
      %107 = arith.mulf %101, %105 : vector<8x128xf32>
      %108 = arith.addf %106, %107 : vector<8x128xf32>
      %109 = math.tanh %108 : vector<8x128xf32>
      %110 = arith.mulf %103, %109 : vector<8x128xf32>
      %c32_i32_69 = arith.constant 32 : i32
      %111 = arith.muli %arg22, %c32_i32_69 : i32
      %c8_i32_70 = arith.constant 8 : i32
      %112 = arith.muli %c1_i32_64, %c8_i32_70 : i32
      %113 = arith.addi %111, %112 : i32
      %114 = tpu.assume_multiple %113, 8 : i32
      %115 = arith.index_cast %114 : i32 to index
      %c0_71 = arith.constant 0 : index
      %116 = vector.load %arg21[%115, %c0_71] : memref<64x128xf32, #tpu.memory_space<vmem>>, vector<8x128xf32>
      tpu.vector_store %arg21[%115, %c0_71], %110 {strides = array<i32>} : memref<64x128xf32, #tpu.memory_space<vmem>>, vector<8x128xf32>,
      %c2_i32_72 = arith.constant 2 : i32
      %c8_i32_73 = arith.constant 8 : i32
      %117 = arith.muli %c2_i32_72, %c8_i32_73 : i32
      %118 = tpu.assume_multiple %117, 8 : i32
      %119 = arith.index_cast %118 : i32 to index
      %c0_74 = arith.constant 0 : index
      %120 = vector.load %arg20[%119, %c0_74] : memref<32x512xf32, #tpu.memory_space<vmem>>, vector<8x512xf32>
      %121 = arith.truncf %110 : vector<8x128xf32> to vector<8x128xbf16>
      %cst_75 = arith.constant dense<0.000000e+00> : vector<8x512xf32>
      %122 = tpu.matmul %121, %1, %cst_75 {dimension_numbers = #tpu.dot_dimension_numbers<[1], [0], [0], [1], [0, 0, 1, 1], [], []>} : vector<8x128xbf16>, vector<128x512xbf16>, vector<8x512xf32> -> vector<8x512xf32>
      %123 = arith.addf %120, %122 : vector<8x512xf32>
      %124 = vector.extract_strided_slice %123 {offsets = [0, 0], sizes = [8, 384], strides = [1, 1]} : vector<8x512xf32> to vector<8x384xf32>
      %125 = arith.negf %124 : vector<8x384xf32>
      %126 = math.exp %125 : vector<8x384xf32>
      %cst_76 = arith.constant 1.000000e+00 : f32
      %127 = vector.broadcast %cst_76 : f32 to vector<8x384xf32>
      %128 = arith.addf %127, %126 : vector<8x384xf32>
      %129 = arith.divf %127, %128 : vector<8x384xf32>
      %130 = vector.extract_strided_slice %129 {offsets = [0, 0], sizes = [8, 128], strides = [1, 1]} : vector<8x384xf32> to vector<8x128xf32>
      %131 = vector.extract_strided_slice %129 {offsets = [0, 128], sizes = [8, 128], strides = [1, 1]} : vector<8x384xf32> to vector<8x128xf32>
      %132 = vector.extract_strided_slice %129 {offsets = [0, 256], sizes = [8, 128], strides = [1, 1]} : vector<8x384xf32> to vector<8x128xf32>
      %133 = vector.extract_strided_slice %123 {offsets = [0, 384], sizes = [8, 128], strides = [1, 1]} : vector<8x512xf32> to vector<8x128xf32>
      %134 = math.tanh %133 : vector<8x128xf32>
      %135 = arith.mulf %131, %108 : vector<8x128xf32>
      %136 = arith.mulf %130, %134 : vector<8x128xf32>
      %137 = arith.addf %135, %136 : vector<8x128xf32>
      %138 = math.tanh %137 : vector<8x128xf32>
      %139 = arith.mulf %132, %138 : vector<8x128xf32>
      %c32_i32_77 = arith.constant 32 : i32
      %140 = arith.muli %arg22, %c32_i32_77 : i32
      %c8_i32_78 = arith.constant 8 : i32
      %141 = arith.muli %c2_i32_72, %c8_i32_78 : i32
      %142 = arith.addi %140, %141 : i32
      %143 = tpu.assume_multiple %142, 8 : i32
      %144 = arith.index_cast %143 : i32 to index
      %c0_79 = arith.constant 0 : index
      %145 = vector.load %arg21[%144, %c0_79] : memref<64x128xf32, #tpu.memory_space<vmem>>, vector<8x128xf32>
      tpu.vector_store %arg21[%144, %c0_79], %139 {strides = array<i32>} : memref<64x128xf32, #tpu.memory_space<vmem>>, vector<8x128xf32>,
      %c3_i32 = arith.constant 3 : i32
      %c8_i32_80 = arith.constant 8 : i32
      %146 = arith.muli %c3_i32, %c8_i32_80 : i32
      %147 = tpu.assume_multiple %146, 8 : i32
      %148 = arith.index_cast %147 : i32 to index
      %c0_81 = arith.constant 0 : index
      %149 = vector.load %arg20[%148, %c0_81] : memref<32x512xf32, #tpu.memory_space<vmem>>, vector<8x512xf32>
      %150 = arith.truncf %139 : vector<8x128xf32> to vector<8x128xbf16>
      %cst_82 = arith.constant dense<0.000000e+00> : vector<8x512xf32>
      %151 = tpu.matmul %150, %1, %cst_82 {dimension_numbers = #tpu.dot_dimension_numbers<[1], [0], [0], [1], [0, 0, 1, 1], [], []>} : vector<8x128xbf16>, vector<128x512xbf16>, vector<8x512xf32> -> vector<8x512xf32>
      %152 = arith.addf %149, %151 : vector<8x512xf32>
      %153 = vector.extract_strided_slice %152 {offsets = [0, 0], sizes = [8, 384], strides = [1, 1]} : vector<8x512xf32> to vector<8x384xf32>
      %154 = arith.negf %153 : vector<8x384xf32>
      %155 = math.exp %154 : vector<8x384xf32>
      %cst_83 = arith.constant 1.000000e+00 : f32
      %156 = vector.broadcast %cst_83 : f32 to vector<8x384xf32>
      %157 = arith.addf %156, %155 : vector<8x384xf32>
      %158 = arith.divf %156, %157 : vector<8x384xf32>
      %159 = vector.extract_strided_slice %158 {offsets = [0, 0], sizes = [8, 128], strides = [1, 1]} : vector<8x384xf32> to vector<8x128xf32>
      %160 = vector.extract_strided_slice %158 {offsets = [0, 128], sizes = [8, 128], strides = [1, 1]} : vector<8x384xf32> to vector<8x128xf32>
      %161 = vector.extract_strided_slice %158 {offsets = [0, 256], sizes = [8, 128], strides = [1, 1]} : vector<8x384xf32> to vector<8x128xf32>
      %162 = vector.extract_strided_slice %152 {offsets = [0, 384], sizes = [8, 128], strides = [1, 1]} : vector<8x512xf32> to vector<8x128xf32>
      %163 = math.tanh %162 : vector<8x128xf32>
      %164 = arith.mulf %160, %137 : vector<8x128xf32>
      %165 = arith.mulf %159, %163 : vector<8x128xf32>
      %166 = arith.addf %164, %165 : vector<8x128xf32>
      %167 = math.tanh %166 : vector<8x128xf32>
      %168 = arith.mulf %161, %167 : vector<8x128xf32>
      %c32_i32_84 = arith.constant 32 : i32
      %169 = arith.muli %arg22, %c32_i32_84 : i32
      %c8_i32_85 = arith.constant 8 : i32
      %170 = arith.muli %c3_i32, %c8_i32_85 : i32
      %171 = arith.addi %169, %170 : i32
      %172 = tpu.assume_multiple %171, 8 : i32
      %173 = arith.index_cast %172 : i32 to index
      %c0_86 = arith.constant 0 : index
      %174 = vector.load %arg21[%173, %c0_86] : memref<64x128xf32, #tpu.memory_space<vmem>>, vector<8x128xf32>
      tpu.vector_store %arg21[%173, %c0_86], %168 {strides = array<i32>} : memref<64x128xf32, #tpu.memory_space<vmem>>, vector<8x128xf32>,
      %c4_i32_87 = arith.constant 4 : i32
      scf.yield %168, %166 : vector<8x128xf32>, vector<8x128xf32>
    }
    %c2_i32_5 = arith.constant 2 : i32
    %c0_6 = arith.constant 0 : index
    %c0_7 = arith.constant 0 : index
    %6 = vector.load %arg5[%c0_6, %c0_7] : memref<128x512xbf16, #tpu.memory_space<vmem>>, vector<128x512xbf16>
    %c0_8 = arith.constant 0 : index
    %c0_9 = arith.constant 0 : index
    %7 = vector.load %arg6[%c0_8, %c0_9] : memref<128x512xbf16, #tpu.memory_space<vmem>>, vector<128x512xbf16>
    %c0_10 = arith.constant 0 : index
    %c0_11 = arith.constant 0 : index
    %8 = vector.load %arg7[%c0_10, %c0_11] : memref<1x512xf32, #tpu.memory_space<vmem>>, vector<1x512xf32>
    %cst_12 = arith.constant 0.000000e+00 : f32
    %9 = vector.broadcast %cst_12 : f32 to vector<8x128xf32>
    %c0_i32_13 = arith.constant 0 : i32
    %c2_i32_14 = arith.constant 2 : i32
    %10 = arith.addi %c0_i32_13, %c2_i32_14 : i32
    %c1_i32_15 = arith.constant 1 : i32
    %11:2 = scf.for %arg22 = %c0_i32_13 to %10 step %c1_i32_15 iter_args(%arg23 = %9, %arg24 = %9) -> (vector<8x128xf32>, vector<8x128xf32>)  : i32 {
      %c32_i32 = arith.constant 32 : i32
      %49 = arith.muli %arg22, %c32_i32 : i32
      %50 = tpu.assume_multiple %49, 32 : i32
      %51 = arith.index_cast %50 : i32 to index
      %c0_53 = arith.constant 0 : index
      %52 = vector.load %arg21[%51, %c0_53] : memref<64x128xf32, #tpu.memory_space<vmem>>, vector<32x128xf32>
      %53 = arith.truncf %52 : vector<32x128xf32> to vector<32x128xbf16>
      %cst_54 = arith.constant dense<0.000000e+00> : vector<32x512xf32>
      %54 = tpu.matmul %53, %6, %cst_54 {dimension_numbers = #tpu.dot_dimension_numbers<[1], [0], [0], [1], [0, 0, 1, 1], [], []>} : vector<32x128xbf16>, vector<128x512xbf16>, vector<32x512xf32> -> vector<32x512xf32>
      %55 = vector.broadcast %8 : vector<1x512xf32> to vector<32x512xf32>
      %56 = arith.addf %54, %55 : vector<32x512xf32>
      %c0_55 = arith.constant 0 : index
      %c0_56 = arith.constant 0 : index
      %57 = vector.load %arg20[%c0_55, %c0_56] : memref<32x512xf32, #tpu.memory_space<vmem>>, vector<32x512xf32>
      tpu.vector_store %arg20[%c0_55, %c0_56], %56 {strides = array<i32>} : memref<32x512xf32, #tpu.memory_space<vmem>>, vector<32x512xf32>,
      %c0_i32_57 = arith.constant 0 : i32
      %c8_i32 = arith.constant 8 : i32
      %58 = arith.muli %c0_i32_57, %c8_i32 : i32
      %59 = tpu.assume_multiple %58, 8 : i32
      %60 = arith.index_cast %59 : i32 to index
      %c0_58 = arith.constant 0 : index
      %61 = vector.load %arg20[%60, %c0_58] : memref<32x512xf32, #tpu.memory_space<vmem>>, vector<8x512xf32>
      %62 = arith.truncf %arg23 : vector<8x128xf32> to vector<8x128xbf16>
      %cst_59 = arith.constant dense<0.000000e+00> : vector<8x512xf32>
      %63 = tpu.matmul %62, %7, %cst_59 {dimension_numbers = #tpu.dot_dimension_numbers<[1], [0], [0], [1], [0, 0, 1, 1], [], []>} : vector<8x128xbf16>, vector<128x512xbf16>, vector<8x512xf32> -> vector<8x512xf32>
      %64 = arith.addf %61, %63 : vector<8x512xf32>
      %65 = vector.extract_strided_slice %64 {offsets = [0, 0], sizes = [8, 384], strides = [1, 1]} : vector<8x512xf32> to vector<8x384xf32>
      %66 = arith.negf %65 : vector<8x384xf32>
      %67 = math.exp %66 : vector<8x384xf32>
      %cst_60 = arith.constant 1.000000e+00 : f32
      %68 = vector.broadcast %cst_60 : f32 to vector<8x384xf32>
      %69 = arith.addf %68, %67 : vector<8x384xf32>
      %70 = arith.divf %68, %69 : vector<8x384xf32>
      %71 = vector.extract_strided_slice %70 {offsets = [0, 0], sizes = [8, 128], strides = [1, 1]} : vector<8x384xf32> to vector<8x128xf32>
      %72 = vector.extract_strided_slice %70 {offsets = [0, 128], sizes = [8, 128], strides = [1, 1]} : vector<8x384xf32> to vector<8x128xf32>
      %73 = vector.extract_strided_slice %70 {offsets = [0, 256], sizes = [8, 128], strides = [1, 1]} : vector<8x384xf32> to vector<8x128xf32>
      %74 = vector.extract_strided_slice %64 {offsets = [0, 384], sizes = [8, 128], strides = [1, 1]} : vector<8x512xf32> to vector<8x128xf32>
      %75 = math.tanh %74 : vector<8x128xf32>
      %76 = arith.mulf %72, %arg24 : vector<8x128xf32>
      %77 = arith.mulf %71, %75 : vector<8x128xf32>
      %78 = arith.addf %76, %77 : vector<8x128xf32>
      %79 = math.tanh %78 : vector<8x128xf32>
      %80 = arith.mulf %73, %79 : vector<8x128xf32>
      %c32_i32_61 = arith.constant 32 : i32
      %81 = arith.muli %arg22, %c32_i32_61 : i32
      %c8_i32_62 = arith.constant 8 : i32
      %82 = arith.muli %c0_i32_57, %c8_i32_62 : i32
      %83 = arith.addi %81, %82 : i32
      %84 = tpu.assume_multiple %83, 8 : i32
      %85 = arith.index_cast %84 : i32 to index
      %c0_63 = arith.constant 0 : index
      %86 = vector.load %arg21[%85, %c0_63] : memref<64x128xf32, #tpu.memory_space<vmem>>, vector<8x128xf32>
      tpu.vector_store %arg21[%85, %c0_63], %80 {strides = array<i32>} : memref<64x128xf32, #tpu.memory_space<vmem>>, vector<8x128xf32>,
      %c1_i32_64 = arith.constant 1 : i32
      %c8_i32_65 = arith.constant 8 : i32
      %87 = arith.muli %c1_i32_64, %c8_i32_65 : i32
      %88 = tpu.assume_multiple %87, 8 : i32
      %89 = arith.index_cast %88 : i32 to index
      %c0_66 = arith.constant 0 : index
      %90 = vector.load %arg20[%89, %c0_66] : memref<32x512xf32, #tpu.memory_space<vmem>>, vector<8x512xf32>
      %91 = arith.truncf %80 : vector<8x128xf32> to vector<8x128xbf16>
      %cst_67 = arith.constant dense<0.000000e+00> : vector<8x512xf32>
      %92 = tpu.matmul %91, %7, %cst_67 {dimension_numbers = #tpu.dot_dimension_numbers<[1], [0], [0], [1], [0, 0, 1, 1], [], []>} : vector<8x128xbf16>, vector<128x512xbf16>, vector<8x512xf32> -> vector<8x512xf32>
      %93 = arith.addf %90, %92 : vector<8x512xf32>
      %94 = vector.extract_strided_slice %93 {offsets = [0, 0], sizes = [8, 384], strides = [1, 1]} : vector<8x512xf32> to vector<8x384xf32>
      %95 = arith.negf %94 : vector<8x384xf32>
      %96 = math.exp %95 : vector<8x384xf32>
      %cst_68 = arith.constant 1.000000e+00 : f32
      %97 = vector.broadcast %cst_68 : f32 to vector<8x384xf32>
      %98 = arith.addf %97, %96 : vector<8x384xf32>
      %99 = arith.divf %97, %98 : vector<8x384xf32>
      %100 = vector.extract_strided_slice %99 {offsets = [0, 0], sizes = [8, 128], strides = [1, 1]} : vector<8x384xf32> to vector<8x128xf32>
      %101 = vector.extract_strided_slice %99 {offsets = [0, 128], sizes = [8, 128], strides = [1, 1]} : vector<8x384xf32> to vector<8x128xf32>
      %102 = vector.extract_strided_slice %99 {offsets = [0, 256], sizes = [8, 128], strides = [1, 1]} : vector<8x384xf32> to vector<8x128xf32>
      %103 = vector.extract_strided_slice %93 {offsets = [0, 384], sizes = [8, 128], strides = [1, 1]} : vector<8x512xf32> to vector<8x128xf32>
      %104 = math.tanh %103 : vector<8x128xf32>
      %105 = arith.mulf %101, %78 : vector<8x128xf32>
      %106 = arith.mulf %100, %104 : vector<8x128xf32>
      %107 = arith.addf %105, %106 : vector<8x128xf32>
      %108 = math.tanh %107 : vector<8x128xf32>
      %109 = arith.mulf %102, %108 : vector<8x128xf32>
      %c32_i32_69 = arith.constant 32 : i32
      %110 = arith.muli %arg22, %c32_i32_69 : i32
      %c8_i32_70 = arith.constant 8 : i32
      %111 = arith.muli %c1_i32_64, %c8_i32_70 : i32
      %112 = arith.addi %110, %111 : i32
      %113 = tpu.assume_multiple %112, 8 : i32
      %114 = arith.index_cast %113 : i32 to index
      %c0_71 = arith.constant 0 : index
      %115 = vector.load %arg21[%114, %c0_71] : memref<64x128xf32, #tpu.memory_space<vmem>>, vector<8x128xf32>
      tpu.vector_store %arg21[%114, %c0_71], %109 {strides = array<i32>} : memref<64x128xf32, #tpu.memory_space<vmem>>, vector<8x128xf32>,
      %c2_i32_72 = arith.constant 2 : i32
      %c8_i32_73 = arith.constant 8 : i32
      %116 = arith.muli %c2_i32_72, %c8_i32_73 : i32
      %117 = tpu.assume_multiple %116, 8 : i32
      %118 = arith.index_cast %117 : i32 to index
      %c0_74 = arith.constant 0 : index
      %119 = vector.load %arg20[%118, %c0_74] : memref<32x512xf32, #tpu.memory_space<vmem>>, vector<8x512xf32>
      %120 = arith.truncf %109 : vector<8x128xf32> to vector<8x128xbf16>
      %cst_75 = arith.constant dense<0.000000e+00> : vector<8x512xf32>
      %121 = tpu.matmul %120, %7, %cst_75 {dimension_numbers = #tpu.dot_dimension_numbers<[1], [0], [0], [1], [0, 0, 1, 1], [], []>} : vector<8x128xbf16>, vector<128x512xbf16>, vector<8x512xf32> -> vector<8x512xf32>
      %122 = arith.addf %119, %121 : vector<8x512xf32>
      %123 = vector.extract_strided_slice %122 {offsets = [0, 0], sizes = [8, 384], strides = [1, 1]} : vector<8x512xf32> to vector<8x384xf32>
      %124 = arith.negf %123 : vector<8x384xf32>
      %125 = math.exp %124 : vector<8x384xf32>
      %cst_76 = arith.constant 1.000000e+00 : f32
      %126 = vector.broadcast %cst_76 : f32 to vector<8x384xf32>
      %127 = arith.addf %126, %125 : vector<8x384xf32>
      %128 = arith.divf %126, %127 : vector<8x384xf32>
      %129 = vector.extract_strided_slice %128 {offsets = [0, 0], sizes = [8, 128], strides = [1, 1]} : vector<8x384xf32> to vector<8x128xf32>
      %130 = vector.extract_strided_slice %128 {offsets = [0, 128], sizes = [8, 128], strides = [1, 1]} : vector<8x384xf32> to vector<8x128xf32>
      %131 = vector.extract_strided_slice %128 {offsets = [0, 256], sizes = [8, 128], strides = [1, 1]} : vector<8x384xf32> to vector<8x128xf32>
      %132 = vector.extract_strided_slice %122 {offsets = [0, 384], sizes = [8, 128], strides = [1, 1]} : vector<8x512xf32> to vector<8x128xf32>
      %133 = math.tanh %132 : vector<8x128xf32>
      %134 = arith.mulf %130, %107 : vector<8x128xf32>
      %135 = arith.mulf %129, %133 : vector<8x128xf32>
      %136 = arith.addf %134, %135 : vector<8x128xf32>
      %137 = math.tanh %136 : vector<8x128xf32>
      %138 = arith.mulf %131, %137 : vector<8x128xf32>
      %c32_i32_77 = arith.constant 32 : i32
      %139 = arith.muli %arg22, %c32_i32_77 : i32
      %c8_i32_78 = arith.constant 8 : i32
      %140 = arith.muli %c2_i32_72, %c8_i32_78 : i32
      %141 = arith.addi %139, %140 : i32
      %142 = tpu.assume_multiple %141, 8 : i32
      %143 = arith.index_cast %142 : i32 to index
      %c0_79 = arith.constant 0 : index
      %144 = vector.load %arg21[%143, %c0_79] : memref<64x128xf32, #tpu.memory_space<vmem>>, vector<8x128xf32>
      tpu.vector_store %arg21[%143, %c0_79], %138 {strides = array<i32>} : memref<64x128xf32, #tpu.memory_space<vmem>>, vector<8x128xf32>,
      %c3_i32 = arith.constant 3 : i32
      %c8_i32_80 = arith.constant 8 : i32
      %145 = arith.muli %c3_i32, %c8_i32_80 : i32
      %146 = tpu.assume_multiple %145, 8 : i32
      %147 = arith.index_cast %146 : i32 to index
      %c0_81 = arith.constant 0 : index
      %148 = vector.load %arg20[%147, %c0_81] : memref<32x512xf32, #tpu.memory_space<vmem>>, vector<8x512xf32>
      %149 = arith.truncf %138 : vector<8x128xf32> to vector<8x128xbf16>
      %cst_82 = arith.constant dense<0.000000e+00> : vector<8x512xf32>
      %150 = tpu.matmul %149, %7, %cst_82 {dimension_numbers = #tpu.dot_dimension_numbers<[1], [0], [0], [1], [0, 0, 1, 1], [], []>} : vector<8x128xbf16>, vector<128x512xbf16>, vector<8x512xf32> -> vector<8x512xf32>
      %151 = arith.addf %148, %150 : vector<8x512xf32>
      %152 = vector.extract_strided_slice %151 {offsets = [0, 0], sizes = [8, 384], strides = [1, 1]} : vector<8x512xf32> to vector<8x384xf32>
      %153 = arith.negf %152 : vector<8x384xf32>
      %154 = math.exp %153 : vector<8x384xf32>
      %cst_83 = arith.constant 1.000000e+00 : f32
      %155 = vector.broadcast %cst_83 : f32 to vector<8x384xf32>
      %156 = arith.addf %155, %154 : vector<8x384xf32>
      %157 = arith.divf %155, %156 : vector<8x384xf32>
      %158 = vector.extract_strided_slice %157 {offsets = [0, 0], sizes = [8, 128], strides = [1, 1]} : vector<8x384xf32> to vector<8x128xf32>
      %159 = vector.extract_strided_slice %157 {offsets = [0, 128], sizes = [8, 128], strides = [1, 1]} : vector<8x384xf32> to vector<8x128xf32>
      %160 = vector.extract_strided_slice %157 {offsets = [0, 256], sizes = [8, 128], strides = [1, 1]} : vector<8x384xf32> to vector<8x128xf32>
      %161 = vector.extract_strided_slice %151 {offsets = [0, 384], sizes = [8, 128], strides = [1, 1]} : vector<8x512xf32> to vector<8x128xf32>
      %162 = math.tanh %161 : vector<8x128xf32>
      %163 = arith.mulf %159, %136 : vector<8x128xf32>
      %164 = arith.mulf %158, %162 : vector<8x128xf32>
      %165 = arith.addf %163, %164 : vector<8x128xf32>
      %166 = math.tanh %165 : vector<8x128xf32>
      %167 = arith.mulf %160, %166 : vector<8x128xf32>
      %c32_i32_84 = arith.constant 32 : i32
      %168 = arith.muli %arg22, %c32_i32_84 : i32
      %c8_i32_85 = arith.constant 8 : i32
      %169 = arith.muli %c3_i32, %c8_i32_85 : i32
      %170 = arith.addi %168, %169 : i32
      %171 = tpu.assume_multiple %170, 8 : i32
      %172 = arith.index_cast %171 : i32 to index
      %c0_86 = arith.constant 0 : index
      %173 = vector.load %arg21[%172, %c0_86] : memref<64x128xf32, #tpu.memory_space<vmem>>, vector<8x128xf32>
      tpu.vector_store %arg21[%172, %c0_86], %167 {strides = array<i32>} : memref<64x128xf32, #tpu.memory_space<vmem>>, vector<8x128xf32>,
      %c4_i32 = arith.constant 4 : i32
      scf.yield %167, %165 : vector<8x128xf32>, vector<8x128xf32>
    }
    %c2_i32_16 = arith.constant 2 : i32
    %c0_17 = arith.constant 0 : index
    %c0_18 = arith.constant 0 : index
    %12 = vector.load %arg8[%c0_17, %c0_18] : memref<128x512xbf16, #tpu.memory_space<vmem>>, vector<128x512xbf16>
    %c0_19 = arith.constant 0 : index
    %c0_20 = arith.constant 0 : index
    %13 = vector.load %arg9[%c0_19, %c0_20] : memref<128x512xbf16, #tpu.memory_space<vmem>>, vector<128x512xbf16>
    %c0_21 = arith.constant 0 : index
    %c0_22 = arith.constant 0 : index
    %14 = vector.load %arg10[%c0_21, %c0_22] : memref<1x512xf32, #tpu.memory_space<vmem>>, vector<1x512xf32>
    %cst_23 = arith.constant 0.000000e+00 : f32
    %15 = vector.broadcast %cst_23 : f32 to vector<8x128xf32>
    %c0_i32_24 = arith.constant 0 : i32
    %c2_i32_25 = arith.constant 2 : i32
    %16 = arith.addi %c0_i32_24, %c2_i32_25 : i32
    %c1_i32_26 = arith.constant 1 : i32
    %17:2 = scf.for %arg22 = %c0_i32_24 to %16 step %c1_i32_26 iter_args(%arg23 = %15, %arg24 = %15) -> (vector<8x128xf32>, vector<8x128xf32>)  : i32 {
      %c32_i32 = arith.constant 32 : i32
      %49 = arith.muli %arg22, %c32_i32 : i32
      %50 = tpu.assume_multiple %49, 32 : i32
      %51 = arith.index_cast %50 : i32 to index
      %c0_53 = arith.constant 0 : index
      %52 = vector.load %arg21[%51, %c0_53] : memref<64x128xf32, #tpu.memory_space<vmem>>, vector<32x128xf32>
      %53 = arith.truncf %52 : vector<32x128xf32> to vector<32x128xbf16>
      %cst_54 = arith.constant dense<0.000000e+00> : vector<32x512xf32>
      %54 = tpu.matmul %53, %12, %cst_54 {dimension_numbers = #tpu.dot_dimension_numbers<[1], [0], [0], [1], [0, 0, 1, 1], [], []>} : vector<32x128xbf16>, vector<128x512xbf16>, vector<32x512xf32> -> vector<32x512xf32>
      %55 = vector.broadcast %14 : vector<1x512xf32> to vector<32x512xf32>
      %56 = arith.addf %54, %55 : vector<32x512xf32>
      %c0_55 = arith.constant 0 : index
      %c0_56 = arith.constant 0 : index
      %57 = vector.load %arg20[%c0_55, %c0_56] : memref<32x512xf32, #tpu.memory_space<vmem>>, vector<32x512xf32>
      tpu.vector_store %arg20[%c0_55, %c0_56], %56 {strides = array<i32>} : memref<32x512xf32, #tpu.memory_space<vmem>>, vector<32x512xf32>,
      %c0_i32_57 = arith.constant 0 : i32
      %c8_i32 = arith.constant 8 : i32
      %58 = arith.muli %c0_i32_57, %c8_i32 : i32
      %59 = tpu.assume_multiple %58, 8 : i32
      %60 = arith.index_cast %59 : i32 to index
      %c0_58 = arith.constant 0 : index
      %61 = vector.load %arg20[%60, %c0_58] : memref<32x512xf32, #tpu.memory_space<vmem>>, vector<8x512xf32>
      %62 = arith.truncf %arg23 : vector<8x128xf32> to vector<8x128xbf16>
      %cst_59 = arith.constant dense<0.000000e+00> : vector<8x512xf32>
      %63 = tpu.matmul %62, %13, %cst_59 {dimension_numbers = #tpu.dot_dimension_numbers<[1], [0], [0], [1], [0, 0, 1, 1], [], []>} : vector<8x128xbf16>, vector<128x512xbf16>, vector<8x512xf32> -> vector<8x512xf32>
      %64 = arith.addf %61, %63 : vector<8x512xf32>
      %65 = vector.extract_strided_slice %64 {offsets = [0, 0], sizes = [8, 384], strides = [1, 1]} : vector<8x512xf32> to vector<8x384xf32>
      %66 = arith.negf %65 : vector<8x384xf32>
      %67 = math.exp %66 : vector<8x384xf32>
      %cst_60 = arith.constant 1.000000e+00 : f32
      %68 = vector.broadcast %cst_60 : f32 to vector<8x384xf32>
      %69 = arith.addf %68, %67 : vector<8x384xf32>
      %70 = arith.divf %68, %69 : vector<8x384xf32>
      %71 = vector.extract_strided_slice %70 {offsets = [0, 0], sizes = [8, 128], strides = [1, 1]} : vector<8x384xf32> to vector<8x128xf32>
      %72 = vector.extract_strided_slice %70 {offsets = [0, 128], sizes = [8, 128], strides = [1, 1]} : vector<8x384xf32> to vector<8x128xf32>
      %73 = vector.extract_strided_slice %70 {offsets = [0, 256], sizes = [8, 128], strides = [1, 1]} : vector<8x384xf32> to vector<8x128xf32>
      %74 = vector.extract_strided_slice %64 {offsets = [0, 384], sizes = [8, 128], strides = [1, 1]} : vector<8x512xf32> to vector<8x128xf32>
      %75 = math.tanh %74 : vector<8x128xf32>
      %76 = arith.mulf %72, %arg24 : vector<8x128xf32>
      %77 = arith.mulf %71, %75 : vector<8x128xf32>
      %78 = arith.addf %76, %77 : vector<8x128xf32>
      %79 = math.tanh %78 : vector<8x128xf32>
      %80 = arith.mulf %73, %79 : vector<8x128xf32>
      %c1_i32_61 = arith.constant 1 : i32
      %c8_i32_62 = arith.constant 8 : i32
      %81 = arith.muli %c1_i32_61, %c8_i32_62 : i32
      %82 = tpu.assume_multiple %81, 8 : i32
      %83 = arith.index_cast %82 : i32 to index
      %c0_63 = arith.constant 0 : index
      %84 = vector.load %arg20[%83, %c0_63] : memref<32x512xf32, #tpu.memory_space<vmem>>, vector<8x512xf32>
      %85 = arith.truncf %80 : vector<8x128xf32> to vector<8x128xbf16>
      %cst_64 = arith.constant dense<0.000000e+00> : vector<8x512xf32>
      %86 = tpu.matmul %85, %13, %cst_64 {dimension_numbers = #tpu.dot_dimension_numbers<[1], [0], [0], [1], [0, 0, 1, 1], [], []>} : vector<8x128xbf16>, vector<128x512xbf16>, vector<8x512xf32> -> vector<8x512xf32>
      %87 = arith.addf %84, %86 : vector<8x512xf32>
      %88 = vector.extract_strided_slice %87 {offsets = [0, 0], sizes = [8, 384], strides = [1, 1]} : vector<8x512xf32> to vector<8x384xf32>
      %89 = arith.negf %88 : vector<8x384xf32>
      %90 = math.exp %89 : vector<8x384xf32>
      %cst_65 = arith.constant 1.000000e+00 : f32
      %91 = vector.broadcast %cst_65 : f32 to vector<8x384xf32>
      %92 = arith.addf %91, %90 : vector<8x384xf32>
      %93 = arith.divf %91, %92 : vector<8x384xf32>
      %94 = vector.extract_strided_slice %93 {offsets = [0, 0], sizes = [8, 128], strides = [1, 1]} : vector<8x384xf32> to vector<8x128xf32>
      %95 = vector.extract_strided_slice %93 {offsets = [0, 128], sizes = [8, 128], strides = [1, 1]} : vector<8x384xf32> to vector<8x128xf32>
      %96 = vector.extract_strided_slice %93 {offsets = [0, 256], sizes = [8, 128], strides = [1, 1]} : vector<8x384xf32> to vector<8x128xf32>
      %97 = vector.extract_strided_slice %87 {offsets = [0, 384], sizes = [8, 128], strides = [1, 1]} : vector<8x512xf32> to vector<8x128xf32>
      %98 = math.tanh %97 : vector<8x128xf32>
      %99 = arith.mulf %95, %78 : vector<8x128xf32>
      %100 = arith.mulf %94, %98 : vector<8x128xf32>
      %101 = arith.addf %99, %100 : vector<8x128xf32>
      %102 = math.tanh %101 : vector<8x128xf32>
      %103 = arith.mulf %96, %102 : vector<8x128xf32>
      %c2_i32_66 = arith.constant 2 : i32
      %c8_i32_67 = arith.constant 8 : i32
      %104 = arith.muli %c2_i32_66, %c8_i32_67 : i32
      %105 = tpu.assume_multiple %104, 8 : i32
      %106 = arith.index_cast %105 : i32 to index
      %c0_68 = arith.constant 0 : index
      %107 = vector.load %arg20[%106, %c0_68] : memref<32x512xf32, #tpu.memory_space<vmem>>, vector<8x512xf32>
      %108 = arith.truncf %103 : vector<8x128xf32> to vector<8x128xbf16>
      %cst_69 = arith.constant dense<0.000000e+00> : vector<8x512xf32>
      %109 = tpu.matmul %108, %13, %cst_69 {dimension_numbers = #tpu.dot_dimension_numbers<[1], [0], [0], [1], [0, 0, 1, 1], [], []>} : vector<8x128xbf16>, vector<128x512xbf16>, vector<8x512xf32> -> vector<8x512xf32>
      %110 = arith.addf %107, %109 : vector<8x512xf32>
      %111 = vector.extract_strided_slice %110 {offsets = [0, 0], sizes = [8, 384], strides = [1, 1]} : vector<8x512xf32> to vector<8x384xf32>
      %112 = arith.negf %111 : vector<8x384xf32>
      %113 = math.exp %112 : vector<8x384xf32>
      %cst_70 = arith.constant 1.000000e+00 : f32
      %114 = vector.broadcast %cst_70 : f32 to vector<8x384xf32>
      %115 = arith.addf %114, %113 : vector<8x384xf32>
      %116 = arith.divf %114, %115 : vector<8x384xf32>
      %117 = vector.extract_strided_slice %116 {offsets = [0, 0], sizes = [8, 128], strides = [1, 1]} : vector<8x384xf32> to vector<8x128xf32>
      %118 = vector.extract_strided_slice %116 {offsets = [0, 128], sizes = [8, 128], strides = [1, 1]} : vector<8x384xf32> to vector<8x128xf32>
      %119 = vector.extract_strided_slice %116 {offsets = [0, 256], sizes = [8, 128], strides = [1, 1]} : vector<8x384xf32> to vector<8x128xf32>
      %120 = vector.extract_strided_slice %110 {offsets = [0, 384], sizes = [8, 128], strides = [1, 1]} : vector<8x512xf32> to vector<8x128xf32>
      %121 = math.tanh %120 : vector<8x128xf32>
      %122 = arith.mulf %118, %101 : vector<8x128xf32>
      %123 = arith.mulf %117, %121 : vector<8x128xf32>
      %124 = arith.addf %122, %123 : vector<8x128xf32>
      %125 = math.tanh %124 : vector<8x128xf32>
      %126 = arith.mulf %119, %125 : vector<8x128xf32>
      %c3_i32 = arith.constant 3 : i32
      %c8_i32_71 = arith.constant 8 : i32
      %127 = arith.muli %c3_i32, %c8_i32_71 : i32
      %128 = tpu.assume_multiple %127, 8 : i32
      %129 = arith.index_cast %128 : i32 to index
      %c0_72 = arith.constant 0 : index
      %130 = vector.load %arg20[%129, %c0_72] : memref<32x512xf32, #tpu.memory_space<vmem>>, vector<8x512xf32>
      %131 = arith.truncf %126 : vector<8x128xf32> to vector<8x128xbf16>
      %cst_73 = arith.constant dense<0.000000e+00> : vector<8x512xf32>
      %132 = tpu.matmul %131, %13, %cst_73 {dimension_numbers = #tpu.dot_dimension_numbers<[1], [0], [0], [1], [0, 0, 1, 1], [], []>} : vector<8x128xbf16>, vector<128x512xbf16>, vector<8x512xf32> -> vector<8x512xf32>
      %133 = arith.addf %130, %132 : vector<8x512xf32>
      %134 = vector.extract_strided_slice %133 {offsets = [0, 0], sizes = [8, 384], strides = [1, 1]} : vector<8x512xf32> to vector<8x384xf32>
      %135 = arith.negf %134 : vector<8x384xf32>
      %136 = math.exp %135 : vector<8x384xf32>
      %cst_74 = arith.constant 1.000000e+00 : f32
      %137 = vector.broadcast %cst_74 : f32 to vector<8x384xf32>
      %138 = arith.addf %137, %136 : vector<8x384xf32>
      %139 = arith.divf %137, %138 : vector<8x384xf32>
      %140 = vector.extract_strided_slice %139 {offsets = [0, 0], sizes = [8, 128], strides = [1, 1]} : vector<8x384xf32> to vector<8x128xf32>
      %141 = vector.extract_strided_slice %139 {offsets = [0, 128], sizes = [8, 128], strides = [1, 1]} : vector<8x384xf32> to vector<8x128xf32>
      %142 = vector.extract_strided_slice %139 {offsets = [0, 256], sizes = [8, 128], strides = [1, 1]} : vector<8x384xf32> to vector<8x128xf32>
      %143 = vector.extract_strided_slice %133 {offsets = [0, 384], sizes = [8, 128], strides = [1, 1]} : vector<8x512xf32> to vector<8x128xf32>
      %144 = math.tanh %143 : vector<8x128xf32>
      %145 = arith.mulf %141, %124 : vector<8x128xf32>
      %146 = arith.mulf %140, %144 : vector<8x128xf32>
      %147 = arith.addf %145, %146 : vector<8x128xf32>
      %148 = math.tanh %147 : vector<8x128xf32>
      %149 = arith.mulf %142, %148 : vector<8x128xf32>
      %c4_i32 = arith.constant 4 : i32
      scf.yield %149, %147 : vector<8x128xf32>, vector<8x128xf32>
    }
    %c2_i32_27 = arith.constant 2 : i32
    %18 = arith.truncf %17#0 : vector<8x128xf32> to vector<8x128xbf16>
    %c0_28 = arith.constant 0 : index
    %c0_29 = arith.constant 0 : index
    %19 = vector.load %arg11[%c0_28, %c0_29] : memref<128x256xbf16, #tpu.memory_space<vmem>>, vector<128x256xbf16>
    %cst_30 = arith.constant dense<0.000000e+00> : vector<8x256xf32>
    %20 = tpu.matmul %18, %19, %cst_30 {dimension_numbers = #tpu.dot_dimension_numbers<[1], [0], [0], [1], [0, 0, 1, 1], [], []>} : vector<8x128xbf16>, vector<128x256xbf16>, vector<8x256xf32> -> vector<8x256xf32>
    %c0_31 = arith.constant 0 : index
    %c0_32 = arith.constant 0 : index
    %21 = vector.load %arg12[%c0_31, %c0_32] : memref<1x256xf32, #tpu.memory_space<vmem>>, vector<1x256xf32>
    %22 = vector.broadcast %21 : vector<1x256xf32> to vector<8x256xf32>
    %23 = arith.addf %20, %22 : vector<8x256xf32>
    %cst_33 = arith.constant 0.000000e+00 : f32
    %24 = vector.broadcast %cst_33 : f32 to vector<8x256xf32>
    %25 = arith.maximumf %23, %24 : vector<8x256xf32>
    %26 = arith.truncf %25 : vector<8x256xf32> to vector<8x256xbf16>
    %c0_34 = arith.constant 0 : index
    %c0_35 = arith.constant 0 : index
    %27 = vector.load %arg13[%c0_34, %c0_35] : memref<256x128xbf16, #tpu.memory_space<vmem>>, vector<256x128xbf16>
    %cst_36 = arith.constant dense<0.000000e+00> : vector<8x128xf32>
    %28 = tpu.matmul %26, %27, %cst_36 {dimension_numbers = #tpu.dot_dimension_numbers<[1], [0], [0], [1], [0, 0, 1, 1], [], []>} : vector<8x256xbf16>, vector<256x128xbf16>, vector<8x128xf32> -> vector<8x128xf32>
    %c0_37 = arith.constant 0 : index
    %c0_38 = arith.constant 0 : index
    %29 = vector.load %arg14[%c0_37, %c0_38] : memref<1x128xf32, #tpu.memory_space<vmem>>, vector<1x128xf32>
    %30 = vector.broadcast %29 : vector<1x128xf32> to vector<8x128xf32>
    %31 = arith.addf %28, %30 : vector<8x128xf32>
    %cst_39 = arith.constant 0.000000e+00 : f32
    %32 = vector.broadcast %cst_39 : f32 to vector<8x128xf32>
    %33 = arith.maximumf %31, %32 : vector<8x128xf32>
    %34 = arith.truncf %33 : vector<8x128xf32> to vector<8x128xbf16>
    %c0_40 = arith.constant 0 : index
    %c0_41 = arith.constant 0 : index
    %35 = vector.load %arg15[%c0_40, %c0_41] : memref<128x64xbf16, #tpu.memory_space<vmem>>, vector<128x64xbf16>
    %cst_42 = arith.constant dense<0.000000e+00> : vector<8x64xf32>
    %36 = tpu.matmul %34, %35, %cst_42 {dimension_numbers = #tpu.dot_dimension_numbers<[1], [0], [0], [1], [0, 0, 1, 1], [], []>} : vector<8x128xbf16>, vector<128x64xbf16>, vector<8x64xf32> -> vector<8x64xf32>
    %c0_43 = arith.constant 0 : index
    %c0_44 = arith.constant 0 : index
    %37 = vector.load %arg16[%c0_43, %c0_44] : memref<1x64xf32, #tpu.memory_space<vmem>>, vector<1x64xf32>
    %38 = vector.broadcast %37 : vector<1x64xf32> to vector<8x64xf32>
    %39 = arith.addf %36, %38 : vector<8x64xf32>
    %cst_45 = arith.constant 0.000000e+00 : f32
    %40 = vector.broadcast %cst_45 : f32 to vector<8x64xf32>
    %41 = arith.maximumf %39, %40 : vector<8x64xf32>
    %42 = arith.truncf %41 : vector<8x64xf32> to vector<8x64xbf16>
    %c0_46 = arith.constant 0 : index
    %c0_47 = arith.constant 0 : index
    %43 = vector.load %arg17[%c0_46, %c0_47] : memref<64x128xbf16, #tpu.memory_space<vmem>>, vector<64x128xbf16>
    %cst_48 = arith.constant dense<0.000000e+00> : vector<8x128xf32>
    %44 = tpu.matmul %42, %43, %cst_48 {dimension_numbers = #tpu.dot_dimension_numbers<[1], [0], [0], [1], [0, 0, 1, 1], [], []>} : vector<8x64xbf16>, vector<64x128xbf16>, vector<8x128xf32> -> vector<8x128xf32>
    %c0_49 = arith.constant 0 : index
    %c0_50 = arith.constant 0 : index
    %45 = vector.load %arg18[%c0_49, %c0_50] : memref<1x128xf32, #tpu.memory_space<vmem>>, vector<1x128xf32>
    %46 = vector.broadcast %45 : vector<1x128xf32> to vector<8x128xf32>
    %47 = arith.addf %44, %46 : vector<8x128xf32>
    %c0_51 = arith.constant 0 : index
    %c0_52 = arith.constant 0 : index
    %48 = vector.load %arg19[%c0_51, %c0_52] : memref<8x128xf32, #tpu.memory_space<vmem>>, vector<8x128xf32>
    tpu.vector_store %arg19[%c0_51, %c0_52], %47 {strides = array<i32>} : memref<8x128xf32, #tpu.memory_space<vmem>>, vector<8x128xf32>,
    return
  }
  func.func @transform_0(%arg0: i32) -> (i32, i32, i32) {
    %c0_i32 = arith.constant 0 : i32
    %c0_i32_0 = arith.constant 0 : i32
    %c0_i32_1 = arith.constant 0 : i32
    return %c0_i32, %arg0, %c0_i32_0 : i32, i32, i32
  }
  func.func @transform_1(%arg0: i32) -> (i32, i32) {
    %c0_i32 = arith.constant 0 : i32
    %c0_i32_0 = arith.constant 0 : i32
    %c0_i32_1 = arith.constant 0 : i32
    return %c0_i32, %c0_i32_0 : i32, i32
  }
  func.func @transform_2(%arg0: i32) -> (i32, i32) {
    %c0_i32 = arith.constant 0 : i32
    %c0_i32_0 = arith.constant 0 : i32
    %c0_i32_1 = arith.constant 0 : i32
    return %c0_i32, %c0_i32_0 : i32, i32
  }
  func.func @transform_3(%arg0: i32) -> (i32, i32) {
    %c0_i32 = arith.constant 0 : i32
    %c0_i32_0 = arith.constant 0 : i32
    %c0_i32_1 = arith.constant 0 : i32
    return %c0_i32, %c0_i32_0 : i32, i32
  }
  func.func @transform_4(%arg0: i32) -> (i32, i32) {
    %c0_i32 = arith.constant 0 : i32
    %c0_i32_0 = arith.constant 0 : i32
    %c0_i32_1 = arith.constant 0 : i32
    return %c0_i32, %c0_i32_0 : i32, i32
  }
  func.func @transform_5(%arg0: i32) -> (i32, i32) {
    %c0_i32 = arith.constant 0 : i32
    %c0_i32_0 = arith.constant 0 : i32
    %c0_i32_1 = arith.constant 0 : i32
    return %c0_i32, %c0_i32_0 : i32, i32
  }
  func.func @transform_6(%arg0: i32) -> (i32, i32) {
    %c0_i32 = arith.constant 0 : i32
    %c0_i32_0 = arith.constant 0 : i32
    %c0_i32_1 = arith.constant 0 : i32
    return %c0_i32, %c0_i32_0 : i32, i32
  }
  func.func @transform_7(%arg0: i32) -> (i32, i32) {
    %c0_i32 = arith.constant 0 : i32
    %c0_i32_0 = arith.constant 0 : i32
    %c0_i32_1 = arith.constant 0 : i32
    return %c0_i32, %c0_i32_0 : i32, i32
  }
  func.func @transform_8(%arg0: i32) -> (i32, i32) {
    %c0_i32 = arith.constant 0 : i32
    %c0_i32_0 = arith.constant 0 : i32
    %c0_i32_1 = arith.constant 0 : i32
    return %c0_i32, %c0_i32_0 : i32, i32
  }
  func.func @transform_9(%arg0: i32) -> (i32, i32) {
    %c0_i32 = arith.constant 0 : i32
    %c0_i32_0 = arith.constant 0 : i32
    %c0_i32_1 = arith.constant 0 : i32
    return %c0_i32, %c0_i32_0 : i32, i32
  }
  func.func @transform_10(%arg0: i32) -> (i32, i32) {
    %c0_i32 = arith.constant 0 : i32
    %c0_i32_0 = arith.constant 0 : i32
    %c0_i32_1 = arith.constant 0 : i32
    return %c0_i32, %c0_i32_0 : i32, i32
  }
  func.func @transform_11(%arg0: i32) -> (i32, i32) {
    %c0_i32 = arith.constant 0 : i32
    %c0_i32_0 = arith.constant 0 : i32
    %c0_i32_1 = arith.constant 0 : i32
    return %c0_i32, %c0_i32_0 : i32, i32
  }
  func.func @transform_12(%arg0: i32) -> (i32, i32) {
    %c0_i32 = arith.constant 0 : i32
    %c0_i32_0 = arith.constant 0 : i32
    %c0_i32_1 = arith.constant 0 : i32
    return %c0_i32, %c0_i32_0 : i32, i32
  }
  func.func @transform_13(%arg0: i32) -> (i32, i32) {
    %c0_i32 = arith.constant 0 : i32
    %c0_i32_0 = arith.constant 0 : i32
    %c0_i32_1 = arith.constant 0 : i32
    return %c0_i32, %c0_i32_0 : i32, i32
  }
  func.func @transform_14(%arg0: i32) -> (i32, i32) {
    %c0_i32 = arith.constant 0 : i32
    %c0_i32_0 = arith.constant 0 : i32
    %c0_i32_1 = arith.constant 0 : i32
    return %c0_i32, %c0_i32_0 : i32, i32
  }
  func.func @transform_15(%arg0: i32) -> (i32, i32) {
    %c0_i32 = arith.constant 0 : i32
    %c0_i32_0 = arith.constant 0 : i32
    %c0_i32_1 = arith.constant 0 : i32
    return %c0_i32, %c0_i32_0 : i32, i32
  }
  func.func @transform_16(%arg0: i32) -> (i32, i32) {
    %c0_i32 = arith.constant 0 : i32
    %c0_i32_0 = arith.constant 0 : i32
    %c0_i32_1 = arith.constant 0 : i32
    return %c0_i32, %c0_i32_0 : i32, i32
  }
  func.func @transform_17(%arg0: i32) -> (i32, i32) {
    %c0_i32 = arith.constant 0 : i32
    %c0_i32_0 = arith.constant 0 : i32
    %c0_i32_1 = arith.constant 0 : i32
    return %c0_i32, %c0_i32_0 : i32, i32
  }
  func.func @transform_18(%arg0: i32) -> (i32, i32) {
    %c0_i32 = arith.constant 0 : i32
    %c0_i32_0 = arith.constant 0 : i32
    return %arg0, %c0_i32 : i32, i32
  }
}

</mosaic_0001>

<bundles_post_ra>
// kernel: lstm_model_forward.1
= control target key start
LH: loop header
LB: loop body
LE: loop exit
PB: predicated region body
PF: predicated region fallthrough
CT: control target
= control target key end

     0   :  { %s9080_s0 = inlined_call_operand.vmem [shape: f32[8,16,128], index: 0, kind: input, shape index: {}]   ;;  %s9081_s1 = inlined_call_operand.vmem [shape: bf16[128,512], index: 1, kind: input, shape index: {}]   ;;  %s9082_s2 = inlined_call_operand.vmem [shape: bf16[128,512], index: 2, kind: input, shape index: {}]   ;;  %s9083_s3 = inlined_call_operand.vmem [shape: f32[1,512], index: 3, kind: input, shape index: {}]   ;;  %s9084_s4 = inlined_call_operand.hbm [shape: bf16[128,512], index: 4, kind: input, shape index: {}]   ;;  %s9085_s5 = inlined_call_operand.hbm [shape: bf16[128,512], index: 5, kind: input, shape index: {}]   ;;  %s9086_s6 = inlined_call_operand.vmem [shape: f32[1,512], index: 6, kind: input, shape index: {}]   ;;  %s9087_s7 = inlined_call_operand.hbm [shape: bf16[128,512], index: 7, kind: input, shape index: {}]   ;;  %s9088_s8 = inlined_call_operand.hbm [shape: bf16[128,512], index: 8, kind: input, shape index: {}]   ;;  %s9089_s9 = inlined_call_operand.vmem [shape: f32[1,512], index: 9, kind: input, shape index: {}]   ;;  %s9090_s10 = inlined_call_operand.hbm [shape: bf16[128,256], index: 10, kind: input, shape index: {}]   ;;  %s9091_s11 = inlined_call_operand.vmem [shape: f32[1,256], index: 11, kind: input, shape index: {}]   ;;  %s9092_s12 = inlined_call_operand.hbm [shape: bf16[256,128], index: 12, kind: input, shape index: {}]   ;;  %s9093_s13 = inlined_call_operand.vmem [shape: f32[1,128], index: 13, kind: input, shape index: {}]   ;;  %s9094_s14 = inlined_call_operand.vmem [shape: bf16[128,64], index: 14, kind: input, shape index: {}]   ;;  %s9095_s15 = inlined_call_operand.vmem [shape: f32[1,64], index: 15, kind: input, shape index: {}]   ;;  %s9096_s16 = inlined_call_operand.hbm [shape: bf16[64,128], index: 16, kind: input, shape index: {}]   ;;  %s9097_s17 = inlined_call_operand.vmem [shape: f32[1,128], index: 17, kind: input, shape index: {}]   ;;  %s9098_s18 = inlined_call_operand.vmem [shape: f32[16,128], index: 18, kind: output, shape index: {}]  }
   0x1   :  { %9110 = sst [smem:[#allocation172_spill]] %s9080_s0 }
   0x2   :  { %9111 = sst [smem:[#allocation173_spill]] %s9081_s1 }
   0x3   :  { %9112 = sst [smem:[#allocation174_spill]] %s9082_s2 }
   0x4   :  { %9113 = sst [smem:[#allocation175_spill]] %s9084_s4 }
   0x5   :  { %9114 = sst [smem:[#allocation176_spill]] %s9085_s5 }
   0x6   :  { %9115 = sst [smem:[#allocation177_spill]] %s9088_s8 }
   0x7   :  { %9116 = sst [smem:[#allocation178_spill]] %s9091_s11 }
   0x8   :  { %9117 = sst [smem:[#allocation179_spill]] %s9092_s12 }
   0x9   :  { %9118 = sst [smem:[#allocation180_spill]] %s9093_s13 }
   0xa   :  { %9119 = sst [smem:[#allocation181_spill]] %s9095_s15 }
   0xb   :  { %9120 = sst [smem:[#allocation182_spill]] %s9097_s17 }
   0xc   :  { %23 = vsyncpa [#allocation6], 0 }
   0xd   :  { %24 = vsyncpa [#allocation8], 0 }
   0xe   :  { %25 = vsyncpa [#allocation11], 0 }
   0xf   :  { %26 = vsyncpa [#allocation14], 0  ;;  %s6494_s27 = smov 0   ;;  %s6496_s28 = smov 0  }
  0x10   :  { %s6498_s29 = smov 0  }
  0x11 LB: > { %s6510_s30 = sadd.s32 4294967295, %s6348_s29   ;;  %s6513_s0 = sadd.s32 1, %s6348_s29   ;;  %s6348_s29 = sphi %s6498_s29, %s9962_s29   ;;  %s6344_s28 = sphi %s6496_s28, %s9965_s28   ;;  %s6340_s27 = sphi %s6494_s27, %s9964_s27  }
  0x12   : > { %9121 = sst [smem:[#allocation20_spill]] %s6513_s0  ;;  %s36_s19 = ssub.s32 %s6348_s29, %s6513_s0 }
  0x13   : > { %s39_s1 = sadd.s32 1, %s6344_s28  ;;  %p37_p0 = scmp.eq.s32.totalorder %s36_s19, 0 }
  0x14   : > { %p46_p1 = scmp.ne.s32.totalorder %s6344_s28, %s6340_s27  ;;  %p47_p2 = scmp.eq.s32.totalorder %s6348_s29, 0 }
  0x15   : > { %p4438_p3 = scmp.ge.s32.totalorder %s6348_s29, 1  ;;  %p446_p5 = scmp.lt.s32.totalorder %s6348_s29, 3 }
  0x16   : > { %s6523_s20 = scalar_select %p37_p0, %s6344_s28, %s39_s1  }
  0x17   : > { %p6525_p4 = por %p47_p2, %p46_p1  ;;  %p5746_p6 = scmp.eq.s32.totalorder %s6510_s30, 0 }
  0x18   : > { %9122 = sst [smem:[#allocation21_spill]] %s6523_s20  ;;  %p6531_p7 = pnand %p4438_p3, %p446_p5 }
  0x19   : > { %s9125_s5 = sld [smem:[#allocation176_spill]]  ;;  %s6386_s20 = smov [#allocation7]  }
  0x1a   : > { %p5724_p8 = pneg %p6531_p7  ;;  %s9126_s8 = sld [smem:[#allocation177_spill]] }
  0x1b   : > { %s482_s0 = sshll.u32 %s6386_s20, 4  ;;  %s6387_s2 = smov 256   ;;  %s483_s0 = int_to_ptr.vmem [resolvable:$true] %s482_s0 }
  0x1c   : > { %p6545_p9 = pnand %p5746_p6, %p5724_p8  ;;  %s6388_s23 = smov 16  }
  0x1d   : > { %s6389_s25 = smov [#allocation10]   ;;  %s9128_s12 = sld [smem:[#allocation179_spill]] }
  0x1e   : > { %s513_s26 = sshll.u32 %s6389_s25, 4  ;;  %s6390_s20 = smov [#allocation13]   ;;  %s514_s26 = int_to_ptr.vmem [resolvable:$true] %s513_s26 }
  0x1f   : > { %s480_s24 = sshll.u32 %s9125_s5, 4  ;;  %s547_s15 = sshll.u32 %s6390_s20, 4  ;;  %s481_s24 = int_to_ptr.hbm [resolvable:$true] %s480_s24  ;;  %s548_s15 = int_to_ptr.vmem [resolvable:$true] %s547_s15 }
  0x20   : > { %s511_s19 = sshll.u32 %s9126_s8, 4  ;;  %s9129_s4 = sld [smem:[#allocation175_spill]]  ;;  %s512_s19 = int_to_ptr.hbm [resolvable:$true] %s511_s19 }
  0x21   : > { %5730 = dma.hbm_to_vmem [thread:$0]  (!%p6545_p9), %s481_s24, 4096, %s483_s0, [#allocation8], %s6387_s2, %s6387_s2, %s6388_s23  }
  0x22   : > { %5736 = dma.hbm_to_vmem [thread:$0]  (!%p6545_p9), %s512_s19, 4096, %s514_s26, [#allocation11], %s6387_s2, %s6387_s2, %s6388_s23  }
  0x23   : > { %s545_s17 = sshll.u32 %s9128_s12, 4  ;;  %s9103_s24 = smov 64   ;;  %s546_s17 = int_to_ptr.hbm [resolvable:$true] %s545_s17 }
  0x24   : > { %s6392_s25 = smov 4   ;;  %s6393_s5 = smov [#allocation5]  }
  0x25   : > { %5742 = dma.hbm_to_vmem [thread:$0]  (!%p6545_p9), %s546_s17, 2048, %s548_s15, [#allocation14], %s9103_s24, %s9103_s24, %s6392_s25  }
  0x26   : > { %s466_s0 = sshll.u32 %s9129_s4, 4  ;;  %s468_s8 = sshll.u32 %s6393_s5, 4  ;;  %s467_s0 = int_to_ptr.hbm [resolvable:$true] %s466_s0  ;;  %s469_s8 = int_to_ptr.vmem [resolvable:$true] %s468_s8 }
  0x27   : > { %s497_s26 = sshll.u32 %s9087_s7, 4  ;;  %s528_s20 = sshll.u32 %s9090_s10, 4  ;;  %s498_s26 = int_to_ptr.hbm [resolvable:$true] %s497_s26  ;;  %s529_s20 = int_to_ptr.hbm [resolvable:$true] %s528_s20 }
  0x28   : > { %5727 = dma.hbm_to_vmem [thread:$0]  (!%p6545_p9), %s467_s0, 4096, %s469_s8, [#allocation6], %s6387_s2, %s6387_s2, %s6388_s23  }
  0x29   : > { %s6394_s15 = smov [#allocation9]   ;;  %s6395_s12 = smov [#allocation12]  }
  0x2a   : > { %s499_s17 = sshll.u32 %s6394_s15, 4  ;;  %s530_s5 = sshll.u32 %s6395_s12, 4  ;;  %s500_s17 = int_to_ptr.vmem [resolvable:$true] %s499_s17  ;;  %s531_s5 = int_to_ptr.vmem [resolvable:$true] %s530_s5 }
  0x2b   : > { %5733 = dma.hbm_to_vmem [thread:$0]  (!%p6545_p9), %s498_s26, 4096, %s500_s17, [#allocation8], %s6387_s2, %s6387_s2, %s6388_s23  }
  0x2c   : > { %s6396_s19 = smov 128   ;;  %s6397_s24 = smov 8  }
  0x2d   : > { %5739 = dma.hbm_to_vmem [thread:$0]  (!%p6545_p9), %s529_s20, 2048, %s531_s5, [#allocation11], %s6396_s19, %s6396_s19, %s6397_s24  }
  0x2e   : > { %s568_s11 = sshll.u32 %s9096_s16, 4  ;;  %s6398_s13 = smov [#allocation15]   ;;  %s569_s11 = int_to_ptr.hbm [resolvable:$true] %s568_s11 }
  0x2f   : > { %s570_s15 = sshll.u32 %s6398_s13, 4  ;;  %s9130_s4 = smov 64   ;;  %s571_s15 = int_to_ptr.vmem [resolvable:$true] %s570_s15 }
  0x30   : > { %5745 = dma.hbm_to_vmem [thread:$0]  (!%p6545_p9), %s569_s11, 512, %s571_s15, [#allocation14], %s9130_s4, %s9130_s4, %s6392_s25  }
  0x31   : > { %p4446_p10 = scmp.ge.s32.totalorder %s6348_s29, 2 }
  0x33   : > { %583 = sbr.rel (%p4446_p10) target bundleno = 74 (0x4a), region = 84 }
  0x38   : > { %586 = sbr.rel (!%p6525_p4) target bundleno = 74 (0x4a), region = 88  ;;  %s588_s2 = sand.u32 (%p6525_p4), 1, %s6344_s28  }
  0x39   : > { %s4448_s23 = sshll.u32 (%p6525_p4), %s6348_s29, 3  ;;  %s4447_s24 = sshll.u32 (%p6525_p4), %s588_s2, 6 }
  0x3a   : > { %s9131_s17 = sld [smem:[#allocation172_spill]] (%p6525_p4)  ;;  %s590_s1 = scalar_lea.vmem (%p6525_p4), [#allocation4], %s4447_s24 }
  0x40   : > { %s592_s12 = scalar_lea.vmem %s9131_s17, %s4448_s23 }
  0x41   : > { %v635_v0 = vld [vmem:[%s592_s12] sm:$0xff]  ;;  %v637_v1 = vld [vmem:[%s592_s12 + $0x10] sm:$0xff] }
  0x42   : > { %v639_v2 = vld [vmem:[%s592_s12 + $0x20] sm:$0xff]  ;;  %636 = vst [vmem:[%s590_s1] sm:$0xff] %v635_v0  ;;  %v641_v3 = vld [vmem:[%s592_s12 + $0x30] sm:$0xff] }
  0x43   : > { %638 = vst [vmem:[%s590_s1 + $0x8] sm:$0xff] %v637_v1  ;;  %v643_v4 = vld [vmem:[%s592_s12 + $0x40] sm:$0xff]  ;;  %v645_v5 = vld [vmem:[%s592_s12 + $0x50] sm:$0xff] }
  0x44   : > { %640 = vst [vmem:[%s590_s1 + $0x10] sm:$0xff] %v639_v2  ;;  %v647_v6 = vld [vmem:[%s592_s12 + $0x60] sm:$0xff]  ;;  %v649_v7 = vld [vmem:[%s592_s12 + $0x70] sm:$0xff] }
  0x45   : > { %642 = vst [vmem:[%s590_s1 + $0x18] sm:$0xff] %v641_v3 }
  0x46   : > { %644 = vst [vmem:[%s590_s1 + $0x20] sm:$0xff] %v643_v4 }
  0x47   : > { %646 = vst [vmem:[%s590_s1 + $0x28] sm:$0xff] %v645_v5 }
  0x48   : > { %648 = vst [vmem:[%s590_s1 + $0x30] sm:$0xff] %v647_v6 }
  0x49   : > { %650 = vst [vmem:[%s590_s1 + $0x38] sm:$0xff] %v649_v7 }
  0x4a PF: > { %659 = sbr.rel (%p6531_p7) target bundleno = 3164 (0xc5c), region = 126 }
  0x4f   : > { %s662_s4 = sand.u32 1, %s6340_s27  }
  0x50   : > { %s6607_s29 = sshll.u32 %s662_s4, 6 }
  0x51   : > { %s664_s21 = scalar_lea.vmem [#allocation4], %s6607_s29 }
  0x52   : > { %6323 = dma.done.wait (%p5746_p6), [#allocation6], 4096  }
  0x53   : > { %6325 = vsyncadd (%p5746_p6), [#allocation6], 4294963200 }
  0x54   : > { %6327 = dma.done.wait (%p5746_p6), [#allocation8], 8192  }
  0x55   : > { %6329 = vsyncadd (%p5746_p6), [#allocation8], 4294959104 }
  0x56   : > { %6331 = dma.done.wait (%p5746_p6), [#allocation11], 6144  }
  0x57   : > { %6333 = vsyncadd (%p5746_p6), [#allocation11], 4294961152 }
  0x58   : > { %6335 = dma.done.wait (%p5746_p6), [#allocation14], 2560  }
  0x59   : > { %6337 = vsyncadd (%p5746_p6), [#allocation14], 4294964736  ;;  %p749_p11 = scmp.lt.s32.totalorder %s6510_s30, 1  ;;  %s9132_s8 = sld [smem:[#allocation173_spill]] }
  0x5a   : > { %s9197_s15 = sld [smem:[#allocation174_spill]]  ;;  %s7282_s4 = smov 0  }
  0x5b   : > { %s9967_s30 = smov (!%p749_p11, %s6510_s30), 1 }
  0x5c   : > { %s4458_s27 = sshll.u32 %s9967_s30, 3 }
  0x5d   : > { %s6631_s5 = scalar_lea.vmem %s9098_s18, %s4458_s27 }
  0x5f   : > { %v6636_v8 = vld [vmem:[%s9132_s8 + $0x4] sm:$0xf]  ;;  %v6641_v9 = vld [vmem:[%s9132_s8] sm:$0xf]  ;;  %v6646_v10 = vld [vmem:[%s9132_s8 + $0xc] sm:$0xf] }
  0x60   : > { %9133 = vst [vmem:[#allocation22_spill] sm:$0xff] %v6636_v8  ;;  %v6651_v11 = vld [vmem:[%s9132_s8 + $0x8] sm:$0xf]  ;;  %v6656_v12 = vld [vmem:[%s9132_s8 + $0x10] sm:$0xf0] }
  0x61   : > { %9134 = vst [vmem:[#allocation23_spill] sm:$0xff] %v6641_v9  ;;  %v6661_v13 = vld [vmem:[%s9132_s8 + $0xc] sm:$0xf0]  ;;  %v6666_v14 = vld [vmem:[%s9132_s8 + $0x18] sm:$0xf0] }
  0x62   : > { %9135 = vst [vmem:[#allocation24_spill] sm:$0xff] %v6646_v10  ;;  %v6671_v15 = vld [vmem:[%s9132_s8 + $0x14] sm:$0xf0]  ;;  %v6676_v16 = vld [vmem:[%s9132_s8 + $0x24] sm:$0xf] }
  0x63   : > { %9136 = vst [vmem:[#allocation25_spill] sm:$0xff] %v6651_v11  ;;  %v6681_v17 = vld [vmem:[%s9132_s8 + $0x20] sm:$0xf]  ;;  %v6686_v18 = vld [vmem:[%s9132_s8 + $0x2c] sm:$0xf] }
  0x64   : > { %9137 = vst [vmem:[#allocation26_spill] sm:$0xff] %v6656_v12  ;;  %v6691_v19 = vld [vmem:[%s9132_s8 + $0x28] sm:$0xf]  ;;  %v6696_v20 = vld [vmem:[%s9132_s8 + $0x30] sm:$0xf0]  ;;  %v7280_v12 = vmov 0.0  }
  0x65   : > { %9138 = vst [vmem:[#allocation27_spill] sm:$0xff] %v6661_v13  ;;  %v6701_v21 = vld [vmem:[%s9132_s8 + $0x2c] sm:$0xf0]  ;;  %v6706_v22 = vld [vmem:[%s9132_s8 + $0x38] sm:$0xf0] }
  0x66   : > { %9139 = vst [vmem:[#allocation28_spill] sm:$0xff] %v6666_v14  ;;  %v6711_v23 = vld [vmem:[%s9132_s8 + $0x34] sm:$0xf0]  ;;  %v6716_v24 = vld [vmem:[%s9132_s8 + $0x44] sm:$0xf] }
  0x67   : > { %9140 = vst [vmem:[#allocation29_spill] sm:$0xff] %v6671_v15  ;;  %v6721_v25 = vld [vmem:[%s9132_s8 + $0x40] sm:$0xf]  ;;  %v6726_v26 = vld [vmem:[%s9132_s8 + $0x4c] sm:$0xf] }
  0x68   : > { %9141 = vst [vmem:[#allocation30_spill] sm:$0xff] %v6676_v16  ;;  %v6731_v27 = vld [vmem:[%s9132_s8 + $0x48] sm:$0xf]  ;;  %v6736_v28 = vld [vmem:[%s9132_s8 + $0x50] sm:$0xf0] }
  0x69   : > { %9142 = vst [vmem:[#allocation31_spill] sm:$0xff] %v6681_v17  ;;  %v6741_v29 = vld [vmem:[%s9132_s8 + $0x4c] sm:$0xf0]  ;;  %v6746_v30 = vld [vmem:[%s9132_s8 + $0x58] sm:$0xf0] }
  0x6a   : > { %9143 = vst [vmem:[#allocation32_spill] sm:$0xff] %v6686_v18  ;;  %v6751_v31 = vld [vmem:[%s9132_s8 + $0x54] sm:$0xf0]  ;;  %v6756_v32 = vld [vmem:[%s9132_s8 + $0x64] sm:$0xf] }
  0x6b   : > { %9144 = vst [vmem:[#allocation33_spill] sm:$0xff] %v6691_v19  ;;  %v6761_v33 = vld [vmem:[%s9132_s8 + $0x60] sm:$0xf]  ;;  %v6766_v34 = vld [vmem:[%s9132_s8 + $0x6c] sm:$0xf] }
  0x6c   : > { %9145 = vst [vmem:[#allocation34_spill] sm:$0xff] %v6696_v20  ;;  %v6771_v35 = vld [vmem:[%s9132_s8 + $0x68] sm:$0xf]  ;;  %v6776_v36 = vld [vmem:[%s9132_s8 + $0x70] sm:$0xf0] }
  0x6d   : > { %9146 = vst [vmem:[#allocation35_spill] sm:$0xff] %v6701_v21  ;;  %v6781_v37 = vld [vmem:[%s9132_s8 + $0x6c] sm:$0xf0]  ;;  %v6786_v38 = vld [vmem:[%s9132_s8 + $0x78] sm:$0xf0] }
  0x6e   : > { %9147 = vst [vmem:[#allocation36_spill] sm:$0xff] %v6706_v22  ;;  %v6791_v39 = vld [vmem:[%s9132_s8 + $0x74] sm:$0xf0]  ;;  %v6796_v40 = vld [vmem:[%s9132_s8 + $0x84] sm:$0xf] }
  0x6f   : > { %9148 = vst [vmem:[#allocation37_spill] sm:$0xff] %v6711_v23  ;;  %v6801_v41 = vld [vmem:[%s9132_s8 + $0x80] sm:$0xf]  ;;  %v6806_v42 = vld [vmem:[%s9132_s8 + $0x8c] sm:$0xf] }
  0x70   : > { %9149 = vst [vmem:[#allocation38_spill] sm:$0xff] %v6716_v24  ;;  %v6811_v43 = vld [vmem:[%s9132_s8 + $0x88] sm:$0xf]  ;;  %v6816_v44 = vld [vmem:[%s9132_s8 + $0x90] sm:$0xf0] }
  0x71   : > { %9150 = vst [vmem:[#allocation39_spill] sm:$0xff] %v6721_v25  ;;  %v6821_v45 = vld [vmem:[%s9132_s8 + $0x8c] sm:$0xf0]  ;;  %v6826_v46 = vld [vmem:[%s9132_s8 + $0x98] sm:$0xf0] }
  0x72   : > { %9151 = vst [vmem:[#allocation40_spill] sm:$0xff] %v6726_v26  ;;  %v6831_v47 = vld [vmem:[%s9132_s8 + $0x94] sm:$0xf0]  ;;  %v6836_v48 = vld [vmem:[%s9132_s8 + $0xa4] sm:$0xf] }
  0x73   : > { %9152 = vst [vmem:[#allocation41_spill] sm:$0xff] %v6731_v27  ;;  %v6841_v49 = vld [vmem:[%s9132_s8 + $0xa0] sm:$0xf]  ;;  %v6846_v50 = vld [vmem:[%s9132_s8 + $0xac] sm:$0xf] }
  0x74   : > { %9153 = vst [vmem:[#allocation42_spill] sm:$0xff] %v6736_v28  ;;  %v6851_v51 = vld [vmem:[%s9132_s8 + $0xa8] sm:$0xf]  ;;  %v6856_v52 = vld [vmem:[%s9132_s8 + $0xb0] sm:$0xf0] }
  0x75   : > { %9154 = vst [vmem:[#allocation43_spill] sm:$0xff] %v6741_v29  ;;  %v6861_v53 = vld [vmem:[%s9132_s8 + $0xac] sm:$0xf0]  ;;  %v6866_v54 = vld [vmem:[%s9132_s8 + $0xb8] sm:$0xf0] }
  0x76   : > { %9155 = vst [vmem:[#allocation44_spill] sm:$0xff] %v6746_v30  ;;  %v6871_v55 = vld [vmem:[%s9132_s8 + $0xb4] sm:$0xf0]  ;;  %v6876_v56 = vld [vmem:[%s9132_s8 + $0xc4] sm:$0xf] }
  0x77   : > { %9156 = vst [vmem:[#allocation45_spill] sm:$0xff] %v6751_v31  ;;  %v6881_v57 = vld [vmem:[%s9132_s8 + $0xc0] sm:$0xf]  ;;  %v6886_v58 = vld [vmem:[%s9132_s8 + $0xcc] sm:$0xf] }
  0x78   : > { %9157 = vst [vmem:[#allocation46_spill] sm:$0xff] %v6756_v32  ;;  %v6891_v59 = vld [vmem:[%s9132_s8 + $0xc8] sm:$0xf]  ;;  %v6896_v60 = vld [vmem:[%s9132_s8 + $0xd0] sm:$0xf0] }
  0x79   : > { %9158 = vst [vmem:[#allocation47_spill] sm:$0xff] %v6761_v33  ;;  %v6901_v61 = vld [vmem:[%s9132_s8 + $0xcc] sm:$0xf0]  ;;  %v6906_v62 = vld [vmem:[%s9132_s8 + $0xd8] sm:$0xf0] }
  0x7a   : > { %9159 = vst [vmem:[#allocation48_spill] sm:$0xff] %v6766_v34  ;;  %v6911_v63 = vld [vmem:[%s9132_s8 + $0xd4] sm:$0xf0]  ;;  %v6916_v0 = vld [vmem:[%s9132_s8 + $0xe4] sm:$0xf] }
  0x7b   : > { %9160 = vst [vmem:[#allocation49_spill] sm:$0xff] %v6771_v35  ;;  %v6921_v1 = vld [vmem:[%s9132_s8 + $0xe0] sm:$0xf]  ;;  %v6926_v2 = vld [vmem:[%s9132_s8 + $0xec] sm:$0xf] }
  0x7c   : > { %9161 = vst [vmem:[#allocation50_spill] sm:$0xff] %v6776_v36  ;;  %v6931_v3 = vld [vmem:[%s9132_s8 + $0xe8] sm:$0xf]  ;;  %v6936_v4 = vld [vmem:[%s9132_s8 + $0xf0] sm:$0xf0] }
  0x7d   : > { %9162 = vst [vmem:[#allocation51_spill] sm:$0xff] %v6781_v37  ;;  %v6941_v5 = vld [vmem:[%s9132_s8 + $0xec] sm:$0xf0]  ;;  %v6946_v6 = vld [vmem:[%s9132_s8 + $0xf8] sm:$0xf0] }
  0x7e   : > { %9163 = vst [vmem:[#allocation52_spill] sm:$0xff] %v6786_v38  ;;  %v6951_v7 = vld [vmem:[%s9132_s8 + $0xf4] sm:$0xf0]  ;;  %v6956_v10 = vld [vmem:[%s9197_s15 + $0x4] sm:$0xf] }
  0x7f   : > { %9164 = vst [vmem:[#allocation53_spill] sm:$0xff] %v6791_v39  ;;  %v6961_v14 = vld [vmem:[%s9197_s15] sm:$0xf]  ;;  %v6966_v15 = vld [vmem:[%s9197_s15 + $0xc] sm:$0xf] }
  0x80   : > { %9165 = vst [vmem:[#allocation54_spill] sm:$0xff] %v6796_v40  ;;  %v6971_v11 = vld [vmem:[%s9197_s15 + $0x8] sm:$0xf]  ;;  %v6976_v8 = vld [vmem:[%s9197_s15 + $0x10] sm:$0xf0] }
  0x81   : > { %9166 = vst [vmem:[#allocation55_spill] sm:$0xff] %v6801_v41 }
  0x82   : > { %9167 = vst [vmem:[#allocation56_spill] sm:$0xff] %v6806_v42 }
  0x83   : > { %9168 = vst [vmem:[#allocation57_spill] sm:$0xff] %v6811_v43 }
  0x84   : > { %9169 = vst [vmem:[#allocation58_spill] sm:$0xff] %v6816_v44 }
  0x85   : > { %9170 = vst [vmem:[#allocation59_spill] sm:$0xff] %v6821_v45 }
  0x86   : > { %9171 = vst [vmem:[#allocation60_spill] sm:$0xff] %v6826_v46 }
  0x87   : > { %9172 = vst [vmem:[#allocation61_spill] sm:$0xff] %v6831_v47 }
  0x88   : > { %9173 = vst [vmem:[#allocation62_spill] sm:$0xff] %v6836_v48 }
  0x89   : > { %9174 = vst [vmem:[#allocation63_spill] sm:$0xff] %v6841_v49 }
  0x8a   : > { %9175 = vst [vmem:[#allocation64_spill] sm:$0xff] %v6846_v50 }
  0x8b   : > { %9176 = vst [vmem:[#allocation65_spill] sm:$0xff] %v6851_v51 }
  0x8c   : > { %9177 = vst [vmem:[#allocation66_spill] sm:$0xff] %v6856_v52 }
  0x8d   : > { %9178 = vst [vmem:[#allocation67_spill] sm:$0xff] %v6861_v53 }
  0x8e   : > { %9179 = vst [vmem:[#allocation68_spill] sm:$0xff] %v6866_v54 }
  0x8f   : > { %9180 = vst [vmem:[#allocation69_spill] sm:$0xff] %v6871_v55 }
  0x90   : > { %9181 = vst [vmem:[#allocation70_spill] sm:$0xff] %v6876_v56 }
  0x91   : > { %9182 = vst [vmem:[#allocation71_spill] sm:$0xff] %v6881_v57 }
  0x92   : > { %9183 = vst [vmem:[#allocation72_spill] sm:$0xff] %v6886_v58 }
  0x93   : > { %9184 = vst [vmem:[#allocation73_spill] sm:$0xff] %v6891_v59 }
  0x94   : > { %9185 = vst [vmem:[#allocation74_spill] sm:$0xff] %v6896_v60 }
  0x95   : > { %9186 = vst [vmem:[#allocation75_spill] sm:$0xff] %v6901_v61 }
  0x96   : > { %9187 = vst [vmem:[#allocation76_spill] sm:$0xff] %v6906_v62 }
  0x97   : > { %9188 = vst [vmem:[#allocation77_spill] sm:$0xff] %v6911_v63 }
  0x98   : > { %9189 = vst [vmem:[#allocation78_spill] sm:$0xff] %v6916_v0 }
  0x99   : > { %9190 = vst [vmem:[#allocation79_spill] sm:$0xff] %v6921_v1 }
  0x9a   : > { %9191 = vst [vmem:[#allocation80_spill] sm:$0xff] %v6926_v2 }
  0x9b   : > { %9192 = vst [vmem:[#allocation81_spill] sm:$0xff] %v6931_v3 }
  0x9c   : > { %9193 = vst [vmem:[#allocation82_spill] sm:$0xff] %v6936_v4 }
  0x9d   : > { %9194 = vst [vmem:[#allocation83_spill] sm:$0xff] %v6941_v5 }
  0x9e   : > { %9195 = vst [vmem:[#allocation84_spill] sm:$0xff] %v6946_v6 }
  0x9f   : > { %9196 = vst [vmem:[#allocation85_spill] sm:$0xff] %v6951_v7 }
  0xa0   : > { %9198 = vst [vmem:[#allocation86_spill] sm:$0xff] %v6956_v10  ;;  %v6981_v10 = vld [vmem:[%s9197_s15 + $0xc] sm:$0xf0] }
  0xa1   : > { %9199 = vst [vmem:[#allocation87_spill] sm:$0xff] %v6961_v14  ;;  %v6986_v14 = vld [vmem:[%s9197_s15 + $0x18] sm:$0xf0] }
  0xa2   : > { %9200 = vst [vmem:[#allocation88_spill] sm:$0xff] %v6966_v15  ;;  %v6991_v15 = vld [vmem:[%s9197_s15 + $0x14] sm:$0xf0] }
  0xa3   : > { %9201 = vst [vmem:[#allocation89_spill] sm:$0xff] %v6971_v11  ;;  %v6996_v11 = vld [vmem:[%s9197_s15 + $0x24] sm:$0xf] }
  0xa4   : > { %9202 = vst [vmem:[#allocation90_spill] sm:$0xff] %v6976_v8  ;;  %v7001_v8 = vld [vmem:[%s9197_s15 + $0x20] sm:$0xf] }
  0xa5   : > { %9203 = vst [vmem:[#allocation91_spill] sm:$0xff] %v6981_v10  ;;  %v7006_v10 = vld [vmem:[%s9197_s15 + $0x2c] sm:$0xf] }
  0xa6   : > { %9204 = vst [vmem:[#allocation92_spill] sm:$0xff] %v6986_v14  ;;  %v7011_v14 = vld [vmem:[%s9197_s15 + $0x28] sm:$0xf] }
  0xa7   : > { %9205 = vst [vmem:[#allocation93_spill] sm:$0xff] %v6991_v15  ;;  %v7016_v15 = vld [vmem:[%s9197_s15 + $0x30] sm:$0xf0] }
  0xa8   : > { %9206 = vst [vmem:[#allocation94_spill] sm:$0xff] %v6996_v11  ;;  %v7021_v11 = vld [vmem:[%s9197_s15 + $0x2c] sm:$0xf0] }
  0xa9   : > { %9207 = vst [vmem:[#allocation95_spill] sm:$0xff] %v7001_v8  ;;  %v7026_v8 = vld [vmem:[%s9197_s15 + $0x38] sm:$0xf0] }
  0xaa   : > { %9208 = vst [vmem:[#allocation96_spill] sm:$0xff] %v7006_v10  ;;  %v7031_v10 = vld [vmem:[%s9197_s15 + $0x34] sm:$0xf0] }
  0xab   : > { %9209 = vst [vmem:[#allocation97_spill] sm:$0xff] %v7011_v14  ;;  %v7036_v14 = vld [vmem:[%s9197_s15 + $0x44] sm:$0xf] }
  0xac   : > { %9210 = vst [vmem:[#allocation98_spill] sm:$0xff] %v7016_v15  ;;  %v7041_v15 = vld [vmem:[%s9197_s15 + $0x40] sm:$0xf] }
  0xad   : > { %9211 = vst [vmem:[#allocation99_spill] sm:$0xff] %v7021_v11  ;;  %v7046_v11 = vld [vmem:[%s9197_s15 + $0x4c] sm:$0xf] }
  0xae   : > { %9212 = vst [vmem:[#allocation100_spill] sm:$0xff] %v7026_v8  ;;  %v7051_v8 = vld [vmem:[%s9197_s15 + $0x48] sm:$0xf] }
  0xaf   : > { %9213 = vst [vmem:[#allocation101_spill] sm:$0xff] %v7031_v10  ;;  %v7056_v10 = vld [vmem:[%s9197_s15 + $0x50] sm:$0xf0] }
  0xb0   : > { %9214 = vst [vmem:[#allocation102_spill] sm:$0xff] %v7036_v14  ;;  %v7061_v14 = vld [vmem:[%s9197_s15 + $0x4c] sm:$0xf0] }
  0xb1   : > { %9215 = vst [vmem:[#allocation103_spill] sm:$0xff] %v7041_v15  ;;  %v7066_v15 = vld [vmem:[%s9197_s15 + $0x58] sm:$0xf0] }
  0xb2   : > { %9216 = vst [vmem:[#allocation104_spill] sm:$0xff] %v7046_v11  ;;  %v7071_v11 = vld [vmem:[%s9197_s15 + $0x54] sm:$0xf0] }
  0xb3   : > { %9217 = vst [vmem:[#allocation105_spill] sm:$0xff] %v7051_v8  ;;  %v7076_v8 = vld [vmem:[%s9197_s15 + $0x64] sm:$0xf] }
  0xb4   : > { %9218 = vst [vmem:[#allocation106_spill] sm:$0xff] %v7056_v10  ;;  %v7081_v10 = vld [vmem:[%s9197_s15 + $0x60] sm:$0xf] }
  0xb5   : > { %9219 = vst [vmem:[#allocation107_spill] sm:$0xff] %v7061_v14  ;;  %v7086_v14 = vld [vmem:[%s9197_s15 + $0x6c] sm:$0xf] }
  0xb6   : > { %9220 = vst [vmem:[#allocation108_spill] sm:$0xff] %v7066_v15  ;;  %v7091_v15 = vld [vmem:[%s9197_s15 + $0x68] sm:$0xf] }
  0xb7   : > { %9221 = vst [vmem:[#allocation109_spill] sm:$0xff] %v7071_v11  ;;  %v7096_v11 = vld [vmem:[%s9197_s15 + $0x70] sm:$0xf0] }
  0xb8   : > { %9222 = vst [vmem:[#allocation110_spill] sm:$0xff] %v7076_v8  ;;  %v7101_v8 = vld [vmem:[%s9197_s15 + $0x6c] sm:$0xf0] }
  0xb9   : > { %9223 = vst [vmem:[#allocation111_spill] sm:$0xff] %v7081_v10  ;;  %v7106_v10 = vld [vmem:[%s9197_s15 + $0x78] sm:$0xf0] }
  0xba   : > { %9224 = vst [vmem:[#allocation112_spill] sm:$0xff] %v7086_v14  ;;  %v7111_v14 = vld [vmem:[%s9197_s15 + $0x74] sm:$0xf0] }
  0xbb   : > { %9225 = vst [vmem:[#allocation113_spill] sm:$0xff] %v7091_v15  ;;  %v7116_v15 = vld [vmem:[%s9197_s15 + $0x84] sm:$0xf] }
  0xbc   : > { %9226 = vst [vmem:[#allocation114_spill] sm:$0xff] %v7096_v11  ;;  %v7121_v11 = vld [vmem:[%s9197_s15 + $0x80] sm:$0xf] }
  0xbd   : > { %9227 = vst [vmem:[#allocation115_spill] sm:$0xff] %v7101_v8  ;;  %v7126_v8 = vld [vmem:[%s9197_s15 + $0x8c] sm:$0xf] }
  0xbe   : > { %9228 = vst [vmem:[#allocation116_spill] sm:$0xff] %v7106_v10  ;;  %v7131_v10 = vld [vmem:[%s9197_s15 + $0x88] sm:$0xf] }
  0xbf   : > { %9229 = vst [vmem:[#allocation117_spill] sm:$0xff] %v7111_v14  ;;  %v7136_v14 = vld [vmem:[%s9197_s15 + $0x90] sm:$0xf0] }
  0xc0   : > { %9230 = vst [vmem:[#allocation118_spill] sm:$0xff] %v7116_v15  ;;  %v7141_v15 = vld [vmem:[%s9197_s15 + $0x8c] sm:$0xf0] }
  0xc1   : > { %9231 = vst [vmem:[#allocation119_spill] sm:$0xff] %v7121_v11  ;;  %v7146_v11 = vld [vmem:[%s9197_s15 + $0x98] sm:$0xf0] }
  0xc2   : > { %9232 = vst [vmem:[#allocation120_spill] sm:$0xff] %v7126_v8  ;;  %v7151_v8 = vld [vmem:[%s9197_s15 + $0x94] sm:$0xf0] }
  0xc3   : > { %9233 = vst [vmem:[#allocation121_spill] sm:$0xff] %v7131_v10  ;;  %v7156_v10 = vld [vmem:[%s9197_s15 + $0xa4] sm:$0xf] }
  0xc4   : > { %9234 = vst [vmem:[#allocation122_spill] sm:$0xff] %v7136_v14  ;;  %v7161_v14 = vld [vmem:[%s9197_s15 + $0xa0] sm:$0xf] }
  0xc5   : > { %9235 = vst [vmem:[#allocation123_spill] sm:$0xff] %v7141_v15  ;;  %v7166_v15 = vld [vmem:[%s9197_s15 + $0xac] sm:$0xf] }
  0xc6   : > { %9236 = vst [vmem:[#allocation124_spill] sm:$0xff] %v7146_v11  ;;  %v7171_v11 = vld [vmem:[%s9197_s15 + $0xa8] sm:$0xf] }
  0xc7   : > { %9237 = vst [vmem:[#allocation125_spill] sm:$0xff] %v7151_v8  ;;  %v7176_v8 = vld [vmem:[%s9197_s15 + $0xb0] sm:$0xf0] }
  0xc8   : > { %9238 = vst [vmem:[#allocation126_spill] sm:$0xff] %v7156_v10  ;;  %v7181_v10 = vld [vmem:[%s9197_s15 + $0xac] sm:$0xf0] }
  0xc9   : > { %9239 = vst [vmem:[#allocation127_spill] sm:$0xff] %v7161_v14  ;;  %v7186_v14 = vld [vmem:[%s9197_s15 + $0xb8] sm:$0xf0] }
  0xca   : > { %9240 = vst [vmem:[#allocation128_spill] sm:$0xff] %v7166_v15  ;;  %v7191_v15 = vld [vmem:[%s9197_s15 + $0xb4] sm:$0xf0] }
  0xcb   : > { %9241 = vst [vmem:[#allocation129_spill] sm:$0xff] %v7171_v11  ;;  %v7196_v11 = vld [vmem:[%s9197_s15 + $0xc4] sm:$0xf] }
  0xcc   : > { %9242 = vst [vmem:[#allocation130_spill] sm:$0xff] %v7176_v8  ;;  %v7201_v8 = vld [vmem:[%s9197_s15 + $0xc0] sm:$0xf] }
  0xcd   : > { %9243 = vst [vmem:[#allocation131_spill] sm:$0xff] %v7181_v10  ;;  %v7206_v10 = vld [vmem:[%s9197_s15 + $0xcc] sm:$0xf] }
  0xce   : > { %9244 = vst [vmem:[#allocation132_spill] sm:$0xff] %v7186_v14  ;;  %v7211_v14 = vld [vmem:[%s9197_s15 + $0xc8] sm:$0xf] }
  0xcf   : > { %9245 = vst [vmem:[#allocation133_spill] sm:$0xff] %v7191_v15  ;;  %v7216_v15 = vld [vmem:[%s9197_s15 + $0xd0] sm:$0xf0] }
  0xd0   : > { %9246 = vst [vmem:[#allocation134_spill] sm:$0xff] %v7196_v11  ;;  %v7221_v11 = vld [vmem:[%s9197_s15 + $0xcc] sm:$0xf0] }
  0xd1   : > { %9247 = vst [vmem:[#allocation135_spill] sm:$0xff] %v7201_v8  ;;  %v7226_v8 = vld [vmem:[%s9197_s15 + $0xd8] sm:$0xf0] }
  0xd2   : > { %9248 = vst [vmem:[#allocation136_spill] sm:$0xff] %v7206_v10  ;;  %v7231_v10 = vld [vmem:[%s9197_s15 + $0xd4] sm:$0xf0] }
  0xd3   : > { %9249 = vst [vmem:[#allocation137_spill] sm:$0xff] %v7211_v14  ;;  %v7236_v14 = vld [vmem:[%s9197_s15 + $0xe4] sm:$0xf] }
  0xd4   : > { %9250 = vst [vmem:[#allocation138_spill] sm:$0xff] %v7216_v15  ;;  %v7241_v15 = vld [vmem:[%s9197_s15 + $0xe0] sm:$0xf] }
  0xd5   : > { %9251 = vst [vmem:[#allocation139_spill] sm:$0xff] %v7221_v11  ;;  %v7246_v11 = vld [vmem:[%s9197_s15 + $0xec] sm:$0xf] }
  0xd6   : > { %9252 = vst [vmem:[#allocation140_spill] sm:$0xff] %v7226_v8  ;;  %v7251_v8 = vld [vmem:[%s9197_s15 + $0xe8] sm:$0xf] }
  0xd7   : > { %9253 = vst [vmem:[#allocation141_spill] sm:$0xff] %v7231_v10  ;;  %v7256_v10 = vld [vmem:[%s9197_s15 + $0xf0] sm:$0xf0] }
  0xd8   : > { %9254 = vst [vmem:[#allocation142_spill] sm:$0xff] %v7236_v14  ;;  %v7261_v14 = vld [vmem:[%s9197_s15 + $0xec] sm:$0xf0] }
  0xd9   : > { %9255 = vst [vmem:[#allocation143_spill] sm:$0xff] %v7241_v15  ;;  %v7266_v15 = vld [vmem:[%s9197_s15 + $0xf8] sm:$0xf0] }
  0xda   : > { %9256 = vst [vmem:[#allocation144_spill] sm:$0xff] %v7246_v11  ;;  %v7271_v11 = vld [vmem:[%s9197_s15 + $0xf4] sm:$0xf0] }
  0xdb   : > { %9257 = vst [vmem:[#allocation145_spill] sm:$0xff] %v7251_v8  ;;  %v7276_v8 = vld [vmem:[%s9083_s3] sm:$0xf] }
  0xdc   : > { %9258 = vst [vmem:[#allocation146_spill] sm:$0xff] %v7256_v10  ;;  %v7278_v10 = vmov 0.0  }
  0xdd   : > { %9259 = vst [vmem:[#allocation147_spill] sm:$0xff] %v7261_v14 }
  0xde   : > { %9260 = vst [vmem:[#allocation148_spill] sm:$0xff] %v7266_v15 }
  0xdf   : > { %9261 = vst [vmem:[#allocation149_spill] sm:$0xff] %v7271_v11 }
  0xe0   : > { %9262 = vst [vmem:[#allocation150_spill] sm:$0xff] %v7276_v8 }
  0xe1 LB: >> { %9263 = vst [vmem:[#allocation151_spill] sm:$0xff] %v6352_v10  ;;  %v9265_v1 = vld [vmem:[#allocation79_spill] sm:$0xff]  ;;  %v9267_v4 = vld [vmem:[#allocation82_spill] sm:$0xff]  ;;  %v9269_v3 = vld [vmem:[#allocation81_spill] sm:$0xff]  ;;  %s5523_s27 = sshll.u32 %s6360_s4, 5  ;;  %s824_s4 = sadd.s32 1, %s6360_s4   ;;  %s6360_s4 = sphi %s7282_s4, %s824_s4   ;;  %v6356_v12 = vphi %v7280_v12, %v1773_v12   ;;  %v6352_v10 = vphi %v7278_v10, %v1771_v10  }
  0xe2   : >> { %9264 = vst [vmem:[#allocation152_spill] sm:$0xff] %v6356_v12  ;;  %v9266_v5 = vld [vmem:[#allocation83_spill] sm:$0xff]  ;;  %v9268_v0 = vld [vmem:[#allocation78_spill] sm:$0xff]  ;;  %v9270_v7 = vld [vmem:[#allocation85_spill] sm:$0xff]  ;;  %s7354_s22 = scalar_lea.vmem %s664_s21, %s5523_s27 [#allocation4]  ;;  %s7628_s25 = scalar_lea.vmem [#allocation3], %s5523_s27 }
  0xe3   : >> { %v4576_v8 = vor.u32 %v9266_v5, %v9265_v1  ;;  %v4580_v15 = vor.u32 %v9268_v0, %v9267_v4  ;;  %v4584_v11 = vor.u32 %v9270_v7, %v9269_v3  ;;  %v9271_v6 = vld [vmem:[#allocation84_spill] sm:$0xff]  ;;  %v9273_v57 = vld [vmem:[#allocation71_spill] sm:$0xff]  ;;  %v9275_v60 = vld [vmem:[#allocation74_spill] sm:$0xff]  ;;  %p821_p12 = scmp.ge.s32.totalorder %s824_s4, 2  }
  0xe4   : >> { %v9272_v2 = vld [vmem:[#allocation80_spill] sm:$0xff]  ;;  %v9274_v61 = vld [vmem:[#allocation75_spill] sm:$0xff]  ;;  %v9276_v56 = vld [vmem:[#allocation70_spill] sm:$0xff]  ;;  %s7959_s19 = smov (%p821_p12), 0  }
  0xe5   : >> { %v4588_v14 = vor.u32 %v9272_v2, %v9271_v6  ;;  %1005 = vmatpush.bf16.msra.mxu0 %v4576_v8  ;;  %1024 = vmatpush.bf16.msra.mxu1 %v4580_v15  ;;  %v4560_v10 = vor.u32 %v9274_v61, %v9273_v57  ;;  %v4564_v12 = vor.u32 %v9276_v56, %v9275_v60  ;;  %v9277_v59 = vld [vmem:[#allocation73_spill] sm:$0xff]  ;;  %v9279_v62 = vld [vmem:[#allocation76_spill] sm:$0xff]  ;;  %v9281_v49 = vld [vmem:[#allocation63_spill] sm:$0xff] }
  0xe6   : >> { %1043 = vmatpush.bf16.msra.mxu2 %v4584_v11  ;;  %v9278_v63 = vld [vmem:[#allocation77_spill] sm:$0xff]  ;;  %v9280_v58 = vld [vmem:[#allocation72_spill] sm:$0xff]  ;;  %v9282_v53 = vld [vmem:[#allocation67_spill] sm:$0xff] }
  0xe7   : >> { %1062 = vmatpush.bf16.msra.mxu3 %v4588_v14  ;;  %v4568_v1 = vor.u32 %v9278_v63, %v9277_v59  ;;  %v4572_v0 = vor.u32 %v9280_v58, %v9279_v62  ;;  %v4544_v8 = vor.u32 %v9282_v53, %v9281_v49  ;;  %v9283_v52 = vld [vmem:[#allocation66_spill] sm:$0xff]  ;;  %v9285_v51 = vld [vmem:[#allocation65_spill] sm:$0xff]  ;;  %v9287_v54 = vld [vmem:[#allocation68_spill] sm:$0xff] }
  0xe8   : >> { %v9284_v48 = vld [vmem:[#allocation62_spill] sm:$0xff]  ;;  %v9286_v55 = vld [vmem:[#allocation69_spill] sm:$0xff]  ;;  %v9288_v50 = vld [vmem:[#allocation64_spill] sm:$0xff] }
  0xe9   : >> { %1006 = vmatpush.bf16.msra.mxu0 %v4560_v10  ;;  %1025 = vmatpush.bf16.msra.mxu1 %v4564_v12  ;;  %v4548_v15 = vor.u32 %v9284_v48, %v9283_v52  ;;  %v4552_v11 = vor.u32 %v9286_v55, %v9285_v51  ;;  %v4556_v14 = vor.u32 %v9288_v50, %v9287_v54  ;;  %v9289_v41 = vld [vmem:[#allocation55_spill] sm:$0xff]  ;;  %v9291_v44 = vld [vmem:[#allocation58_spill] sm:$0xff]  ;;  %v9293_v43 = vld [vmem:[#allocation57_spill] sm:$0xff] }
  0xea   : >> { %1044 = vmatpush.bf16.msra.mxu2 %v4568_v1  ;;  %v9290_v45 = vld [vmem:[#allocation59_spill] sm:$0xff]  ;;  %v9292_v40 = vld [vmem:[#allocation54_spill] sm:$0xff]  ;;  %v9294_v47 = vld [vmem:[#allocation61_spill] sm:$0xff] }
  0xeb   : >> { %1063 = vmatpush.bf16.msra.mxu3 %v4572_v0  ;;  %v4528_v10 = vor.u32 %v9290_v45, %v9289_v41  ;;  %v4532_v12 = vor.u32 %v9292_v40, %v9291_v44  ;;  %v4536_v1 = vor.u32 %v9294_v47, %v9293_v43  ;;  %v9295_v46 = vld [vmem:[#allocation60_spill] sm:$0xff]  ;;  %v9297_v33 = vld [vmem:[#allocation47_spill] sm:$0xff]  ;;  %v9299_v36 = vld [vmem:[#allocation50_spill] sm:$0xff] }
  0xec   : >> { %v9296_v42 = vld [vmem:[#allocation56_spill] sm:$0xff]  ;;  %v9298_v37 = vld [vmem:[#allocation51_spill] sm:$0xff]  ;;  %v9300_v32 = vld [vmem:[#allocation46_spill] sm:$0xff] }
  0xed   : >> { %1007 = vmatpush.bf16.msra.mxu0 %v4544_v8  ;;  %1026 = vmatpush.bf16.msra.mxu1 %v4548_v15  ;;  %v4540_v0 = vor.u32 %v9296_v42, %v9295_v46  ;;  %v4512_v8 = vor.u32 %v9298_v37, %v9297_v33  ;;  %v4516_v15 = vor.u32 %v9300_v32, %v9299_v36  ;;  %v9301_v35 = vld [vmem:[#allocation49_spill] sm:$0xff]  ;;  %v9303_v38 = vld [vmem:[#allocation52_spill] sm:$0xff]  ;;  %v9305_v25 = vld [vmem:[#allocation39_spill] sm:$0xff] }
  0xee   : >> { %1045 = vmatpush.bf16.msra.mxu2 %v4552_v11  ;;  %v9302_v39 = vld [vmem:[#allocation53_spill] sm:$0xff]  ;;  %v9304_v34 = vld [vmem:[#allocation48_spill] sm:$0xff]  ;;  %v9306_v29 = vld [vmem:[#allocation43_spill] sm:$0xff] }
  0xef   : >> { %1064 = vmatpush.bf16.msra.mxu3 %v4556_v14  ;;  %v4520_v11 = vor.u32 %v9302_v39, %v9301_v35  ;;  %v4524_v14 = vor.u32 %v9304_v34, %v9303_v38  ;;  %v9307_v28 = vld [vmem:[#allocation42_spill] sm:$0xff]  ;;  %v9309_v27 = vld [vmem:[#allocation41_spill] sm:$0xff]  ;;  %v9311_v30 = vld [vmem:[#allocation44_spill] sm:$0xff] }
  0xf0   : >> { %v9308_v24 = vld [vmem:[#allocation38_spill] sm:$0xff]  ;;  %v9310_v31 = vld [vmem:[#allocation45_spill] sm:$0xff]  ;;  %v9312_v26 = vld [vmem:[#allocation40_spill] sm:$0xff] }
  0xf1   : >> { %1008 = vmatpush.bf16.msra.mxu0 %v4528_v10  ;;  %1027 = vmatpush.bf16.msra.mxu1 %v4532_v12  ;;  %v4496_v10 = vor.u32 %v9306_v29, %v9305_v25  ;;  %v4500_v12 = vor.u32 %v9308_v24, %v9307_v28  ;;  %v9313_v17 = vld [vmem:[#allocation31_spill] sm:$0xff]  ;;  %v9315_v20 = vld [vmem:[#allocation34_spill] sm:$0xff]  ;;  %v9317_v19 = vld [vmem:[#allocation33_spill] sm:$0xff] }
  0xf2   : >> { %1046 = vmatpush.bf16.msra.mxu2 %v4536_v1  ;;  %v4504_v1 = vor.u32 %v9310_v31, %v9309_v27  ;;  %v9314_v21 = vld [vmem:[#allocation35_spill] sm:$0xff]  ;;  %v9316_v16 = vld [vmem:[#allocation30_spill] sm:$0xff]  ;;  %v9318_v23 = vld [vmem:[#allocation37_spill] sm:$0xff] }
  0xf3   : >> { %1065 = vmatpush.bf16.msra.mxu3 %v4540_v0  ;;  %v4508_v0 = vor.u32 %v9312_v26, %v9311_v30  ;;  %v9319_v22 = vld [vmem:[#allocation36_spill] sm:$0xff]  ;;  %v9321_v9 = vld [vmem:[#allocation23_spill] sm:$0xff]  ;;  %v830_v2 = vld [vmem:[%s7354_s22] sm:$0xff] }
  0xf4   : >> { %v9320_v18 = vld [vmem:[#allocation32_spill] sm:$0xff]  ;;  %v9322_v13 = vld [vmem:[#allocation27_spill] sm:$0xff]  ;;  %v9325_v4 = vld [vmem:[#allocation25_spill] sm:$0xff] }
  0xf5   : >> { %1009 = vmatpush.bf16.msra.mxu0 %v4512_v8  ;;  %1028 = vmatpush.bf16.msra.mxu1 %v4516_v15  ;;  %v4480_v8 = vor.u32 %v9314_v21, %v9313_v17  ;;  %v4484_v15 = vor.u32 %v9316_v16, %v9315_v20  ;;  %v831_v3 = vld [vmem:[%s7354_s22 + $0x8] sm:$0xff]  ;;  %v9326_v5 = vld [vmem:[#allocation29_spill] sm:$0xff]  ;;  %v9327_v7 = vld [vmem:[#allocation28_spill] sm:$0xff] }
  0xf6   : >> { %1047 = vmatpush.bf16.msra.mxu2 %v4520_v11  ;;  %v4488_v11 = vor.u32 %v9318_v23, %v9317_v19  ;;  %v4472_v6 = vor.u32 %v9326_v5, %v9325_v4  ;;  %v9328_v16 = vld [vmem:[#allocation24_spill] sm:$0xff]  ;;  %v9330_v19 = vld [vmem:[#allocation147_spill] sm:$0xff]  ;;  %v9332_v20 = vld [vmem:[#allocation142_spill] sm:$0xff] }
  0xf7   : >> { %1066 = vmatpush.bf16.msra.mxu3 %v4524_v14  ;;  %v4492_v14 = vor.u32 %v9320_v18, %v9319_v22  ;;  %v4476_v17 = vor.u32 %v9328_v16, %v9327_v7  ;;  %v9329_v18 = vld [vmem:[#allocation143_spill] sm:$0xff]  ;;  %v9335_v4 = vld [vmem:[#allocation148_spill] sm:$0xff]  ;;  %v9342_v7 = vld [vmem:[#allocation141_spill] sm:$0xff] }
  0xf8   : >> { %v9336_v5 = vld [vmem:[#allocation144_spill] sm:$0xff]  ;;  %v833_v23 = vld [vmem:[%s7354_s22 + $0x18] sm:$0xff]  ;;  %v9364_v26 = vld [vmem:[#allocation110_spill] sm:$0xff] }
  0xf9   : >> { %1010 = vmatpush.bf16.msra.mxu0 %v4496_v10  ;;  %1029 = vmatpush.bf16.msra.mxu1 %v4500_v12  ;;  %v4464_v10 = vor.u32 %v9322_v13, %v9321_v9  ;;  %v9323_v12 = vld [vmem:[#allocation26_spill] sm:$0xff]  ;;  %v834_v13 = vpack.c.bf16 %v831_v3, %v830_v2  ;;  %v7380_v16 = vor.u32 %v9336_v5, %v9335_v4  ;;  %v832_v22 = vld [vmem:[%s7354_s22 + $0x10] sm:$0xff] }
  0xfa   : >> { %1048 = vmatpush.bf16.msra.mxu2 %v4504_v1  ;;  %v9324_v1 = vld [vmem:[#allocation22_spill] sm:$0xff]  ;;  %v9360_v24 = vld [vmem:[#allocation120_spill] sm:$0xff]  ;;  %v835_v28 = vpack.c.bf16 %v833_v23, %v832_v22 }
  0xfb   : >> { %1067 = vmatpush.bf16.msra.mxu3 %v4508_v0  ;;  %v4468_v0 = vor.u32 %v9324_v1, %v9323_v12  ;;  %v9339_v2 = vld [vmem:[#allocation138_spill] sm:$0xff]  ;;  %v9343_v1 = vld [vmem:[#allocation140_spill] sm:$0xff] }
  0xfc   : >> { %v9340_v3 = vld [vmem:[#allocation134_spill] sm:$0xff]  ;;  %v9368_v29 = vld [vmem:[#allocation112_spill] sm:$0xff] }
  0xfd   : >> { %1011 = vmatpush.bf16.msra.mxu0 %v4480_v8  ;;  %1030 = vmatpush.bf16.msra.mxu1 %v4484_v15  ;;  %v7368_v8 = vor.u32 %v9330_v19, %v9329_v18  ;;  %v9331_v15 = vld [vmem:[#allocation146_spill] sm:$0xff]  ;;  %v9337_v18 = vld [vmem:[#allocation135_spill] sm:$0xff]  ;;  %v9376_v31 = vld [vmem:[#allocation104_spill] sm:$0xff] }
  0xfe   : >> { %1049 = vmatpush.bf16.msra.mxu2 %v4488_v11  ;;  %v7372_v9 = vor.u32 %v9332_v20, %v9331_v15  ;;  %v9333_v11 = vld [vmem:[#allocation145_spill] sm:$0xff]  ;;  %v9338_v19 = vld [vmem:[#allocation139_spill] sm:$0xff]  ;;  %v9347_v4 = vld [vmem:[#allocation130_spill] sm:$0xff] }
  0xff   : >> { %1068 = vmatpush.bf16.msra.mxu3 %v4492_v14  ;;  %v9334_v14 = vld [vmem:[#allocation149_spill] sm:$0xff]  ;;  %v7386_v20 = vor.u32 %v9338_v19, %v9337_v18  ;;  %v9348_v5 = vld [vmem:[#allocation126_spill] sm:$0xff]  ;;  %v9384_v34 = vld [vmem:[#allocation96_spill] sm:$0xff] }
 0x100   : >> { %v7376_v12 = vor.u32 %v9334_v14, %v9333_v11  ;;  %v9345_v11 = vld [vmem:[#allocation127_spill] sm:$0xff]  ;;  %v7410_v18 = vor.u32 %v9348_v5, %v9347_v4  ;;  %v9349_v19 = vld [vmem:[#allocation129_spill] sm:$0xff]  ;;  %v9355_v4 = vld [vmem:[#allocation122_spill] sm:$0xff] }
 0x101   : >> { %1012 = vmatpush.bf16.msra.mxu0 %v4464_v10  ;;  %1031 = vmatpush.bf16.msra.mxu1 %v4468_v0  ;;  %v9344_v0 = vld [vmem:[#allocation136_spill] sm:$0xff]  ;;  %v9356_v5 = vld [vmem:[#allocation118_spill] sm:$0xff] }
 0x102   : >> { %1050 = vmatpush.bf16.msra.mxu2 %v4472_v6  ;;  %v7390_v6 = vor.u32 %v9340_v3, %v9339_v2  ;;  %v7400_v15 = vor.u32 %v9344_v0, %v9343_v1  ;;  %v9350_v2 = vld [vmem:[#allocation133_spill] sm:$0xff]  ;;  %v9353_v0 = vld [vmem:[#allocation119_spill] sm:$0xff]  ;;  %v7430_v21 = vor.u32 %v9356_v5, %v9355_v4  ;;  %v9363_v5 = vld [vmem:[#allocation114_spill] sm:$0xff] }
 0x103   : >> { %1069 = vmatpush.bf16.msra.mxu3 %v4476_v17  ;;  %v9341_v17 = vld [vmem:[#allocation137_spill] sm:$0xff]  ;;  %v7416_v3 = vor.u32 %v9350_v2, %v9349_v19  ;;  %v7452_v27 = vor.u32 %v9364_v26, %v9363_v5  ;;  %v9370_v26 = vld [vmem:[#allocation107_spill] sm:$0xff]  ;;  %v9371_v22 = vld [vmem:[#allocation106_spill] sm:$0xff] }
 0x104   : >> { %1013 = vmatmul.bf16.vlgmr.msra.gmra.mxu0 %v834_v13  ;;  %1032 = vmatmul.bf16.vlgmr.msra.gmra.mxu1 %v834_v13  ;;  %v7396_v10 = vor.u32 %v9342_v7, %v9341_v17  ;;  %v9351_v17 = vld [vmem:[#allocation132_spill] sm:$0xff]  ;;  %v9357_v19 = vld [vmem:[#allocation121_spill] sm:$0xff]  ;;  %v9372_v23 = vld [vmem:[#allocation102_spill] sm:$0xff] }
 0x105   : >> { %1265 = vmatpush.bf16.msrb.mxu0 %v7368_v8  ;;  %1278 = vmatpush.bf16.msrb.mxu1 %v7372_v9  ;;  %v9352_v7 = vld [vmem:[#allocation128_spill] sm:$0xff]  ;;  %v9358_v2 = vld [vmem:[#allocation125_spill] sm:$0xff]  ;;  %v7472_v5 = vor.u32 %v9372_v23, %v9371_v22  ;;  %v9378_v22 = vld [vmem:[#allocation99_spill] sm:$0xff] }
 0x106   : >> { %1051 = vmatmul.bf16.vlgmr.msra.gmra.mxu2 %v834_v13  ;;  %1070 = vmatmul.bf16.vlgmr.msra.gmra.mxu3 %v834_v13  ;;  %v9346_v13 = vld [vmem:[#allocation131_spill] sm:$0xff]  ;;  %v7420_v1 = vor.u32 %v9352_v7, %v9351_v17  ;;  %v7438_v17 = vor.u32 %v9358_v2, %v9357_v19  ;;  %v9359_v7 = vld [vmem:[#allocation124_spill] sm:$0xff]  ;;  %v9365_v19 = vld [vmem:[#allocation113_spill] sm:$0xff] }
 0x107   : >> { %1291 = vmatpush.bf16.msrb.mxu2 %v7376_v12  ;;  %1304 = vmatpush.bf16.msrb.mxu3 %v7380_v16  ;;  %v7406_v14 = vor.u32 %v9346_v13, %v9345_v11  ;;  %v9354_v11 = vld [vmem:[#allocation123_spill] sm:$0xff]  ;;  %v7442_v25 = vor.u32 %v9360_v24, %v9359_v7  ;;  %v9366_v24 = vld [vmem:[#allocation117_spill] sm:$0xff]  ;;  %v9367_v7 = vld [vmem:[#allocation116_spill] sm:$0xff] }
 0x108   : >> { %v7426_v13 = vor.u32 %v9354_v11, %v9353_v0  ;;  %v9361_v0 = vld [vmem:[#allocation111_spill] sm:$0xff]  ;;  %v7458_v2 = vor.u32 %v9366_v24, %v9365_v19  ;;  %v7462_v30 = vor.u32 %v9368_v29, %v9367_v7  ;;  %v9373_v29 = vld [vmem:[#allocation105_spill] sm:$0xff]  ;;  %v9375_v7 = vld [vmem:[#allocation108_spill] sm:$0xff] }
 0x109   : >> { %1266 = vmatpush.bf16.msrb.mxu0 %v7386_v20  ;;  %1279 = vmatpush.bf16.msrb.mxu1 %v7390_v6  ;;  %v9362_v11 = vld [vmem:[#allocation115_spill] sm:$0xff]  ;;  %v9374_v19 = vld [vmem:[#allocation109_spill] sm:$0xff]  ;;  %v9380_v32 = vld [vmem:[#allocation94_spill] sm:$0xff] }
 0x10a   : >> { %v7448_v4 = vor.u32 %v9362_v11, %v9361_v0  ;;  %v9369_v0 = vld [vmem:[#allocation103_spill] sm:$0xff]  ;;  %v7478_v24 = vor.u32 %v9374_v19, %v9373_v29  ;;  %v9381_v29 = vld [vmem:[#allocation97_spill] sm:$0xff]  ;;  %v9388_v36 = vld [vmem:[#allocation86_spill] sm:$0xff] }
 0x10b   : >> { %1292 = vmatpush.bf16.msrb.mxu2 %v7396_v10  ;;  %1305 = vmatpush.bf16.msrb.mxu3 %v7400_v15  ;;  %v7468_v11 = vor.u32 %v9370_v26, %v9369_v0  ;;  %v7482_v0 = vor.u32 %v9376_v31, %v9375_v7  ;;  %v9377_v26 = vld [vmem:[#allocation95_spill] sm:$0xff]  ;;  %v9382_v19 = vld [vmem:[#allocation101_spill] sm:$0xff]  ;;  %v9383_v7 = vld [vmem:[#allocation100_spill] sm:$0xff] }
 0x10c   : >> { %v7488_v23 = vor.u32 %v9378_v22, %v9377_v26  ;;  %v7498_v31 = vor.u32 %v9382_v19, %v9381_v29  ;;  %v7502_v35 = vor.u32 %v9384_v34, %v9383_v7  ;;  %v9385_v26 = vld [vmem:[#allocation87_spill] sm:$0xff]  ;;  %v9389_v29 = vld [vmem:[#allocation89_spill] sm:$0xff]  ;;  %v9391_v7 = vld [vmem:[#allocation92_spill] sm:$0xff] }
 0x10d   : >> { %1267 = vmatpush.bf16.msrb.mxu0 %v7406_v14  ;;  %1280 = vmatpush.bf16.msrb.mxu1 %v7410_v18  ;;  %v9386_v22 = vld [vmem:[#allocation91_spill] sm:$0xff]  ;;  %v9390_v19 = vld [vmem:[#allocation93_spill] sm:$0xff]  ;;  %v9392_v38 = vld [vmem:[#allocation88_spill] sm:$0xff] }
 0x10e   : >> { %v7518_v34 = vor.u32 %v9390_v19, %v9389_v29  ;;  %v7522_v39 = vor.u32 %v9392_v38, %v9391_v7  ;;  %v9394_v38 = vld [vmem:[#allocation150_spill] sm:$0xff] }
 0x10f   : >> { %1293 = vmatpush.bf16.msrb.mxu2 %v7416_v3  ;;  %1306 = vmatpush.bf16.msrb.mxu3 %v7420_v1  ;;  %v840_v40 = vperm.slane %v9394_v38, 3 }
 0x111   : >> { %1268 = vmatpush.bf16.msrb.mxu0 %v7426_v13  ;;  %1281 = vmatpush.bf16.msrb.mxu1 %v7430_v21 }
 0x113   : >> { %1294 = vmatpush.bf16.msrb.mxu2 %v7438_v17  ;;  %1307 = vmatpush.bf16.msrb.mxu3 %v7442_v25 }
 0x114   : >> { %1018 = vmatmul.bf16.gmra.mxu0 %v835_v28  ;;  %1037 = vmatmul.bf16.gmra.mxu1 %v835_v28 }
 0x115   : >> { %1269 = vmatpush.bf16.msrb.mxu0 %v7448_v4  ;;  %1282 = vmatpush.bf16.msrb.mxu1 %v7452_v27 }
 0x116   : >> { %1056 = vmatmul.bf16.gmra.mxu2 %v835_v28  ;;  %1075 = vmatmul.bf16.gmra.mxu3 %v835_v28  ;;  %v9379_v28 = vld [vmem:[#allocation98_spill] sm:$0xff] }
 0x117   : >> { %1295 = vmatpush.bf16.msrb.mxu2 %v7458_v2  ;;  %1308 = vmatpush.bf16.msrb.mxu3 %v7462_v30  ;;  %v7492_v33 = vor.u32 %v9380_v32, %v9379_v28  ;;  %v7508_v32 = vor.u32 %v9386_v22, %v9385_v26  ;;  %v9387_v28 = vld [vmem:[#allocation90_spill] sm:$0xff]  ;;  %v9393_v26 = vld [vmem:[#allocation152_spill] sm:$0xff]  ;;  %v837_v22 = vperm.slane %v9394_v38, 0 }
 0x118   : >> { %v7512_v37 = vor.u32 %v9388_v36, %v9387_v28  ;;  %v1104_v36 = vpack.c.bf16 %v9393_v26, %v9393_v26  ;;  %v838_v28 = vperm.slane %v9394_v38, 1 }
 0x119   : >> { %1270 = vmatpush.bf16.msrb.mxu0 %v7468_v11  ;;  %1283 = vmatpush.bf16.msrb.mxu1 %v7472_v5 }
 0x11b   : >> { %1296 = vmatpush.bf16.msrb.mxu2 %v7478_v24  ;;  %1309 = vmatpush.bf16.msrb.mxu3 %v7482_v0 }
 0x11d   : >> { %1271 = vmatpush.bf16.msrb.mxu0 %v7488_v23  ;;  %1284 = vmatpush.bf16.msrb.mxu1 %v7492_v33 }
 0x11f   : >> { %1297 = vmatpush.bf16.msrb.mxu2 %v7498_v31  ;;  %1310 = vmatpush.bf16.msrb.mxu3 %v7502_v35 }
 0x121   : >> { %1272 = vmatpush.bf16.msrb.mxu0 %v7508_v32  ;;  %1285 = vmatpush.bf16.msrb.mxu1 %v7512_v37 }
 0x123   : >> { %1298 = vmatpush.bf16.msrb.mxu2 %v7518_v34  ;;  %1311 = vmatpush.bf16.msrb.mxu3 %v7522_v39 }
 0x124   : >> { %1273 = vmatmul.bf16.vlgmr.msrb.gmra.mxu0 %v1104_v36  ;;  %1286 = vmatmul.bf16.vlgmr.msrb.gmra.mxu1 %v1104_v36 }
 0x125   : >> { %1395 = vmatpush.bf16.msra.mxu0 %v7368_v8  ;;  %1408 = vmatpush.bf16.msra.mxu1 %v7372_v9 }
 0x126   : >> { %1299 = vmatmul.bf16.vlgmr.msrb.gmra.mxu2 %v1104_v36  ;;  %1312 = vmatmul.bf16.vlgmr.msrb.gmra.mxu3 %v1104_v36  ;;  %v839_v36 = vperm.slane %v9394_v38, 2 }
 0x127   : >> { %1421 = vmatpush.bf16.msra.mxu2 %v7376_v12  ;;  %1434 = vmatpush.bf16.msra.mxu3 %v7380_v16 }
 0x129   : >> { %1396 = vmatpush.bf16.msra.mxu0 %v7386_v20  ;;  %1409 = vmatpush.bf16.msra.mxu1 %v7390_v6 }
 0x12b   : >> { %1422 = vmatpush.bf16.msra.mxu2 %v7396_v10  ;;  %1435 = vmatpush.bf16.msra.mxu3 %v7400_v15 }
 0x12d   : >> { %1397 = vmatpush.bf16.msra.mxu0 %v7406_v14  ;;  %1410 = vmatpush.bf16.msra.mxu1 %v7410_v18 }
 0x12f   : >> { %1423 = vmatpush.bf16.msra.mxu2 %v7416_v3  ;;  %1436 = vmatpush.bf16.msra.mxu3 %v7420_v1 }
 0x131   : >> { %1398 = vmatpush.bf16.msra.mxu0 %v7426_v13  ;;  %1411 = vmatpush.bf16.msra.mxu1 %v7430_v21 }
 0x133   : >> { %1424 = vmatpush.bf16.msra.mxu2 %v7438_v17  ;;  %1437 = vmatpush.bf16.msra.mxu3 %v7442_v25 }
 0x135   : >> { %1399 = vmatpush.bf16.msra.mxu0 %v7448_v4  ;;  %1412 = vmatpush.bf16.msra.mxu1 %v7452_v27 }
 0x137   : >> { %1425 = vmatpush.bf16.msra.mxu2 %v7458_v2  ;;  %1438 = vmatpush.bf16.msra.mxu3 %v7462_v30 }
 0x139   : >> { %1400 = vmatpush.bf16.msra.mxu0 %v7468_v11  ;;  %1413 = vmatpush.bf16.msra.mxu1 %v7472_v5 }
 0x13b   : >> { %1426 = vmatpush.bf16.msra.mxu2 %v7478_v24  ;;  %1439 = vmatpush.bf16.msra.mxu3 %v7482_v0 }
 0x13d   : >> { %1401 = vmatpush.bf16.msra.mxu0 %v7488_v23  ;;  %1414 = vmatpush.bf16.msra.mxu1 %v7492_v33 }
 0x13f   : >> { %1427 = vmatpush.bf16.msra.mxu2 %v7498_v31  ;;  %1440 = vmatpush.bf16.msra.mxu3 %v7502_v35 }
 0x141   : >> { %1402 = vmatpush.bf16.msra.mxu0 %v7508_v32  ;;  %1415 = vmatpush.bf16.msra.mxu1 %v7512_v37 }
 0x143   : >> { %1428 = vmatpush.bf16.msra.mxu2 %v7518_v34  ;;  %1441 = vmatpush.bf16.msra.mxu3 %v7522_v39 }
 0x145   : >> { %1525 = vmatpush.bf16.msrb.mxu0 %v7368_v8  ;;  %1538 = vmatpush.bf16.msrb.mxu1 %v7372_v9 }
 0x147   : >> { %1551 = vmatpush.bf16.msrb.mxu2 %v7376_v12  ;;  %1564 = vmatpush.bf16.msrb.mxu3 %v7380_v16 }
 0x149   : >> { %1526 = vmatpush.bf16.msrb.mxu0 %v7386_v20  ;;  %1539 = vmatpush.bf16.msrb.mxu1 %v7390_v6 }
 0x14b   : >> { %1552 = vmatpush.bf16.msrb.mxu2 %v7396_v10  ;;  %1565 = vmatpush.bf16.msrb.mxu3 %v7400_v15 }
 0x14d   : >> { %1527 = vmatpush.bf16.msrb.mxu0 %v7406_v14  ;;  %1540 = vmatpush.bf16.msrb.mxu1 %v7410_v18 }
 0x14f   : >> { %1553 = vmatpush.bf16.msrb.mxu2 %v7416_v3  ;;  %1566 = vmatpush.bf16.msrb.mxu3 %v7420_v1 }
 0x151   : >> { %1528 = vmatpush.bf16.msrb.mxu0 %v7426_v13  ;;  %1541 = vmatpush.bf16.msrb.mxu1 %v7430_v21 }
 0x153   : >> { %1554 = vmatpush.bf16.msrb.mxu2 %v7438_v17  ;;  %1567 = vmatpush.bf16.msrb.mxu3 %v7442_v25 }
 0x155   : >> { %1529 = vmatpush.bf16.msrb.mxu0 %v7448_v4  ;;  %1542 = vmatpush.bf16.msrb.mxu1 %v7452_v27 }
 0x157   : >> { %1555 = vmatpush.bf16.msrb.mxu2 %v7458_v2  ;;  %1568 = vmatpush.bf16.msrb.mxu3 %v7462_v30 }
 0x159   : >> { %1530 = vmatpush.bf16.msrb.mxu0 %v7468_v11  ;;  %1543 = vmatpush.bf16.msrb.mxu1 %v7472_v5 }
 0x15b   : >> { %1556 = vmatpush.bf16.msrb.mxu2 %v7478_v24  ;;  %1569 = vmatpush.bf16.msrb.mxu3 %v7482_v0 }
 0x15d   : >> { %1531 = vmatpush.bf16.msrb.mxu0 %v7488_v23  ;;  %1544 = vmatpush.bf16.msrb.mxu1 %v7492_v33 }
 0x15f   : >> { %1557 = vmatpush.bf16.msrb.mxu2 %v7498_v31  ;;  %1570 = vmatpush.bf16.msrb.mxu3 %v7502_v35 }
 0x161   : >> { %1532 = vmatpush.bf16.msrb.mxu0 %v7508_v32  ;;  %1545 = vmatpush.bf16.msrb.mxu1 %v7512_v37 }
 0x163   : >> { %1558 = vmatpush.bf16.msrb.mxu2 %v7518_v34  ;;  %1571 = vmatpush.bf16.msrb.mxu3 %v7522_v39 }
 0x181   : >> { %v1014_v29 = vpop.f32.mrf.mxu0  ;;  %v1033_v19 = vpop.f32.mrf.mxu1 }
 0x182   : >> { %v1015_v7 = vadd.f32 %v1014_v29, %v837_v22  ;;  %v1034_v26 = vadd.f32 %v1033_v19, %v838_v28 }
 0x189   : >> { %v1052_v41 = vpop.f32.mrf.mxu2  ;;  %v1071_v42 = vpop.f32.mrf.mxu3 }
 0x18a   : >> { %v1053_v43 = vadd.f32 %v1052_v41, %v839_v36  ;;  %v1072_v44 = vadd.f32 %v1071_v42, %v840_v40  ;;  %v1016_v45 = vpop.f32.mrf.mxu0  ;;  %v1035_v46 = vpop.f32.mrf.mxu1 }
 0x18b   : >> { %v7598_v47 = vadd.f32 %v1016_v45, %v837_v22  ;;  %v7600_v48 = vadd.f32 %v1035_v46, %v838_v28 }
 0x191   : >> { %v1054_v49 = vpop.f32.mrf.mxu2  ;;  %v1073_v50 = vpop.f32.mrf.mxu3 }
 0x192   : >> { %v7602_v51 = vadd.f32 %v1054_v49, %v839_v36  ;;  %v7604_v29 = vadd.f32 %v1073_v50, %v840_v40  ;;  %v1019_v19 = vpop.f32.mrf.mxu0  ;;  %v1038_v52 = vpop.f32.mrf.mxu1 }
 0x193   : >> { %v7606_v53 = vadd.f32 %v1019_v19, %v837_v22  ;;  %v7608_v38 = vadd.f32 %v1038_v52, %v838_v28 }
 0x199   : >> { %v1057_v41 = vpop.f32.mrf.mxu2  ;;  %v1076_v42 = vpop.f32.mrf.mxu3 }
 0x19a   : >> { %v7610_v54 = vadd.f32 %v1057_v41, %v839_v36  ;;  %v7612_v45 = vadd.f32 %v1076_v42, %v840_v40  ;;  %v1021_v46 = vpop.f32.mrf.mxu0  ;;  %v1040_v55 = vpop.f32.mrf.mxu1 }
 0x19b   : >> { %v7614_v56 = vadd.f32 %v1021_v46, %v837_v22  ;;  %v7616_v49 = vadd.f32 %v1040_v55, %v838_v28 }
 0x19c   : >> { %9395 = vst [vmem:[#allocation152_spill] sm:$0xff] %v7610_v54  ;;  %v9401_v54 = vld [vmem:[#allocation151_spill] sm:$0xff] }
 0x19d   : >> { %9396 = vst [vmem:[#allocation153_spill] sm:$0xff] %v7612_v45 }
 0x19e   : >> { %9397 = vst [vmem:[#allocation154_spill] sm:$0xff] %v7614_v56 }
 0x19f   : >> { %9398 = vst [vmem:[#allocation155_spill] sm:$0xff] %v7616_v49 }
 0x1a1   : >> { %v1059_v50 = vpop.f32.mrf.mxu2  ;;  %v1078_v57 = vpop.f32.mrf.mxu3 }
 0x1a2   : >> { %v7618_v58 = vadd.f32 %v1059_v50, %v839_v36  ;;  %v7620_v19 = vadd.f32 %v1078_v57, %v840_v40  ;;  %v1274_v52 = vpop.f32.mrf.mxu0  ;;  %v1287_v59 = vpop.f32.mrf.mxu1 }
 0x1a3   : >> { %v1317_v60 = vadd.f32 %v1274_v52, %v1015_v7  ;;  %v1318_v61 = vadd.f32 %v1287_v59, %v1034_v26 }
 0x1a4   : >> { %9399 = vst [vmem:[#allocation156_spill] sm:$0xff] %v7618_v58 }
 0x1a5   : >> { %9400 = vst [vmem:[#allocation157_spill] sm:$0xff] %v7620_v19  ;;  %v4717_v41 = vmul.f32 -1.442695, %v1317_v60  ;;  %v4718_v62 = vmul.f32 -1.442695, %v1318_v61 }
 0x1a7   : >> { %5869 = vpow2.f32 %v4717_v41 }
 0x1a8   : >> { %5871 = vpow2.f32 %v4718_v62 }
 0x1a9   : >> { %v1300_v42 = vpop.f32.mrf.mxu2  ;;  %v1313_v63 = vpop.f32.mrf.mxu3 }
 0x1aa   : >> { %v1319_v22 = vadd.f32 %v1300_v42, %v1053_v43  ;;  %v1276_v46 = vpop.f32.mrf.mxu0  ;;  %v1289_v55 = vpop.f32.mrf.mxu1  ;;  %v1320_v26 = vadd.f32 %v1313_v63, %v1072_v44 }
 0x1ac   : >> { %v4719_v28 = vmul.f32 -1.442695, %v1319_v22 }
 0x1ad   : >> { %v5870_v49 = vpop.eup %5869 }
 0x1ae   : >> { %v5872_v56 = vpop.eup %5871  ;;  %v1330_v36 = vadd.f32 1.0, %v5870_v49  ;;  %5873 = vpow2.f32 %v4719_v28 }
 0x1af   : >> { %v1331_v40 = vadd.f32 1.0, %v5872_v56 }
 0x1b0   : >> { %5875 = vrcp.f32 %v1330_v36  ;;  %v1344_v42 = vand.u32 2147483648, %v1330_v36  ;;  %v1342_v56 = vand.u32 2147483647, %v1330_v36  ;;  %vm1338_vm2 = vweird.f32 %v1330_v36 }
 0x1b1   : >> { %5877 = vrcp.f32 %v1331_v40  ;;  %v1302_v57 = vpop.f32.mrf.mxu2  ;;  %v1315_v7 = vpop.f32.mrf.mxu3  ;;  %v1359_v22 = vand.u32 2147483648, %v1331_v40  ;;  %v1357_v55 = vand.u32 2147483647, %v1331_v40  ;;  %vm1353_vm3 = vweird.f32 %v1331_v40 }
 0x1b2   : >> { %v1345_v63 = vor.u32 1.1754944e-38, %v1344_v42  ;;  %vm1343_vm6 = vcmp.eq.f32.partialorder %v1342_v56, 8.507059e+37 }
 0x1b3   : >> { %vm1358_vm7 = vcmp.eq.f32.partialorder %v1357_v55, 8.507059e+37 }
 0x1b4   : >> { %v5874_v59 = vpop.eup %5873 }
 0x1b5   : >> { %v1332_v60 = vadd.f32 1.0, %v5874_v59  ;;  %v1360_v59 = vor.u32 1.1754944e-38, %v1359_v22 }
 0x1b6   : >> { %v5876_v61 = vpop.eup %5875 }
 0x1b7   : >> { %v5878_v62 = vpop.eup %5877  ;;  %v1334_v50 = vmul.f32 %v5876_v61, %v1330_v36  ;;  %5879 = vrcp.f32 %v1332_v60  ;;  %vm1339_vm0 = vweird.f32 %v5876_v61  ;;  %v1374_v42 = vand.u32 2147483648, %v1332_v60 }
 0x1b8   : >> { %v1349_v43 = vmul.f32 %v5878_v62, %v1331_v40  ;;  %5881 = vtanh.f32 %v1320_v26  ;;  %vm1354_vm1 = vweird.f32 %v5878_v62  ;;  %vm1340_vm4 = vmor %vm1338_vm2, %vm1339_vm0  ;;  %vm1368_vm9 = vweird.f32 %v1332_v60 }
 0x1b9   : >> { %v1335_v52 = vsub.f32 1.0, %v1334_v50  ;;  %vm1355_vm5 = vmor %vm1353_vm3, %vm1354_vm1  ;;  %v1375_v56 = vor.u32 1.1754944e-38, %v1374_v42 }
 0x1ba   : >> { %v1350_v41 = vsub.f32 1.0, %v1349_v43 }
 0x1bb   : >> { %v1336_v49 = vmul.f32 %v5876_v61, %v1335_v52 }
 0x1bc   : >> { %v1351_v46 = vmul.f32 %v5878_v62, %v1350_v41 }
 0x1bd   : >> { %v5880_v28 = vpop.eup %5879  ;;  %v1337_v57 = vadd.f32 %v5876_v61, %v1336_v49 }
 0x1be   : >> { %v1364_v44 = vmul.f32 %v5880_v28, %v1332_v60  ;;  %v1352_v7 = vadd.f32 %v5878_v62, %v1351_v46  ;;  %v5882_v26 = vpop.eup %5881  ;;  %vm1369_vm8 = vweird.f32 %v5880_v28 }
 0x1bf   : >> { %v1341_v50 = vsel %vm1340_vm4, %v5876_v61, %v1337_v57  ;;  %v1372_v61 = vand.u32 2147483647, %v1332_v60  ;;  %vm1370_vm10 = vmor %vm1368_vm9, %vm1369_vm8 }
 0x1c0   : >> { %v1365_v43 = vsub.f32 1.0, %v1364_v44  ;;  %v1346_v52 = vsel %vm1343_vm6, %v1345_v63, %v1341_v50  ;;  %v1356_v19 = vsel %vm1355_vm5, %v5878_v62, %v1352_v7 }
 0x1c1   : >> { %v1361_v41 = vsel %vm1358_vm7, %v1360_v59, %v1356_v19  ;;  %v1380_v58 = vmul.f32 %v5882_v26, %v1346_v52  ;;  %vm1373_vm11 = vcmp.eq.f32.partialorder %v1372_v61, 8.507059e+37 }
 0x1c2   : >> { %v1366_v45 = vmul.f32 %v5880_v28, %v1365_v43  ;;  %v1379_v36 = vmul.f32 %v9401_v54, %v1361_v41 }
 0x1c4   : >> { %v7623_v40 = vadd.f32 %v1380_v58, %v1379_v36  ;;  %v1367_v49 = vadd.f32 %v5880_v28, %v1366_v45 }
 0x1c6   : >> { %5883 = vtanh.f32 %v7623_v40  ;;  %v1371_v22 = vsel %vm1370_vm10, %v5880_v28, %v1367_v49 }
 0x1c7   : >> { %v1376_v19 = vsel %vm1373_vm11, %v1375_v56, %v1371_v22 }
 0x1cc   : >> { %v5884_v62 = vpop.eup %5883 }
 0x1cd   : >> { %v1383_v46 = vmul.f32 %v5884_v62, %v1376_v19 }
 0x1cf   : >> { %1386 = vst [vmem:[%s7628_s25] sm:$0xff] %v1383_v46  ;;  %v1394_v54 = vpack.c.bf16 %v1383_v46, %v1383_v46 }
 0x1d1   : >> { %1403 = vmatmul.bf16.vlgmr.msra.gmra.mxu0 %v1394_v54  ;;  %1416 = vmatmul.bf16.vlgmr.msra.gmra.mxu1 %v1394_v54 }
 0x1d2   : >> { %1429 = vmatmul.bf16.vlgmr.msra.gmra.mxu2 %v1394_v54  ;;  %1442 = vmatmul.bf16.vlgmr.msra.gmra.mxu3 %v1394_v54 }
 0x1d3   : >> { %1655 = vmatpush.bf16.msra.mxu0 %v7368_v8  ;;  %1668 = vmatpush.bf16.msra.mxu1 %v7372_v9 }
 0x1d4   : >> { %1681 = vmatpush.bf16.msra.mxu2 %v7376_v12  ;;  %1694 = vmatpush.bf16.msra.mxu3 %v7380_v16 }
 0x1d7   : >> { %1656 = vmatpush.bf16.msra.mxu0 %v7386_v20  ;;  %1669 = vmatpush.bf16.msra.mxu1 %v7390_v6 }
 0x1d8   : >> { %1682 = vmatpush.bf16.msra.mxu2 %v7396_v10  ;;  %1695 = vmatpush.bf16.msra.mxu3 %v7400_v15 }
 0x1db   : >> { %1657 = vmatpush.bf16.msra.mxu0 %v7406_v14  ;;  %1670 = vmatpush.bf16.msra.mxu1 %v7410_v18 }
 0x1dc   : >> { %1683 = vmatpush.bf16.msra.mxu2 %v7416_v3  ;;  %1696 = vmatpush.bf16.msra.mxu3 %v7420_v1 }
 0x1df   : >> { %1658 = vmatpush.bf16.msra.mxu0 %v7426_v13  ;;  %1671 = vmatpush.bf16.msra.mxu1 %v7430_v21 }
 0x1e0   : >> { %1684 = vmatpush.bf16.msra.mxu2 %v7438_v17  ;;  %1697 = vmatpush.bf16.msra.mxu3 %v7442_v25 }
 0x1e3   : >> { %1659 = vmatpush.bf16.msra.mxu0 %v7448_v4  ;;  %1672 = vmatpush.bf16.msra.mxu1 %v7452_v27 }
 0x1e4   : >> { %1685 = vmatpush.bf16.msra.mxu2 %v7458_v2  ;;  %1698 = vmatpush.bf16.msra.mxu3 %v7462_v30 }
 0x1e7   : >> { %1660 = vmatpush.bf16.msra.mxu0 %v7468_v11  ;;  %1673 = vmatpush.bf16.msra.mxu1 %v7472_v5 }
 0x1e8   : >> { %1686 = vmatpush.bf16.msra.mxu2 %v7478_v24  ;;  %1699 = vmatpush.bf16.msra.mxu3 %v7482_v0 }
 0x1eb   : >> { %1661 = vmatpush.bf16.msra.mxu0 %v7488_v23  ;;  %1674 = vmatpush.bf16.msra.mxu1 %v7492_v33 }
 0x1ec   : >> { %1687 = vmatpush.bf16.msra.mxu2 %v7498_v31  ;;  %1700 = vmatpush.bf16.msra.mxu3 %v7502_v35 }
 0x1ef   : >> { %1662 = vmatpush.bf16.msra.mxu0 %v7508_v32  ;;  %1675 = vmatpush.bf16.msra.mxu1 %v7512_v37 }
 0x1f0   : >> { %1688 = vmatpush.bf16.msra.mxu2 %v7518_v34  ;;  %1701 = vmatpush.bf16.msra.mxu3 %v7522_v39 }
 0x24e   : >> { %v1404_v9 = vpop.f32.mrf.mxu0  ;;  %v1417_v21 = vpop.f32.mrf.mxu1 }
 0x24f   : >> { %v1447_v25 = vadd.f32 %v1404_v9, %v7598_v47  ;;  %v1448_v27 = vadd.f32 %v1417_v21, %v7600_v48 }
 0x251   : >> { %v4721_v30 = vmul.f32 -1.442695, %v1447_v25  ;;  %v4722_v33 = vmul.f32 -1.442695, %v1448_v27 }
 0x253   : >> { %5885 = vpow2.f32 %v4721_v30  ;;  %v9402_v30 = vld [vmem:[#allocation152_spill] sm:$0xff] }
 0x254   : >> { %5887 = vpow2.f32 %v4722_v33 }
 0x255   : >> { %v1430_v58 = vpop.f32.mrf.mxu2  ;;  %v1443_v35 = vpop.f32.mrf.mxu3 }
 0x256   : >> { %v1449_v8 = vadd.f32 %v1430_v58, %v7602_v51  ;;  %v1406_v12 = vpop.f32.mrf.mxu0  ;;  %v1419_v37 = vpop.f32.mrf.mxu1  ;;  %v1450_v3 = vadd.f32 %v1443_v35, %v7604_v29 }
 0x258   : >> { %v4723_v16 = vmul.f32 -1.442695, %v1449_v8 }
 0x259   : >> { %v5886_v20 = vpop.eup %5885 }
 0x25a   : >> { %v5888_v6 = vpop.eup %5887  ;;  %v1460_v39 = vadd.f32 1.0, %v5886_v20  ;;  %5889 = vpow2.f32 %v4723_v16 }
 0x25b   : >> { %v1461_v10 = vadd.f32 1.0, %v5888_v6 }
 0x25c   : >> { %5891 = vrcp.f32 %v1460_v39  ;;  %v1474_v2 = vand.u32 2147483648, %v1460_v39  ;;  %v1472_v24 = vand.u32 2147483647, %v1460_v39  ;;  %vm1468_vm14 = vweird.f32 %v1460_v39 }
 0x25d   : >> { %5893 = vrcp.f32 %v1461_v10  ;;  %v1432_v47 = vpop.f32.mrf.mxu2  ;;  %v1445_v48 = vpop.f32.mrf.mxu3  ;;  %v1489_v11 = vand.u32 2147483648, %v1461_v10  ;;  %v1487_v23 = vand.u32 2147483647, %v1461_v10  ;;  %vm1483_vm15 = vweird.f32 %v1461_v10 }
 0x25e   : >> { %v1475_v29 = vor.u32 1.1754944e-38, %v1474_v2  ;;  %vm1473_vm2 = vcmp.eq.f32.partialorder %v1472_v24, 8.507059e+37  ;;  %v9403_v47 = vld [vmem:[#allocation153_spill] sm:$0xff] }
 0x25f   : >> { %v1490_v60 = vor.u32 1.1754944e-38, %v1489_v11  ;;  %vm1488_vm3 = vcmp.eq.f32.partialorder %v1487_v23, 8.507059e+37 }
 0x260   : >> { %v5890_v15 = vpop.eup %5889 }
 0x261   : >> { %v1462_v14 = vadd.f32 1.0, %v5890_v15 }
 0x262   : >> { %v5892_v18 = vpop.eup %5891 }
 0x263   : >> { %v5894_v1 = vpop.eup %5893  ;;  %v1464_v13 = vmul.f32 %v5892_v18, %v1460_v39  ;;  %5895 = vrcp.f32 %v1462_v14  ;;  %vm1469_vm12 = vweird.f32 %v5892_v18  ;;  %v1504_v41 = vand.u32 2147483648, %v1462_v14 }
 0x264   : >> { %v1479_v51 = vmul.f32 %v5894_v1, %v1461_v10  ;;  %5897 = vtanh.f32 %v1450_v3  ;;  %vm1484_vm13 = vweird.f32 %v5894_v1  ;;  %vm1470_vm0 = vmor %vm1468_vm14, %vm1469_vm12  ;;  %vm1498_vm5 = vweird.f32 %v1462_v14 }
 0x265   : >> { %v1465_v17 = vsub.f32 1.0, %v1464_v13  ;;  %vm1485_vm1 = vmor %vm1483_vm15, %vm1484_vm13  ;;  %v1502_v36 = vand.u32 2147483647, %v1462_v14  ;;  %v1505_v42 = vor.u32 1.1754944e-38, %v1504_v41 }
 0x266   : >> { %v1480_v4 = vsub.f32 1.0, %v1479_v51 }
 0x267   : >> { %v1466_v5 = vmul.f32 %v5892_v18, %v1465_v17  ;;  %vm1503_vm7 = vcmp.eq.f32.partialorder %v1502_v36, 8.507059e+37 }
 0x268   : >> { %v1481_v0 = vmul.f32 %v5894_v1, %v1480_v4 }
 0x269   : >> { %v5896_v31 = vpop.eup %5895  ;;  %v1467_v32 = vadd.f32 %v5892_v18, %v1466_v5 }
 0x26a   : >> { %v1494_v34 = vmul.f32 %v5896_v31, %v1462_v14  ;;  %v1482_v45 = vadd.f32 %v5894_v1, %v1481_v0  ;;  %v5898_v28 = vpop.eup %5897  ;;  %vm1499_vm4 = vweird.f32 %v5896_v31 }
 0x26b   : >> { %v1471_v55 = vsel %vm1470_vm0, %v5892_v18, %v1467_v32  ;;  %vm1500_vm6 = vmor %vm1498_vm5, %vm1499_vm4 }
 0x26c   : >> { %v1495_v57 = vsub.f32 1.0, %v1494_v34  ;;  %v1476_v44 = vsel %vm1473_vm2, %v1475_v29, %v1471_v55  ;;  %v1486_v63 = vsel %vm1485_vm1, %v5894_v1, %v1482_v45 }
 0x26d   : >> { %v1491_v7 = vsel %vm1488_vm3, %v1490_v60, %v1486_v63  ;;  %v1510_v59 = vmul.f32 %v5898_v28, %v1476_v44 }
 0x26e   : >> { %v1496_v50 = vmul.f32 %v5896_v31, %v1495_v57  ;;  %v1509_v26 = vmul.f32 %v1491_v7, %v7623_v40 }
 0x270   : >> { %v7668_v43 = vadd.f32 %v1510_v59, %v1509_v26  ;;  %v1497_v52 = vadd.f32 %v5896_v31, %v1496_v50 }
 0x272   : >> { %5899 = vtanh.f32 %v7668_v43  ;;  %v1501_v49 = vsel %vm1500_vm6, %v5896_v31, %v1497_v52 }
 0x273   : >> { %v1506_v22 = vsel %vm1503_vm7, %v1505_v42, %v1501_v49 }
 0x278   : >> { %v5900_v61 = vpop.eup %5899 }
 0x279   : >> { %v1513_v56 = vmul.f32 %v5900_v61, %v1506_v22 }
 0x27b   : >> { %4725 = vst [vmem:[%s7628_s25 + $0x8] sm:$0xff] %v1513_v56  ;;  %v1524_v62 = vpack.c.bf16 %v1513_v56, %v1513_v56  ;;  %v9404_v56 = vld [vmem:[#allocation154_spill] sm:$0xff] }
 0x27d   : >> { %1533 = vmatmul.bf16.vlgmr.msrb.gmra.mxu0 %v1524_v62  ;;  %1546 = vmatmul.bf16.vlgmr.msrb.gmra.mxu1 %v1524_v62 }
 0x27e   : >> { %1559 = vmatmul.bf16.vlgmr.msrb.gmra.mxu2 %v1524_v62  ;;  %1572 = vmatmul.bf16.vlgmr.msrb.gmra.mxu3 %v1524_v62 }
 0x2fa   : >> { %v1534_v40 = vpop.f32.mrf.mxu0  ;;  %v1547_v19 = vpop.f32.mrf.mxu1 }
 0x2fb   : >> { %v1577_v46 = vadd.f32 %v1534_v40, %v7606_v53  ;;  %v1578_v54 = vadd.f32 %v1547_v19, %v7608_v38  ;;  %v9405_v40 = vld [vmem:[#allocation155_spill] sm:$0xff] }
 0x2fd   : >> { %v4726_v9 = vmul.f32 -1.442695, %v1577_v46  ;;  %v4727_v21 = vmul.f32 -1.442695, %v1578_v54 }
 0x2ff   : >> { %5901 = vpow2.f32 %v4726_v9 }
 0x300   : >> { %5903 = vpow2.f32 %v4727_v21 }
 0x301   : >> { %v1560_v25 = vpop.f32.mrf.mxu2  ;;  %v1573_v27 = vpop.f32.mrf.mxu3 }
 0x302   : >> { %v1579_v33 = vadd.f32 %v1560_v25, %v9402_v30  ;;  %v1536_v58 = vpop.f32.mrf.mxu0  ;;  %v1549_v35 = vpop.f32.mrf.mxu1  ;;  %v1580_v48 = vadd.f32 %v1573_v27, %v9403_v47  ;;  %v9406_v25 = vld [vmem:[#allocation156_spill] sm:$0xff] }
 0x304   : >> { %v4728_v8 = vmul.f32 -1.442695, %v1579_v33 }
 0x305   : >> { %v5902_v12 = vpop.eup %5901 }
 0x306   : >> { %v5904_v37 = vpop.eup %5903  ;;  %v1590_v16 = vadd.f32 1.0, %v5902_v12  ;;  %5905 = vpow2.f32 %v4728_v8 }
 0x307   : >> { %v1591_v20 = vadd.f32 1.0, %v5904_v37 }
 0x308   : >> { %5907 = vrcp.f32 %v1590_v16  ;;  %v1604_v13 = vand.u32 2147483648, %v1590_v16  ;;  %v1602_v4 = vand.u32 2147483647, %v1590_v16  ;;  %vm1598_vm10 = vweird.f32 %v1590_v16 }
 0x309   : >> { %5909 = vrcp.f32 %v1591_v20  ;;  %v1562_v53 = vpop.f32.mrf.mxu2  ;;  %v1575_v38 = vpop.f32.mrf.mxu3  ;;  %v1619_v51 = vand.u32 2147483648, %v1591_v20  ;;  %v1617_v11 = vand.u32 2147483647, %v1591_v20  ;;  %vm1613_vm11 = vweird.f32 %v1591_v20 }
 0x30a   : >> { %v1605_v23 = vor.u32 1.1754944e-38, %v1604_v13  ;;  %vm1603_vm14 = vcmp.eq.f32.partialorder %v1602_v4, 8.507059e+37 }
 0x30b   : >> { %v1620_v32 = vor.u32 1.1754944e-38, %v1619_v51  ;;  %vm1618_vm15 = vcmp.eq.f32.partialorder %v1617_v11, 8.507059e+37 }
 0x30c   : >> { %v5906_v6 = vpop.eup %5905 }
 0x30d   : >> { %v1592_v39 = vadd.f32 1.0, %v5906_v6 }
 0x30e   : >> { %v5908_v10 = vpop.eup %5907 }
 0x30f   : >> { %v5910_v15 = vpop.eup %5909  ;;  %v1594_v14 = vmul.f32 %v5908_v10, %v1590_v16  ;;  %5911 = vrcp.f32 %v1592_v39  ;;  %vm1599_vm8 = vweird.f32 %v5908_v10  ;;  %v1634_v50 = vand.u32 2147483648, %v1592_v39 }
 0x310   : >> { %v1609_v18 = vmul.f32 %v5910_v15, %v1591_v20  ;;  %5913 = vtanh.f32 %v1580_v48  ;;  %vm1614_vm9 = vweird.f32 %v5910_v15  ;;  %vm1600_vm12 = vmor %vm1598_vm10, %vm1599_vm8  ;;  %vm1628_vm1 = vweird.f32 %v1592_v39 }
 0x311   : >> { %v1595_v3 = vsub.f32 1.0, %v1594_v14  ;;  %vm1615_vm13 = vmor %vm1613_vm11, %vm1614_vm9  ;;  %v1632_v26 = vand.u32 2147483647, %v1592_v39  ;;  %v1635_v41 = vor.u32 1.1754944e-38, %v1634_v50 }
 0x312   : >> { %v1610_v1 = vsub.f32 1.0, %v1609_v18 }
 0x313   : >> { %v1596_v17 = vmul.f32 %v5908_v10, %v1595_v3  ;;  %vm1633_vm3 = vcmp.eq.f32.partialorder %v1632_v26, 8.507059e+37 }
 0x314   : >> { %v1611_v2 = vmul.f32 %v5910_v15, %v1610_v1 }
 0x315   : >> { %v5912_v5 = vpop.eup %5911  ;;  %v1597_v24 = vadd.f32 %v5908_v10, %v1596_v17 }
 0x316   : >> { %v1624_v0 = vmul.f32 %v5912_v5, %v1592_v39  ;;  %v1612_v31 = vadd.f32 %v5910_v15, %v1611_v2  ;;  %v5914_v29 = vpop.eup %5913  ;;  %vm1629_vm0 = vweird.f32 %v5912_v5  ;;  %v9407_v39 = vld [vmem:[#allocation157_spill] sm:$0xff] }
 0x317   : >> { %v1601_v34 = vsel %vm1600_vm12, %v5908_v10, %v1597_v24  ;;  %vm1630_vm2 = vmor %vm1628_vm1, %vm1629_vm0 }
 0x318   : >> { %v1625_v45 = vsub.f32 1.0, %v1624_v0  ;;  %v1606_v60 = vsel %vm1603_vm14, %v1605_v23, %v1601_v34  ;;  %v1616_v55 = vsel %vm1615_vm13, %v5910_v15, %v1612_v31 }
 0x319   : >> { %v1621_v28 = vsel %vm1618_vm15, %v1620_v32, %v1616_v55  ;;  %v1640_v57 = vmul.f32 %v5914_v29, %v1606_v60 }
 0x31a   : >> { %v1626_v44 = vmul.f32 %v5912_v5, %v1625_v45  ;;  %v1639_v63 = vmul.f32 %v1621_v28, %v7668_v43 }
 0x31c   : >> { %v7677_v7 = vadd.f32 %v1640_v57, %v1639_v63  ;;  %v1627_v59 = vadd.f32 %v5912_v5, %v1626_v44 }
 0x31e   : >> { %5915 = vtanh.f32 %v7677_v7  ;;  %v1631_v52 = vsel %vm1630_vm2, %v5912_v5, %v1627_v59 }
 0x31f   : >> { %v1636_v49 = vsel %vm1633_vm3, %v1635_v41, %v1631_v52 }
 0x324   : >> { %v5916_v36 = vpop.eup %5915 }
 0x325   : >> { %v1643_v42 = vmul.f32 %v5916_v36, %v1636_v49  ;;  %v7696_v36 = vld [vmem:[#allocation5] sm:$0xf] (%p821_p12)  ;;  %v7698_v49 = vld [vmem:[#allocation5 + $0xc] sm:$0xf] (%p821_p12) }
 0x326   : > { %9409 = vst [vmem:[#allocation23_spill] sm:$0xff] (%p821_p12), %v7696_v36  ;;  %v7836_v36 = vld [vmem:[#allocation7 + $0x14] sm:$0xf0] (%p821_p12) }
 0x327   : >> { %4730 = vst [vmem:[%s7628_s25 + $0x10] sm:$0xff] %v1643_v42  ;;  %v1654_v61 = vpack.c.bf16 %v1643_v42, %v1643_v42  ;;  %v7700_v42 = vld [vmem:[#allocation5 + $0x8] sm:$0xf] (%p821_p12) }
 0x328   : > { %9410 = vst [vmem:[#allocation24_spill] sm:$0xff] (%p821_p12), %v7698_v49  ;;  %v7822_v49 = vld [vmem:[#allocation7 + $0x4] sm:$0xf] (%p821_p12) }
 0x329   : >> { %1663 = vmatmul.bf16.vlgmr.msra.gmra.mxu0 %v1654_v61  ;;  %1676 = vmatmul.bf16.vlgmr.msra.gmra.mxu1 %v1654_v61  ;;  %9411 = vst [vmem:[#allocation25_spill] sm:$0xff] (%p821_p12), %v7700_v42  ;;  %v7828_v42 = vld [vmem:[#allocation7 + $0x8] sm:$0xf] (%p821_p12) }
 0x32a   : >> { %1689 = vmatmul.bf16.vlgmr.msra.gmra.mxu2 %v1654_v61  ;;  %1702 = vmatmul.bf16.vlgmr.msra.gmra.mxu3 %v1654_v61  ;;  %v7702_v61 = vld [vmem:[#allocation5 + $0x10] sm:$0xf0] (%p821_p12)  ;;  %9472 = vst [vmem:[#allocation86_spill] sm:$0xff] (%p821_p12), %v7822_v49  ;;  %v7844_v49 = vld [vmem:[#allocation7 + $0x28] sm:$0xf] (%p821_p12) }
 0x32b   : > { %9412 = vst [vmem:[#allocation26_spill] sm:$0xff] (%p821_p12), %v7702_v61  ;;  %v7832_v61 = vld [vmem:[#allocation7 + $0xc] sm:$0xf0] (%p821_p12) }
 0x32c   : > { %9475 = vst [vmem:[#allocation89_spill] sm:$0xff] (%p821_p12), %v7828_v42  ;;  %v7850_v42 = vld [vmem:[#allocation7 + $0x38] sm:$0xf0] (%p821_p12) }
 0x32d   : > { %9477 = vst [vmem:[#allocation91_spill] sm:$0xff] (%p821_p12), %v7832_v61  ;;  %v7854_v61 = vld [vmem:[#allocation7 + $0x44] sm:$0xf] (%p821_p12) }
 0x32e   : > { %9479 = vst [vmem:[#allocation93_spill] sm:$0xff] (%p821_p12), %v7836_v36  ;;  %v7858_v36 = vld [vmem:[#allocation7 + $0x4c] sm:$0xf] (%p821_p12) }
 0x32f   : > { %9483 = vst [vmem:[#allocation97_spill] sm:$0xff] (%p821_p12), %v7844_v49  ;;  %v7866_v49 = vld [vmem:[#allocation7 + $0x58] sm:$0xf0] (%p821_p12) }
 0x330   : > { %9486 = vst [vmem:[#allocation100_spill] sm:$0xff] (%p821_p12), %v7850_v42  ;;  %v7872_v42 = vld [vmem:[#allocation7 + $0x60] sm:$0xf] (%p821_p12) }
 0x331   : > { %9488 = vst [vmem:[#allocation102_spill] sm:$0xff] (%p821_p12), %v7854_v61  ;;  %v7876_v61 = vld [vmem:[#allocation7 + $0x68] sm:$0xf] (%p821_p12) }
 0x332   : > { %9490 = vst [vmem:[#allocation104_spill] sm:$0xff] (%p821_p12), %v7858_v36  ;;  %v7880_v36 = vld [vmem:[#allocation7 + $0x6c] sm:$0xf0] (%p821_p12) }
 0x333   : > { %9494 = vst [vmem:[#allocation108_spill] sm:$0xff] (%p821_p12), %v7866_v49  ;;  %v7888_v49 = vld [vmem:[#allocation7 + $0x80] sm:$0xf] (%p821_p12) }
 0x334   : > { %9497 = vst [vmem:[#allocation111_spill] sm:$0xff] (%p821_p12), %v7872_v42  ;;  %v7894_v42 = vld [vmem:[#allocation7 + $0x90] sm:$0xf0] (%p821_p12) }
 0x335   : > { %9499 = vst [vmem:[#allocation113_spill] sm:$0xff] (%p821_p12), %v7876_v61  ;;  %v7898_v61 = vld [vmem:[#allocation7 + $0x98] sm:$0xf0] (%p821_p12) }
 0x336   : > { %9501 = vst [vmem:[#allocation115_spill] sm:$0xff] (%p821_p12), %v7880_v36  ;;  %v7902_v36 = vld [vmem:[#allocation7 + $0xa4] sm:$0xf] (%p821_p12) }
 0x337   : > { %9505 = vst [vmem:[#allocation119_spill] sm:$0xff] (%p821_p12), %v7888_v49  ;;  %v7910_v49 = vld [vmem:[#allocation7 + $0xb0] sm:$0xf0] (%p821_p12) }
 0x338   : > { %9508 = vst [vmem:[#allocation122_spill] sm:$0xff] (%p821_p12), %v7894_v42  ;;  %v7916_v42 = vld [vmem:[#allocation7 + $0xb4] sm:$0xf0] (%p821_p12) }
 0x339   : > { %9510 = vst [vmem:[#allocation124_spill] sm:$0xff] (%p821_p12), %v7898_v61  ;;  %v7920_v61 = vld [vmem:[#allocation7 + $0xc0] sm:$0xf] (%p821_p12) }
 0x33a   : > { %9512 = vst [vmem:[#allocation126_spill] sm:$0xff] (%p821_p12), %v7902_v36  ;;  %v7924_v36 = vld [vmem:[#allocation7 + $0xc8] sm:$0xf] (%p821_p12) }
 0x33b   : > { %9516 = vst [vmem:[#allocation130_spill] sm:$0xff] (%p821_p12), %v7910_v49  ;;  %v7932_v49 = vld [vmem:[#allocation7 + $0xd4] sm:$0xf0] (%p821_p12) }
 0x33c   : > { %9519 = vst [vmem:[#allocation133_spill] sm:$0xff] (%p821_p12), %v7916_v42  ;;  %v7938_v42 = vld [vmem:[#allocation7 + $0xec] sm:$0xf] (%p821_p12) }
 0x33d   : > { %9521 = vst [vmem:[#allocation135_spill] sm:$0xff] (%p821_p12), %v7920_v61  ;;  %v7942_v61 = vld [vmem:[#allocation7 + $0xf0] sm:$0xf0] (%p821_p12) }
 0x33e   : > { %9523 = vst [vmem:[#allocation137_spill] sm:$0xff] (%p821_p12), %v7924_v36  ;;  %v7946_v36 = vld [vmem:[#allocation7 + $0xf8] sm:$0xf0] (%p821_p12) }
 0x33f   : > { %9527 = vst [vmem:[#allocation141_spill] sm:$0xff] (%p821_p12), %v7932_v49  ;;  %v7955_v49 = vmov (%p821_p12), 0.0  }
 0x340   : > { %9530 = vst [vmem:[#allocation144_spill] sm:$0xff] (%p821_p12), %v7938_v42 }
 0x341   : > { %9532 = vst [vmem:[#allocation146_spill] sm:$0xff] (%p821_p12), %v7942_v61 }
 0x342   : > { %9534 = vst [vmem:[#allocation148_spill] sm:$0xff] (%p821_p12), %v7946_v36 }
 0x3a6   : >> { %v1664_v43 = vpop.f32.mrf.mxu0  ;;  %v1677_v22 = vpop.f32.mrf.mxu1 }
 0x3a7   : >> { %v1707_v62 = vadd.f32 %v1664_v43, %v9404_v56  ;;  %v1708_v19 = vadd.f32 %v1677_v22, %v9405_v40  ;;  %v7704_v43 = vld [vmem:[#allocation5 + $0xc] sm:$0xf0] (%p821_p12)  ;;  %v7706_v22 = vld [vmem:[#allocation5 + $0x18] sm:$0xf0] (%p821_p12)  ;;  %v7708_v56 = vld [vmem:[#allocation5 + $0x14] sm:$0xf0] (%p821_p12) }
 0x3a8   : > { %9413 = vst [vmem:[#allocation27_spill] sm:$0xff] (%p821_p12), %v7704_v43  ;;  %v7712_v40 = vld [vmem:[#allocation5 + $0x20] sm:$0xf] (%p821_p12)  ;;  %v7834_v43 = vld [vmem:[#allocation7 + $0x18] sm:$0xf0] (%p821_p12) }
 0x3a9   : >> { %v4731_v46 = vmul.f32 -1.442695, %v1707_v62  ;;  %v4732_v54 = vmul.f32 -1.442695, %v1708_v19  ;;  %9414 = vst [vmem:[#allocation28_spill] sm:$0xff] (%p821_p12), %v7706_v22 }
 0x3aa   : > { %9415 = vst [vmem:[#allocation29_spill] sm:$0xff] (%p821_p12), %v7708_v56  ;;  %v7710_v62 = vld [vmem:[#allocation5 + $0x24] sm:$0xf] (%p821_p12)  ;;  %v7714_v19 = vld [vmem:[#allocation5 + $0x2c] sm:$0xf] (%p821_p12) }
 0x3ab   : >> { %5917 = vpow2.f32 %v4731_v46  ;;  %9416 = vst [vmem:[#allocation30_spill] sm:$0xff] (%p821_p12), %v7710_v62  ;;  %v7716_v46 = vld [vmem:[#allocation5 + $0x28] sm:$0xf] (%p821_p12)  ;;  %v7824_v22 = vld [vmem:[#allocation7] sm:$0xf] (%p821_p12) }
 0x3ac   : >> { %5919 = vpow2.f32 %v4732_v54  ;;  %9417 = vst [vmem:[#allocation31_spill] sm:$0xff] (%p821_p12), %v7712_v40  ;;  %v7718_v54 = vld [vmem:[#allocation5 + $0x30] sm:$0xf0] (%p821_p12)  ;;  %v7826_v56 = vld [vmem:[#allocation7 + $0xc] sm:$0xf] (%p821_p12) }
 0x3ad   : >> { %v1690_v9 = vpop.f32.mrf.mxu2  ;;  %v1703_v21 = vpop.f32.mrf.mxu3  ;;  %9418 = vst [vmem:[#allocation32_spill] sm:$0xff] (%p821_p12), %v7714_v19  ;;  %v7838_v19 = vld [vmem:[#allocation7 + $0x24] sm:$0xf] (%p821_p12) }
 0x3ae   : >> { %v1709_v27 = vadd.f32 %v1690_v9, %v9406_v25  ;;  %v1666_v30 = vpop.f32.mrf.mxu0  ;;  %v1679_v33 = vpop.f32.mrf.mxu1  ;;  %v1710_v10 = vadd.f32 %v1703_v21, %v9407_v39  ;;  %9419 = vst [vmem:[#allocation33_spill] sm:$0xff] (%p821_p12), %v7716_v46  ;;  %v7720_v9 = vld [vmem:[#allocation5 + $0x2c] sm:$0xf0] (%p821_p12)  ;;  %v7722_v21 = vld [vmem:[#allocation5 + $0x38] sm:$0xf0] (%p821_p12) }
 0x3af   : > { %9420 = vst [vmem:[#allocation34_spill] sm:$0xff] (%p821_p12), %v7718_v54  ;;  %v7724_v25 = vld [vmem:[#allocation5 + $0x34] sm:$0xf0] (%p821_p12)  ;;  %v7728_v30 = vld [vmem:[#allocation5 + $0x40] sm:$0xf] (%p821_p12) }
 0x3b0   : >> { %v4733_v58 = vmul.f32 -1.442695, %v1709_v27  ;;  %9421 = vst [vmem:[#allocation35_spill] sm:$0xff] (%p821_p12), %v7720_v9  ;;  %v7726_v27 = vld [vmem:[#allocation5 + $0x44] sm:$0xf] (%p821_p12) }
 0x3b1   : >> { %v5918_v35 = vpop.eup %5917  ;;  %9422 = vst [vmem:[#allocation36_spill] sm:$0xff] (%p821_p12), %v7722_v21  ;;  %v7730_v33 = vld [vmem:[#allocation5 + $0x4c] sm:$0xf] (%p821_p12)  ;;  %v7752_v39 = vld [vmem:[#allocation5 + $0x6c] sm:$0xf0] (%p821_p12) }
 0x3b2   : >> { %v5920_v8 = vpop.eup %5919  ;;  %v1720_v12 = vadd.f32 1.0, %v5918_v35  ;;  %5921 = vpow2.f32 %v4733_v58  ;;  %9423 = vst [vmem:[#allocation37_spill] sm:$0xff] (%p821_p12), %v7724_v25  ;;  %v7732_v58 = vld [vmem:[#allocation5 + $0x48] sm:$0xf] (%p821_p12)  ;;  %v7734_v35 = vld [vmem:[#allocation5 + $0x50] sm:$0xf0] (%p821_p12) }
 0x3b3   : >> { %v1721_v37 = vadd.f32 1.0, %v5920_v8  ;;  %9424 = vst [vmem:[#allocation38_spill] sm:$0xff] (%p821_p12), %v7726_v27  ;;  %v7736_v8 = vld [vmem:[#allocation5 + $0x4c] sm:$0xf0] (%p821_p12)  ;;  %v7840_v21 = vld [vmem:[#allocation7 + $0x20] sm:$0xf] (%p821_p12) }
 0x3b4   : >> { %5923 = vrcp.f32 %v1720_v12  ;;  %v1734_v3 = vand.u32 2147483648, %v1720_v12  ;;  %v1732_v51 = vand.u32 2147483647, %v1720_v12  ;;  %vm1728_vm6 = vweird.f32 %v1720_v12  ;;  %9425 = vst [vmem:[#allocation39_spill] sm:$0xff] (%p821_p12), %v7728_v30  ;;  %v7842_v25 = vld [vmem:[#allocation7 + $0x2c] sm:$0xf] (%p821_p12) }
 0x3b5   : >> { %5925 = vrcp.f32 %v1721_v37  ;;  %v1692_v16 = vpop.f32.mrf.mxu2  ;;  %v1705_v20 = vpop.f32.mrf.mxu3  ;;  %v1749_v1 = vand.u32 2147483648, %v1721_v37  ;;  %v1747_v4 = vand.u32 2147483647, %v1721_v37  ;;  %vm1743_vm7 = vweird.f32 %v1721_v37  ;;  %9426 = vst [vmem:[#allocation40_spill] sm:$0xff] (%p821_p12), %v7730_v33 }
 0x3b6   : >> { %v1735_v24 = vor.u32 1.1754944e-38, %v1734_v3  ;;  %vm1733_vm10 = vcmp.eq.f32.partialorder %v1732_v51, 8.507059e+37  ;;  %9427 = vst [vmem:[#allocation41_spill] sm:$0xff] (%p821_p12), %v7732_v58  ;;  %v7742_v16 = vld [vmem:[#allocation5 + $0x64] sm:$0xf] (%p821_p12) }
 0x3b7   : >> { %v1750_v23 = vor.u32 1.1754944e-38, %v1749_v1  ;;  %vm1748_vm11 = vcmp.eq.f32.partialorder %v1747_v4, 8.507059e+37  ;;  %9428 = vst [vmem:[#allocation42_spill] sm:$0xff] (%p821_p12), %v7734_v35  ;;  %v7744_v20 = vld [vmem:[#allocation5 + $0x60] sm:$0xf] (%p821_p12) }
 0x3b8   : >> { %v5922_v53 = vpop.eup %5921  ;;  %9429 = vst [vmem:[#allocation43_spill] sm:$0xff] (%p821_p12), %v7736_v8  ;;  %v7766_v3 = vld [vmem:[#allocation5 + $0x90] sm:$0xf0] (%p821_p12)  ;;  %v7768_v1 = vld [vmem:[#allocation5 + $0x8c] sm:$0xf0] (%p821_p12) }
 0x3b9   : >> { %v1722_v38 = vadd.f32 1.0, %v5922_v53  ;;  %9432 = vst [vmem:[#allocation46_spill] sm:$0xff] (%p821_p12), %v7742_v16  ;;  %v7746_v53 = vld [vmem:[#allocation5 + $0x6c] sm:$0xf] (%p821_p12)  ;;  %v7772_v51 = vld [vmem:[#allocation5 + $0x94] sm:$0xf0] (%p821_p12) }
 0x3ba   : >> { %v5924_v6 = vpop.eup %5923  ;;  %9433 = vst [vmem:[#allocation47_spill] sm:$0xff] (%p821_p12), %v7744_v20  ;;  %v7776_v4 = vld [vmem:[#allocation5 + $0xa0] sm:$0xf] (%p821_p12) }
 0x3bb   : >> { %v5926_v47 = vpop.eup %5925  ;;  %v1724_v48 = vmul.f32 %v5924_v6, %v1720_v12  ;;  %5927 = vrcp.f32 %v1722_v38  ;;  %vm1729_vm4 = vweird.f32 %v5924_v6  ;;  %v1764_v63 = vand.u32 2147483648, %v1722_v38  ;;  %9434 = vst [vmem:[#allocation48_spill] sm:$0xff] (%p821_p12), %v7746_v53 }
 0x3bc   : >> { %v1739_v15 = vmul.f32 %v5926_v47, %v1721_v37  ;;  %5929 = vtanh.f32 %v1710_v10  ;;  %vm1744_vm5 = vweird.f32 %v5926_v47  ;;  %vm1730_vm8 = vmor %vm1728_vm6, %vm1729_vm4  ;;  %vm1758_vm13 = vweird.f32 %v1722_v38  ;;  %v7740_v37 = vld [vmem:[#allocation5 + $0x54] sm:$0xf0] (%p821_p12)  ;;  %9437 = vst [vmem:[#allocation51_spill] sm:$0xff] (%p821_p12), %v7752_v39 }
 0x3bd   : >> { %v1725_v14 = vsub.f32 1.0, %v1724_v48  ;;  %vm1745_vm9 = vmor %vm1743_vm7, %vm1744_vm5  ;;  %v1762_v59 = vand.u32 2147483647, %v1722_v38  ;;  %v1765_v26 = vor.u32 1.1754944e-38, %v1764_v63  ;;  %9431 = vst [vmem:[#allocation45_spill] sm:$0xff] (%p821_p12), %v7740_v37 }
 0x3be   : >> { %v1740_v18 = vsub.f32 1.0, %v1739_v15  ;;  %v7758_v48 = vld [vmem:[#allocation5 + $0x84] sm:$0xf] (%p821_p12)  ;;  %v7760_v15 = vld [vmem:[#allocation5 + $0x80] sm:$0xf] (%p821_p12)  ;;  %9444 = vst [vmem:[#allocation58_spill] sm:$0xff] (%p821_p12), %v7766_v3 }
 0x3bf   : >> { %v1726_v13 = vmul.f32 %v5924_v6, %v1725_v14  ;;  %vm1763_vm15 = vcmp.eq.f32.partialorder %v1762_v59, 8.507059e+37  ;;  %9440 = vst [vmem:[#allocation54_spill] sm:$0xff] (%p821_p12), %v7758_v48  ;;  %v7762_v14 = vld [vmem:[#allocation5 + $0x8c] sm:$0xf] (%p821_p12)  ;;  %v7812_v59 = vld [vmem:[#allocation5 + $0xe8] sm:$0xf] (%p821_p12) }
 0x3c0   : >> { %v1741_v17 = vmul.f32 %v5926_v47, %v1740_v18  ;;  %9441 = vst [vmem:[#allocation55_spill] sm:$0xff] (%p821_p12), %v7760_v15  ;;  %v7764_v18 = vld [vmem:[#allocation5 + $0x88] sm:$0xf] (%p821_p12)  ;;  %v7810_v63 = vld [vmem:[#allocation5 + $0xec] sm:$0xf] (%p821_p12) }
 0x3c1   : >> { %v5928_v2 = vpop.eup %5927  ;;  %v1727_v11 = vadd.f32 %v5924_v6, %v1726_v13  ;;  %9442 = vst [vmem:[#allocation56_spill] sm:$0xff] (%p821_p12), %v7762_v14  ;;  %v7770_v13 = vld [vmem:[#allocation5 + $0x98] sm:$0xf0] (%p821_p12) }
 0x3c2   : >> { %v1754_v5 = vmul.f32 %v5928_v2, %v1722_v38  ;;  %v1742_v0 = vadd.f32 %v5926_v47, %v1741_v17  ;;  %v5930_v32 = vpop.eup %5929  ;;  %vm1759_vm12 = vweird.f32 %v5928_v2  ;;  %v7748_v38 = vld [vmem:[#allocation5 + $0x68] sm:$0xf] (%p821_p12)  ;;  %9443 = vst [vmem:[#allocation57_spill] sm:$0xff] (%p821_p12), %v7764_v18  ;;  %v7774_v17 = vld [vmem:[#allocation5 + $0xa4] sm:$0xf] (%p821_p12) }
 0x3c3   : >> { %v1731_v31 = vsel %vm1730_vm8, %v5924_v6, %v1727_v11  ;;  %vm1760_vm14 = vmor %vm1758_vm13, %vm1759_vm12  ;;  %9435 = vst [vmem:[#allocation49_spill] sm:$0xff] (%p821_p12), %v7748_v38  ;;  %v7750_v6 = vld [vmem:[#allocation5 + $0x70] sm:$0xf0] (%p821_p12)  ;;  %v7780_v11 = vld [vmem:[#allocation5 + $0xa8] sm:$0xf] (%p821_p12) }
 0x3c4   : >> { %v1755_v34 = vsub.f32 1.0, %v1754_v5  ;;  %v1736_v29 = vsel %vm1733_vm10, %v1735_v24, %v1731_v31  ;;  %v1746_v45 = vsel %vm1745_vm9, %v5926_v47, %v1742_v0  ;;  %9436 = vst [vmem:[#allocation50_spill] sm:$0xff] (%p821_p12), %v7750_v6  ;;  %v7756_v47 = vld [vmem:[#allocation5 + $0x74] sm:$0xf0] (%p821_p12)  ;;  %v7782_v5 = vld [vmem:[#allocation5 + $0xb0] sm:$0xf0] (%p821_p12) }
 0x3c5   : >> { %v1751_v60 = vsel %vm1748_vm11, %v1750_v23, %v1746_v45  ;;  %v1770_v55 = vmul.f32 %v5930_v32, %v1736_v29  ;;  %9439 = vst [vmem:[#allocation53_spill] sm:$0xff] (%p821_p12), %v7756_v47  ;;  %v7784_v24 = vld [vmem:[#allocation5 + $0xac] sm:$0xf0] (%p821_p12)  ;;  %v7786_v0 = vld [vmem:[#allocation5 + $0xb8] sm:$0xf0] (%p821_p12) }
 0x3c6   : >> { %v1756_v28 = vmul.f32 %v5928_v2, %v1755_v34  ;;  %v1769_v57 = vmul.f32 %v1751_v60, %v7677_v7  ;;  %v7694_v7 = vld [vmem:[#allocation5 + $0x4] sm:$0xf] (%p821_p12)  ;;  %9445 = vst [vmem:[#allocation59_spill] sm:$0xff] (%p821_p12), %v7768_v1  ;;  %v7788_v23 = vld [vmem:[#allocation5 + $0xb4] sm:$0xf0] (%p821_p12) }
 0x3c7   : > { %9408 = vst [vmem:[#allocation22_spill] sm:$0xff] (%p821_p12), %v7694_v7  ;;  %v7790_v31 = vld [vmem:[#allocation5 + $0xc4] sm:$0xf] (%p821_p12)  ;;  %v7792_v32 = vld [vmem:[#allocation5 + $0xc0] sm:$0xf] (%p821_p12) }
 0x3c8   : >> { %v1771_v10 = vadd.f32 %v1770_v55, %v1769_v57   ;;  %v1757_v44 = vadd.f32 %v5928_v2, %v1756_v28  ;;  %9446 = vst [vmem:[#allocation60_spill] sm:$0xff] (%p821_p12), %v7770_v13  ;;  %v7794_v34 = vld [vmem:[#allocation5 + $0xcc] sm:$0xf] (%p821_p12)  ;;  %v7796_v29 = vld [vmem:[#allocation5 + $0xc8] sm:$0xf] (%p821_p12) }
 0x3c9   : > { %9447 = vst [vmem:[#allocation61_spill] sm:$0xff] (%p821_p12), %v7772_v51  ;;  %v7798_v45 = vld [vmem:[#allocation5 + $0xd0] sm:$0xf0] (%p821_p12)  ;;  %v7800_v60 = vld [vmem:[#allocation5 + $0xcc] sm:$0xf0] (%p821_p12) }
 0x3ca   : >> { %5931 = vtanh.f32 %v1771_v10  ;;  %v1761_v50 = vsel %vm1760_vm14, %v5928_v2, %v1757_v44  ;;  %v7754_v10 = vld [vmem:[#allocation5 + $0x78] sm:$0xf0] (%p821_p12)  ;;  %9448 = vst [vmem:[#allocation62_spill] sm:$0xff] (%p821_p12), %v7774_v17  ;;  %v7778_v2 = vld [vmem:[#allocation5 + $0xac] sm:$0xf] (%p821_p12) }
 0x3cb   : >> { %v1766_v41 = vsel %vm1763_vm15, %v1765_v26, %v1761_v50  ;;  %9438 = vst [vmem:[#allocation52_spill] sm:$0xff] (%p821_p12), %v7754_v10  ;;  %v7802_v55 = vld [vmem:[#allocation5 + $0xd8] sm:$0xf0] (%p821_p12)  ;;  %v7804_v28 = vld [vmem:[#allocation5 + $0xd4] sm:$0xf0] (%p821_p12) }
 0x3cc   : > { %9449 = vst [vmem:[#allocation63_spill] sm:$0xff] (%p821_p12), %v7776_v4  ;;  %v7806_v57 = vld [vmem:[#allocation5 + $0xe4] sm:$0xf] (%p821_p12)  ;;  %v7808_v44 = vld [vmem:[#allocation5 + $0xe0] sm:$0xf] (%p821_p12) }
 0x3cd   : > { %9450 = vst [vmem:[#allocation64_spill] sm:$0xff] (%p821_p12), %v7778_v2  ;;  %v7814_v50 = vld [vmem:[#allocation5 + $0xf0] sm:$0xf0] (%p821_p12)  ;;  %v7816_v26 = vld [vmem:[#allocation5 + $0xec] sm:$0xf0] (%p821_p12) }
 0x3ce   : > { %9451 = vst [vmem:[#allocation65_spill] sm:$0xff] (%p821_p12), %v7780_v11  ;;  %v7830_v7 = vld [vmem:[#allocation7 + $0x10] sm:$0xf0] (%p821_p12) }
 0x3cf   : > { %823 = sbr.rel (!%p821_p12) target bundleno = 225 (0xe1), region = 238  ;;  %9452 = vst [vmem:[#allocation66_spill] sm:$0xff] (%p821_p12), %v7782_v5 }
 0x3d0   : >> { %v5932_v52 = vpop.eup %5931  ;;  %9453 = vst [vmem:[#allocation67_spill] sm:$0xff] (%p821_p12), %v7784_v24 }
 0x3d1   : >> { %v1773_v12 = vmul.f32 %v5932_v52, %v1766_v41   ;;  %9454 = vst [vmem:[#allocation68_spill] sm:$0xff] (%p821_p12), %v7786_v0  ;;  %v7818_v52 = vld [vmem:[#allocation5 + $0xf8] sm:$0xf0] (%p821_p12)  ;;  %v7820_v41 = vld [vmem:[#allocation5 + $0xf4] sm:$0xf0] (%p821_p12) }
 0x3d2   : > { %9455 = vst [vmem:[#allocation69_spill] sm:$0xff] (%p821_p12), %v7788_v23 }
 0x3d3   : >> { %4735 = vst [vmem:[%s7628_s25 + $0x18] sm:$0xff] %v1773_v12  ;;  %v7738_v12 = vld [vmem:[#allocation5 + $0x58] sm:$0xf0] (%p821_p12) }
 0x3d4   : > { %9430 = vst [vmem:[#allocation44_spill] sm:$0xff] %v7738_v12 }
 0x3d5   : > { %9456 = vst [vmem:[#allocation70_spill] sm:$0xff] %v7790_v31 }
 0x3d6   : > { %9457 = vst [vmem:[#allocation71_spill] sm:$0xff] %v7792_v32 }
 0x3d7   : > { %9458 = vst [vmem:[#allocation72_spill] sm:$0xff] %v7794_v34 }
 0x3d8   : > { %9459 = vst [vmem:[#allocation73_spill] sm:$0xff] %v7796_v29 }
 0x3d9   : > { %9460 = vst [vmem:[#allocation74_spill] sm:$0xff] %v7798_v45 }
 0x3da   : > { %9461 = vst [vmem:[#allocation75_spill] sm:$0xff] %v7800_v60 }
 0x3db   : > { %9462 = vst [vmem:[#allocation76_spill] sm:$0xff] %v7802_v55 }
 0x3dc   : > { %9463 = vst [vmem:[#allocation77_spill] sm:$0xff] %v7804_v28 }
 0x3dd   : > { %9464 = vst [vmem:[#allocation78_spill] sm:$0xff] %v7806_v57 }
 0x3de   : > { %9465 = vst [vmem:[#allocation79_spill] sm:$0xff] %v7808_v44 }
 0x3df   : > { %9466 = vst [vmem:[#allocation80_spill] sm:$0xff] %v7810_v63 }
 0x3e0   : > { %9467 = vst [vmem:[#allocation81_spill] sm:$0xff] %v7812_v59 }
 0x3e1   : > { %9468 = vst [vmem:[#allocation82_spill] sm:$0xff] %v7814_v50 }
 0x3e2   : > { %9469 = vst [vmem:[#allocation83_spill] sm:$0xff] %v7816_v26 }
 0x3e3   : > { %9470 = vst [vmem:[#allocation84_spill] sm:$0xff] %v7818_v52 }
 0x3e4   : > { %9471 = vst [vmem:[#allocation85_spill] sm:$0xff] %v7820_v41 }
 0x3e5   : > { %9473 = vst [vmem:[#allocation87_spill] sm:$0xff] %v7824_v22  ;;  %v7846_v22 = vld [vmem:[#allocation7 + $0x30] sm:$0xf0] }
 0x3e6   : > { %9474 = vst [vmem:[#allocation88_spill] sm:$0xff] %v7826_v56  ;;  %v7848_v56 = vld [vmem:[#allocation7 + $0x2c] sm:$0xf0] }
 0x3e7   : > { %9476 = vst [vmem:[#allocation90_spill] sm:$0xff] %v7830_v7  ;;  %v7852_v7 = vld [vmem:[#allocation7 + $0x34] sm:$0xf0] }
 0x3e8   : > { %9478 = vst [vmem:[#allocation92_spill] sm:$0xff] %v7834_v43  ;;  %v7856_v43 = vld [vmem:[#allocation7 + $0x40] sm:$0xf] }
 0x3e9   : > { %9480 = vst [vmem:[#allocation94_spill] sm:$0xff] %v7838_v19  ;;  %v7860_v19 = vld [vmem:[#allocation7 + $0x48] sm:$0xf] }
 0x3ea   : > { %9481 = vst [vmem:[#allocation95_spill] sm:$0xff] %v7840_v21  ;;  %v7862_v21 = vld [vmem:[#allocation7 + $0x50] sm:$0xf0] }
 0x3eb   : > { %9482 = vst [vmem:[#allocation96_spill] sm:$0xff] %v7842_v25  ;;  %v7864_v25 = vld [vmem:[#allocation7 + $0x4c] sm:$0xf0] }
 0x3ec   : > { %9484 = vst [vmem:[#allocation98_spill] sm:$0xff] %v7846_v22  ;;  %v7868_v22 = vld [vmem:[#allocation7 + $0x54] sm:$0xf0] }
 0x3ed   : > { %9485 = vst [vmem:[#allocation99_spill] sm:$0xff] %v7848_v56  ;;  %v7870_v56 = vld [vmem:[#allocation7 + $0x64] sm:$0xf] }
 0x3ee   : > { %9487 = vst [vmem:[#allocation101_spill] sm:$0xff] %v7852_v7  ;;  %v7874_v7 = vld [vmem:[#allocation7 + $0x6c] sm:$0xf] }
 0x3ef   : > { %9489 = vst [vmem:[#allocation103_spill] sm:$0xff] %v7856_v43  ;;  %v7878_v43 = vld [vmem:[#allocation7 + $0x70] sm:$0xf0] }
 0x3f0   : > { %9491 = vst [vmem:[#allocation105_spill] sm:$0xff] %v7860_v19  ;;  %v7882_v19 = vld [vmem:[#allocation7 + $0x78] sm:$0xf0] }
 0x3f1   : > { %9492 = vst [vmem:[#allocation106_spill] sm:$0xff] %v7862_v21  ;;  %v7884_v21 = vld [vmem:[#allocation7 + $0x74] sm:$0xf0] }
 0x3f2   : > { %9493 = vst [vmem:[#allocation107_spill] sm:$0xff] %v7864_v25  ;;  %v7886_v25 = vld [vmem:[#allocation7 + $0x84] sm:$0xf] }
 0x3f3   : > { %9495 = vst [vmem:[#allocation109_spill] sm:$0xff] %v7868_v22  ;;  %v7890_v22 = vld [vmem:[#allocation7 + $0x8c] sm:$0xf] }
 0x3f4   : > { %9496 = vst [vmem:[#allocation110_spill] sm:$0xff] %v7870_v56  ;;  %v7892_v56 = vld [vmem:[#allocation7 + $0x88] sm:$0xf] }
 0x3f5   : > { %9498 = vst [vmem:[#allocation112_spill] sm:$0xff] %v7874_v7  ;;  %v7896_v7 = vld [vmem:[#allocation7 + $0x8c] sm:$0xf0] }
 0x3f6   : > { %9500 = vst [vmem:[#allocation114_spill] sm:$0xff] %v7878_v43  ;;  %v7900_v43 = vld [vmem:[#allocation7 + $0x94] sm:$0xf0] }
 0x3f7   : > { %9502 = vst [vmem:[#allocation116_spill] sm:$0xff] %v7882_v19  ;;  %v7904_v19 = vld [vmem:[#allocation7 + $0xa0] sm:$0xf] }
 0x3f8   : > { %9503 = vst [vmem:[#allocation117_spill] sm:$0xff] %v7884_v21  ;;  %v7906_v21 = vld [vmem:[#allocation7 + $0xac] sm:$0xf] }
 0x3f9   : > { %9504 = vst [vmem:[#allocation118_spill] sm:$0xff] %v7886_v25  ;;  %v7908_v25 = vld [vmem:[#allocation7 + $0xa8] sm:$0xf] }
 0x3fa   : > { %9506 = vst [vmem:[#allocation120_spill] sm:$0xff] %v7890_v22  ;;  %v7912_v22 = vld [vmem:[#allocation7 + $0xac] sm:$0xf0] }
 0x3fb   : > { %9507 = vst [vmem:[#allocation121_spill] sm:$0xff] %v7892_v56  ;;  %v7914_v56 = vld [vmem:[#allocation7 + $0xb8] sm:$0xf0] }
 0x3fc   : > { %9509 = vst [vmem:[#allocation123_spill] sm:$0xff] %v7896_v7  ;;  %v7918_v7 = vld [vmem:[#allocation7 + $0xc4] sm:$0xf] }
 0x3fd   : > { %9511 = vst [vmem:[#allocation125_spill] sm:$0xff] %v7900_v43  ;;  %v7922_v43 = vld [vmem:[#allocation7 + $0xcc] sm:$0xf] }
 0x3fe   : > { %9513 = vst [vmem:[#allocation127_spill] sm:$0xff] %v7904_v19  ;;  %v7926_v19 = vld [vmem:[#allocation7 + $0xd0] sm:$0xf0] }
 0x3ff   : > { %9514 = vst [vmem:[#allocation128_spill] sm:$0xff] %v7906_v21  ;;  %v7928_v21 = vld [vmem:[#allocation7 + $0xcc] sm:$0xf0] }
 0x400   : > { %9515 = vst [vmem:[#allocation129_spill] sm:$0xff] %v7908_v25  ;;  %v7930_v25 = vld [vmem:[#allocation7 + $0xd8] sm:$0xf0] }
 0x401   : > { %9517 = vst [vmem:[#allocation131_spill] sm:$0xff] %v7912_v22  ;;  %v7934_v22 = vld [vmem:[#allocation7 + $0xe4] sm:$0xf] }
 0x402   : > { %9518 = vst [vmem:[#allocation132_spill] sm:$0xff] %v7914_v56  ;;  %v7936_v56 = vld [vmem:[#allocation7 + $0xe0] sm:$0xf] }
 0x403   : > { %9520 = vst [vmem:[#allocation134_spill] sm:$0xff] %v7918_v7  ;;  %v7940_v7 = vld [vmem:[#allocation7 + $0xe8] sm:$0xf] }
 0x404   : > { %9522 = vst [vmem:[#allocation136_spill] sm:$0xff] %v7922_v43  ;;  %v7944_v43 = vld [vmem:[#allocation7 + $0xec] sm:$0xf0] }
 0x405   : > { %9524 = vst [vmem:[#allocation138_spill] sm:$0xff] %v7926_v19  ;;  %v7948_v19 = vld [vmem:[#allocation7 + $0xf4] sm:$0xf0] }
 0x406   : > { %9525 = vst [vmem:[#allocation139_spill] sm:$0xff] %v7928_v21  ;;  %v7957_v21 = vmov 0.0  }
 0x407   : > { %9526 = vst [vmem:[#allocation140_spill] sm:$0xff] %v7930_v25  ;;  %v7953_v25 = vld [vmem:[%s9086_s6] sm:$0xf] }
 0x408   : > { %9528 = vst [vmem:[#allocation142_spill] sm:$0xff] %v7934_v22 }
 0x409   : > { %9529 = vst [vmem:[#allocation143_spill] sm:$0xff] %v7936_v56 }
 0x40a   : > { %9531 = vst [vmem:[#allocation145_spill] sm:$0xff] %v7940_v7 }
 0x40b   : > { %9533 = vst [vmem:[#allocation147_spill] sm:$0xff] %v7944_v43 }
 0x40c   : > { %9535 = vst [vmem:[#allocation149_spill] sm:$0xff] %v7948_v19 }
 0x40d   : > { %9536 = vst [vmem:[#allocation150_spill] sm:$0xff] %v7953_v25 }
 0x40e LB: >> { %9537 = vst [vmem:[#allocation158_spill] sm:$0xff] %v6364_v49  ;;  %v9539_v44 = vld [vmem:[#allocation79_spill] sm:$0xff]  ;;  %v9541_v50 = vld [vmem:[#allocation82_spill] sm:$0xff]  ;;  %v9543_v59 = vld [vmem:[#allocation81_spill] sm:$0xff]  ;;  %s4736_s0 = sshll.u32 %s6372_s19, 5  ;;  %s1847_s19 = sadd.s32 1, %s6372_s19   ;;  %s6372_s19 = sphi %s7959_s19, %s1847_s19   ;;  %v6368_v21 = vphi %v7957_v21, %v2794_v21   ;;  %v6364_v49 = vphi %v7955_v49, %v2792_v49  }
 0x40f   : >> { %9538 = vst [vmem:[#allocation159_spill] sm:$0xff] %v6368_v21  ;;  %v9540_v26 = vld [vmem:[#allocation83_spill] sm:$0xff]  ;;  %v9542_v57 = vld [vmem:[#allocation78_spill] sm:$0xff]  ;;  %v9544_v41 = vld [vmem:[#allocation85_spill] sm:$0xff]  ;;  %s8031_s11 = scalar_lea.vmem [#allocation3], %s4736_s0  ;;  %p1844_p13 = scmp.ge.s32.totalorder %s1847_s19, 2  }
 0x410   : >> { %v4852_v25 = vor.u32 %v9540_v26, %v9539_v44  ;;  %v4856_v42 = vor.u32 %v9542_v57, %v9541_v50  ;;  %v4860_v36 = vor.u32 %v9544_v41, %v9543_v59  ;;  %v9545_v52 = vld [vmem:[#allocation84_spill] sm:$0xff]  ;;  %v9547_v32 = vld [vmem:[#allocation71_spill] sm:$0xff]  ;;  %v9549_v45 = vld [vmem:[#allocation74_spill] sm:$0xff]  ;;  %s8628_s30 = smov (%p1844_p13), 0  }
 0x411   : >> { %v9546_v63 = vld [vmem:[#allocation80_spill] sm:$0xff]  ;;  %v9548_v60 = vld [vmem:[#allocation75_spill] sm:$0xff]  ;;  %v9550_v31 = vld [vmem:[#allocation70_spill] sm:$0xff] }
 0x412   : >> { %v4864_v19 = vor.u32 %v9546_v63, %v9545_v52  ;;  %2027 = vmatpush.bf16.msra.mxu0 %v4852_v25  ;;  %2046 = vmatpush.bf16.msra.mxu1 %v4856_v42  ;;  %v4836_v49 = vor.u32 %v9548_v60, %v9547_v32  ;;  %v4840_v21 = vor.u32 %v9550_v31, %v9549_v45  ;;  %v9551_v29 = vld [vmem:[#allocation73_spill] sm:$0xff]  ;;  %v9553_v55 = vld [vmem:[#allocation76_spill] sm:$0xff]  ;;  %v9555_v4 = vld [vmem:[#allocation63_spill] sm:$0xff] }
 0x413   : >> { %2065 = vmatpush.bf16.msra.mxu2 %v4860_v36  ;;  %v9552_v28 = vld [vmem:[#allocation77_spill] sm:$0xff]  ;;  %v9554_v34 = vld [vmem:[#allocation72_spill] sm:$0xff]  ;;  %v9556_v24 = vld [vmem:[#allocation67_spill] sm:$0xff] }
 0x414   : >> { %2084 = vmatpush.bf16.msra.mxu3 %v4864_v19  ;;  %v4844_v26 = vor.u32 %v9552_v28, %v9551_v29  ;;  %v4848_v44 = vor.u32 %v9554_v34, %v9553_v55  ;;  %v4820_v25 = vor.u32 %v9556_v24, %v9555_v4  ;;  %v9557_v5 = vld [vmem:[#allocation66_spill] sm:$0xff]  ;;  %v9559_v11 = vld [vmem:[#allocation65_spill] sm:$0xff]  ;;  %v9561_v0 = vld [vmem:[#allocation68_spill] sm:$0xff] }
 0x415   : >> { %v9558_v17 = vld [vmem:[#allocation62_spill] sm:$0xff]  ;;  %v9560_v23 = vld [vmem:[#allocation69_spill] sm:$0xff]  ;;  %v9562_v2 = vld [vmem:[#allocation64_spill] sm:$0xff] }
 0x416   : >> { %2028 = vmatpush.bf16.msra.mxu0 %v4836_v49  ;;  %2047 = vmatpush.bf16.msra.mxu1 %v4840_v21  ;;  %v4824_v42 = vor.u32 %v9558_v17, %v9557_v5  ;;  %v4828_v36 = vor.u32 %v9560_v23, %v9559_v11  ;;  %v4832_v19 = vor.u32 %v9562_v2, %v9561_v0  ;;  %v9563_v15 = vld [vmem:[#allocation55_spill] sm:$0xff]  ;;  %v9565_v3 = vld [vmem:[#allocation58_spill] sm:$0xff]  ;;  %v9567_v18 = vld [vmem:[#allocation57_spill] sm:$0xff] }
 0x417   : >> { %2066 = vmatpush.bf16.msra.mxu2 %v4844_v26  ;;  %v9564_v1 = vld [vmem:[#allocation59_spill] sm:$0xff]  ;;  %v9566_v48 = vld [vmem:[#allocation54_spill] sm:$0xff]  ;;  %v9568_v51 = vld [vmem:[#allocation61_spill] sm:$0xff] }
 0x418   : >> { %2085 = vmatpush.bf16.msra.mxu3 %v4848_v44  ;;  %v4804_v49 = vor.u32 %v9564_v1, %v9563_v15  ;;  %v4808_v21 = vor.u32 %v9566_v48, %v9565_v3  ;;  %v4812_v26 = vor.u32 %v9568_v51, %v9567_v18  ;;  %v9569_v13 = vld [vmem:[#allocation60_spill] sm:$0xff]  ;;  %v9571_v20 = vld [vmem:[#allocation47_spill] sm:$0xff]  ;;  %v9573_v6 = vld [vmem:[#allocation50_spill] sm:$0xff] }
 0x419   : >> { %v9570_v14 = vld [vmem:[#allocation56_spill] sm:$0xff]  ;;  %v9572_v39 = vld [vmem:[#allocation51_spill] sm:$0xff]  ;;  %v9574_v16 = vld [vmem:[#allocation46_spill] sm:$0xff] }
 0x41a   : >> { %2029 = vmatpush.bf16.msra.mxu0 %v4820_v25  ;;  %2048 = vmatpush.bf16.msra.mxu1 %v4824_v42  ;;  %v4816_v44 = vor.u32 %v9570_v14, %v9569_v13  ;;  %v4788_v25 = vor.u32 %v9572_v39, %v9571_v20  ;;  %v4792_v42 = vor.u32 %v9574_v16, %v9573_v6  ;;  %v9575_v38 = vld [vmem:[#allocation49_spill] sm:$0xff]  ;;  %v9577_v10 = vld [vmem:[#allocation52_spill] sm:$0xff]  ;;  %v9579_v30 = vld [vmem:[#allocation39_spill] sm:$0xff] }
 0x41b   : >> { %2067 = vmatpush.bf16.msra.mxu2 %v4828_v36  ;;  %v9576_v47 = vld [vmem:[#allocation53_spill] sm:$0xff]  ;;  %v9578_v53 = vld [vmem:[#allocation48_spill] sm:$0xff]  ;;  %v9580_v8 = vld [vmem:[#allocation43_spill] sm:$0xff] }
 0x41c   : >> { %2086 = vmatpush.bf16.msra.mxu3 %v4832_v19  ;;  %v4796_v36 = vor.u32 %v9576_v47, %v9575_v38  ;;  %v4800_v19 = vor.u32 %v9578_v53, %v9577_v10  ;;  %v9581_v35 = vld [vmem:[#allocation42_spill] sm:$0xff]  ;;  %v9583_v58 = vld [vmem:[#allocation41_spill] sm:$0xff]  ;;  %v9585_v12 = vld [vmem:[#allocation44_spill] sm:$0xff] }
 0x41d   : >> { %v9582_v27 = vld [vmem:[#allocation38_spill] sm:$0xff]  ;;  %v9584_v37 = vld [vmem:[#allocation45_spill] sm:$0xff]  ;;  %v9586_v33 = vld [vmem:[#allocation40_spill] sm:$0xff] }
 0x41e   : >> { %2030 = vmatpush.bf16.msra.mxu0 %v4804_v49  ;;  %2049 = vmatpush.bf16.msra.mxu1 %v4808_v21  ;;  %v4772_v49 = vor.u32 %v9580_v8, %v9579_v30  ;;  %v4776_v21 = vor.u32 %v9582_v27, %v9581_v35  ;;  %v9587_v40 = vld [vmem:[#allocation31_spill] sm:$0xff]  ;;  %v9589_v54 = vld [vmem:[#allocation34_spill] sm:$0xff]  ;;  %v9591_v46 = vld [vmem:[#allocation33_spill] sm:$0xff] }
 0x41f   : >> { %2068 = vmatpush.bf16.msra.mxu2 %v4812_v26  ;;  %v4780_v26 = vor.u32 %v9584_v37, %v9583_v58  ;;  %v9588_v9 = vld [vmem:[#allocation35_spill] sm:$0xff]  ;;  %v9590_v62 = vld [vmem:[#allocation30_spill] sm:$0xff]  ;;  %v9593_v0 = vld [vmem:[#allocation36_spill] sm:$0xff] }
 0x420   : >> { %2087 = vmatpush.bf16.msra.mxu3 %v4816_v44  ;;  %v4784_v44 = vor.u32 %v9586_v33, %v9585_v12  ;;  %v9594_v1 = vld [vmem:[#allocation32_spill] sm:$0xff]  ;;  %v9595_v3 = vld [vmem:[#allocation23_spill] sm:$0xff]  ;;  %v9598_v5 = vld [vmem:[#allocation22_spill] sm:$0xff] }
 0x421   : >> { %v4768_v2 = vor.u32 %v9594_v1, %v9593_v0  ;;  %v9596_v4 = vld [vmem:[#allocation27_spill] sm:$0xff]  ;;  %v9600_v8 = vld [vmem:[#allocation29_spill] sm:$0xff]  ;;  %v9601_v1 = vld [vmem:[#allocation28_spill] sm:$0xff] }
 0x422   : >> { %2031 = vmatpush.bf16.msra.mxu0 %v4788_v25  ;;  %2050 = vmatpush.bf16.msra.mxu1 %v4792_v42  ;;  %v4756_v25 = vor.u32 %v9588_v9, %v9587_v40  ;;  %v4760_v42 = vor.u32 %v9590_v62, %v9589_v54  ;;  %v9602_v0 = vld [vmem:[#allocation24_spill] sm:$0xff]  ;;  %v9603_v56 = vld [vmem:[#allocation143_spill] sm:$0xff]  ;;  %v9605_v61 = vld [vmem:[#allocation146_spill] sm:$0xff] }
 0x423   : >> { %2069 = vmatpush.bf16.msra.mxu2 %v4796_v36  ;;  %v9592_v36 = vld [vmem:[#allocation37_spill] sm:$0xff]  ;;  %v9604_v43 = vld [vmem:[#allocation147_spill] sm:$0xff]  ;;  %v9606_v22 = vld [vmem:[#allocation142_spill] sm:$0xff] }
 0x424   : >> { %2088 = vmatpush.bf16.msra.mxu3 %v4800_v19  ;;  %v4764_v19 = vor.u32 %v9592_v36, %v9591_v46  ;;  %v9599_v36 = vld [vmem:[#allocation25_spill] sm:$0xff]  ;;  %v9626_v10 = vld [vmem:[#allocation128_spill] sm:$0xff]  ;;  %v9630_v12 = vld [vmem:[#allocation118_spill] sm:$0xff] }
 0x425   : >> { %v4748_v9 = vor.u32 %v9600_v8, %v9599_v36  ;;  %v9607_v7 = vld [vmem:[#allocation145_spill] sm:$0xff]  ;;  %v9609_v8 = vld [vmem:[#allocation148_spill] sm:$0xff]  ;;  %v9611_v36 = vld [vmem:[#allocation135_spill] sm:$0xff] }
 0x426   : >> { %2032 = vmatpush.bf16.msra.mxu0 %v4772_v49  ;;  %2051 = vmatpush.bf16.msra.mxu1 %v4776_v21  ;;  %v4740_v49 = vor.u32 %v9596_v4, %v9595_v3  ;;  %v9597_v21 = vld [vmem:[#allocation26_spill] sm:$0xff]  ;;  %v8041_v3 = vor.u32 %v9604_v43, %v9603_v56  ;;  %v8045_v4 = vor.u32 %v9606_v22, %v9605_v61  ;;  %v1854_v14 = vld [vmem:[%s8031_s11 + $0x10] sm:$0xff]  ;;  %v1855_v15 = vld [vmem:[%s8031_s11 + $0x18] sm:$0xff] }
 0x427   : >> { %2070 = vmatpush.bf16.msra.mxu2 %v4780_v26  ;;  %v4744_v6 = vor.u32 %v9598_v5, %v9597_v21  ;;  %v1852_v26 = vld [vmem:[%s8031_s11] sm:$0xff]  ;;  %v9634_v16 = vld [vmem:[#allocation120_spill] sm:$0xff]  ;;  %v1857_v22 = vpack.c.bf16 %v1855_v15, %v1854_v14 }
 0x428   : >> { %2089 = vmatpush.bf16.msra.mxu3 %v4784_v44  ;;  %v1853_v44 = vld [vmem:[%s8031_s11 + $0x8] sm:$0xff]  ;;  %v9638_v18 = vld [vmem:[#allocation110_spill] sm:$0xff]  ;;  %v9642_v23 = vld [vmem:[#allocation112_spill] sm:$0xff] }
 0x429   : >> { %v1856_v5 = vpack.c.bf16 %v1853_v44, %v1852_v26  ;;  %v9615_v26 = vld [vmem:[#allocation137_spill] sm:$0xff]  ;;  %v9645_v15 = vld [vmem:[#allocation106_spill] sm:$0xff]  ;;  %v9650_v27 = vld [vmem:[#allocation104_spill] sm:$0xff] }
 0x42a   : >> { %2033 = vmatpush.bf16.msra.mxu0 %v4756_v25  ;;  %2052 = vmatpush.bf16.msra.mxu1 %v4760_v42  ;;  %v4752_v25 = vor.u32 %v9602_v0, %v9601_v1  ;;  %v9612_v1 = vld [vmem:[#allocation139_spill] sm:$0xff]  ;;  %v9616_v44 = vld [vmem:[#allocation141_spill] sm:$0xff]  ;;  %v9646_v14 = vld [vmem:[#allocation102_spill] sm:$0xff] }
 0x42b   : >> { %2071 = vmatpush.bf16.msra.mxu2 %v4764_v19  ;;  %v9610_v19 = vld [vmem:[#allocation144_spill] sm:$0xff]  ;;  %v8059_v0 = vor.u32 %v9612_v1, %v9611_v36  ;;  %v9619_v36 = vld [vmem:[#allocation127_spill] sm:$0xff]  ;;  %v9654_v28 = vld [vmem:[#allocation94_spill] sm:$0xff] }
 0x42c   : >> { %2090 = vmatpush.bf16.msra.mxu3 %v4768_v2  ;;  %v9608_v2 = vld [vmem:[#allocation149_spill] sm:$0xff]  ;;  %v8053_v21 = vor.u32 %v9610_v19, %v9609_v8  ;;  %v9618_v8 = vld [vmem:[#allocation136_spill] sm:$0xff]  ;;  %v9662_v32 = vld [vmem:[#allocation86_spill] sm:$0xff] }
 0x42d   : >> { %v8049_v42 = vor.u32 %v9608_v2, %v9607_v7  ;;  %v9617_v2 = vld [vmem:[#allocation140_spill] sm:$0xff] }
 0x42e   : >> { %2034 = vmatpush.bf16.msra.mxu0 %v4740_v49  ;;  %2053 = vmatpush.bf16.msra.mxu1 %v4744_v6  ;;  %v9613_v49 = vld [vmem:[#allocation138_spill] sm:$0xff]  ;;  %v8073_v19 = vor.u32 %v9618_v8, %v9617_v2  ;;  %v9625_v8 = vld [vmem:[#allocation132_spill] sm:$0xff] }
 0x42f   : >> { %2072 = vmatpush.bf16.msra.mxu2 %v4748_v9  ;;  %v9614_v6 = vld [vmem:[#allocation134_spill] sm:$0xff]  ;;  %v8093_v11 = vor.u32 %v9626_v10, %v9625_v8  ;;  %v9631_v10 = vld [vmem:[#allocation121_spill] sm:$0xff]  ;;  %v9633_v8 = vld [vmem:[#allocation124_spill] sm:$0xff] }
 0x430   : >> { %2091 = vmatpush.bf16.msra.mxu3 %v4752_v25  ;;  %v8063_v9 = vor.u32 %v9614_v6, %v9613_v49  ;;  %v8069_v25 = vor.u32 %v9616_v44, %v9615_v26  ;;  %v9621_v49 = vld [vmem:[#allocation130_spill] sm:$0xff]  ;;  %v9623_v26 = vld [vmem:[#allocation129_spill] sm:$0xff]  ;;  %v8115_v17 = vor.u32 %v9634_v16, %v9633_v8  ;;  %v9641_v8 = vld [vmem:[#allocation116_spill] sm:$0xff] }
 0x431   : >> { %2035 = vmatmul.bf16.vlgmr.msra.gmra.mxu0 %v1856_v5  ;;  %2054 = vmatmul.bf16.vlgmr.msra.gmra.mxu1 %v1856_v5  ;;  %v9622_v6 = vld [vmem:[#allocation126_spill] sm:$0xff]  ;;  %v9624_v44 = vld [vmem:[#allocation133_spill] sm:$0xff]  ;;  %v8135_v24 = vor.u32 %v9642_v23, %v9641_v8  ;;  %v9649_v8 = vld [vmem:[#allocation108_spill] sm:$0xff] }
 0x432   : >> { %2287 = vmatpush.bf16.msrb.mxu0 %v8041_v3  ;;  %2300 = vmatpush.bf16.msrb.mxu1 %v8045_v4  ;;  %v8083_v7 = vor.u32 %v9622_v6, %v9621_v49  ;;  %v8089_v2 = vor.u32 %v9624_v44, %v9623_v26  ;;  %v9629_v6 = vld [vmem:[#allocation122_spill] sm:$0xff]  ;;  %v9632_v26 = vld [vmem:[#allocation125_spill] sm:$0xff]  ;;  %v9658_v30 = vld [vmem:[#allocation96_spill] sm:$0xff] }
 0x433   : >> { %2073 = vmatmul.bf16.vlgmr.msra.gmra.mxu2 %v1856_v5  ;;  %2092 = vmatmul.bf16.vlgmr.msra.gmra.mxu3 %v1856_v5  ;;  %v9620_v5 = vld [vmem:[#allocation131_spill] sm:$0xff]  ;;  %v8103_v13 = vor.u32 %v9630_v12, %v9629_v6  ;;  %v8111_v44 = vor.u32 %v9632_v26, %v9631_v10  ;;  %v9637_v6 = vld [vmem:[#allocation114_spill] sm:$0xff]  ;;  %v9639_v10 = vld [vmem:[#allocation113_spill] sm:$0xff] }
 0x434   : >> { %2313 = vmatpush.bf16.msrb.mxu2 %v8049_v42  ;;  %2326 = vmatpush.bf16.msrb.mxu3 %v8053_v21  ;;  %v8079_v1 = vor.u32 %v9620_v5, %v9619_v36  ;;  %v9627_v36 = vld [vmem:[#allocation119_spill] sm:$0xff]  ;;  %v8125_v20 = vor.u32 %v9638_v18, %v9637_v6  ;;  %v9640_v16 = vld [vmem:[#allocation117_spill] sm:$0xff]  ;;  %v8145_v6 = vor.u32 %v9646_v14, %v9645_v15  ;;  %v9666_v34 = vld [vmem:[#allocation88_spill] sm:$0xff] }
 0x435   : >> { %v9628_v5 = vld [vmem:[#allocation123_spill] sm:$0xff]  ;;  %v8131_v26 = vor.u32 %v9640_v16, %v9639_v10  ;;  %v9647_v23 = vld [vmem:[#allocation105_spill] sm:$0xff] }
 0x436   : >> { %2288 = vmatpush.bf16.msrb.mxu0 %v8059_v0  ;;  %2301 = vmatpush.bf16.msrb.mxu1 %v8063_v9  ;;  %v8099_v49 = vor.u32 %v9628_v5, %v9627_v36  ;;  %v9635_v12 = vld [vmem:[#allocation111_spill] sm:$0xff]  ;;  %v9648_v10 = vld [vmem:[#allocation109_spill] sm:$0xff] }
 0x437   : >> { %v9636_v36 = vld [vmem:[#allocation115_spill] sm:$0xff]  ;;  %v8151_v16 = vor.u32 %v9648_v10, %v9647_v23  ;;  %v9655_v23 = vld [vmem:[#allocation97_spill] sm:$0xff] }
 0x438   : >> { %2314 = vmatpush.bf16.msrb.mxu2 %v8069_v25  ;;  %2327 = vmatpush.bf16.msrb.mxu3 %v8073_v19  ;;  %v8121_v5 = vor.u32 %v9636_v36, %v9635_v12  ;;  %v9643_v12 = vld [vmem:[#allocation103_spill] sm:$0xff]  ;;  %v9656_v10 = vld [vmem:[#allocation101_spill] sm:$0xff] }
 0x439   : >> { %v9644_v18 = vld [vmem:[#allocation107_spill] sm:$0xff] }
 0x43a   : >> { %2289 = vmatpush.bf16.msrb.mxu0 %v8079_v1  ;;  %2302 = vmatpush.bf16.msrb.mxu1 %v8083_v7  ;;  %v8141_v36 = vor.u32 %v9644_v18, %v9643_v12  ;;  %v8155_v12 = vor.u32 %v9650_v27, %v9649_v8  ;;  %v9651_v18 = vld [vmem:[#allocation95_spill] sm:$0xff]  ;;  %v8171_v27 = vor.u32 %v9656_v10, %v9655_v23  ;;  %v9657_v8 = vld [vmem:[#allocation100_spill] sm:$0xff]  ;;  %v9663_v23 = vld [vmem:[#allocation89_spill] sm:$0xff] }
 0x43b   : >> { %v9652_v15 = vld [vmem:[#allocation99_spill] sm:$0xff]  ;;  %v8175_v31 = vor.u32 %v9658_v30, %v9657_v8  ;;  %v9664_v10 = vld [vmem:[#allocation93_spill] sm:$0xff]  ;;  %v9665_v8 = vld [vmem:[#allocation92_spill] sm:$0xff] }
 0x43c   : >> { %2315 = vmatpush.bf16.msrb.mxu2 %v8089_v2  ;;  %2328 = vmatpush.bf16.msrb.mxu3 %v8093_v11  ;;  %v8161_v14 = vor.u32 %v9652_v15, %v9651_v18  ;;  %v9659_v18 = vld [vmem:[#allocation87_spill] sm:$0xff]  ;;  %v8191_v30 = vor.u32 %v9664_v10, %v9663_v23  ;;  %v8195_v35 = vor.u32 %v9666_v34, %v9665_v8  ;;  %v9668_v34 = vld [vmem:[#allocation150_spill] sm:$0xff] }
 0x43d   : >> { %v9660_v15 = vld [vmem:[#allocation91_spill] sm:$0xff]  ;;  %v1862_v37 = vperm.slane %v9668_v34, 3 }
 0x43e   : >> { %2290 = vmatpush.bf16.msrb.mxu0 %v8099_v49  ;;  %2303 = vmatpush.bf16.msrb.mxu1 %v8103_v13 }
 0x440   : >> { %2316 = vmatpush.bf16.msrb.mxu2 %v8111_v44  ;;  %2329 = vmatpush.bf16.msrb.mxu3 %v8115_v17 }
 0x441   : >> { %2040 = vmatmul.bf16.gmra.mxu0 %v1857_v22  ;;  %2059 = vmatmul.bf16.gmra.mxu1 %v1857_v22 }
 0x442   : >> { %2291 = vmatpush.bf16.msrb.mxu0 %v8121_v5  ;;  %2304 = vmatpush.bf16.msrb.mxu1 %v8125_v20 }
 0x443   : >> { %2078 = vmatmul.bf16.gmra.mxu2 %v1857_v22  ;;  %2097 = vmatmul.bf16.gmra.mxu3 %v1857_v22  ;;  %v9653_v22 = vld [vmem:[#allocation98_spill] sm:$0xff] }
 0x444   : >> { %2317 = vmatpush.bf16.msrb.mxu2 %v8131_v26  ;;  %2330 = vmatpush.bf16.msrb.mxu3 %v8135_v24  ;;  %v8165_v29 = vor.u32 %v9654_v28, %v9653_v22  ;;  %v8181_v28 = vor.u32 %v9660_v15, %v9659_v18  ;;  %v9661_v22 = vld [vmem:[#allocation90_spill] sm:$0xff]  ;;  %v9667_v18 = vld [vmem:[#allocation159_spill] sm:$0xff]  ;;  %v1859_v15 = vperm.slane %v9668_v34, 0 }
 0x445   : >> { %v8185_v33 = vor.u32 %v9662_v32, %v9661_v22  ;;  %v2126_v32 = vpack.c.bf16 %v9667_v18, %v9667_v18  ;;  %v1860_v22 = vperm.slane %v9668_v34, 1 }
 0x446   : >> { %2292 = vmatpush.bf16.msrb.mxu0 %v8141_v36  ;;  %2305 = vmatpush.bf16.msrb.mxu1 %v8145_v6 }
 0x448   : >> { %2318 = vmatpush.bf16.msrb.mxu2 %v8151_v16  ;;  %2331 = vmatpush.bf16.msrb.mxu3 %v8155_v12 }
 0x44a   : >> { %2293 = vmatpush.bf16.msrb.mxu0 %v8161_v14  ;;  %2306 = vmatpush.bf16.msrb.mxu1 %v8165_v29 }
 0x44c   : >> { %2319 = vmatpush.bf16.msrb.mxu2 %v8171_v27  ;;  %2332 = vmatpush.bf16.msrb.mxu3 %v8175_v31 }
 0x44e   : >> { %2294 = vmatpush.bf16.msrb.mxu0 %v8181_v28  ;;  %2307 = vmatpush.bf16.msrb.mxu1 %v8185_v33 }
 0x450   : >> { %2320 = vmatpush.bf16.msrb.mxu2 %v8191_v30  ;;  %2333 = vmatpush.bf16.msrb.mxu3 %v8195_v35 }
 0x451   : >> { %2295 = vmatmul.bf16.vlgmr.msrb.gmra.mxu0 %v2126_v32  ;;  %2308 = vmatmul.bf16.vlgmr.msrb.gmra.mxu1 %v2126_v32 }
 0x452   : >> { %2416 = vmatpush.bf16.msra.mxu0 %v8041_v3  ;;  %2429 = vmatpush.bf16.msra.mxu1 %v8045_v4 }
 0x453   : >> { %2321 = vmatmul.bf16.vlgmr.msrb.gmra.mxu2 %v2126_v32  ;;  %2334 = vmatmul.bf16.vlgmr.msrb.gmra.mxu3 %v2126_v32  ;;  %v1861_v32 = vperm.slane %v9668_v34, 2 }
 0x454   : >> { %2442 = vmatpush.bf16.msra.mxu2 %v8049_v42  ;;  %2455 = vmatpush.bf16.msra.mxu3 %v8053_v21 }
 0x456   : >> { %2417 = vmatpush.bf16.msra.mxu0 %v8059_v0  ;;  %2430 = vmatpush.bf16.msra.mxu1 %v8063_v9 }
 0x458   : >> { %2443 = vmatpush.bf16.msra.mxu2 %v8069_v25  ;;  %2456 = vmatpush.bf16.msra.mxu3 %v8073_v19 }
 0x45a   : >> { %2418 = vmatpush.bf16.msra.mxu0 %v8079_v1  ;;  %2431 = vmatpush.bf16.msra.mxu1 %v8083_v7 }
 0x45c   : >> { %2444 = vmatpush.bf16.msra.mxu2 %v8089_v2  ;;  %2457 = vmatpush.bf16.msra.mxu3 %v8093_v11 }
 0x45e   : >> { %2419 = vmatpush.bf16.msra.mxu0 %v8099_v49  ;;  %2432 = vmatpush.bf16.msra.mxu1 %v8103_v13 }
 0x460   : >> { %2445 = vmatpush.bf16.msra.mxu2 %v8111_v44  ;;  %2458 = vmatpush.bf16.msra.mxu3 %v8115_v17 }
 0x462   : >> { %2420 = vmatpush.bf16.msra.mxu0 %v8121_v5  ;;  %2433 = vmatpush.bf16.msra.mxu1 %v8125_v20 }
 0x464   : >> { %2446 = vmatpush.bf16.msra.mxu2 %v8131_v26  ;;  %2459 = vmatpush.bf16.msra.mxu3 %v8135_v24 }
 0x466   : >> { %2421 = vmatpush.bf16.msra.mxu0 %v8141_v36  ;;  %2434 = vmatpush.bf16.msra.mxu1 %v8145_v6 }
 0x468   : >> { %2447 = vmatpush.bf16.msra.mxu2 %v8151_v16  ;;  %2460 = vmatpush.bf16.msra.mxu3 %v8155_v12 }
 0x46a   : >> { %2422 = vmatpush.bf16.msra.mxu0 %v8161_v14  ;;  %2435 = vmatpush.bf16.msra.mxu1 %v8165_v29 }
 0x46c   : >> { %2448 = vmatpush.bf16.msra.mxu2 %v8171_v27  ;;  %2461 = vmatpush.bf16.msra.mxu3 %v8175_v31 }
 0x46e   : >> { %2423 = vmatpush.bf16.msra.mxu0 %v8181_v28  ;;  %2436 = vmatpush.bf16.msra.mxu1 %v8185_v33 }
 0x470   : >> { %2449 = vmatpush.bf16.msra.mxu2 %v8191_v30  ;;  %2462 = vmatpush.bf16.msra.mxu3 %v8195_v35 }
 0x472   : >> { %2546 = vmatpush.bf16.msrb.mxu0 %v8041_v3  ;;  %2559 = vmatpush.bf16.msrb.mxu1 %v8045_v4 }
 0x474   : >> { %2572 = vmatpush.bf16.msrb.mxu2 %v8049_v42  ;;  %2585 = vmatpush.bf16.msrb.mxu3 %v8053_v21 }
 0x476   : >> { %2547 = vmatpush.bf16.msrb.mxu0 %v8059_v0  ;;  %2560 = vmatpush.bf16.msrb.mxu1 %v8063_v9 }
 0x478   : >> { %2573 = vmatpush.bf16.msrb.mxu2 %v8069_v25  ;;  %2586 = vmatpush.bf16.msrb.mxu3 %v8073_v19 }
 0x47a   : >> { %2548 = vmatpush.bf16.msrb.mxu0 %v8079_v1  ;;  %2561 = vmatpush.bf16.msrb.mxu1 %v8083_v7 }
 0x47c   : >> { %2574 = vmatpush.bf16.msrb.mxu2 %v8089_v2  ;;  %2587 = vmatpush.bf16.msrb.mxu3 %v8093_v11 }
 0x47e   : >> { %2549 = vmatpush.bf16.msrb.mxu0 %v8099_v49  ;;  %2562 = vmatpush.bf16.msrb.mxu1 %v8103_v13 }
 0x480   : >> { %2575 = vmatpush.bf16.msrb.mxu2 %v8111_v44  ;;  %2588 = vmatpush.bf16.msrb.mxu3 %v8115_v17 }
 0x482   : >> { %2550 = vmatpush.bf16.msrb.mxu0 %v8121_v5  ;;  %2563 = vmatpush.bf16.msrb.mxu1 %v8125_v20 }
 0x484   : >> { %2576 = vmatpush.bf16.msrb.mxu2 %v8131_v26  ;;  %2589 = vmatpush.bf16.msrb.mxu3 %v8135_v24 }
 0x486   : >> { %2551 = vmatpush.bf16.msrb.mxu0 %v8141_v36  ;;  %2564 = vmatpush.bf16.msrb.mxu1 %v8145_v6 }
 0x488   : >> { %2577 = vmatpush.bf16.msrb.mxu2 %v8151_v16  ;;  %2590 = vmatpush.bf16.msrb.mxu3 %v8155_v12 }
 0x48a   : >> { %2552 = vmatpush.bf16.msrb.mxu0 %v8161_v14  ;;  %2565 = vmatpush.bf16.msrb.mxu1 %v8165_v29 }
 0x48c   : >> { %2578 = vmatpush.bf16.msrb.mxu2 %v8171_v27  ;;  %2591 = vmatpush.bf16.msrb.mxu3 %v8175_v31 }
 0x48e   : >> { %2553 = vmatpush.bf16.msrb.mxu0 %v8181_v28  ;;  %2566 = vmatpush.bf16.msrb.mxu1 %v8185_v33 }
 0x490   : >> { %2579 = vmatpush.bf16.msrb.mxu2 %v8191_v30  ;;  %2592 = vmatpush.bf16.msrb.mxu3 %v8195_v35 }
 0x4ae   : >> { %v2036_v23 = vpop.f32.mrf.mxu0  ;;  %v2055_v10 = vpop.f32.mrf.mxu1 }
 0x4af   : >> { %v2037_v8 = vadd.f32 %v2036_v23, %v1859_v15  ;;  %v2056_v18 = vadd.f32 %v2055_v10, %v1860_v22 }
 0x4b6   : >> { %v2074_v38 = vpop.f32.mrf.mxu2  ;;  %v2093_v39 = vpop.f32.mrf.mxu3 }
 0x4b7   : >> { %v2075_v40 = vadd.f32 %v2074_v38, %v1861_v32  ;;  %v2094_v41 = vadd.f32 %v2093_v39, %v1862_v37  ;;  %v2038_v43 = vpop.f32.mrf.mxu0  ;;  %v2057_v45 = vpop.f32.mrf.mxu1 }
 0x4b8   : >> { %v8271_v46 = vadd.f32 %v2038_v43, %v1859_v15  ;;  %v8273_v47 = vadd.f32 %v2057_v45, %v1860_v22 }
 0x4be   : >> { %v2076_v48 = vpop.f32.mrf.mxu2  ;;  %v2095_v50 = vpop.f32.mrf.mxu3 }
 0x4bf   : >> { %v8275_v51 = vadd.f32 %v2076_v48, %v1861_v32  ;;  %v8277_v23 = vadd.f32 %v2095_v50, %v1862_v37  ;;  %v2041_v10 = vpop.f32.mrf.mxu0  ;;  %v2060_v52 = vpop.f32.mrf.mxu1 }
 0x4c0   : >> { %v8279_v53 = vadd.f32 %v2041_v10, %v1859_v15  ;;  %v8281_v34 = vadd.f32 %v2060_v52, %v1860_v22 }
 0x4c6   : >> { %v2079_v38 = vpop.f32.mrf.mxu2  ;;  %v2098_v39 = vpop.f32.mrf.mxu3 }
 0x4c7   : >> { %v8283_v54 = vadd.f32 %v2079_v38, %v1861_v32  ;;  %v8285_v43 = vadd.f32 %v2098_v39, %v1862_v37  ;;  %v2043_v45 = vpop.f32.mrf.mxu0  ;;  %v2062_v55 = vpop.f32.mrf.mxu1 }
 0x4c8   : >> { %v8287_v56 = vadd.f32 %v2043_v45, %v1859_v15  ;;  %v8289_v48 = vadd.f32 %v2062_v55, %v1860_v22 }
 0x4c9   : >> { %9669 = vst [vmem:[#allocation159_spill] sm:$0xff] %v8283_v54  ;;  %v9675_v54 = vld [vmem:[#allocation158_spill] sm:$0xff] }
 0x4ca   : >> { %9670 = vst [vmem:[#allocation160_spill] sm:$0xff] %v8285_v43 }
 0x4cb   : >> { %9671 = vst [vmem:[#allocation161_spill] sm:$0xff] %v8287_v56 }
 0x4cc   : >> { %9672 = vst [vmem:[#allocation162_spill] sm:$0xff] %v8289_v48 }
 0x4ce   : >> { %v2081_v50 = vpop.f32.mrf.mxu2  ;;  %v2100_v57 = vpop.f32.mrf.mxu3 }
 0x4cf   : >> { %v8291_v58 = vadd.f32 %v2081_v50, %v1861_v32  ;;  %v8293_v10 = vadd.f32 %v2100_v57, %v1862_v37  ;;  %v2296_v52 = vpop.f32.mrf.mxu0  ;;  %v2309_v59 = vpop.f32.mrf.mxu1 }
 0x4d0   : >> { %v2339_v60 = vadd.f32 %v2296_v52, %v2037_v8  ;;  %v2340_v61 = vadd.f32 %v2309_v59, %v2056_v18 }
 0x4d1   : >> { %9673 = vst [vmem:[#allocation163_spill] sm:$0xff] %v8291_v58 }
 0x4d2   : >> { %9674 = vst [vmem:[#allocation164_spill] sm:$0xff] %v8293_v10  ;;  %v4993_v38 = vmul.f32 -1.442695, %v2339_v60  ;;  %v4994_v62 = vmul.f32 -1.442695, %v2340_v61 }
 0x4d4   : >> { %5933 = vpow2.f32 %v4993_v38 }
 0x4d5   : >> { %5935 = vpow2.f32 %v4994_v62 }
 0x4d6   : >> { %v2322_v39 = vpop.f32.mrf.mxu2  ;;  %v2335_v63 = vpop.f32.mrf.mxu3 }
 0x4d7   : >> { %v2341_v15 = vadd.f32 %v2322_v39, %v2075_v40  ;;  %v2298_v45 = vpop.f32.mrf.mxu0  ;;  %v2311_v55 = vpop.f32.mrf.mxu1  ;;  %v2342_v18 = vadd.f32 %v2335_v63, %v2094_v41 }
 0x4d9   : >> { %v4995_v22 = vmul.f32 -1.442695, %v2341_v15 }
 0x4da   : >> { %v5934_v48 = vpop.eup %5933 }
 0x4db   : >> { %v5936_v56 = vpop.eup %5935  ;;  %v2352_v32 = vadd.f32 1.0, %v5934_v48  ;;  %5937 = vpow2.f32 %v4995_v22 }
 0x4dc   : >> { %v2353_v37 = vadd.f32 1.0, %v5936_v56 }
 0x4dd   : >> { %5939 = vrcp.f32 %v2352_v32  ;;  %v2366_v39 = vand.u32 2147483648, %v2352_v32  ;;  %v2364_v56 = vand.u32 2147483647, %v2352_v32  ;;  %vm2360_vm2 = vweird.f32 %v2352_v32 }
 0x4de   : >> { %5941 = vrcp.f32 %v2353_v37  ;;  %v2324_v57 = vpop.f32.mrf.mxu2  ;;  %v2337_v8 = vpop.f32.mrf.mxu3  ;;  %v2381_v15 = vand.u32 2147483648, %v2353_v37  ;;  %v2379_v55 = vand.u32 2147483647, %v2353_v37  ;;  %vm2375_vm3 = vweird.f32 %v2353_v37 }
 0x4df   : >> { %v2367_v41 = vor.u32 1.1754944e-38, %v2366_v39  ;;  %vm2365_vm6 = vcmp.eq.f32.partialorder %v2364_v56, 8.507059e+37 }
 0x4e0   : >> { %vm2380_vm7 = vcmp.eq.f32.partialorder %v2379_v55, 8.507059e+37 }
 0x4e1   : >> { %v5938_v59 = vpop.eup %5937 }
 0x4e2   : >> { %v2354_v60 = vadd.f32 1.0, %v5938_v59  ;;  %v2382_v59 = vor.u32 1.1754944e-38, %v2381_v15 }
 0x4e3   : >> { %v5940_v61 = vpop.eup %5939 }
 0x4e4   : >> { %v5942_v62 = vpop.eup %5941  ;;  %v2356_v50 = vmul.f32 %v5940_v61, %v2352_v32  ;;  %5943 = vrcp.f32 %v2354_v60  ;;  %vm2361_vm0 = vweird.f32 %v5940_v61  ;;  %v2396_v39 = vand.u32 2147483648, %v2354_v60 }
 0x4e5   : >> { %v2371_v40 = vmul.f32 %v5942_v62, %v2353_v37  ;;  %5945 = vtanh.f32 %v2342_v18  ;;  %vm2376_vm1 = vweird.f32 %v5942_v62  ;;  %vm2362_vm4 = vmor %vm2360_vm2, %vm2361_vm0  ;;  %vm2390_vm9 = vweird.f32 %v2354_v60 }
 0x4e6   : >> { %v2357_v52 = vsub.f32 1.0, %v2356_v50  ;;  %vm2377_vm5 = vmor %vm2375_vm3, %vm2376_vm1  ;;  %v2397_v56 = vor.u32 1.1754944e-38, %v2396_v39 }
 0x4e7   : >> { %v2372_v38 = vsub.f32 1.0, %v2371_v40 }
 0x4e8   : >> { %v2358_v48 = vmul.f32 %v5940_v61, %v2357_v52 }
 0x4e9   : >> { %v2373_v45 = vmul.f32 %v5942_v62, %v2372_v38 }
 0x4ea   : >> { %v5944_v22 = vpop.eup %5943  ;;  %v2359_v57 = vadd.f32 %v5940_v61, %v2358_v48 }
 0x4eb   : >> { %v2386_v63 = vmul.f32 %v5944_v22, %v2354_v60  ;;  %v2374_v8 = vadd.f32 %v5942_v62, %v2373_v45  ;;  %v5946_v18 = vpop.eup %5945  ;;  %vm2391_vm8 = vweird.f32 %v5944_v22 }
 0x4ec   : >> { %v2363_v50 = vsel %vm2362_vm4, %v5940_v61, %v2359_v57  ;;  %v2394_v61 = vand.u32 2147483647, %v2354_v60  ;;  %vm2392_vm10 = vmor %vm2390_vm9, %vm2391_vm8 }
 0x4ed   : >> { %v2387_v40 = vsub.f32 1.0, %v2386_v63  ;;  %v2368_v52 = vsel %vm2365_vm6, %v2367_v41, %v2363_v50  ;;  %v2378_v10 = vsel %vm2377_vm5, %v5942_v62, %v2374_v8 }
 0x4ee   : >> { %v2383_v38 = vsel %vm2380_vm7, %v2382_v59, %v2378_v10  ;;  %v2402_v58 = vmul.f32 %v5946_v18, %v2368_v52  ;;  %vm2395_vm11 = vcmp.eq.f32.partialorder %v2394_v61, 8.507059e+37 }
 0x4ef   : >> { %v2388_v43 = vmul.f32 %v5944_v22, %v2387_v40  ;;  %v2401_v32 = vmul.f32 %v9675_v54, %v2383_v38 }
 0x4f1   : >> { %v8296_v37 = vadd.f32 %v2402_v58, %v2401_v32  ;;  %v2389_v48 = vadd.f32 %v5944_v22, %v2388_v43 }
 0x4f3   : >> { %5947 = vtanh.f32 %v8296_v37  ;;  %v2393_v15 = vsel %vm2392_vm10, %v5944_v22, %v2389_v48 }
 0x4f4   : >> { %v2398_v10 = vsel %vm2395_vm11, %v2397_v56, %v2393_v15 }
 0x4f9   : >> { %v5948_v62 = vpop.eup %5947 }
 0x4fa   : >> { %v2405_v45 = vmul.f32 %v5948_v62, %v2398_v10 }
 0x4fc   : >> { %2407 = vst [vmem:[%s8031_s11] sm:$0xff] %v2405_v45  ;;  %v2415_v55 = vpack.c.bf16 %v2405_v45, %v2405_v45 }
 0x4fe   : >> { %2424 = vmatmul.bf16.vlgmr.msra.gmra.mxu0 %v2415_v55  ;;  %2437 = vmatmul.bf16.vlgmr.msra.gmra.mxu1 %v2415_v55 }
 0x4ff   : >> { %2450 = vmatmul.bf16.vlgmr.msra.gmra.mxu2 %v2415_v55  ;;  %2463 = vmatmul.bf16.vlgmr.msra.gmra.mxu3 %v2415_v55 }
 0x500   : >> { %2676 = vmatpush.bf16.msra.mxu0 %v8041_v3  ;;  %2689 = vmatpush.bf16.msra.mxu1 %v8045_v4 }
 0x501   : >> { %2702 = vmatpush.bf16.msra.mxu2 %v8049_v42  ;;  %2715 = vmatpush.bf16.msra.mxu3 %v8053_v21 }
 0x504   : >> { %2677 = vmatpush.bf16.msra.mxu0 %v8059_v0  ;;  %2690 = vmatpush.bf16.msra.mxu1 %v8063_v9 }
 0x505   : >> { %2703 = vmatpush.bf16.msra.mxu2 %v8069_v25  ;;  %2716 = vmatpush.bf16.msra.mxu3 %v8073_v19 }
 0x508   : >> { %2678 = vmatpush.bf16.msra.mxu0 %v8079_v1  ;;  %2691 = vmatpush.bf16.msra.mxu1 %v8083_v7 }
 0x509   : >> { %2704 = vmatpush.bf16.msra.mxu2 %v8089_v2  ;;  %2717 = vmatpush.bf16.msra.mxu3 %v8093_v11 }
 0x50c   : >> { %2679 = vmatpush.bf16.msra.mxu0 %v8099_v49  ;;  %2692 = vmatpush.bf16.msra.mxu1 %v8103_v13 }
 0x50d   : >> { %2705 = vmatpush.bf16.msra.mxu2 %v8111_v44  ;;  %2718 = vmatpush.bf16.msra.mxu3 %v8115_v17 }
 0x510   : >> { %2680 = vmatpush.bf16.msra.mxu0 %v8121_v5  ;;  %2693 = vmatpush.bf16.msra.mxu1 %v8125_v20 }
 0x511   : >> { %2706 = vmatpush.bf16.msra.mxu2 %v8131_v26  ;;  %2719 = vmatpush.bf16.msra.mxu3 %v8135_v24 }
 0x514   : >> { %2681 = vmatpush.bf16.msra.mxu0 %v8141_v36  ;;  %2694 = vmatpush.bf16.msra.mxu1 %v8145_v6 }
 0x515   : >> { %2707 = vmatpush.bf16.msra.mxu2 %v8151_v16  ;;  %2720 = vmatpush.bf16.msra.mxu3 %v8155_v12 }
 0x518   : >> { %2682 = vmatpush.bf16.msra.mxu0 %v8161_v14  ;;  %2695 = vmatpush.bf16.msra.mxu1 %v8165_v29 }
 0x519   : >> { %2708 = vmatpush.bf16.msra.mxu2 %v8171_v27  ;;  %2721 = vmatpush.bf16.msra.mxu3 %v8175_v31 }
 0x51c   : >> { %2683 = vmatpush.bf16.msra.mxu0 %v8181_v28  ;;  %2696 = vmatpush.bf16.msra.mxu1 %v8185_v33 }
 0x51d   : >> { %2709 = vmatpush.bf16.msra.mxu2 %v8191_v30  ;;  %2722 = vmatpush.bf16.msra.mxu3 %v8195_v35 }
 0x57b   : >> { %v2425_v7 = vpop.f32.mrf.mxu0  ;;  %v2438_v54 = vpop.f32.mrf.mxu1 }
 0x57c   : >> { %v2468_v58 = vadd.f32 %v2425_v7, %v8271_v46  ;;  %v2469_v20 = vadd.f32 %v2438_v54, %v8273_v47 }
 0x57e   : >> { %v4996_v13 = vmul.f32 -1.442695, %v2468_v58  ;;  %v4997_v17 = vmul.f32 -1.442695, %v2469_v20 }
 0x580   : >> { %5949 = vpow2.f32 %v4996_v13  ;;  %v9676_v13 = vld [vmem:[#allocation159_spill] sm:$0xff] }
 0x581   : >> { %5951 = vpow2.f32 %v4997_v17 }
 0x582   : >> { %v2451_v11 = vpop.f32.mrf.mxu2  ;;  %v2464_v24 = vpop.f32.mrf.mxu3 }
 0x583   : >> { %v2470_v31 = vadd.f32 %v2451_v11, %v8275_v51  ;;  %v2427_v29 = vpop.f32.mrf.mxu0  ;;  %v2440_v33 = vpop.f32.mrf.mxu1  ;;  %v2471_v19 = vadd.f32 %v2464_v24, %v8277_v23 }
 0x585   : >> { %v4998_v3 = vmul.f32 -1.442695, %v2470_v31 }
 0x586   : >> { %v5950_v4 = vpop.eup %5949 }
 0x587   : >> { %v5952_v42 = vpop.eup %5951  ;;  %v2481_v35 = vadd.f32 1.0, %v5950_v4  ;;  %5953 = vpow2.f32 %v4998_v3 }
 0x588   : >> { %v2482_v21 = vadd.f32 1.0, %v5952_v42 }
 0x589   : >> { %5955 = vrcp.f32 %v2481_v35  ;;  %v2495_v5 = vand.u32 2147483648, %v2481_v35  ;;  %v2493_v6 = vand.u32 2147483647, %v2481_v35  ;;  %vm2489_vm14 = vweird.f32 %v2481_v35 }
 0x58a   : >> { %5957 = vrcp.f32 %v2482_v21  ;;  %v2453_v46 = vpop.f32.mrf.mxu2  ;;  %v2466_v47 = vpop.f32.mrf.mxu3  ;;  %v2510_v26 = vand.u32 2147483648, %v2482_v21  ;;  %v2508_v12 = vand.u32 2147483647, %v2482_v21  ;;  %vm2504_vm15 = vweird.f32 %v2482_v21 }
 0x58b   : >> { %v2496_v30 = vor.u32 1.1754944e-38, %v2495_v5  ;;  %vm2494_vm2 = vcmp.eq.f32.partialorder %v2493_v6, 8.507059e+37  ;;  %v9677_v46 = vld [vmem:[#allocation160_spill] sm:$0xff] }
 0x58c   : >> { %v2511_v43 = vor.u32 1.1754944e-38, %v2510_v26  ;;  %vm2509_vm3 = vcmp.eq.f32.partialorder %v2508_v12, 8.507059e+37 }
 0x58d   : >> { %v5954_v0 = vpop.eup %5953 }
 0x58e   : >> { %v2483_v9 = vadd.f32 1.0, %v5954_v0 }
 0x58f   : >> { %v5956_v25 = vpop.eup %5955 }
 0x590   : >> { %v5958_v1 = vpop.eup %5957  ;;  %v2485_v2 = vmul.f32 %v5956_v25, %v2481_v35  ;;  %5959 = vrcp.f32 %v2483_v9  ;;  %vm2490_vm12 = vweird.f32 %v5956_v25  ;;  %v2525_v38 = vand.u32 2147483648, %v2483_v9 }
 0x591   : >> { %v2500_v51 = vmul.f32 %v5958_v1, %v2482_v21  ;;  %5961 = vtanh.f32 %v2471_v19  ;;  %vm2505_vm13 = vweird.f32 %v5958_v1  ;;  %vm2491_vm0 = vmor %vm2489_vm14, %vm2490_vm12  ;;  %vm2519_vm5 = vweird.f32 %v2483_v9 }
 0x592   : >> { %v2486_v49 = vsub.f32 1.0, %v2485_v2  ;;  %vm2506_vm1 = vmor %vm2504_vm15, %vm2505_vm13  ;;  %v2523_v32 = vand.u32 2147483647, %v2483_v9  ;;  %v2526_v39 = vor.u32 1.1754944e-38, %v2525_v38 }
 0x593   : >> { %v2501_v44 = vsub.f32 1.0, %v2500_v51 }
 0x594   : >> { %v2487_v36 = vmul.f32 %v5956_v25, %v2486_v49  ;;  %vm2524_vm7 = vcmp.eq.f32.partialorder %v2523_v32, 8.507059e+37 }
 0x595   : >> { %v2502_v16 = vmul.f32 %v5958_v1, %v2501_v44 }
 0x596   : >> { %v5960_v14 = vpop.eup %5959  ;;  %v2488_v27 = vadd.f32 %v5956_v25, %v2487_v36 }
 0x597   : >> { %v2515_v28 = vmul.f32 %v5960_v14, %v2483_v9  ;;  %v2503_v23 = vadd.f32 %v5958_v1, %v2502_v16  ;;  %v5962_v22 = vpop.eup %5961  ;;  %vm2520_vm4 = vweird.f32 %v5960_v14 }
 0x598   : >> { %v2492_v60 = vsel %vm2491_vm0, %v5956_v25, %v2488_v27  ;;  %vm2521_vm6 = vmor %vm2519_vm5, %vm2520_vm4 }
 0x599   : >> { %v2516_v57 = vsub.f32 1.0, %v2515_v28  ;;  %v2497_v63 = vsel %vm2494_vm2, %v2496_v30, %v2492_v60  ;;  %v2507_v41 = vsel %vm2506_vm1, %v5958_v1, %v2503_v23 }
 0x59a   : >> { %v2512_v8 = vsel %vm2509_vm3, %v2511_v43, %v2507_v41  ;;  %v2531_v59 = vmul.f32 %v5962_v22, %v2497_v63 }
 0x59b   : >> { %v2517_v50 = vmul.f32 %v5960_v14, %v2516_v57  ;;  %v2530_v18 = vmul.f32 %v2512_v8, %v8296_v37 }
 0x59d   : >> { %v8337_v40 = vadd.f32 %v2531_v59, %v2530_v18  ;;  %v2518_v52 = vadd.f32 %v5960_v14, %v2517_v50 }
 0x59f   : >> { %5963 = vtanh.f32 %v8337_v40  ;;  %v2522_v48 = vsel %vm2521_vm6, %v5960_v14, %v2518_v52 }
 0x5a0   : >> { %v2527_v15 = vsel %vm2524_vm7, %v2526_v39, %v2522_v48 }
 0x5a5   : >> { %v5964_v61 = vpop.eup %5963 }
 0x5a6   : >> { %v2534_v56 = vmul.f32 %v5964_v61, %v2527_v15 }
 0x5a8   : >> { %5000 = vst [vmem:[%s8031_s11 + $0x8] sm:$0xff] %v2534_v56  ;;  %v2545_v62 = vpack.c.bf16 %v2534_v56, %v2534_v56  ;;  %v9678_v56 = vld [vmem:[#allocation161_spill] sm:$0xff] }
 0x5aa   : >> { %2554 = vmatmul.bf16.vlgmr.msrb.gmra.mxu0 %v2545_v62  ;;  %2567 = vmatmul.bf16.vlgmr.msrb.gmra.mxu1 %v2545_v62 }
 0x5ab   : >> { %2580 = vmatmul.bf16.vlgmr.msrb.gmra.mxu2 %v2545_v62  ;;  %2593 = vmatmul.bf16.vlgmr.msrb.gmra.mxu3 %v2545_v62 }
 0x627   : >> { %v2555_v37 = vpop.f32.mrf.mxu0  ;;  %v2568_v10 = vpop.f32.mrf.mxu1 }
 0x628   : >> { %v2598_v45 = vadd.f32 %v2555_v37, %v8279_v53  ;;  %v2599_v55 = vadd.f32 %v2568_v10, %v8281_v34  ;;  %v9679_v37 = vld [vmem:[#allocation162_spill] sm:$0xff] }
 0x62a   : >> { %v5001_v7 = vmul.f32 -1.442695, %v2598_v45  ;;  %v5002_v54 = vmul.f32 -1.442695, %v2599_v55 }
 0x62c   : >> { %5965 = vpow2.f32 %v5001_v7 }
 0x62d   : >> { %5967 = vpow2.f32 %v5002_v54 }
 0x62e   : >> { %v2581_v58 = vpop.f32.mrf.mxu2  ;;  %v2594_v20 = vpop.f32.mrf.mxu3 }
 0x62f   : >> { %v2600_v17 = vadd.f32 %v2581_v58, %v9676_v13  ;;  %v2557_v11 = vpop.f32.mrf.mxu0  ;;  %v2570_v24 = vpop.f32.mrf.mxu1  ;;  %v2601_v47 = vadd.f32 %v2594_v20, %v9677_v46  ;;  %v9680_v58 = vld [vmem:[#allocation163_spill] sm:$0xff] }
 0x631   : >> { %v5003_v31 = vmul.f32 -1.442695, %v2600_v17 }
 0x632   : >> { %v5966_v29 = vpop.eup %5965 }
 0x633   : >> { %v5968_v33 = vpop.eup %5967  ;;  %v2611_v3 = vadd.f32 1.0, %v5966_v29  ;;  %5969 = vpow2.f32 %v5003_v31 }
 0x634   : >> { %v2612_v4 = vadd.f32 1.0, %v5968_v33 }
 0x635   : >> { %5971 = vrcp.f32 %v2611_v3  ;;  %v2625_v2 = vand.u32 2147483648, %v2611_v3  ;;  %v2623_v44 = vand.u32 2147483647, %v2611_v3  ;;  %vm2619_vm10 = vweird.f32 %v2611_v3 }
 0x636   : >> { %5973 = vrcp.f32 %v2612_v4  ;;  %v2583_v53 = vpop.f32.mrf.mxu2  ;;  %v2596_v34 = vpop.f32.mrf.mxu3  ;;  %v2640_v51 = vand.u32 2147483648, %v2612_v4  ;;  %v2638_v26 = vand.u32 2147483647, %v2612_v4  ;;  %vm2634_vm11 = vweird.f32 %v2612_v4 }
 0x637   : >> { %v2626_v12 = vor.u32 1.1754944e-38, %v2625_v2  ;;  %vm2624_vm14 = vcmp.eq.f32.partialorder %v2623_v44, 8.507059e+37 }
 0x638   : >> { %v2641_v27 = vor.u32 1.1754944e-38, %v2640_v51  ;;  %vm2639_vm15 = vcmp.eq.f32.partialorder %v2638_v26, 8.507059e+37 }
 0x639   : >> { %v5970_v42 = vpop.eup %5969 }
 0x63a   : >> { %v2613_v35 = vadd.f32 1.0, %v5970_v42 }
 0x63b   : >> { %v5972_v21 = vpop.eup %5971 }
 0x63c   : >> { %v5974_v0 = vpop.eup %5973  ;;  %v2615_v9 = vmul.f32 %v5972_v21, %v2611_v3  ;;  %5975 = vrcp.f32 %v2613_v35  ;;  %vm2620_vm8 = vweird.f32 %v5972_v21  ;;  %v2655_v50 = vand.u32 2147483648, %v2613_v35 }
 0x63d   : >> { %v2630_v25 = vmul.f32 %v5974_v0, %v2612_v4  ;;  %5977 = vtanh.f32 %v2601_v47  ;;  %vm2635_vm9 = vweird.f32 %v5974_v0  ;;  %vm2621_vm12 = vmor %vm2619_vm10, %vm2620_vm8  ;;  %vm2649_vm1 = vweird.f32 %v2613_v35 }
 0x63e   : >> { %v2616_v19 = vsub.f32 1.0, %v2615_v9  ;;  %vm2636_vm13 = vmor %vm2634_vm11, %vm2635_vm9  ;;  %v2653_v18 = vand.u32 2147483647, %v2613_v35  ;;  %v2656_v38 = vor.u32 1.1754944e-38, %v2655_v50 }
 0x63f   : >> { %v2631_v1 = vsub.f32 1.0, %v2630_v25 }
 0x640   : >> { %v2617_v49 = vmul.f32 %v5972_v21, %v2616_v19  ;;  %vm2654_vm3 = vcmp.eq.f32.partialorder %v2653_v18, 8.507059e+37 }
 0x641   : >> { %v2632_v5 = vmul.f32 %v5974_v0, %v2631_v1 }
 0x642   : >> { %v5976_v36 = vpop.eup %5975  ;;  %v2618_v6 = vadd.f32 %v5972_v21, %v2617_v49 }
 0x643   : >> { %v2645_v16 = vmul.f32 %v5976_v36, %v2613_v35  ;;  %v2633_v14 = vadd.f32 %v5974_v0, %v2632_v5  ;;  %v5978_v30 = vpop.eup %5977  ;;  %vm2650_vm0 = vweird.f32 %v5976_v36  ;;  %v9681_v35 = vld [vmem:[#allocation164_spill] sm:$0xff] }
 0x644   : >> { %v2622_v28 = vsel %vm2621_vm12, %v5972_v21, %v2618_v6  ;;  %vm2651_vm2 = vmor %vm2649_vm1, %vm2650_vm0 }
 0x645   : >> { %v2646_v23 = vsub.f32 1.0, %v2645_v16  ;;  %v2627_v43 = vsel %vm2624_vm14, %v2626_v12, %v2622_v28  ;;  %v2637_v60 = vsel %vm2636_vm13, %v5974_v0, %v2633_v14 }
 0x646   : >> { %v2642_v22 = vsel %vm2639_vm15, %v2641_v27, %v2637_v60  ;;  %v2661_v57 = vmul.f32 %v5978_v30, %v2627_v43 }
 0x647   : >> { %v2647_v63 = vmul.f32 %v5976_v36, %v2646_v23  ;;  %v2660_v41 = vmul.f32 %v2642_v22, %v8337_v40 }
 0x649   : >> { %v8346_v8 = vadd.f32 %v2661_v57, %v2660_v41  ;;  %v2648_v59 = vadd.f32 %v5976_v36, %v2647_v63 }
 0x64b   : >> { %5979 = vtanh.f32 %v8346_v8  ;;  %v2652_v52 = vsel %vm2651_vm2, %v5976_v36, %v2648_v59 }
 0x64c   : >> { %v2657_v48 = vsel %vm2654_vm3, %v2656_v38, %v2652_v52 }
 0x651   : >> { %v5980_v32 = vpop.eup %5979 }
 0x652   : >> { %v2664_v39 = vmul.f32 %v5980_v32, %v2657_v48  ;;  %v8365_v32 = vld [vmem:[#allocation9] sm:$0xf] (%p1844_p13)  ;;  %v8367_v48 = vld [vmem:[#allocation9 + $0xc] sm:$0xf] (%p1844_p13) }
 0x653   : > { %9683 = vst [vmem:[#allocation23_spill] sm:$0xff] (%p1844_p13), %v8365_v32  ;;  %v8505_v32 = vld [vmem:[#allocation10 + $0x14] sm:$0xf0] (%p1844_p13) }
 0x654   : >> { %5005 = vst [vmem:[%s8031_s11 + $0x10] sm:$0xff] %v2664_v39  ;;  %v2675_v61 = vpack.c.bf16 %v2664_v39, %v2664_v39  ;;  %v8369_v39 = vld [vmem:[#allocation9 + $0x8] sm:$0xf] (%p1844_p13) }
 0x655   : > { %9684 = vst [vmem:[#allocation24_spill] sm:$0xff] (%p1844_p13), %v8367_v48  ;;  %v8491_v48 = vld [vmem:[#allocation10 + $0x4] sm:$0xf] (%p1844_p13) }
 0x656   : >> { %2684 = vmatmul.bf16.vlgmr.msra.gmra.mxu0 %v2675_v61  ;;  %2697 = vmatmul.bf16.vlgmr.msra.gmra.mxu1 %v2675_v61  ;;  %9685 = vst [vmem:[#allocation25_spill] sm:$0xff] (%p1844_p13), %v8369_v39  ;;  %v8497_v39 = vld [vmem:[#allocation10 + $0x8] sm:$0xf] (%p1844_p13) }
 0x657   : >> { %2710 = vmatmul.bf16.vlgmr.msra.gmra.mxu2 %v2675_v61  ;;  %2723 = vmatmul.bf16.vlgmr.msra.gmra.mxu3 %v2675_v61  ;;  %v8371_v61 = vld [vmem:[#allocation9 + $0x10] sm:$0xf0] (%p1844_p13)  ;;  %9746 = vst [vmem:[#allocation86_spill] sm:$0xff] (%p1844_p13), %v8491_v48  ;;  %v8513_v48 = vld [vmem:[#allocation10 + $0x28] sm:$0xf] (%p1844_p13) }
 0x658   : > { %9686 = vst [vmem:[#allocation26_spill] sm:$0xff] (%p1844_p13), %v8371_v61  ;;  %v8501_v61 = vld [vmem:[#allocation10 + $0xc] sm:$0xf0] (%p1844_p13) }
 0x659   : > { %9749 = vst [vmem:[#allocation89_spill] sm:$0xff] (%p1844_p13), %v8497_v39  ;;  %v8519_v39 = vld [vmem:[#allocation10 + $0x38] sm:$0xf0] (%p1844_p13) }
 0x65a   : > { %9751 = vst [vmem:[#allocation91_spill] sm:$0xff] (%p1844_p13), %v8501_v61  ;;  %v8523_v61 = vld [vmem:[#allocation10 + $0x44] sm:$0xf] (%p1844_p13) }
 0x65b   : > { %9753 = vst [vmem:[#allocation93_spill] sm:$0xff] (%p1844_p13), %v8505_v32  ;;  %v8527_v32 = vld [vmem:[#allocation10 + $0x4c] sm:$0xf] (%p1844_p13) }
 0x65c   : > { %9757 = vst [vmem:[#allocation97_spill] sm:$0xff] (%p1844_p13), %v8513_v48  ;;  %v8535_v48 = vld [vmem:[#allocation10 + $0x58] sm:$0xf0] (%p1844_p13) }
 0x65d   : > { %9760 = vst [vmem:[#allocation100_spill] sm:$0xff] (%p1844_p13), %v8519_v39  ;;  %v8541_v39 = vld [vmem:[#allocation10 + $0x60] sm:$0xf] (%p1844_p13) }
 0x65e   : > { %9762 = vst [vmem:[#allocation102_spill] sm:$0xff] (%p1844_p13), %v8523_v61  ;;  %v8545_v61 = vld [vmem:[#allocation10 + $0x68] sm:$0xf] (%p1844_p13) }
 0x65f   : > { %9764 = vst [vmem:[#allocation104_spill] sm:$0xff] (%p1844_p13), %v8527_v32  ;;  %v8549_v32 = vld [vmem:[#allocation10 + $0x6c] sm:$0xf0] (%p1844_p13) }
 0x660   : > { %9768 = vst [vmem:[#allocation108_spill] sm:$0xff] (%p1844_p13), %v8535_v48  ;;  %v8557_v48 = vld [vmem:[#allocation10 + $0x80] sm:$0xf] (%p1844_p13) }
 0x661   : > { %9771 = vst [vmem:[#allocation111_spill] sm:$0xff] (%p1844_p13), %v8541_v39  ;;  %v8563_v39 = vld [vmem:[#allocation10 + $0x90] sm:$0xf0] (%p1844_p13) }
 0x662   : > { %9773 = vst [vmem:[#allocation113_spill] sm:$0xff] (%p1844_p13), %v8545_v61  ;;  %v8567_v61 = vld [vmem:[#allocation10 + $0x98] sm:$0xf0] (%p1844_p13) }
 0x663   : > { %9775 = vst [vmem:[#allocation115_spill] sm:$0xff] (%p1844_p13), %v8549_v32  ;;  %v8571_v32 = vld [vmem:[#allocation10 + $0xa4] sm:$0xf] (%p1844_p13) }
 0x664   : > { %9779 = vst [vmem:[#allocation119_spill] sm:$0xff] (%p1844_p13), %v8557_v48  ;;  %v8579_v48 = vld [vmem:[#allocation10 + $0xb0] sm:$0xf0] (%p1844_p13) }
 0x665   : > { %9782 = vst [vmem:[#allocation122_spill] sm:$0xff] (%p1844_p13), %v8563_v39  ;;  %v8585_v39 = vld [vmem:[#allocation10 + $0xb4] sm:$0xf0] (%p1844_p13) }
 0x666   : > { %9784 = vst [vmem:[#allocation124_spill] sm:$0xff] (%p1844_p13), %v8567_v61  ;;  %v8589_v61 = vld [vmem:[#allocation10 + $0xc0] sm:$0xf] (%p1844_p13) }
 0x667   : > { %9786 = vst [vmem:[#allocation126_spill] sm:$0xff] (%p1844_p13), %v8571_v32  ;;  %v8593_v32 = vld [vmem:[#allocation10 + $0xc8] sm:$0xf] (%p1844_p13) }
 0x668   : > { %9790 = vst [vmem:[#allocation130_spill] sm:$0xff] (%p1844_p13), %v8579_v48  ;;  %v8601_v48 = vld [vmem:[#allocation10 + $0xd4] sm:$0xf0] (%p1844_p13) }
 0x669   : > { %9793 = vst [vmem:[#allocation133_spill] sm:$0xff] (%p1844_p13), %v8585_v39  ;;  %v8607_v39 = vld [vmem:[#allocation10 + $0xec] sm:$0xf] (%p1844_p13) }
 0x66a   : > { %9795 = vst [vmem:[#allocation135_spill] sm:$0xff] (%p1844_p13), %v8589_v61  ;;  %v8611_v61 = vld [vmem:[#allocation10 + $0xf0] sm:$0xf0] (%p1844_p13) }
 0x66b   : > { %9797 = vst [vmem:[#allocation137_spill] sm:$0xff] (%p1844_p13), %v8593_v32  ;;  %v8615_v32 = vld [vmem:[#allocation10 + $0xf8] sm:$0xf0] (%p1844_p13) }
 0x66c   : > { %9801 = vst [vmem:[#allocation141_spill] sm:$0xff] (%p1844_p13), %v8601_v48  ;;  %v8624_v48 = vmov (%p1844_p13), 0.0  }
 0x66d   : > { %9804 = vst [vmem:[#allocation144_spill] sm:$0xff] (%p1844_p13), %v8607_v39 }
 0x66e   : > { %9806 = vst [vmem:[#allocation146_spill] sm:$0xff] (%p1844_p13), %v8611_v61 }
 0x66f   : > { %9808 = vst [vmem:[#allocation148_spill] sm:$0xff] (%p1844_p13), %v8615_v32 }
 0x6d3   : >> { %v2685_v40 = vpop.f32.mrf.mxu0  ;;  %v2698_v15 = vpop.f32.mrf.mxu1 }
 0x6d4   : >> { %v2728_v62 = vadd.f32 %v2685_v40, %v9678_v56  ;;  %v2729_v10 = vadd.f32 %v2698_v15, %v9679_v37  ;;  %v8373_v40 = vld [vmem:[#allocation9 + $0xc] sm:$0xf0] (%p1844_p13)  ;;  %v8375_v15 = vld [vmem:[#allocation9 + $0x18] sm:$0xf0] (%p1844_p13)  ;;  %v8377_v56 = vld [vmem:[#allocation9 + $0x14] sm:$0xf0] (%p1844_p13) }
 0x6d5   : > { %9687 = vst [vmem:[#allocation27_spill] sm:$0xff] (%p1844_p13), %v8373_v40  ;;  %v8381_v37 = vld [vmem:[#allocation9 + $0x20] sm:$0xf] (%p1844_p13)  ;;  %v8503_v40 = vld [vmem:[#allocation10 + $0x18] sm:$0xf0] (%p1844_p13) }
 0x6d6   : >> { %v5006_v45 = vmul.f32 -1.442695, %v2728_v62  ;;  %v5007_v55 = vmul.f32 -1.442695, %v2729_v10  ;;  %9688 = vst [vmem:[#allocation28_spill] sm:$0xff] (%p1844_p13), %v8375_v15 }
 0x6d7   : > { %9689 = vst [vmem:[#allocation29_spill] sm:$0xff] (%p1844_p13), %v8377_v56  ;;  %v8379_v62 = vld [vmem:[#allocation9 + $0x24] sm:$0xf] (%p1844_p13)  ;;  %v8383_v10 = vld [vmem:[#allocation9 + $0x2c] sm:$0xf] (%p1844_p13) }
 0x6d8   : >> { %5981 = vpow2.f32 %v5006_v45  ;;  %9690 = vst [vmem:[#allocation30_spill] sm:$0xff] (%p1844_p13), %v8379_v62  ;;  %v8385_v45 = vld [vmem:[#allocation9 + $0x28] sm:$0xf] (%p1844_p13)  ;;  %v8493_v15 = vld [vmem:[#allocation10] sm:$0xf] (%p1844_p13) }
 0x6d9   : >> { %5983 = vpow2.f32 %v5007_v55  ;;  %9691 = vst [vmem:[#allocation31_spill] sm:$0xff] (%p1844_p13), %v8381_v37  ;;  %v8387_v55 = vld [vmem:[#allocation9 + $0x30] sm:$0xf0] (%p1844_p13)  ;;  %v8495_v56 = vld [vmem:[#allocation10 + $0xc] sm:$0xf] (%p1844_p13) }
 0x6da   : >> { %v2711_v7 = vpop.f32.mrf.mxu2  ;;  %v2724_v54 = vpop.f32.mrf.mxu3  ;;  %9692 = vst [vmem:[#allocation32_spill] sm:$0xff] (%p1844_p13), %v8383_v10  ;;  %v8507_v10 = vld [vmem:[#allocation10 + $0x24] sm:$0xf] (%p1844_p13) }
 0x6db   : >> { %v2730_v20 = vadd.f32 %v2711_v7, %v9680_v58  ;;  %v2687_v13 = vpop.f32.mrf.mxu0  ;;  %v2700_v17 = vpop.f32.mrf.mxu1  ;;  %v2731_v21 = vadd.f32 %v2724_v54, %v9681_v35  ;;  %9693 = vst [vmem:[#allocation33_spill] sm:$0xff] (%p1844_p13), %v8385_v45  ;;  %v8389_v7 = vld [vmem:[#allocation9 + $0x2c] sm:$0xf0] (%p1844_p13)  ;;  %v8391_v54 = vld [vmem:[#allocation9 + $0x38] sm:$0xf0] (%p1844_p13) }
 0x6dc   : > { %9694 = vst [vmem:[#allocation34_spill] sm:$0xff] (%p1844_p13), %v8387_v55  ;;  %v8393_v58 = vld [vmem:[#allocation9 + $0x34] sm:$0xf0] (%p1844_p13)  ;;  %v8397_v13 = vld [vmem:[#allocation9 + $0x40] sm:$0xf] (%p1844_p13) }
 0x6dd   : >> { %v5008_v11 = vmul.f32 -1.442695, %v2730_v20  ;;  %9695 = vst [vmem:[#allocation35_spill] sm:$0xff] (%p1844_p13), %v8389_v7  ;;  %v8395_v20 = vld [vmem:[#allocation9 + $0x44] sm:$0xf] (%p1844_p13) }
 0x6de   : >> { %v5982_v24 = vpop.eup %5981  ;;  %9696 = vst [vmem:[#allocation36_spill] sm:$0xff] (%p1844_p13), %v8391_v54  ;;  %v8399_v17 = vld [vmem:[#allocation9 + $0x4c] sm:$0xf] (%p1844_p13)  ;;  %v8421_v35 = vld [vmem:[#allocation9 + $0x6c] sm:$0xf0] (%p1844_p13) }
 0x6df   : >> { %v5984_v31 = vpop.eup %5983  ;;  %v2741_v29 = vadd.f32 1.0, %v5982_v24  ;;  %5985 = vpow2.f32 %v5008_v11  ;;  %9697 = vst [vmem:[#allocation37_spill] sm:$0xff] (%p1844_p13), %v8393_v58  ;;  %v8401_v11 = vld [vmem:[#allocation9 + $0x48] sm:$0xf] (%p1844_p13)  ;;  %v8403_v24 = vld [vmem:[#allocation9 + $0x50] sm:$0xf0] (%p1844_p13) }
 0x6e0   : >> { %v2742_v33 = vadd.f32 1.0, %v5984_v31  ;;  %9698 = vst [vmem:[#allocation38_spill] sm:$0xff] (%p1844_p13), %v8395_v20  ;;  %v8405_v31 = vld [vmem:[#allocation9 + $0x4c] sm:$0xf0] (%p1844_p13)  ;;  %v8509_v54 = vld [vmem:[#allocation10 + $0x20] sm:$0xf] (%p1844_p13) }
 0x6e1   : >> { %5987 = vrcp.f32 %v2741_v29  ;;  %v2755_v19 = vand.u32 2147483648, %v2741_v29  ;;  %v2753_v51 = vand.u32 2147483647, %v2741_v29  ;;  %vm2749_vm6 = vweird.f32 %v2741_v29  ;;  %9699 = vst [vmem:[#allocation39_spill] sm:$0xff] (%p1844_p13), %v8397_v13  ;;  %v8511_v58 = vld [vmem:[#allocation10 + $0x2c] sm:$0xf] (%p1844_p13) }
 0x6e2   : >> { %5989 = vrcp.f32 %v2742_v33  ;;  %v2713_v3 = vpop.f32.mrf.mxu2  ;;  %v2726_v4 = vpop.f32.mrf.mxu3  ;;  %v2770_v1 = vand.u32 2147483648, %v2742_v33  ;;  %v2768_v44 = vand.u32 2147483647, %v2742_v33  ;;  %vm2764_vm7 = vweird.f32 %v2742_v33  ;;  %9700 = vst [vmem:[#allocation40_spill] sm:$0xff] (%p1844_p13), %v8399_v17 }
 0x6e3   : >> { %v2756_v6 = vor.u32 1.1754944e-38, %v2755_v19  ;;  %vm2754_vm10 = vcmp.eq.f32.partialorder %v2753_v51, 8.507059e+37  ;;  %9701 = vst [vmem:[#allocation41_spill] sm:$0xff] (%p1844_p13), %v8401_v11  ;;  %v8411_v3 = vld [vmem:[#allocation9 + $0x64] sm:$0xf] (%p1844_p13) }
 0x6e4   : >> { %v2771_v12 = vor.u32 1.1754944e-38, %v2770_v1  ;;  %vm2769_vm11 = vcmp.eq.f32.partialorder %v2768_v44, 8.507059e+37  ;;  %9702 = vst [vmem:[#allocation42_spill] sm:$0xff] (%p1844_p13), %v8403_v24  ;;  %v8413_v4 = vld [vmem:[#allocation9 + $0x60] sm:$0xf] (%p1844_p13) }
 0x6e5   : >> { %v5986_v53 = vpop.eup %5985  ;;  %9703 = vst [vmem:[#allocation43_spill] sm:$0xff] (%p1844_p13), %v8405_v31  ;;  %v8435_v19 = vld [vmem:[#allocation9 + $0x90] sm:$0xf0] (%p1844_p13)  ;;  %v8437_v1 = vld [vmem:[#allocation9 + $0x8c] sm:$0xf0] (%p1844_p13) }
 0x6e6   : >> { %v2743_v34 = vadd.f32 1.0, %v5986_v53  ;;  %9706 = vst [vmem:[#allocation46_spill] sm:$0xff] (%p1844_p13), %v8411_v3  ;;  %v8415_v53 = vld [vmem:[#allocation9 + $0x6c] sm:$0xf] (%p1844_p13)  ;;  %v8441_v51 = vld [vmem:[#allocation9 + $0x94] sm:$0xf0] (%p1844_p13) }
 0x6e7   : >> { %v5988_v42 = vpop.eup %5987  ;;  %9707 = vst [vmem:[#allocation47_spill] sm:$0xff] (%p1844_p13), %v8413_v4  ;;  %v8445_v44 = vld [vmem:[#allocation9 + $0xa0] sm:$0xf] (%p1844_p13) }
 0x6e8   : >> { %v5990_v46 = vpop.eup %5989  ;;  %v2745_v47 = vmul.f32 %v5988_v42, %v2741_v29  ;;  %5991 = vrcp.f32 %v2743_v34  ;;  %vm2750_vm4 = vweird.f32 %v5988_v42  ;;  %v2785_v41 = vand.u32 2147483648, %v2743_v34  ;;  %v8407_v29 = vld [vmem:[#allocation9 + $0x58] sm:$0xf0] (%p1844_p13)  ;;  %9708 = vst [vmem:[#allocation48_spill] sm:$0xff] (%p1844_p13), %v8415_v53 }
 0x6e9   : >> { %v2760_v0 = vmul.f32 %v5990_v46, %v2742_v33  ;;  %5993 = vtanh.f32 %v2731_v21  ;;  %vm2765_vm5 = vweird.f32 %v5990_v46  ;;  %vm2751_vm8 = vmor %vm2749_vm6, %vm2750_vm4  ;;  %vm2779_vm13 = vweird.f32 %v2743_v34  ;;  %9704 = vst [vmem:[#allocation44_spill] sm:$0xff] (%p1844_p13), %v8407_v29  ;;  %v8409_v33 = vld [vmem:[#allocation9 + $0x54] sm:$0xf0] (%p1844_p13) }
 0x6ea   : >> { %v2746_v9 = vsub.f32 1.0, %v2745_v47  ;;  %vm2766_vm9 = vmor %vm2764_vm7, %vm2765_vm5  ;;  %v2783_v59 = vand.u32 2147483647, %v2743_v34  ;;  %v2786_v18 = vor.u32 1.1754944e-38, %v2785_v41  ;;  %9705 = vst [vmem:[#allocation45_spill] sm:$0xff] (%p1844_p13), %v8409_v33 }
 0x6eb   : >> { %v2761_v25 = vsub.f32 1.0, %v2760_v0  ;;  %9711 = vst [vmem:[#allocation51_spill] sm:$0xff] (%p1844_p13), %v8421_v35  ;;  %v8427_v47 = vld [vmem:[#allocation9 + $0x84] sm:$0xf] (%p1844_p13)  ;;  %v8429_v0 = vld [vmem:[#allocation9 + $0x80] sm:$0xf] (%p1844_p13) }
 0x6ec   : >> { %v2747_v2 = vmul.f32 %v5988_v42, %v2746_v9  ;;  %vm2784_vm15 = vcmp.eq.f32.partialorder %v2783_v59, 8.507059e+37  ;;  %9714 = vst [vmem:[#allocation54_spill] sm:$0xff] (%p1844_p13), %v8427_v47  ;;  %v8431_v9 = vld [vmem:[#allocation9 + $0x8c] sm:$0xf] (%p1844_p13)  ;;  %v8481_v59 = vld [vmem:[#allocation9 + $0xe8] sm:$0xf] (%p1844_p13) }
 0x6ed   : >> { %v2762_v49 = vmul.f32 %v5990_v46, %v2761_v25  ;;  %9715 = vst [vmem:[#allocation55_spill] sm:$0xff] (%p1844_p13), %v8429_v0  ;;  %v8433_v25 = vld [vmem:[#allocation9 + $0x88] sm:$0xf] (%p1844_p13)  ;;  %v8479_v41 = vld [vmem:[#allocation9 + $0xec] sm:$0xf] (%p1844_p13) }
 0x6ee   : >> { %v5992_v5 = vpop.eup %5991  ;;  %v2748_v26 = vadd.f32 %v5988_v42, %v2747_v2  ;;  %9716 = vst [vmem:[#allocation56_spill] sm:$0xff] (%p1844_p13), %v8431_v9  ;;  %v8439_v2 = vld [vmem:[#allocation9 + $0x98] sm:$0xf0] (%p1844_p13) }
 0x6ef   : >> { %v2775_v36 = vmul.f32 %v5992_v5, %v2743_v34  ;;  %v2763_v16 = vadd.f32 %v5990_v46, %v2762_v49  ;;  %v5994_v27 = vpop.eup %5993  ;;  %vm2780_vm12 = vweird.f32 %v5992_v5  ;;  %v8417_v34 = vld [vmem:[#allocation9 + $0x68] sm:$0xf] (%p1844_p13)  ;;  %9717 = vst [vmem:[#allocation57_spill] sm:$0xff] (%p1844_p13), %v8433_v25 }
 0x6f0   : >> { %v2752_v14 = vsel %vm2751_vm8, %v5988_v42, %v2748_v26  ;;  %vm2781_vm14 = vmor %vm2779_vm13, %vm2780_vm12  ;;  %9709 = vst [vmem:[#allocation49_spill] sm:$0xff] (%p1844_p13), %v8417_v34  ;;  %v8419_v42 = vld [vmem:[#allocation9 + $0x70] sm:$0xf0] (%p1844_p13)  ;;  %v8449_v26 = vld [vmem:[#allocation9 + $0xa8] sm:$0xf] (%p1844_p13) }
 0x6f1   : >> { %v2776_v28 = vsub.f32 1.0, %v2775_v36  ;;  %v2757_v30 = vsel %vm2754_vm10, %v2756_v6, %v2752_v14  ;;  %v2767_v23 = vsel %vm2766_vm9, %v5990_v46, %v2763_v16  ;;  %9710 = vst [vmem:[#allocation50_spill] sm:$0xff] (%p1844_p13), %v8419_v42  ;;  %v8425_v46 = vld [vmem:[#allocation9 + $0x74] sm:$0xf0] (%p1844_p13)  ;;  %v8451_v36 = vld [vmem:[#allocation9 + $0xb0] sm:$0xf0] (%p1844_p13) }
 0x6f2   : >> { %v2772_v43 = vsel %vm2769_vm11, %v2771_v12, %v2767_v23  ;;  %v2791_v60 = vmul.f32 %v5994_v27, %v2757_v30  ;;  %9713 = vst [vmem:[#allocation53_spill] sm:$0xff] (%p1844_p13), %v8425_v46  ;;  %v8453_v6 = vld [vmem:[#allocation9 + $0xac] sm:$0xf0] (%p1844_p13)  ;;  %v8455_v16 = vld [vmem:[#allocation9 + $0xb8] sm:$0xf0] (%p1844_p13) }
 0x6f3   : >> { %v2777_v22 = vmul.f32 %v5992_v5, %v2776_v28  ;;  %v2790_v57 = vmul.f32 %v2772_v43, %v8346_v8  ;;  %v8363_v8 = vld [vmem:[#allocation9 + $0x4] sm:$0xf] (%p1844_p13)  ;;  %9718 = vst [vmem:[#allocation58_spill] sm:$0xff] (%p1844_p13), %v8435_v19  ;;  %v8457_v12 = vld [vmem:[#allocation9 + $0xb4] sm:$0xf0] (%p1844_p13) }
 0x6f4   : > { %9682 = vst [vmem:[#allocation22_spill] sm:$0xff] (%p1844_p13), %v8363_v8  ;;  %v8459_v14 = vld [vmem:[#allocation9 + $0xc4] sm:$0xf] (%p1844_p13)  ;;  %v8461_v27 = vld [vmem:[#allocation9 + $0xc0] sm:$0xf] (%p1844_p13) }
 0x6f5   : >> { %v2792_v49 = vadd.f32 %v2791_v60, %v2790_v57   ;;  %v2778_v63 = vadd.f32 %v5992_v5, %v2777_v22  ;;  %9719 = vst [vmem:[#allocation59_spill] sm:$0xff] (%p1844_p13), %v8437_v1  ;;  %v8463_v28 = vld [vmem:[#allocation9 + $0xcc] sm:$0xf] (%p1844_p13)  ;;  %v8465_v30 = vld [vmem:[#allocation9 + $0xc8] sm:$0xf] (%p1844_p13) }
 0x6f6   : > { %9720 = vst [vmem:[#allocation60_spill] sm:$0xff] (%p1844_p13), %v8439_v2  ;;  %v8467_v23 = vld [vmem:[#allocation9 + $0xd0] sm:$0xf0] (%p1844_p13)  ;;  %v8469_v43 = vld [vmem:[#allocation9 + $0xcc] sm:$0xf0] (%p1844_p13) }
 0x6f7   : >> { %5995 = vtanh.f32 %v2792_v49  ;;  %v2782_v50 = vsel %vm2781_vm14, %v5992_v5, %v2778_v63  ;;  %9721 = vst [vmem:[#allocation61_spill] sm:$0xff] (%p1844_p13), %v8441_v51  ;;  %v8443_v49 = vld [vmem:[#allocation9 + $0xa4] sm:$0xf] (%p1844_p13)  ;;  %v8447_v5 = vld [vmem:[#allocation9 + $0xac] sm:$0xf] (%p1844_p13) }
 0x6f8   : >> { %v2787_v38 = vsel %vm2784_vm15, %v2786_v18, %v2782_v50  ;;  %9722 = vst [vmem:[#allocation62_spill] sm:$0xff] (%p1844_p13), %v8443_v49  ;;  %v8471_v60 = vld [vmem:[#allocation9 + $0xd8] sm:$0xf0] (%p1844_p13)  ;;  %v8473_v22 = vld [vmem:[#allocation9 + $0xd4] sm:$0xf0] (%p1844_p13) }
 0x6f9   : > { %9723 = vst [vmem:[#allocation63_spill] sm:$0xff] (%p1844_p13), %v8445_v44  ;;  %v8475_v57 = vld [vmem:[#allocation9 + $0xe4] sm:$0xf] (%p1844_p13)  ;;  %v8477_v63 = vld [vmem:[#allocation9 + $0xe0] sm:$0xf] (%p1844_p13) }
 0x6fa   : > { %9724 = vst [vmem:[#allocation64_spill] sm:$0xff] (%p1844_p13), %v8447_v5  ;;  %v8483_v50 = vld [vmem:[#allocation9 + $0xf0] sm:$0xf0] (%p1844_p13)  ;;  %v8485_v18 = vld [vmem:[#allocation9 + $0xec] sm:$0xf0] (%p1844_p13) }
 0x6fb   : > { %9725 = vst [vmem:[#allocation65_spill] sm:$0xff] (%p1844_p13), %v8449_v26  ;;  %v8499_v8 = vld [vmem:[#allocation10 + $0x10] sm:$0xf0] (%p1844_p13) }
 0x6fc   : > { %1846 = sbr.rel (!%p1844_p13) target bundleno = 1038 (0x40e), region = 249  ;;  %9726 = vst [vmem:[#allocation66_spill] sm:$0xff] (%p1844_p13), %v8451_v36 }
 0x6fd   : >> { %v5996_v52 = vpop.eup %5995  ;;  %9727 = vst [vmem:[#allocation67_spill] sm:$0xff] (%p1844_p13), %v8453_v6 }
 0x6fe   : >> { %v2794_v21 = vmul.f32 %v5996_v52, %v2787_v38   ;;  %9728 = vst [vmem:[#allocation68_spill] sm:$0xff] (%p1844_p13), %v8455_v16  ;;  %v8487_v52 = vld [vmem:[#allocation9 + $0xf8] sm:$0xf0] (%p1844_p13)  ;;  %v8489_v38 = vld [vmem:[#allocation9 + $0xf4] sm:$0xf0] (%p1844_p13) }
 0x6ff   : > { %9729 = vst [vmem:[#allocation69_spill] sm:$0xff] (%p1844_p13), %v8457_v12 }
 0x700   : >> { %5010 = vst [vmem:[%s8031_s11 + $0x18] sm:$0xff] %v2794_v21  ;;  %v8423_v21 = vld [vmem:[#allocation9 + $0x78] sm:$0xf0] (%p1844_p13) }
 0x701   : > { %9712 = vst [vmem:[#allocation52_spill] sm:$0xff] %v8423_v21 }
 0x702   : > { %9730 = vst [vmem:[#allocation70_spill] sm:$0xff] %v8459_v14 }
 0x703   : > { %9731 = vst [vmem:[#allocation71_spill] sm:$0xff] %v8461_v27 }
 0x704   : > { %9732 = vst [vmem:[#allocation72_spill] sm:$0xff] %v8463_v28 }
 0x705   : > { %9733 = vst [vmem:[#allocation73_spill] sm:$0xff] %v8465_v30 }
 0x706   : > { %9734 = vst [vmem:[#allocation74_spill] sm:$0xff] %v8467_v23 }
 0x707   : > { %9735 = vst [vmem:[#allocation75_spill] sm:$0xff] %v8469_v43 }
 0x708   : > { %9736 = vst [vmem:[#allocation76_spill] sm:$0xff] %v8471_v60 }
 0x709   : > { %9737 = vst [vmem:[#allocation77_spill] sm:$0xff] %v8473_v22 }
 0x70a   : > { %9738 = vst [vmem:[#allocation78_spill] sm:$0xff] %v8475_v57 }
 0x70b   : > { %9739 = vst [vmem:[#allocation79_spill] sm:$0xff] %v8477_v63 }
 0x70c   : > { %9740 = vst [vmem:[#allocation80_spill] sm:$0xff] %v8479_v41 }
 0x70d   : > { %9741 = vst [vmem:[#allocation81_spill] sm:$0xff] %v8481_v59 }
 0x70e   : > { %9742 = vst [vmem:[#allocation82_spill] sm:$0xff] %v8483_v50 }
 0x70f   : > { %9743 = vst [vmem:[#allocation83_spill] sm:$0xff] %v8485_v18 }
 0x710   : > { %9744 = vst [vmem:[#allocation84_spill] sm:$0xff] %v8487_v52 }
 0x711   : > { %9745 = vst [vmem:[#allocation85_spill] sm:$0xff] %v8489_v38 }
 0x712   : > { %9747 = vst [vmem:[#allocation87_spill] sm:$0xff] %v8493_v15  ;;  %v8515_v15 = vld [vmem:[#allocation10 + $0x30] sm:$0xf0] }
 0x713   : > { %9748 = vst [vmem:[#allocation88_spill] sm:$0xff] %v8495_v56  ;;  %v8517_v56 = vld [vmem:[#allocation10 + $0x2c] sm:$0xf0] }
 0x714   : > { %9750 = vst [vmem:[#allocation90_spill] sm:$0xff] %v8499_v8  ;;  %v8521_v8 = vld [vmem:[#allocation10 + $0x34] sm:$0xf0] }
 0x715   : > { %9752 = vst [vmem:[#allocation92_spill] sm:$0xff] %v8503_v40  ;;  %v8525_v40 = vld [vmem:[#allocation10 + $0x40] sm:$0xf] }
 0x716   : > { %9754 = vst [vmem:[#allocation94_spill] sm:$0xff] %v8507_v10  ;;  %v8529_v10 = vld [vmem:[#allocation10 + $0x48] sm:$0xf] }
 0x717   : > { %9755 = vst [vmem:[#allocation95_spill] sm:$0xff] %v8509_v54  ;;  %v8531_v54 = vld [vmem:[#allocation10 + $0x50] sm:$0xf0] }
 0x718   : > { %9756 = vst [vmem:[#allocation96_spill] sm:$0xff] %v8511_v58  ;;  %v8533_v58 = vld [vmem:[#allocation10 + $0x4c] sm:$0xf0] }
 0x719   : > { %9758 = vst [vmem:[#allocation98_spill] sm:$0xff] %v8515_v15  ;;  %v8537_v15 = vld [vmem:[#allocation10 + $0x54] sm:$0xf0] }
 0x71a   : > { %9759 = vst [vmem:[#allocation99_spill] sm:$0xff] %v8517_v56  ;;  %v8539_v56 = vld [vmem:[#allocation10 + $0x64] sm:$0xf] }
 0x71b   : > { %9761 = vst [vmem:[#allocation101_spill] sm:$0xff] %v8521_v8  ;;  %v8543_v8 = vld [vmem:[#allocation10 + $0x6c] sm:$0xf] }
 0x71c   : > { %9763 = vst [vmem:[#allocation103_spill] sm:$0xff] %v8525_v40  ;;  %v8547_v40 = vld [vmem:[#allocation10 + $0x70] sm:$0xf0] }
 0x71d   : > { %9765 = vst [vmem:[#allocation105_spill] sm:$0xff] %v8529_v10  ;;  %v8551_v10 = vld [vmem:[#allocation10 + $0x78] sm:$0xf0] }
 0x71e   : > { %9766 = vst [vmem:[#allocation106_spill] sm:$0xff] %v8531_v54  ;;  %v8553_v54 = vld [vmem:[#allocation10 + $0x74] sm:$0xf0] }
 0x71f   : > { %9767 = vst [vmem:[#allocation107_spill] sm:$0xff] %v8533_v58  ;;  %v8555_v58 = vld [vmem:[#allocation10 + $0x84] sm:$0xf] }
 0x720   : > { %9769 = vst [vmem:[#allocation109_spill] sm:$0xff] %v8537_v15  ;;  %v8559_v15 = vld [vmem:[#allocation10 + $0x8c] sm:$0xf] }
 0x721   : > { %9770 = vst [vmem:[#allocation110_spill] sm:$0xff] %v8539_v56  ;;  %v8561_v56 = vld [vmem:[#allocation10 + $0x88] sm:$0xf] }
 0x722   : > { %9772 = vst [vmem:[#allocation112_spill] sm:$0xff] %v8543_v8  ;;  %v8565_v8 = vld [vmem:[#allocation10 + $0x8c] sm:$0xf0] }
 0x723   : > { %9774 = vst [vmem:[#allocation114_spill] sm:$0xff] %v8547_v40  ;;  %v8569_v40 = vld [vmem:[#allocation10 + $0x94] sm:$0xf0] }
 0x724   : > { %9776 = vst [vmem:[#allocation116_spill] sm:$0xff] %v8551_v10  ;;  %v8573_v10 = vld [vmem:[#allocation10 + $0xa0] sm:$0xf] }
 0x725   : > { %9777 = vst [vmem:[#allocation117_spill] sm:$0xff] %v8553_v54  ;;  %v8575_v54 = vld [vmem:[#allocation10 + $0xac] sm:$0xf] }
 0x726   : > { %9778 = vst [vmem:[#allocation118_spill] sm:$0xff] %v8555_v58  ;;  %v8577_v58 = vld [vmem:[#allocation10 + $0xa8] sm:$0xf] }
 0x727   : > { %9780 = vst [vmem:[#allocation120_spill] sm:$0xff] %v8559_v15  ;;  %v8581_v15 = vld [vmem:[#allocation10 + $0xac] sm:$0xf0] }
 0x728   : > { %9781 = vst [vmem:[#allocation121_spill] sm:$0xff] %v8561_v56  ;;  %v8583_v56 = vld [vmem:[#allocation10 + $0xb8] sm:$0xf0] }
 0x729   : > { %9783 = vst [vmem:[#allocation123_spill] sm:$0xff] %v8565_v8  ;;  %v8587_v8 = vld [vmem:[#allocation10 + $0xc4] sm:$0xf] }
 0x72a   : > { %9785 = vst [vmem:[#allocation125_spill] sm:$0xff] %v8569_v40  ;;  %v8591_v40 = vld [vmem:[#allocation10 + $0xcc] sm:$0xf] }
 0x72b   : > { %9787 = vst [vmem:[#allocation127_spill] sm:$0xff] %v8573_v10  ;;  %v8595_v10 = vld [vmem:[#allocation10 + $0xd0] sm:$0xf0] }
 0x72c   : > { %9788 = vst [vmem:[#allocation128_spill] sm:$0xff] %v8575_v54  ;;  %v8597_v54 = vld [vmem:[#allocation10 + $0xcc] sm:$0xf0] }
 0x72d   : > { %9789 = vst [vmem:[#allocation129_spill] sm:$0xff] %v8577_v58  ;;  %v8599_v58 = vld [vmem:[#allocation10 + $0xd8] sm:$0xf0] }
 0x72e   : > { %9791 = vst [vmem:[#allocation131_spill] sm:$0xff] %v8581_v15  ;;  %v8603_v15 = vld [vmem:[#allocation10 + $0xe4] sm:$0xf] }
 0x72f   : > { %9792 = vst [vmem:[#allocation132_spill] sm:$0xff] %v8583_v56  ;;  %v8605_v56 = vld [vmem:[#allocation10 + $0xe0] sm:$0xf] }
 0x730   : > { %9794 = vst [vmem:[#allocation134_spill] sm:$0xff] %v8587_v8  ;;  %v8609_v8 = vld [vmem:[#allocation10 + $0xe8] sm:$0xf] }
 0x731   : > { %9796 = vst [vmem:[#allocation136_spill] sm:$0xff] %v8591_v40  ;;  %v8613_v40 = vld [vmem:[#allocation10 + $0xec] sm:$0xf0] }
 0x732   : > { %9798 = vst [vmem:[#allocation138_spill] sm:$0xff] %v8595_v10  ;;  %v8617_v10 = vld [vmem:[#allocation10 + $0xf4] sm:$0xf0] }
 0x733   : > { %9799 = vst [vmem:[#allocation139_spill] sm:$0xff] %v8597_v54  ;;  %v8626_v54 = vmov 0.0  }
 0x734   : > { %9800 = vst [vmem:[#allocation140_spill] sm:$0xff] %v8599_v58  ;;  %v8622_v58 = vld [vmem:[%s9089_s9] sm:$0xf] }
 0x735   : > { %9802 = vst [vmem:[#allocation142_spill] sm:$0xff] %v8603_v15 }
 0x736   : > { %9803 = vst [vmem:[#allocation143_spill] sm:$0xff] %v8605_v56 }
 0x737   : > { %9805 = vst [vmem:[#allocation145_spill] sm:$0xff] %v8609_v8 }
 0x738   : > { %9807 = vst [vmem:[#allocation147_spill] sm:$0xff] %v8613_v40 }
 0x739   : > { %9809 = vst [vmem:[#allocation149_spill] sm:$0xff] %v8617_v10 }
 0x73a   : > { %9810 = vst [vmem:[#allocation150_spill] sm:$0xff] %v8622_v58 }
 0x73b LB: >> { %9811 = vst [vmem:[#allocation165_spill] sm:$0xff] %v6376_v48  ;;  %v9813_v63 = vld [vmem:[#allocation79_spill] sm:$0xff]  ;;  %v9815_v50 = vld [vmem:[#allocation82_spill] sm:$0xff]  ;;  %v9817_v59 = vld [vmem:[#allocation81_spill] sm:$0xff]  ;;  %s5011_s23 = sshll.u32 %s6384_s30, 5  ;;  %s2868_s30 = sadd.s32 1, %s6384_s30   ;;  %s6384_s30 = sphi %s8628_s30, %s2868_s30   ;;  %v6380_v54 = vphi %v8626_v54, %v9957_v54   ;;  %v6376_v48 = vphi %v8624_v48, %v3805_v48  }
 0x73c   : >> { %9812 = vst [vmem:[#allocation166_spill] sm:$0xff] %v6380_v54  ;;  %v9814_v18 = vld [vmem:[#allocation83_spill] sm:$0xff]  ;;  %v9816_v57 = vld [vmem:[#allocation78_spill] sm:$0xff]  ;;  %v9818_v38 = vld [vmem:[#allocation85_spill] sm:$0xff]  ;;  %s8700_s24 = scalar_lea.vmem [#allocation3], %s5011_s23  ;;  %p2865_p0 = scmp.ge.s32.totalorder %s2868_s30, 2  }
 0x73d   : >> { %v5127_v58 = vor.u32 %v9814_v18, %v9813_v63  ;;  %v5131_v39 = vor.u32 %v9816_v57, %v9815_v50  ;;  %v5135_v32 = vor.u32 %v9818_v38, %v9817_v59  ;;  %v9819_v52 = vld [vmem:[#allocation84_spill] sm:$0xff]  ;;  %v9821_v27 = vld [vmem:[#allocation71_spill] sm:$0xff]  ;;  %v9823_v23 = vld [vmem:[#allocation74_spill] sm:$0xff]  ;;  %s9958_s0 = sld [smem:[#allocation178_spill]] (%p2865_p0) }
 0x73e   : >> { %v9820_v41 = vld [vmem:[#allocation80_spill] sm:$0xff]  ;;  %v9822_v43 = vld [vmem:[#allocation75_spill] sm:$0xff]  ;;  %v9824_v14 = vld [vmem:[#allocation70_spill] sm:$0xff]  ;;  %s9959_s17 = sld [smem:[#allocation180_spill]] (%p2865_p0) }
 0x73f   : >> { %v5139_v10 = vor.u32 %v9820_v41, %v9819_v52  ;;  %3048 = vmatpush.bf16.msra.mxu0 %v5127_v58  ;;  %3067 = vmatpush.bf16.msra.mxu1 %v5131_v39  ;;  %v5111_v48 = vor.u32 %v9822_v43, %v9821_v27  ;;  %v5115_v54 = vor.u32 %v9824_v14, %v9823_v23  ;;  %v9825_v30 = vld [vmem:[#allocation73_spill] sm:$0xff]  ;;  %v9827_v60 = vld [vmem:[#allocation76_spill] sm:$0xff]  ;;  %v9829_v44 = vld [vmem:[#allocation63_spill] sm:$0xff]  ;;  %s9960_s4 = sld [smem:[#allocation181_spill]] (%p2865_p0) }
 0x740   : >> { %3086 = vmatpush.bf16.msra.mxu2 %v5135_v32  ;;  %v9826_v22 = vld [vmem:[#allocation77_spill] sm:$0xff]  ;;  %v9828_v28 = vld [vmem:[#allocation72_spill] sm:$0xff]  ;;  %v9830_v6 = vld [vmem:[#allocation67_spill] sm:$0xff]  ;;  %s9961_s25 = sld [smem:[#allocation182_spill]] (%p2865_p0) }
 0x741   : >> { %3105 = vmatpush.bf16.msra.mxu3 %v5139_v10  ;;  %v5119_v18 = vor.u32 %v9826_v22, %v9825_v30  ;;  %v5123_v50 = vor.u32 %v9828_v28, %v9827_v60  ;;  %v5095_v58 = vor.u32 %v9830_v6, %v9829_v44  ;;  %v9831_v36 = vld [vmem:[#allocation66_spill] sm:$0xff]  ;;  %v9833_v26 = vld [vmem:[#allocation65_spill] sm:$0xff]  ;;  %v9835_v16 = vld [vmem:[#allocation68_spill] sm:$0xff] }
 0x742   : >> { %v9832_v49 = vld [vmem:[#allocation62_spill] sm:$0xff]  ;;  %v9834_v12 = vld [vmem:[#allocation69_spill] sm:$0xff]  ;;  %v9836_v5 = vld [vmem:[#allocation64_spill] sm:$0xff] }
 0x743   : >> { %3049 = vmatpush.bf16.msra.mxu0 %v5111_v48  ;;  %3068 = vmatpush.bf16.msra.mxu1 %v5115_v54  ;;  %v5099_v39 = vor.u32 %v9832_v49, %v9831_v36  ;;  %v5103_v32 = vor.u32 %v9834_v12, %v9833_v26  ;;  %v5107_v10 = vor.u32 %v9836_v5, %v9835_v16  ;;  %v9837_v0 = vld [vmem:[#allocation55_spill] sm:$0xff]  ;;  %v9839_v19 = vld [vmem:[#allocation58_spill] sm:$0xff]  ;;  %v9841_v25 = vld [vmem:[#allocation57_spill] sm:$0xff] }
 0x744   : >> { %3087 = vmatpush.bf16.msra.mxu2 %v5119_v18  ;;  %v9838_v1 = vld [vmem:[#allocation59_spill] sm:$0xff]  ;;  %v9840_v47 = vld [vmem:[#allocation54_spill] sm:$0xff]  ;;  %v9842_v51 = vld [vmem:[#allocation61_spill] sm:$0xff] }
 0x745   : >> { %3106 = vmatpush.bf16.msra.mxu3 %v5123_v50  ;;  %v5079_v48 = vor.u32 %v9838_v1, %v9837_v0  ;;  %v5083_v54 = vor.u32 %v9840_v47, %v9839_v19  ;;  %v5087_v18 = vor.u32 %v9842_v51, %v9841_v25  ;;  %v9843_v2 = vld [vmem:[#allocation60_spill] sm:$0xff]  ;;  %v9845_v4 = vld [vmem:[#allocation47_spill] sm:$0xff]  ;;  %v9847_v42 = vld [vmem:[#allocation50_spill] sm:$0xff] }
 0x746   : >> { %v9844_v9 = vld [vmem:[#allocation56_spill] sm:$0xff]  ;;  %v9846_v35 = vld [vmem:[#allocation51_spill] sm:$0xff]  ;;  %v9848_v3 = vld [vmem:[#allocation46_spill] sm:$0xff] }
 0x747   : >> { %3050 = vmatpush.bf16.msra.mxu0 %v5095_v58  ;;  %3069 = vmatpush.bf16.msra.mxu1 %v5099_v39  ;;  %v5091_v50 = vor.u32 %v9844_v9, %v9843_v2  ;;  %v5063_v58 = vor.u32 %v9846_v35, %v9845_v4  ;;  %v5067_v39 = vor.u32 %v9848_v3, %v9847_v42  ;;  %v9849_v34 = vld [vmem:[#allocation49_spill] sm:$0xff]  ;;  %v9851_v21 = vld [vmem:[#allocation52_spill] sm:$0xff]  ;;  %v9853_v13 = vld [vmem:[#allocation39_spill] sm:$0xff] }
 0x748   : >> { %3088 = vmatpush.bf16.msra.mxu2 %v5103_v32  ;;  %v9850_v46 = vld [vmem:[#allocation53_spill] sm:$0xff]  ;;  %v9852_v53 = vld [vmem:[#allocation48_spill] sm:$0xff]  ;;  %v9854_v31 = vld [vmem:[#allocation43_spill] sm:$0xff] }
 0x749   : >> { %3107 = vmatpush.bf16.msra.mxu3 %v5107_v10  ;;  %v5071_v32 = vor.u32 %v9850_v46, %v9849_v34  ;;  %v5075_v10 = vor.u32 %v9852_v53, %v9851_v21  ;;  %v9855_v24 = vld [vmem:[#allocation42_spill] sm:$0xff]  ;;  %v9857_v11 = vld [vmem:[#allocation41_spill] sm:$0xff]  ;;  %v9859_v29 = vld [vmem:[#allocation44_spill] sm:$0xff] }
 0x74a   : >> { %v9856_v20 = vld [vmem:[#allocation38_spill] sm:$0xff]  ;;  %v9858_v33 = vld [vmem:[#allocation45_spill] sm:$0xff]  ;;  %v9860_v17 = vld [vmem:[#allocation40_spill] sm:$0xff] }
 0x74b   : >> { %3051 = vmatpush.bf16.msra.mxu0 %v5079_v48  ;;  %3070 = vmatpush.bf16.msra.mxu1 %v5083_v54  ;;  %v5047_v48 = vor.u32 %v9854_v31, %v9853_v13  ;;  %v5051_v54 = vor.u32 %v9856_v20, %v9855_v24  ;;  %v9861_v37 = vld [vmem:[#allocation31_spill] sm:$0xff]  ;;  %v9863_v55 = vld [vmem:[#allocation34_spill] sm:$0xff]  ;;  %v9865_v45 = vld [vmem:[#allocation33_spill] sm:$0xff] }
 0x74c   : >> { %3089 = vmatpush.bf16.msra.mxu2 %v5087_v18  ;;  %v5055_v18 = vor.u32 %v9858_v33, %v9857_v11  ;;  %v9862_v7 = vld [vmem:[#allocation35_spill] sm:$0xff]  ;;  %v9864_v62 = vld [vmem:[#allocation30_spill] sm:$0xff]  ;;  %v9867_v0 = vld [vmem:[#allocation36_spill] sm:$0xff] }
 0x74d   : >> { %3108 = vmatpush.bf16.msra.mxu3 %v5091_v50  ;;  %v5059_v50 = vor.u32 %v9860_v17, %v9859_v29  ;;  %v9868_v1 = vld [vmem:[#allocation32_spill] sm:$0xff]  ;;  %v9869_v3 = vld [vmem:[#allocation23_spill] sm:$0xff]  ;;  %v9872_v5 = vld [vmem:[#allocation22_spill] sm:$0xff] }
 0x74e   : >> { %v5043_v2 = vor.u32 %v9868_v1, %v9867_v0  ;;  %v9870_v4 = vld [vmem:[#allocation27_spill] sm:$0xff]  ;;  %v9875_v0 = vld [vmem:[#allocation28_spill] sm:$0xff]  ;;  %v9879_v61 = vld [vmem:[#allocation146_spill] sm:$0xff] }
 0x74f   : >> { %3052 = vmatpush.bf16.msra.mxu0 %v5063_v58  ;;  %3071 = vmatpush.bf16.msra.mxu1 %v5067_v39  ;;  %v5031_v58 = vor.u32 %v9862_v7, %v9861_v37  ;;  %v5035_v39 = vor.u32 %v9864_v62, %v9863_v55  ;;  %v9874_v7 = vld [vmem:[#allocation29_spill] sm:$0xff]  ;;  %v9876_v1 = vld [vmem:[#allocation24_spill] sm:$0xff]  ;;  %v9877_v56 = vld [vmem:[#allocation143_spill] sm:$0xff] }
 0x750   : >> { %3090 = vmatpush.bf16.msra.mxu2 %v5071_v32  ;;  %v9866_v32 = vld [vmem:[#allocation37_spill] sm:$0xff]  ;;  %v9878_v40 = vld [vmem:[#allocation147_spill] sm:$0xff]  ;;  %v9880_v15 = vld [vmem:[#allocation142_spill] sm:$0xff] }
 0x751   : >> { %3109 = vmatpush.bf16.msra.mxu3 %v5075_v10  ;;  %v5039_v10 = vor.u32 %v9866_v32, %v9865_v45  ;;  %v9873_v32 = vld [vmem:[#allocation25_spill] sm:$0xff]  ;;  %v9900_v11 = vld [vmem:[#allocation128_spill] sm:$0xff]  ;;  %v9904_v13 = vld [vmem:[#allocation118_spill] sm:$0xff] }
 0x752   : >> { %v5023_v9 = vor.u32 %v9874_v7, %v9873_v32  ;;  %v9881_v8 = vld [vmem:[#allocation145_spill] sm:$0xff]  ;;  %v9883_v7 = vld [vmem:[#allocation148_spill] sm:$0xff]  ;;  %v9885_v32 = vld [vmem:[#allocation135_spill] sm:$0xff] }
 0x753   : >> { %3053 = vmatpush.bf16.msra.mxu0 %v5047_v48  ;;  %3072 = vmatpush.bf16.msra.mxu1 %v5051_v54  ;;  %v5015_v48 = vor.u32 %v9870_v4, %v9869_v3  ;;  %v9871_v54 = vld [vmem:[#allocation26_spill] sm:$0xff]  ;;  %v8710_v3 = vor.u32 %v9878_v40, %v9877_v56  ;;  %v8714_v4 = vor.u32 %v9880_v15, %v9879_v61  ;;  %v2875_v15 = vld [vmem:[%s8700_s24 + $0x10] sm:$0xff]  ;;  %v2876_v16 = vld [vmem:[%s8700_s24 + $0x18] sm:$0xff] }
 0x754   : >> { %3091 = vmatpush.bf16.msra.mxu2 %v5055_v18  ;;  %v5019_v6 = vor.u32 %v9872_v5, %v9871_v54  ;;  %v2873_v18 = vld [vmem:[%s8700_s24] sm:$0xff]  ;;  %v9908_v17 = vld [vmem:[#allocation120_spill] sm:$0xff]  ;;  %v2878_v22 = vpack.c.bf16 %v2876_v16, %v2875_v15 }
 0x755   : >> { %3110 = vmatpush.bf16.msra.mxu3 %v5059_v50  ;;  %v2874_v50 = vld [vmem:[%s8700_s24 + $0x8] sm:$0xff]  ;;  %v9912_v20 = vld [vmem:[#allocation110_spill] sm:$0xff]  ;;  %v9916_v23 = vld [vmem:[#allocation112_spill] sm:$0xff] }
 0x756   : >> { %v2877_v5 = vpack.c.bf16 %v2874_v50, %v2873_v18  ;;  %v9889_v18 = vld [vmem:[#allocation137_spill] sm:$0xff]  ;;  %v9919_v15 = vld [vmem:[#allocation106_spill] sm:$0xff]  ;;  %v9924_v25 = vld [vmem:[#allocation104_spill] sm:$0xff] }
 0x757   : >> { %3054 = vmatpush.bf16.msra.mxu0 %v5031_v58  ;;  %3073 = vmatpush.bf16.msra.mxu1 %v5035_v39  ;;  %v5027_v58 = vor.u32 %v9876_v1, %v9875_v0  ;;  %v9886_v0 = vld [vmem:[#allocation139_spill] sm:$0xff]  ;;  %v9890_v50 = vld [vmem:[#allocation141_spill] sm:$0xff]  ;;  %v9920_v16 = vld [vmem:[#allocation102_spill] sm:$0xff] }
 0x758   : >> { %3092 = vmatpush.bf16.msra.mxu2 %v5039_v10  ;;  %v9884_v10 = vld [vmem:[#allocation144_spill] sm:$0xff]  ;;  %v8728_v1 = vor.u32 %v9886_v0, %v9885_v32  ;;  %v9893_v32 = vld [vmem:[#allocation127_spill] sm:$0xff]  ;;  %v9928_v26 = vld [vmem:[#allocation94_spill] sm:$0xff] }
 0x759   : >> { %3111 = vmatpush.bf16.msra.mxu3 %v5043_v2  ;;  %v9882_v2 = vld [vmem:[#allocation149_spill] sm:$0xff]  ;;  %v8722_v54 = vor.u32 %v9884_v10, %v9883_v7  ;;  %v9892_v7 = vld [vmem:[#allocation136_spill] sm:$0xff]  ;;  %v9936_v30 = vld [vmem:[#allocation86_spill] sm:$0xff] }
 0x75a   : >> { %v8718_v39 = vor.u32 %v9882_v2, %v9881_v8  ;;  %v9891_v2 = vld [vmem:[#allocation140_spill] sm:$0xff] }
 0x75b   : >> { %3055 = vmatpush.bf16.msra.mxu0 %v5015_v48  ;;  %3074 = vmatpush.bf16.msra.mxu1 %v5019_v6  ;;  %v9887_v48 = vld [vmem:[#allocation138_spill] sm:$0xff]  ;;  %v8742_v10 = vor.u32 %v9892_v7, %v9891_v2  ;;  %v9899_v7 = vld [vmem:[#allocation132_spill] sm:$0xff] }
 0x75c   : >> { %3093 = vmatpush.bf16.msra.mxu2 %v5023_v9  ;;  %v9888_v6 = vld [vmem:[#allocation134_spill] sm:$0xff]  ;;  %v8762_v12 = vor.u32 %v9900_v11, %v9899_v7  ;;  %v9905_v11 = vld [vmem:[#allocation121_spill] sm:$0xff]  ;;  %v9907_v7 = vld [vmem:[#allocation124_spill] sm:$0xff] }
 0x75d   : >> { %3112 = vmatpush.bf16.msra.mxu3 %v5027_v58  ;;  %v8732_v9 = vor.u32 %v9888_v6, %v9887_v48  ;;  %v8738_v58 = vor.u32 %v9890_v50, %v9889_v18  ;;  %v9895_v48 = vld [vmem:[#allocation130_spill] sm:$0xff]  ;;  %v9897_v18 = vld [vmem:[#allocation129_spill] sm:$0xff]  ;;  %v8784_v19 = vor.u32 %v9908_v17, %v9907_v7  ;;  %v9915_v7 = vld [vmem:[#allocation116_spill] sm:$0xff] }
 0x75e   : >> { %3056 = vmatmul.bf16.vlgmr.msra.gmra.mxu0 %v2877_v5  ;;  %3075 = vmatmul.bf16.vlgmr.msra.gmra.mxu1 %v2877_v5  ;;  %v9896_v6 = vld [vmem:[#allocation126_spill] sm:$0xff]  ;;  %v9898_v50 = vld [vmem:[#allocation133_spill] sm:$0xff]  ;;  %v8804_v24 = vor.u32 %v9916_v23, %v9915_v7  ;;  %v9923_v7 = vld [vmem:[#allocation108_spill] sm:$0xff] }
 0x75f   : >> { %3308 = vmatpush.bf16.msrb.mxu0 %v8710_v3  ;;  %3321 = vmatpush.bf16.msrb.mxu1 %v8714_v4  ;;  %v8752_v8 = vor.u32 %v9896_v6, %v9895_v48  ;;  %v8758_v2 = vor.u32 %v9898_v50, %v9897_v18  ;;  %v9903_v6 = vld [vmem:[#allocation122_spill] sm:$0xff]  ;;  %v9906_v18 = vld [vmem:[#allocation125_spill] sm:$0xff]  ;;  %v9932_v28 = vld [vmem:[#allocation96_spill] sm:$0xff] }
 0x760   : >> { %3094 = vmatmul.bf16.vlgmr.msra.gmra.mxu2 %v2877_v5  ;;  %3113 = vmatmul.bf16.vlgmr.msra.gmra.mxu3 %v2877_v5  ;;  %v9894_v5 = vld [vmem:[#allocation131_spill] sm:$0xff]  ;;  %v8772_v14 = vor.u32 %v9904_v13, %v9903_v6  ;;  %v8780_v50 = vor.u32 %v9906_v18, %v9905_v11  ;;  %v9911_v6 = vld [vmem:[#allocation114_spill] sm:$0xff]  ;;  %v9913_v11 = vld [vmem:[#allocation113_spill] sm:$0xff] }
 0x761   : >> { %3334 = vmatpush.bf16.msrb.mxu2 %v8718_v39  ;;  %3347 = vmatpush.bf16.msrb.mxu3 %v8722_v54  ;;  %v8748_v0 = vor.u32 %v9894_v5, %v9893_v32  ;;  %v9901_v32 = vld [vmem:[#allocation119_spill] sm:$0xff]  ;;  %v8794_v21 = vor.u32 %v9912_v20, %v9911_v6  ;;  %v9914_v17 = vld [vmem:[#allocation117_spill] sm:$0xff]  ;;  %v8814_v6 = vor.u32 %v9920_v16, %v9919_v15  ;;  %v9940_v33 = vld [vmem:[#allocation88_spill] sm:$0xff] }
 0x762   : >> { %v9902_v5 = vld [vmem:[#allocation123_spill] sm:$0xff]  ;;  %v8800_v18 = vor.u32 %v9914_v17, %v9913_v11  ;;  %v9921_v23 = vld [vmem:[#allocation105_spill] sm:$0xff] }
 0x763   : >> { %3309 = vmatpush.bf16.msrb.mxu0 %v8728_v1  ;;  %3322 = vmatpush.bf16.msrb.mxu1 %v8732_v9  ;;  %v8768_v48 = vor.u32 %v9902_v5, %v9901_v32  ;;  %v9909_v13 = vld [vmem:[#allocation111_spill] sm:$0xff]  ;;  %v9922_v11 = vld [vmem:[#allocation109_spill] sm:$0xff] }
 0x764   : >> { %v9910_v32 = vld [vmem:[#allocation115_spill] sm:$0xff]  ;;  %v8820_v17 = vor.u32 %v9922_v11, %v9921_v23  ;;  %v9929_v23 = vld [vmem:[#allocation97_spill] sm:$0xff] }
 0x765   : >> { %3335 = vmatpush.bf16.msrb.mxu2 %v8738_v58  ;;  %3348 = vmatpush.bf16.msrb.mxu3 %v8742_v10  ;;  %v8790_v5 = vor.u32 %v9910_v32, %v9909_v13  ;;  %v9917_v13 = vld [vmem:[#allocation103_spill] sm:$0xff]  ;;  %v9930_v11 = vld [vmem:[#allocation101_spill] sm:$0xff] }
 0x766   : >> { %v9918_v20 = vld [vmem:[#allocation107_spill] sm:$0xff] }
 0x767   : >> { %3310 = vmatpush.bf16.msrb.mxu0 %v8748_v0  ;;  %3323 = vmatpush.bf16.msrb.mxu1 %v8752_v8  ;;  %v8810_v32 = vor.u32 %v9918_v20, %v9917_v13  ;;  %v8824_v13 = vor.u32 %v9924_v25, %v9923_v7  ;;  %v9925_v20 = vld [vmem:[#allocation95_spill] sm:$0xff]  ;;  %v8840_v25 = vor.u32 %v9930_v11, %v9929_v23  ;;  %v9931_v7 = vld [vmem:[#allocation100_spill] sm:$0xff]  ;;  %v9937_v23 = vld [vmem:[#allocation89_spill] sm:$0xff] }
 0x768   : >> { %v9926_v15 = vld [vmem:[#allocation99_spill] sm:$0xff]  ;;  %v8844_v29 = vor.u32 %v9932_v28, %v9931_v7  ;;  %v9938_v11 = vld [vmem:[#allocation93_spill] sm:$0xff]  ;;  %v9939_v7 = vld [vmem:[#allocation92_spill] sm:$0xff] }
 0x769   : >> { %3336 = vmatpush.bf16.msrb.mxu2 %v8758_v2  ;;  %3349 = vmatpush.bf16.msrb.mxu3 %v8762_v12  ;;  %v8830_v16 = vor.u32 %v9926_v15, %v9925_v20  ;;  %v9933_v20 = vld [vmem:[#allocation87_spill] sm:$0xff]  ;;  %v8860_v28 = vor.u32 %v9938_v11, %v9937_v23  ;;  %v8864_v34 = vor.u32 %v9940_v33, %v9939_v7  ;;  %v9942_v33 = vld [vmem:[#allocation150_spill] sm:$0xff] }
 0x76a   : >> { %v9934_v15 = vld [vmem:[#allocation91_spill] sm:$0xff]  ;;  %v2883_v35 = vperm.slane %v9942_v33, 3 }
 0x76b   : >> { %3311 = vmatpush.bf16.msrb.mxu0 %v8768_v48  ;;  %3324 = vmatpush.bf16.msrb.mxu1 %v8772_v14 }
 0x76d   : >> { %3337 = vmatpush.bf16.msrb.mxu2 %v8780_v50  ;;  %3350 = vmatpush.bf16.msrb.mxu3 %v8784_v19 }
 0x76e   : >> { %3061 = vmatmul.bf16.gmra.mxu0 %v2878_v22  ;;  %3080 = vmatmul.bf16.gmra.mxu1 %v2878_v22 }
 0x76f   : >> { %3312 = vmatpush.bf16.msrb.mxu0 %v8790_v5  ;;  %3325 = vmatpush.bf16.msrb.mxu1 %v8794_v21 }
 0x770   : >> { %3099 = vmatmul.bf16.gmra.mxu2 %v2878_v22  ;;  %3118 = vmatmul.bf16.gmra.mxu3 %v2878_v22  ;;  %v9927_v22 = vld [vmem:[#allocation98_spill] sm:$0xff] }
 0x771   : >> { %3338 = vmatpush.bf16.msrb.mxu2 %v8800_v18  ;;  %3351 = vmatpush.bf16.msrb.mxu3 %v8804_v24  ;;  %v8834_v27 = vor.u32 %v9928_v26, %v9927_v22  ;;  %v8850_v26 = vor.u32 %v9934_v15, %v9933_v20  ;;  %v9935_v22 = vld [vmem:[#allocation90_spill] sm:$0xff]  ;;  %v9941_v20 = vld [vmem:[#allocation166_spill] sm:$0xff]  ;;  %v2880_v15 = vperm.slane %v9942_v33, 0 }
 0x772   : >> { %v8854_v31 = vor.u32 %v9936_v30, %v9935_v22  ;;  %v3147_v30 = vpack.c.bf16 %v9941_v20, %v9941_v20  ;;  %v2881_v22 = vperm.slane %v9942_v33, 1 }
 0x773   : >> { %3313 = vmatpush.bf16.msrb.mxu0 %v8810_v32  ;;  %3326 = vmatpush.bf16.msrb.mxu1 %v8814_v6 }
 0x775   : >> { %3339 = vmatpush.bf16.msrb.mxu2 %v8820_v17  ;;  %3352 = vmatpush.bf16.msrb.mxu3 %v8824_v13 }
 0x777   : >> { %3314 = vmatpush.bf16.msrb.mxu0 %v8830_v16  ;;  %3327 = vmatpush.bf16.msrb.mxu1 %v8834_v27 }
 0x779   : >> { %3340 = vmatpush.bf16.msrb.mxu2 %v8840_v25  ;;  %3353 = vmatpush.bf16.msrb.mxu3 %v8844_v29 }
 0x77b   : >> { %3315 = vmatpush.bf16.msrb.mxu0 %v8850_v26  ;;  %3328 = vmatpush.bf16.msrb.mxu1 %v8854_v31 }
 0x77d   : >> { %3341 = vmatpush.bf16.msrb.mxu2 %v8860_v28  ;;  %3354 = vmatpush.bf16.msrb.mxu3 %v8864_v34 }
 0x77e   : >> { %3316 = vmatmul.bf16.vlgmr.msrb.gmra.mxu0 %v3147_v30  ;;  %3329 = vmatmul.bf16.vlgmr.msrb.gmra.mxu1 %v3147_v30 }
 0x77f   : >> { %3435 = vmatpush.bf16.msra.mxu0 %v8710_v3  ;;  %3448 = vmatpush.bf16.msra.mxu1 %v8714_v4 }
 0x780   : >> { %3342 = vmatmul.bf16.vlgmr.msrb.gmra.mxu2 %v3147_v30  ;;  %3355 = vmatmul.bf16.vlgmr.msrb.gmra.mxu3 %v3147_v30  ;;  %v2882_v30 = vperm.slane %v9942_v33, 2 }
 0x781   : >> { %3461 = vmatpush.bf16.msra.mxu2 %v8718_v39  ;;  %3474 = vmatpush.bf16.msra.mxu3 %v8722_v54 }
 0x783   : >> { %3436 = vmatpush.bf16.msra.mxu0 %v8728_v1  ;;  %3449 = vmatpush.bf16.msra.mxu1 %v8732_v9 }
 0x785   : >> { %3462 = vmatpush.bf16.msra.mxu2 %v8738_v58  ;;  %3475 = vmatpush.bf16.msra.mxu3 %v8742_v10 }
 0x787   : >> { %3437 = vmatpush.bf16.msra.mxu0 %v8748_v0  ;;  %3450 = vmatpush.bf16.msra.mxu1 %v8752_v8 }
 0x789   : >> { %3463 = vmatpush.bf16.msra.mxu2 %v8758_v2  ;;  %3476 = vmatpush.bf16.msra.mxu3 %v8762_v12 }
 0x78b   : >> { %3438 = vmatpush.bf16.msra.mxu0 %v8768_v48  ;;  %3451 = vmatpush.bf16.msra.mxu1 %v8772_v14 }
 0x78d   : >> { %3464 = vmatpush.bf16.msra.mxu2 %v8780_v50  ;;  %3477 = vmatpush.bf16.msra.mxu3 %v8784_v19 }
 0x78f   : >> { %3439 = vmatpush.bf16.msra.mxu0 %v8790_v5  ;;  %3452 = vmatpush.bf16.msra.mxu1 %v8794_v21 }
 0x791   : >> { %3465 = vmatpush.bf16.msra.mxu2 %v8800_v18  ;;  %3478 = vmatpush.bf16.msra.mxu3 %v8804_v24 }
 0x793   : >> { %3440 = vmatpush.bf16.msra.mxu0 %v8810_v32  ;;  %3453 = vmatpush.bf16.msra.mxu1 %v8814_v6 }
 0x795   : >> { %3466 = vmatpush.bf16.msra.mxu2 %v8820_v17  ;;  %3479 = vmatpush.bf16.msra.mxu3 %v8824_v13 }
 0x797   : >> { %3441 = vmatpush.bf16.msra.mxu0 %v8830_v16  ;;  %3454 = vmatpush.bf16.msra.mxu1 %v8834_v27 }
 0x799   : >> { %3467 = vmatpush.bf16.msra.mxu2 %v8840_v25  ;;  %3480 = vmatpush.bf16.msra.mxu3 %v8844_v29 }
 0x79b   : >> { %3442 = vmatpush.bf16.msra.mxu0 %v8850_v26  ;;  %3455 = vmatpush.bf16.msra.mxu1 %v8854_v31 }
 0x79d   : >> { %3468 = vmatpush.bf16.msra.mxu2 %v8860_v28  ;;  %3481 = vmatpush.bf16.msra.mxu3 %v8864_v34 }
 0x79f   : >> { %3562 = vmatpush.bf16.msrb.mxu0 %v8710_v3  ;;  %3575 = vmatpush.bf16.msrb.mxu1 %v8714_v4 }
 0x7a1   : >> { %3588 = vmatpush.bf16.msrb.mxu2 %v8718_v39  ;;  %3601 = vmatpush.bf16.msrb.mxu3 %v8722_v54 }
 0x7a3   : >> { %3563 = vmatpush.bf16.msrb.mxu0 %v8728_v1  ;;  %3576 = vmatpush.bf16.msrb.mxu1 %v8732_v9 }
 0x7a5   : >> { %3589 = vmatpush.bf16.msrb.mxu2 %v8738_v58  ;;  %3602 = vmatpush.bf16.msrb.mxu3 %v8742_v10 }
 0x7a7   : >> { %3564 = vmatpush.bf16.msrb.mxu0 %v8748_v0  ;;  %3577 = vmatpush.bf16.msrb.mxu1 %v8752_v8 }
 0x7a9   : >> { %3590 = vmatpush.bf16.msrb.mxu2 %v8758_v2  ;;  %3603 = vmatpush.bf16.msrb.mxu3 %v8762_v12 }
 0x7ab   : >> { %3565 = vmatpush.bf16.msrb.mxu0 %v8768_v48  ;;  %3578 = vmatpush.bf16.msrb.mxu1 %v8772_v14 }
 0x7ad   : >> { %3591 = vmatpush.bf16.msrb.mxu2 %v8780_v50  ;;  %3604 = vmatpush.bf16.msrb.mxu3 %v8784_v19 }
 0x7af   : >> { %3566 = vmatpush.bf16.msrb.mxu0 %v8790_v5  ;;  %3579 = vmatpush.bf16.msrb.mxu1 %v8794_v21 }
 0x7b1   : >> { %3592 = vmatpush.bf16.msrb.mxu2 %v8800_v18  ;;  %3605 = vmatpush.bf16.msrb.mxu3 %v8804_v24 }
 0x7b3   : >> { %3567 = vmatpush.bf16.msrb.mxu0 %v8810_v32  ;;  %3580 = vmatpush.bf16.msrb.mxu1 %v8814_v6 }
 0x7b5   : >> { %3593 = vmatpush.bf16.msrb.mxu2 %v8820_v17  ;;  %3606 = vmatpush.bf16.msrb.mxu3 %v8824_v13 }
 0x7b7   : >> { %3568 = vmatpush.bf16.msrb.mxu0 %v8830_v16  ;;  %3581 = vmatpush.bf16.msrb.mxu1 %v8834_v27 }
 0x7b9   : >> { %3594 = vmatpush.bf16.msrb.mxu2 %v8840_v25  ;;  %3607 = vmatpush.bf16.msrb.mxu3 %v8844_v29 }
 0x7bb   : >> { %3569 = vmatpush.bf16.msrb.mxu0 %v8850_v26  ;;  %3582 = vmatpush.bf16.msrb.mxu1 %v8854_v31 }
 0x7bd   : >> { %3595 = vmatpush.bf16.msrb.mxu2 %v8860_v28  ;;  %3608 = vmatpush.bf16.msrb.mxu3 %v8864_v34 }
 0x7db   : >> { %v3057_v23 = vpop.f32.mrf.mxu0  ;;  %v3076_v11 = vpop.f32.mrf.mxu1 }
 0x7dc   : >> { %v3058_v7 = vadd.f32 %v3057_v23, %v2880_v15  ;;  %v3077_v20 = vadd.f32 %v3076_v11, %v2881_v22 }
 0x7e3   : >> { %v3095_v36 = vpop.f32.mrf.mxu2  ;;  %v3114_v37 = vpop.f32.mrf.mxu3 }
 0x7e4   : >> { %v3096_v38 = vadd.f32 %v3095_v36, %v2882_v30  ;;  %v3115_v40 = vadd.f32 %v3114_v37, %v2883_v35  ;;  %v3059_v41 = vpop.f32.mrf.mxu0  ;;  %v3078_v42 = vpop.f32.mrf.mxu1 }
 0x7e5   : >> { %v8940_v43 = vadd.f32 %v3059_v41, %v2880_v15  ;;  %v8942_v44 = vadd.f32 %v3078_v42, %v2881_v22 }
 0x7eb   : >> { %v3097_v45 = vpop.f32.mrf.mxu2  ;;  %v3116_v46 = vpop.f32.mrf.mxu3 }
 0x7ec   : >> { %v8944_v47 = vadd.f32 %v3097_v45, %v2882_v30  ;;  %v8946_v23 = vadd.f32 %v3116_v46, %v2883_v35  ;;  %v3062_v11 = vpop.f32.mrf.mxu0  ;;  %v3081_v49 = vpop.f32.mrf.mxu1 }
 0x7ed   : >> { %v8948_v51 = vadd.f32 %v3062_v11, %v2880_v15  ;;  %v8950_v33 = vadd.f32 %v3081_v49, %v2881_v22 }
 0x7f3   : >> { %v3100_v36 = vpop.f32.mrf.mxu2  ;;  %v3119_v37 = vpop.f32.mrf.mxu3 }
 0x7f4   : >> { %v8952_v52 = vadd.f32 %v3100_v36, %v2882_v30  ;;  %v8954_v41 = vadd.f32 %v3119_v37, %v2883_v35  ;;  %v3064_v42 = vpop.f32.mrf.mxu0  ;;  %v3083_v53 = vpop.f32.mrf.mxu1 }
 0x7f5   : >> { %v8956_v55 = vadd.f32 %v3064_v42, %v2880_v15  ;;  %v8958_v45 = vadd.f32 %v3083_v53, %v2881_v22 }
 0x7f6   : >> { %9943 = vst [vmem:[#allocation166_spill] sm:$0xff] %v8952_v52 }
 0x7f7   : >> { %9944 = vst [vmem:[#allocation167_spill] sm:$0xff] %v8954_v41  ;;  %v9949_v41 = vld [vmem:[#allocation165_spill] sm:$0xff] }
 0x7f8   : >> { %9945 = vst [vmem:[#allocation168_spill] sm:$0xff] %v8956_v55 }
 0x7f9   : >> { %9946 = vst [vmem:[#allocation169_spill] sm:$0xff] %v8958_v45 }
 0x7fb   : >> { %v3102_v46 = vpop.f32.mrf.mxu2  ;;  %v3121_v56 = vpop.f32.mrf.mxu3 }
 0x7fc   : >> { %v8960_v57 = vadd.f32 %v3102_v46, %v2882_v30  ;;  %v8962_v11 = vadd.f32 %v3121_v56, %v2883_v35  ;;  %v3317_v49 = vpop.f32.mrf.mxu0  ;;  %v3330_v59 = vpop.f32.mrf.mxu1 }
 0x7fd   : >> { %v3360_v60 = vadd.f32 %v3317_v49, %v3058_v7  ;;  %v3361_v61 = vadd.f32 %v3330_v59, %v3077_v20 }
 0x7fe   : >> { %9947 = vst [vmem:[#allocation170_spill] sm:$0xff] %v8960_v57 }
 0x7ff   : >> { %9948 = vst [vmem:[#allocation171_spill] sm:$0xff] %v8962_v11  ;;  %v5268_v36 = vmul.f32 -1.442695, %v3360_v60  ;;  %v5269_v62 = vmul.f32 -1.442695, %v3361_v61 }
 0x801   : >> { %5997 = vpow2.f32 %v5268_v36 }
 0x802   : >> { %5999 = vpow2.f32 %v5269_v62 }
 0x803   : >> { %v3343_v37 = vpop.f32.mrf.mxu2  ;;  %v3356_v63 = vpop.f32.mrf.mxu3 }
 0x804   : >> { %v3362_v15 = vadd.f32 %v3343_v37, %v3096_v38  ;;  %v3319_v42 = vpop.f32.mrf.mxu0  ;;  %v3332_v53 = vpop.f32.mrf.mxu1  ;;  %v3363_v20 = vadd.f32 %v3356_v63, %v3115_v40 }
 0x806   : >> { %v5270_v22 = vmul.f32 -1.442695, %v3362_v15 }
 0x807   : >> { %v5998_v45 = vpop.eup %5997 }
 0x808   : >> { %v6000_v55 = vpop.eup %5999  ;;  %v3373_v30 = vadd.f32 1.0, %v5998_v45  ;;  %6001 = vpow2.f32 %v5270_v22 }
 0x809   : >> { %v3374_v56 = vadd.f32 1.0, %v6000_v55 }
 0x80a   : >> { %6003 = vrcp.f32 %v3373_v30  ;;  %v3387_v37 = vand.u32 2147483648, %v3373_v30  ;;  %v3385_v55 = vand.u32 2147483647, %v3373_v30  ;;  %vm3381_vm2 = vweird.f32 %v3373_v30 }
 0x80b   : >> { %6005 = vrcp.f32 %v3374_v56  ;;  %v3345_v35 = vpop.f32.mrf.mxu2  ;;  %v3358_v7 = vpop.f32.mrf.mxu3  ;;  %v3402_v15 = vand.u32 2147483648, %v3374_v56  ;;  %v3400_v53 = vand.u32 2147483647, %v3374_v56  ;;  %vm3396_vm3 = vweird.f32 %v3374_v56 }
 0x80c   : >> { %v3388_v63 = vor.u32 1.1754944e-38, %v3387_v37  ;;  %vm3386_vm6 = vcmp.eq.f32.partialorder %v3385_v55, 8.507059e+37 }
 0x80d   : >> { %vm3401_vm7 = vcmp.eq.f32.partialorder %v3400_v53, 8.507059e+37 }
 0x80e   : >> { %v6002_v59 = vpop.eup %6001 }
 0x80f   : >> { %v3375_v60 = vadd.f32 1.0, %v6002_v59  ;;  %v3403_v59 = vor.u32 1.1754944e-38, %v3402_v15 }
 0x810   : >> { %v6004_v61 = vpop.eup %6003 }
 0x811   : >> { %v6006_v62 = vpop.eup %6005  ;;  %v3377_v46 = vmul.f32 %v6004_v61, %v3373_v30  ;;  %6007 = vrcp.f32 %v3375_v60  ;;  %vm3382_vm0 = vweird.f32 %v6004_v61  ;;  %v3417_v37 = vand.u32 2147483648, %v3375_v60 }
 0x812   : >> { %v3392_v38 = vmul.f32 %v6006_v62, %v3374_v56  ;;  %6009 = vtanh.f32 %v3363_v20  ;;  %vm3397_vm1 = vweird.f32 %v6006_v62  ;;  %vm3383_vm4 = vmor %vm3381_vm2, %vm3382_vm0  ;;  %vm3411_vm9 = vweird.f32 %v3375_v60 }
 0x813   : >> { %v3378_v49 = vsub.f32 1.0, %v3377_v46  ;;  %vm3398_vm5 = vmor %vm3396_vm3, %vm3397_vm1  ;;  %v3418_v55 = vor.u32 1.1754944e-38, %v3417_v37 }
 0x814   : >> { %v3393_v36 = vsub.f32 1.0, %v3392_v38 }
 0x815   : >> { %v3379_v45 = vmul.f32 %v6004_v61, %v3378_v49 }
 0x816   : >> { %v3394_v42 = vmul.f32 %v6006_v62, %v3393_v36 }
 0x817   : >> { %v6008_v22 = vpop.eup %6007  ;;  %v3380_v35 = vadd.f32 %v6004_v61, %v3379_v45 }
 0x818   : >> { %v3407_v40 = vmul.f32 %v6008_v22, %v3375_v60  ;;  %v3395_v7 = vadd.f32 %v6006_v62, %v3394_v42  ;;  %v6010_v20 = vpop.eup %6009  ;;  %vm3412_vm8 = vweird.f32 %v6008_v22 }
 0x819   : >> { %v3384_v46 = vsel %vm3383_vm4, %v6004_v61, %v3380_v35  ;;  %v3415_v61 = vand.u32 2147483647, %v3375_v60  ;;  %vm3413_vm10 = vmor %vm3411_vm9, %vm3412_vm8 }
 0x81a   : >> { %v3408_v38 = vsub.f32 1.0, %v3407_v40  ;;  %v3389_v49 = vsel %vm3386_vm6, %v3388_v63, %v3384_v46  ;;  %v3399_v11 = vsel %vm3398_vm5, %v6006_v62, %v3395_v7 }
 0x81b   : >> { %v3404_v36 = vsel %vm3401_vm7, %v3403_v59, %v3399_v11  ;;  %v3423_v57 = vmul.f32 %v6010_v20, %v3389_v49  ;;  %vm3416_vm11 = vcmp.eq.f32.partialorder %v3415_v61, 8.507059e+37 }
 0x81c   : >> { %v3422_v52 = vmul.f32 %v9949_v41, %v3404_v36  ;;  %v3409_v45 = vmul.f32 %v6008_v22, %v3408_v38 }
 0x81e   : >> { %v8965_v30 = vadd.f32 %v3423_v57, %v3422_v52  ;;  %v3410_v56 = vadd.f32 %v6008_v22, %v3409_v45 }
 0x820   : >> { %6011 = vtanh.f32 %v8965_v30  ;;  %v3414_v15 = vsel %vm3413_vm10, %v6008_v22, %v3410_v56 }
 0x821   : >> { %v3419_v42 = vsel %vm3416_vm11, %v3418_v55, %v3414_v15 }
 0x826   : >> { %v6012_v62 = vpop.eup %6011 }
 0x827   : >> { %v3426_v11 = vmul.f32 %v6012_v62, %v3419_v42 }
 0x829   : >> { %v3434_v53 = vpack.c.bf16 %v3426_v11, %v3426_v11 }
 0x82b   : >> { %3443 = vmatmul.bf16.vlgmr.msra.gmra.mxu0 %v3434_v53  ;;  %3456 = vmatmul.bf16.vlgmr.msra.gmra.mxu1 %v3434_v53 }
 0x82c   : >> { %3469 = vmatmul.bf16.vlgmr.msra.gmra.mxu2 %v3434_v53  ;;  %3482 = vmatmul.bf16.vlgmr.msra.gmra.mxu3 %v3434_v53 }
 0x82d   : >> { %3689 = vmatpush.bf16.msra.mxu0 %v8710_v3  ;;  %3702 = vmatpush.bf16.msra.mxu1 %v8714_v4 }
 0x82e   : >> { %3715 = vmatpush.bf16.msra.mxu2 %v8718_v39  ;;  %3728 = vmatpush.bf16.msra.mxu3 %v8722_v54 }
 0x831   : >> { %3690 = vmatpush.bf16.msra.mxu0 %v8728_v1  ;;  %3703 = vmatpush.bf16.msra.mxu1 %v8732_v9 }
 0x832   : >> { %3716 = vmatpush.bf16.msra.mxu2 %v8738_v58  ;;  %3729 = vmatpush.bf16.msra.mxu3 %v8742_v10 }
 0x835   : >> { %3691 = vmatpush.bf16.msra.mxu0 %v8748_v0  ;;  %3704 = vmatpush.bf16.msra.mxu1 %v8752_v8 }
 0x836   : >> { %3717 = vmatpush.bf16.msra.mxu2 %v8758_v2  ;;  %3730 = vmatpush.bf16.msra.mxu3 %v8762_v12 }
 0x839   : >> { %3692 = vmatpush.bf16.msra.mxu0 %v8768_v48  ;;  %3705 = vmatpush.bf16.msra.mxu1 %v8772_v14 }
 0x83a   : >> { %3718 = vmatpush.bf16.msra.mxu2 %v8780_v50  ;;  %3731 = vmatpush.bf16.msra.mxu3 %v8784_v19 }
 0x83d   : >> { %3693 = vmatpush.bf16.msra.mxu0 %v8790_v5  ;;  %3706 = vmatpush.bf16.msra.mxu1 %v8794_v21 }
 0x83e   : >> { %3719 = vmatpush.bf16.msra.mxu2 %v8800_v18  ;;  %3732 = vmatpush.bf16.msra.mxu3 %v8804_v24 }
 0x841   : >> { %3694 = vmatpush.bf16.msra.mxu0 %v8810_v32  ;;  %3707 = vmatpush.bf16.msra.mxu1 %v8814_v6 }
 0x842   : >> { %3720 = vmatpush.bf16.msra.mxu2 %v8820_v17  ;;  %3733 = vmatpush.bf16.msra.mxu3 %v8824_v13 }
 0x845   : >> { %3695 = vmatpush.bf16.msra.mxu0 %v8830_v16  ;;  %3708 = vmatpush.bf16.msra.mxu1 %v8834_v27 }
 0x846   : >> { %3721 = vmatpush.bf16.msra.mxu2 %v8840_v25  ;;  %3734 = vmatpush.bf16.msra.mxu3 %v8844_v29 }
 0x849   : >> { %3696 = vmatpush.bf16.msra.mxu0 %v8850_v26  ;;  %3709 = vmatpush.bf16.msra.mxu1 %v8854_v31 }
 0x84a   : >> { %3722 = vmatpush.bf16.msra.mxu2 %v8860_v28  ;;  %3735 = vmatpush.bf16.msra.mxu3 %v8864_v34 }
 0x8a8   : >> { %v3444_v8 = vpop.f32.mrf.mxu0  ;;  %v3457_v24 = vpop.f32.mrf.mxu1 }
 0x8a9   : >> { %v3487_v21 = vadd.f32 %v3444_v8, %v8940_v43  ;;  %v3488_v19 = vadd.f32 %v3457_v24, %v8942_v44 }
 0x8ab   : >> { %v5271_v12 = vmul.f32 -1.442695, %v3487_v21  ;;  %v5272_v14 = vmul.f32 -1.442695, %v3488_v19 }
 0x8ad   : >> { %6013 = vpow2.f32 %v5271_v12  ;;  %v9950_v12 = vld [vmem:[#allocation166_spill] sm:$0xff] }
 0x8ae   : >> { %6015 = vpow2.f32 %v5272_v14 }
 0x8af   : >> { %v3470_v27 = vpop.f32.mrf.mxu2  ;;  %v3483_v29 = vpop.f32.mrf.mxu3 }
 0x8b0   : >> { %v3489_v57 = vadd.f32 %v3470_v27, %v8944_v47  ;;  %v3446_v52 = vpop.f32.mrf.mxu0  ;;  %v3459_v31 = vpop.f32.mrf.mxu1  ;;  %v3490_v10 = vadd.f32 %v3483_v29, %v8946_v23 }
 0x8b2   : >> { %v5273_v3 = vmul.f32 -1.442695, %v3489_v57 }
 0x8b3   : >> { %v6014_v4 = vpop.eup %6013 }
 0x8b4   : >> { %v6016_v39 = vpop.eup %6015  ;;  %v3500_v34 = vadd.f32 1.0, %v6014_v4  ;;  %6017 = vpow2.f32 %v5273_v3 }
 0x8b5   : >> { %v3501_v54 = vadd.f32 1.0, %v6016_v39 }
 0x8b6   : >> { %6019 = vrcp.f32 %v3500_v34  ;;  %v3514_v5 = vand.u32 2147483648, %v3500_v34  ;;  %v3512_v6 = vand.u32 2147483647, %v3500_v34  ;;  %vm3508_vm14 = vweird.f32 %v3500_v34 }
 0x8b7   : >> { %6021 = vrcp.f32 %v3501_v54  ;;  %v3472_v43 = vpop.f32.mrf.mxu2  ;;  %v3485_v44 = vpop.f32.mrf.mxu3  ;;  %v3529_v18 = vand.u32 2147483648, %v3501_v54  ;;  %v3527_v13 = vand.u32 2147483647, %v3501_v54  ;;  %vm3523_vm15 = vweird.f32 %v3501_v54 }
 0x8b8   : >> { %v3515_v28 = vor.u32 1.1754944e-38, %v3514_v5  ;;  %vm3513_vm2 = vcmp.eq.f32.partialorder %v3512_v6, 8.507059e+37  ;;  %v9951_v43 = vld [vmem:[#allocation167_spill] sm:$0xff] }
 0x8b9   : >> { %v3530_v41 = vor.u32 1.1754944e-38, %v3529_v18  ;;  %vm3528_vm3 = vcmp.eq.f32.partialorder %v3527_v13, 8.507059e+37 }
 0x8ba   : >> { %v6018_v1 = vpop.eup %6017 }
 0x8bb   : >> { %v3502_v9 = vadd.f32 1.0, %v6018_v1 }
 0x8bc   : >> { %v6020_v58 = vpop.eup %6019 }
 0x8bd   : >> { %v6022_v0 = vpop.eup %6021  ;;  %v3504_v2 = vmul.f32 %v6020_v58, %v3500_v34  ;;  %6023 = vrcp.f32 %v3502_v9  ;;  %vm3509_vm12 = vweird.f32 %v6020_v58  ;;  %v3544_v36 = vand.u32 2147483648, %v3502_v9 }
 0x8be   : >> { %v3519_v47 = vmul.f32 %v6022_v0, %v3501_v54  ;;  %6025 = vtanh.f32 %v3490_v10  ;;  %vm3524_vm13 = vweird.f32 %v6022_v0  ;;  %vm3510_vm0 = vmor %vm3508_vm14, %vm3509_vm12  ;;  %vm3538_vm5 = vweird.f32 %v3502_v9 }
 0x8bf   : >> { %v3505_v48 = vsub.f32 1.0, %v3504_v2  ;;  %vm3525_vm1 = vmor %vm3523_vm15, %vm3524_vm13  ;;  %v3542_v45 = vand.u32 2147483647, %v3502_v9  ;;  %v3545_v37 = vor.u32 1.1754944e-38, %v3544_v36 }
 0x8c0   : >> { %v3520_v50 = vsub.f32 1.0, %v3519_v47 }
 0x8c1   : >> { %v3506_v32 = vmul.f32 %v6020_v58, %v3505_v48  ;;  %vm3543_vm7 = vcmp.eq.f32.partialorder %v3542_v45, 8.507059e+37 }
 0x8c2   : >> { %v3521_v17 = vmul.f32 %v6022_v0, %v3520_v50 }
 0x8c3   : >> { %v6024_v16 = vpop.eup %6023  ;;  %v3507_v25 = vadd.f32 %v6020_v58, %v3506_v32 }
 0x8c4   : >> { %v3534_v26 = vmul.f32 %v6024_v16, %v3502_v9  ;;  %v3522_v23 = vadd.f32 %v6022_v0, %v3521_v17  ;;  %v6026_v22 = vpop.eup %6025  ;;  %vm3539_vm4 = vweird.f32 %v6024_v16 }
 0x8c5   : >> { %v3511_v60 = vsel %vm3510_vm0, %v6020_v58, %v3507_v25  ;;  %vm3540_vm6 = vmor %vm3538_vm5, %vm3539_vm4 }
 0x8c6   : >> { %v3535_v35 = vsub.f32 1.0, %v3534_v26  ;;  %v3516_v40 = vsel %vm3513_vm2, %v3515_v28, %v3511_v60  ;;  %v3526_v63 = vsel %vm3525_vm1, %v6022_v0, %v3522_v23 }
 0x8c7   : >> { %v3531_v7 = vsel %vm3528_vm3, %v3530_v41, %v3526_v63  ;;  %v3550_v59 = vmul.f32 %v6026_v22, %v3516_v40 }
 0x8c8   : >> { %v3549_v46 = vmul.f32 %v3531_v7, %v8965_v30  ;;  %v3536_v20 = vmul.f32 %v6024_v16, %v3535_v35 }
 0x8ca   : >> { %v9005_v38 = vadd.f32 %v3550_v59, %v3549_v46  ;;  %v3537_v49 = vadd.f32 %v6024_v16, %v3536_v20 }
 0x8cc   : >> { %6027 = vtanh.f32 %v9005_v38  ;;  %v3541_v56 = vsel %vm3540_vm6, %v6024_v16, %v3537_v49 }
 0x8cd   : >> { %v3546_v15 = vsel %vm3543_vm7, %v3545_v37, %v3541_v56 }
 0x8d2   : >> { %v6028_v61 = vpop.eup %6027 }
 0x8d3   : >> { %v3553_v55 = vmul.f32 %v6028_v61, %v3546_v15 }
 0x8d5   : >> { %v3561_v62 = vpack.c.bf16 %v3553_v55, %v3553_v55  ;;  %v9952_v55 = vld [vmem:[#allocation168_spill] sm:$0xff] }
 0x8d7   : >> { %3570 = vmatmul.bf16.vlgmr.msrb.gmra.mxu0 %v3561_v62  ;;  %3583 = vmatmul.bf16.vlgmr.msrb.gmra.mxu1 %v3561_v62 }
 0x8d8   : >> { %3596 = vmatmul.bf16.vlgmr.msrb.gmra.mxu2 %v3561_v62  ;;  %3609 = vmatmul.bf16.vlgmr.msrb.gmra.mxu3 %v3561_v62 }
 0x954   : >> { %v3571_v30 = vpop.f32.mrf.mxu0  ;;  %v3584_v42 = vpop.f32.mrf.mxu1 }
 0x955   : >> { %v3614_v11 = vadd.f32 %v3571_v30, %v8948_v51  ;;  %v3615_v53 = vadd.f32 %v3584_v42, %v8950_v33  ;;  %v9953_v30 = vld [vmem:[#allocation169_spill] sm:$0xff] }
 0x957   : >> { %v5274_v8 = vmul.f32 -1.442695, %v3614_v11  ;;  %v5275_v24 = vmul.f32 -1.442695, %v3615_v53 }
 0x959   : >> { %6029 = vpow2.f32 %v5274_v8 }
 0x95a   : >> { %6031 = vpow2.f32 %v5275_v24 }
 0x95b   : >> { %v3597_v21 = vpop.f32.mrf.mxu2  ;;  %v3610_v19 = vpop.f32.mrf.mxu3 }
 0x95c   : >> { %v3616_v14 = vadd.f32 %v3597_v21, %v9950_v12  ;;  %v3573_v27 = vpop.f32.mrf.mxu0  ;;  %v3586_v29 = vpop.f32.mrf.mxu1  ;;  %v3617_v44 = vadd.f32 %v3610_v19, %v9951_v43  ;;  %v9954_v21 = vld [vmem:[#allocation170_spill] sm:$0xff] }
 0x95e   : >> { %v5276_v57 = vmul.f32 -1.442695, %v3616_v14 }
 0x95f   : >> { %v6030_v52 = vpop.eup %6029 }
 0x960   : >> { %v6032_v31 = vpop.eup %6031  ;;  %v3627_v3 = vadd.f32 1.0, %v6030_v52  ;;  %6033 = vpow2.f32 %v5276_v57 }
 0x961   : >> { %v3628_v4 = vadd.f32 1.0, %v6032_v31 }
 0x962   : >> { %6035 = vrcp.f32 %v3627_v3  ;;  %v3641_v2 = vand.u32 2147483648, %v3627_v3  ;;  %v3639_v50 = vand.u32 2147483647, %v3627_v3  ;;  %vm3635_vm10 = vweird.f32 %v3627_v3 }
 0x963   : >> { %6037 = vrcp.f32 %v3628_v4  ;;  %v3599_v51 = vpop.f32.mrf.mxu2  ;;  %v3612_v33 = vpop.f32.mrf.mxu3  ;;  %v3656_v47 = vand.u32 2147483648, %v3628_v4  ;;  %v3654_v18 = vand.u32 2147483647, %v3628_v4  ;;  %vm3650_vm11 = vweird.f32 %v3628_v4 }
 0x964   : >> { %v3642_v13 = vor.u32 1.1754944e-38, %v3641_v2  ;;  %vm3640_vm14 = vcmp.eq.f32.partialorder %v3639_v50, 8.507059e+37 }
 0x965   : >> { %v3657_v25 = vor.u32 1.1754944e-38, %v3656_v47  ;;  %vm3655_vm15 = vcmp.eq.f32.partialorder %v3654_v18, 8.507059e+37 }
 0x966   : >> { %v6034_v39 = vpop.eup %6033 }
 0x967   : >> { %v3629_v34 = vadd.f32 1.0, %v6034_v39 }
 0x968   : >> { %v6036_v54 = vpop.eup %6035 }
 0x969   : >> { %v6038_v1 = vpop.eup %6037  ;;  %v3631_v9 = vmul.f32 %v6036_v54, %v3627_v3  ;;  %6039 = vrcp.f32 %v3629_v34  ;;  %vm3636_vm8 = vweird.f32 %v6036_v54  ;;  %v3671_v46 = vand.u32 2147483648, %v3629_v34 }
 0x96a   : >> { %v3646_v58 = vmul.f32 %v6038_v1, %v3628_v4  ;;  %6041 = vtanh.f32 %v3617_v44  ;;  %vm3651_vm9 = vweird.f32 %v6038_v1  ;;  %vm3637_vm12 = vmor %vm3635_vm10, %vm3636_vm8  ;;  %vm3665_vm1 = vweird.f32 %v3629_v34 }
 0x96b   : >> { %v3632_v10 = vsub.f32 1.0, %v3631_v9  ;;  %vm3652_vm13 = vmor %vm3650_vm11, %vm3651_vm9  ;;  %v3669_v20 = vand.u32 2147483647, %v3629_v34  ;;  %v3672_v36 = vor.u32 1.1754944e-38, %v3671_v46 }
 0x96c   : >> { %v3647_v0 = vsub.f32 1.0, %v3646_v58 }
 0x96d   : >> { %v3633_v48 = vmul.f32 %v6036_v54, %v3632_v10  ;;  %vm3670_vm3 = vcmp.eq.f32.partialorder %v3669_v20, 8.507059e+37 }
 0x96e   : >> { %v3648_v5 = vmul.f32 %v6038_v1, %v3647_v0 }
 0x96f   : >> { %v6040_v32 = vpop.eup %6039  ;;  %v3634_v6 = vadd.f32 %v6036_v54, %v3633_v48 }
 0x970   : >> { %v3661_v17 = vmul.f32 %v6040_v32, %v3629_v34  ;;  %v3649_v16 = vadd.f32 %v6038_v1, %v3648_v5  ;;  %v6042_v28 = vpop.eup %6041  ;;  %vm3666_vm0 = vweird.f32 %v6040_v32  ;;  %v9955_v34 = vld [vmem:[#allocation171_spill] sm:$0xff] }
 0x971   : >> { %v3638_v26 = vsel %vm3637_vm12, %v6036_v54, %v3634_v6  ;;  %vm3667_vm2 = vmor %vm3665_vm1, %vm3666_vm0  ;;  %vm4220_vm0 = vcmask (%p2865_p0), 523264  }
 0x972   : >> { %v3662_v23 = vsub.f32 1.0, %v3661_v17  ;;  %v3643_v41 = vsel %vm3640_vm14, %v3642_v13, %v3638_v26  ;;  %v3653_v60 = vsel %vm3652_vm13, %v6038_v1, %v3649_v16 }
 0x973   : >> { %v3658_v22 = vsel %vm3655_vm15, %v3657_v25, %v3653_v60  ;;  %v3677_v35 = vmul.f32 %v6042_v28, %v3643_v41 }
 0x974   : >> { %v3676_v40 = vmul.f32 %v3658_v22, %v9005_v38  ;;  %v3663_v63 = vmul.f32 %v6040_v32, %v3662_v23 }
 0x976   : >> { %v9013_v7 = vadd.f32 %v3677_v35, %v3676_v40  ;;  %v3664_v59 = vadd.f32 %v6040_v32, %v3663_v63 }
 0x978   : >> { %6043 = vtanh.f32 %v9013_v7  ;;  %v3668_v49 = vsel %vm3667_vm2, %v6040_v32, %v3664_v59 }
 0x979   : >> { %v3673_v56 = vsel %vm3670_vm3, %v3672_v36, %v3668_v49 }
 0x97e   : >> { %v6044_v45 = vpop.eup %6043 }
 0x97f   : >> { %v3680_v37 = vmul.f32 %v6044_v45, %v3673_v56  ;;  %v5667_v56 = vld [vmem:[#allocation12 + $0x74] sm:$0xf0] (%p2865_p0) }
 0x981   : >> { %v3688_v61 = vpack.c.bf16 %v3680_v37, %v3680_v37  ;;  %v5666_v37 = vld [vmem:[#allocation12 + $0x74] sm:$0xf] (%p2865_p0) }
 0x983   : >> { %3697 = vmatmul.bf16.vlgmr.msra.gmra.mxu0 %v3688_v61  ;;  %3710 = vmatmul.bf16.vlgmr.msra.gmra.mxu1 %v3688_v61 }
 0x984   : >> { %3723 = vmatmul.bf16.vlgmr.msra.gmra.mxu2 %v3688_v61  ;;  %3736 = vmatmul.bf16.vlgmr.msra.gmra.mxu3 %v3688_v61 }
 0xa00   : >> { %v3698_v38 = vpop.f32.mrf.mxu0  ;;  %v3711_v15 = vpop.f32.mrf.mxu1 }
 0xa01   : >> { %v3741_v62 = vadd.f32 %v3698_v38, %v9952_v55  ;;  %v3742_v42 = vadd.f32 %v3711_v15, %v9953_v30  ;;  %v5340_v38 = vld [vmem:[#allocation12 + $0x78] sm:$0xf0] (%p2865_p0)  ;;  %v5330_v15 = vld [vmem:[#allocation12 + $0x60] sm:$0xf] (%p2865_p0)  ;;  %v5665_v55 = vld [vmem:[#allocation12 + $0x64] sm:$0xf0] (%p2865_p0) }
 0xa02   : > { %v5664_v30 = vld [vmem:[#allocation12 + $0x64] sm:$0xf] (%p2865_p0) }
 0xa03   : >> { %v5277_v11 = vmul.f32 -1.442695, %v3741_v62  ;;  %v5278_v53 = vmul.f32 -1.442695, %v3742_v42  ;;  %v5343_v62 = vor.u32 (%p2865_p0), %v5666_v37, %v5340_v38  ;;  %v5332_v42 = vld [vmem:[#allocation12 + $0x68] sm:$0xf0] (%p2865_p0) }
 0xa04   : > { %v5691_v37 = vld [vmem:[%s9094_s14 + $0x38] sm:$0xff] (%p2865_p0)  ;;  %v5688_v38 = vld [vmem:[%s9094_s14 + $0x20] sm:$0xff] (%p2865_p0) }
 0xa05   : >> { %6045 = vpow2.f32 %v5277_v11  ;;  %v5331_v11 = vor.u32 (%p2865_p0), %v5665_v55, %v5330_v15  ;;  %3924 = vmatpush.bf16.msra.mxu1 (%p2865_p0), %v5343_v62  ;;  %v5687_v15 = vld [vmem:[%s9094_s14 + $0x18] sm:$0xff] (%p2865_p0)  ;;  %v3825_v55 = vld [vmem:[%s9958_s0] sm:$0x3] (%p2865_p0)  ;;  %v5686_v62 = vld [vmem:[%s9094_s14 + $0x10] sm:$0xff] (%p2865_p0) }
 0xa06   : >> { %6047 = vpow2.f32 %v5278_v53  ;;  %v5335_v53 = vor.u32 (%p2865_p0), %v5664_v30, %v5332_v42  ;;  %v3827_v30 = vperm.slane (%p2865_p0), %v3825_v55, 0  ;;  %v3828_v42 = vperm.slane (%p2865_p0), %v3825_v55, 1 }
 0xa07   : >> { %v3724_v8 = vpop.f32.mrf.mxu2  ;;  %v3737_v24 = vpop.f32.mrf.mxu3 }
 0xa08   : >> { %v3743_v19 = vadd.f32 %v3724_v8, %v9954_v21  ;;  %v3700_v12 = vpop.f32.mrf.mxu0  ;;  %v3713_v14 = vpop.f32.mrf.mxu1  ;;  %v3744_v54 = vadd.f32 %v3737_v24, %v9955_v34  ;;  %v5322_v8 = vld [vmem:[#allocation12 + $0x50] sm:$0xf] (%p2865_p0)  ;;  %v5663_v24 = vld [vmem:[#allocation12 + $0x54] sm:$0xf0] (%p2865_p0)  ;;  %v5662_v21 = vld [vmem:[#allocation12 + $0x54] sm:$0xf] (%p2865_p0) }
 0xa09   : > { %v5323_v12 = vor.u32 (%p2865_p0), %v5663_v24, %v5322_v8  ;;  %3925 = vmatpush.bf16.msra.mxu1 (%p2865_p0), %v5335_v53  ;;  %v5674_v34 = vld [vmem:[#allocation13 + $0x30] sm:$0xff] (%p2865_p0) }
 0xa0a   : >> { %v5279_v27 = vmul.f32 -1.442695, %v3743_v19  ;;  %v5324_v19 = vld [vmem:[#allocation12 + $0x58] sm:$0xf0] (%p2865_p0) }
 0xa0b   : >> { %v6046_v29 = vpop.eup %6045  ;;  %v5327_v14 = vor.u32 (%p2865_p0), %v5662_v21, %v5324_v19 }
 0xa0c   : >> { %v6048_v57 = vpop.eup %6047  ;;  %v3754_v52 = vadd.f32 1.0, %v6046_v29  ;;  %6049 = vpow2.f32 %v5279_v27  ;;  %v5314_v27 = vld [vmem:[#allocation12 + $0x40] sm:$0xf] (%p2865_p0)  ;;  %v5661_v29 = vld [vmem:[#allocation12 + $0x44] sm:$0xf0] (%p2865_p0) }
 0xa0d   : >> { %v3755_v31 = vadd.f32 1.0, %v6048_v57  ;;  %v5660_v57 = vld [vmem:[#allocation12 + $0x44] sm:$0xf] (%p2865_p0)  ;;  %3926 = vmatpush.bf16.msra.mxu1 (%p2865_p0), %v5327_v14 }
 0xa0e   : >> { %6051 = vrcp.f32 %v3754_v52  ;;  %v3768_v10 = vand.u32 2147483648, %v3754_v52  ;;  %v3766_v47 = vand.u32 2147483647, %v3754_v52  ;;  %vm3762_vm6 = vweird.f32 %v3754_v52 }
 0xa0f   : >> { %6053 = vrcp.f32 %v3755_v31  ;;  %v3726_v3 = vpop.f32.mrf.mxu2  ;;  %v3739_v4 = vpop.f32.mrf.mxu3  ;;  %v3783_v0 = vand.u32 2147483648, %v3755_v31  ;;  %v3781_v50 = vand.u32 2147483647, %v3755_v31  ;;  %vm3777_vm7 = vweird.f32 %v3755_v31 }
 0xa10   : >> { %v3769_v6 = vor.u32 1.1754944e-38, %v3768_v10  ;;  %vm3767_vm10 = vcmp.eq.f32.partialorder %v3766_v47, 8.507059e+37  ;;  %v5315_v3 = vor.u32 (%p2865_p0), %v5661_v29, %v5314_v27  ;;  %v5683_v4 = vld [vmem:[#allocation13 + $0x78] sm:$0xff] (%p2865_p0)  ;;  %v5657_v10 = vld [vmem:[#allocation12 + $0x24] sm:$0xf0] (%p2865_p0) }
 0xa11   : >> { %v3784_v13 = vor.u32 1.1754944e-38, %v3783_v0  ;;  %vm3782_vm11 = vcmp.eq.f32.partialorder %v3781_v50, 8.507059e+37  ;;  %4086 = vmatpush.bf16.msra.mxu3 (%p2865_p0), %v5683_v4  ;;  %v5673_v0 = vld [vmem:[#allocation13 + $0x28] sm:$0xff] (%p2865_p0) }
 0xa12   : >> { %v6050_v51 = vpop.eup %6049  ;;  %v5300_v47 = vld [vmem:[#allocation12 + $0x28] sm:$0xf0] (%p2865_p0) }
 0xa13   : >> { %v3756_v33 = vadd.f32 1.0, %v6050_v51  ;;  %v5693_v4 = vld [vmem:[#allocation15 + $0x8] sm:$0xff] (%p2865_p0) }
 0xa14   : >> { %v6052_v39 = vpop.eup %6051 }
 0xa15   : >> { %v6054_v43 = vpop.eup %6053  ;;  %v3758_v44 = vmul.f32 %v6052_v39, %v3754_v52  ;;  %6055 = vrcp.f32 %v3756_v33  ;;  %vm3763_vm4 = vweird.f32 %v6052_v39  ;;  %v3798_v63 = vand.u32 2147483648, %v3756_v33  ;;  %v5316_v52 = vld [vmem:[#allocation12 + $0x48] sm:$0xf0] (%p2865_p0) }
 0xa16   : >> { %v3773_v1 = vmul.f32 %v6054_v43, %v3755_v31  ;;  %6057 = vtanh.f32 %v3744_v54  ;;  %vm3778_vm5 = vweird.f32 %v6054_v43  ;;  %vm3764_vm8 = vmor %vm3762_vm6, %vm3763_vm4  ;;  %vm3792_vm13 = vweird.f32 %v3756_v33  ;;  %v5675_v31 = vld [vmem:[#allocation13 + $0x38] sm:$0xff] (%p2865_p0) }
 0xa17   : >> { %v3759_v9 = vsub.f32 1.0, %v3758_v44  ;;  %vm3779_vm9 = vmor %vm3777_vm7, %vm3778_vm5  ;;  %v3796_v59 = vand.u32 2147483647, %v3756_v33  ;;  %v3799_v20 = vor.u32 1.1754944e-38, %v3798_v63  ;;  %v5319_v51 = vor.u32 (%p2865_p0), %v5660_v57, %v5316_v52  ;;  %4073 = vmatpush.bf16.msra.mxu2 (%p2865_p0), %v5675_v31  ;;  %v5682_v44 = vld [vmem:[#allocation13 + $0x70] sm:$0xff] (%p2865_p0)  ;;  %v5685_v57 = vld [vmem:[%s9094_s14 + $0x8] sm:$0xff] (%p2865_p0) }
 0xa18   : >> { %v3774_v58 = vsub.f32 1.0, %v3773_v1  ;;  %4087 = vmatpush.bf16.msra.mxu3 (%p2865_p0), %v5682_v44  ;;  %v5684_v52 = vld [vmem:[%s9094_s14] sm:$0xff] (%p2865_p0)  ;;  %v5695_v31 = vld [vmem:[#allocation15 + $0x18] sm:$0xff] (%p2865_p0) }
 0xa19   : >> { %v3760_v2 = vmul.f32 %v6052_v39, %v3759_v9  ;;  %vm3797_vm15 = vcmp.eq.f32.partialorder %v3796_v59, 8.507059e+37  ;;  %v5298_v9 = vld [vmem:[#allocation12 + $0x20] sm:$0xf] (%p2865_p0)  ;;  %3927 = vmatpush.bf16.msra.mxu1 (%p2865_p0), %v5319_v51  ;;  %v5670_v59 = vld [vmem:[#allocation13 + $0x10] sm:$0xff] (%p2865_p0) }
 0xa1a   : >> { %v3775_v48 = vmul.f32 %v6054_v43, %v3774_v58  ;;  %v5299_v50 = vor.u32 (%p2865_p0), %v5657_v10, %v5298_v9  ;;  %v6061_v51 = vld [vmem:[%s9959_s17] ss:$0 sm:$0xff] (%p2865_p0) }
 0xa1b   : >> { %v6056_v5 = vpop.eup %6055  ;;  %v3761_v18 = vadd.f32 %v6052_v39, %v3760_v2  ;;  %4074 = vmatpush.bf16.msra.mxu2 (%p2865_p0), %v5674_v34  ;;  %v5656_v2 = vld [vmem:[#allocation12 + $0x24] sm:$0xf] (%p2865_p0)  ;;  %v6062_v10 = vld [vmem:[%s9960_s4] ss:$0 sm:$0xff] (%p2865_p0) }
 0xa1c   : >> { %v3788_v32 = vmul.f32 %v6056_v5, %v3756_v33  ;;  %v3776_v17 = vadd.f32 %v6054_v43, %v3775_v48  ;;  %v6058_v25 = vpop.eup %6057  ;;  %vm3793_vm12 = vweird.f32 %v6056_v5  ;;  %v5306_v33 = vld [vmem:[#allocation12 + $0x30] sm:$0xf] (%p2865_p0) }
 0xa1d   : >> { %v3765_v16 = vsel %vm3764_vm8, %v6052_v39, %v3761_v18  ;;  %vm3794_vm14 = vmor %vm3792_vm13, %vm3793_vm12  ;;  %v5659_v39 = vld [vmem:[#allocation12 + $0x34] sm:$0xf0] (%p2865_p0)  ;;  %v5290_v18 = vld [vmem:[#allocation12 + $0x10] sm:$0xf] (%p2865_p0) }
 0xa1e   : >> { %v3789_v26 = vsub.f32 1.0, %v3788_v32  ;;  %v3770_v28 = vsel %vm3767_vm10, %v3769_v6, %v3765_v16  ;;  %v3780_v23 = vsel %vm3779_vm9, %v6054_v43, %v3776_v17  ;;  %v5308_v43 = vld [vmem:[#allocation12 + $0x38] sm:$0xf0] (%p2865_p0)  ;;  %v5307_v1 = vor.u32 (%p2865_p0), %v5659_v39, %v5306_v33  ;;  %v5655_v32 = vld [vmem:[#allocation12 + $0x14] sm:$0xf0] (%p2865_p0)  ;;  %v5672_v6 = vld [vmem:[#allocation13 + $0x20] sm:$0xff] (%p2865_p0) }
 0xa1f   : >> { %v3785_v41 = vsel %vm3782_vm11, %v3784_v13, %v3780_v23  ;;  %v3804_v60 = vmul.f32 %v6058_v25, %v3770_v28  ;;  %4075 = vmatpush.bf16.msra.mxu2 (%p2865_p0), %v5673_v0  ;;  %v5654_v17 = vld [vmem:[#allocation12 + $0x14] sm:$0xf] (%p2865_p0)  ;;  %v5292_v13 = vld [vmem:[#allocation12 + $0x18] sm:$0xf0] (%p2865_p0)  ;;  %v5680_v16 = vld [vmem:[#allocation13 + $0x60] sm:$0xff] (%p2865_p0)  ;;  %v5291_v25 = vor.u32 (%p2865_p0), %v5655_v32, %v5290_v18 }
 0xa20   : >> { %v3790_v22 = vmul.f32 %v6056_v5, %v3789_v26  ;;  %v3803_v35 = vmul.f32 %v3785_v41, %v9013_v7  ;;  %v5338_v7 = vld [vmem:[#allocation12 + $0x70] sm:$0xf] (%p2865_p0)  ;;  %v5295_v26 = vor.u32 (%p2865_p0), %v5654_v17, %v5292_v13  ;;  %v5282_v28 = vld [vmem:[#allocation12] sm:$0xf] (%p2865_p0)  ;;  %v5653_v23 = vld [vmem:[#allocation12 + $0x4] sm:$0xf0] (%p2865_p0) }
 0xa21   : > { %v5339_v61 = vor.u32 (%p2865_p0), %v5667_v56, %v5338_v7  ;;  %v5671_v41 = vld [vmem:[#allocation13 + $0x18] sm:$0xff] (%p2865_p0)  ;;  %v5668_v7 = vld [vmem:[#allocation13] sm:$0xff] (%p2865_p0) }
 0xa22   : >> { %v3805_v48 = vadd.f32 %v3804_v60, %v3803_v35   ;;  %v3791_v40 = vadd.f32 %v6056_v5, %v3790_v22  ;;  %v5652_v60 = vld [vmem:[#allocation12 + $0x4] sm:$0xf] (%p2865_p0)  ;;  %v5284_v22 = vld [vmem:[#allocation12 + $0x8] sm:$0xf0] (%p2865_p0)  ;;  %v5679_v35 = vld [vmem:[#allocation13 + $0x58] sm:$0xff] (%p2865_p0) }
 0xa23   : > { %3911 = vmatpush.bf16.msra.mxu0 (%p2865_p0), %v5339_v61  ;;  %4076 = vmatpush.bf16.msra.mxu2 (%p2865_p0), %v5672_v6  ;;  %v5287_v63 = vor.u32 (%p2865_p0), %v5652_v60, %v5284_v22  ;;  %v5676_v56 = vld [vmem:[#allocation13 + $0x40] sm:$0xff] (%p2865_p0)  ;;  %v5689_v61 = vld [vmem:[%s9094_s14 + $0x28] sm:$0xff] (%p2865_p0) }
 0xa24   : >> { %6059 = vtanh.f32 %v3805_v48  ;;  %v3795_v46 = vsel %vm3794_vm14, %v6056_v5, %v3791_v40  ;;  %v5681_v48 = vld [vmem:[#allocation13 + $0x68] sm:$0xff] (%p2865_p0)  ;;  %v5303_v5 = vor.u32 (%p2865_p0), %v5656_v2, %v5300_v47  ;;  %v5283_v40 = vor.u32 (%p2865_p0), %v5653_v23, %v5282_v28 }
 0xa25   : >> { %v3800_v36 = vsel %vm3797_vm15, %v3799_v20, %v3795_v46  ;;  %4088 = vmatpush.bf16.msra.mxu3 (%p2865_p0), %v5681_v48  ;;  %v5678_v46 = vld [vmem:[#allocation13 + $0x50] sm:$0xff] (%p2865_p0) }
 0xa27   : > { %3912 = vmatpush.bf16.msra.mxu0 (%p2865_p0), %v5331_v11  ;;  %4077 = vmatpush.bf16.msra.mxu2 (%p2865_p0), %v5671_v41 }
 0xa29   : > { %4089 = vmatpush.bf16.msra.mxu3 (%p2865_p0), %v5680_v16 }
 0xa2a   : >> { %v6060_v49 = vpop.eup %6059  ;;  %2867 = sbr.rel (!%p2865_p0) target bundleno = 1851 (0x73b), region = 260 }
 0xa2b   : >> { %v9021_v54 = vmul.f32 %v6060_v49, %v3800_v36   ;;  %3913 = vmatpush.bf16.msra.mxu0 (%p2865_p0), %v5323_v12  ;;  %4078 = vmatpush.bf16.msra.mxu2 (%p2865_p0), %v5670_v59  ;;  %v5669_v49 = vld [vmem:[#allocation13 + $0x8] sm:$0xff] (%p2865_p0) }
 0xa2c   : > { %v5677_v36 = vld [vmem:[#allocation13 + $0x48] sm:$0xff] (%p2865_p0) }
 0xa2d   : >> { %v9956_v45 = vmov %v9021_v54  ;;  %4090 = vmatpush.bf16.msra.mxu3 (%p2865_p0), %v5679_v35 }
 0xa2e   : >> { %v9957_v54 = vmov %v9956_v45  ;;  %v3808_v20 = vpack.c.bf16 (%p2865_p0), %v9956_v45, %v9956_v45  ;;  %v5690_v45 = vld [vmem:[%s9094_s14 + $0x30] sm:$0xff] (%p2865_p0) }
 0xa2f   : > { %v5658_v54 = vld [vmem:[#allocation12 + $0x34] sm:$0xf]  ;;  %3914 = vmatpush.bf16.msra.mxu0 %v5315_v3  ;;  %4079 = vmatpush.bf16.msra.mxu2 %v5669_v49 }
 0xa30   : > { %v5311_v58 = vor.u32 %v5658_v54, %v5308_v43  ;;  %v5694_v3 = vld [vmem:[#allocation15 + $0x10] sm:$0xff] }
 0xa31   : > { %4091 = vmatpush.bf16.msra.mxu3 %v5678_v46 }
 0xa32   : > { %3928 = vmatpush.bf16.msra.mxu1 %v5311_v58  ;;  %v5692_v58 = vld [vmem:[#allocation15] sm:$0xff] }
 0xa33   : > { %3915 = vmatpush.bf16.msra.mxu0 %v5307_v1  ;;  %4080 = vmatpush.bf16.msra.mxu2 %v5668_v7 }
 0xa35   : > { %4092 = vmatpush.bf16.msra.mxu3 %v5677_v36 }
 0xa36   : > { %3929 = vmatpush.bf16.msra.mxu1 %v5303_v5  ;;  %v6063_v5 = vld [vmem:[%s9961_s25] ss:$0 sm:$0xff] }
 0xa37   : > { %3916 = vmatpush.bf16.msra.mxu0 %v5299_v50 }
 0xa39   : > { %4093 = vmatpush.bf16.msra.mxu3 %v5676_v56 }
 0xa3a   : > { %3930 = vmatpush.bf16.msra.mxu1 %v5295_v26 }
 0xa3b   : > { %3917 = vmatpush.bf16.msra.mxu0 %v5291_v25 }
 0xa3e   : > { %3931 = vmatpush.bf16.msra.mxu1 %v5287_v63 }
 0xa3f   : > { %3918 = vmatpush.bf16.msra.mxu0 %v5283_v40 }
 0xa41   : > { %3932 = vmatmul.bf16.vlgmr.msra.gmra.mxu1 %v3808_v20 }
 0xa42   : > { %3919 = vmatmul.bf16.vlgmr.msra.gmra.mxu0 %v3808_v20  ;;  %4228 = vmatpush.bf16.msrb.mxu1 %v5695_v31 }
 0xa43   : > { %4169 = vmatpush.bf16.msrb.mxu0 %v5691_v37 }
 0xa46   : > { %4229 = vmatpush.bf16.msrb.mxu1 %v5694_v3 }
 0xa47   : > { %4170 = vmatpush.bf16.msrb.mxu0 %v5690_v45 }
 0xa4a   : > { %4230 = vmatpush.bf16.msrb.mxu1 %v5693_v4 }
 0xa4b   : > { %4171 = vmatpush.bf16.msrb.mxu0 %v5689_v61 }
 0xa4e   : > { %4231 = vmatpush.bf16.msrb.mxu1 %v5692_v58 }
 0xa4f   : > { %4172 = vmatpush.bf16.msrb.mxu0 %v5688_v38 }
 0xa53   : > { %4173 = vmatpush.bf16.msrb.mxu0 %v5687_v15 }
 0xa57   : > { %4174 = vmatpush.bf16.msrb.mxu0 %v5686_v62 }
 0xa5b   : > { %4175 = vmatpush.bf16.msrb.mxu0 %v5685_v57 }
 0xa5f   : > { %4176 = vmatpush.bf16.msrb.mxu0 %v5684_v52 }
 0xabe   : > { %v3933_v8 = vpop.f32.mrf.mxu1 }
 0xabf   : > { %v3920_v11 = vpop.f32.mrf.mxu0  ;;  %v3934_v24 = vadd.f32 %v3933_v8, %v3828_v42 }
 0xac0   : > { %v3921_v53 = vadd.f32 %v3920_v11, %v3827_v30 }
 0xac1   : > { %v3938_v19 = vmax.f32 %v3934_v24, 0.0 }
 0xac2   : > { %v3937_v21 = vmax.f32 %v3921_v53, 0.0 }
 0xac3   : > { %v3940_v14 = vpack.c.bf16 %v3938_v19, %v3938_v19 }
 0xac4   : > { %v3939_v12 = vpack.c.bf16 %v3937_v21, %v3937_v21 }
 0xac5   : > { %4094 = vmatmul.bf16.vlgmr.msra.gmra.mxu3 %v3940_v14 }
 0xac6   : > { %4081 = vmatmul.bf16.vlgmr.msra.gmra.mxu2 %v3939_v12  ;;  %v3935_v29 = vpop.f32.mrf.mxu1 }
 0xac7   : > { %v3922_v27 = vpop.f32.mrf.mxu0 }
 0xb48   : > { %v4095_v34 = vpop.f32.mrf.mxu3 }
 0xb49   : > { %v4082_v33 = vpop.f32.mrf.mxu2 }
 0xb4a   : > { %v4083_v39 = vadd.f32 %v6061_v51, %v4082_v33 }
 0xb4c   : > { %v4096_v54 = vadd.f32 %v4095_v34, %v4083_v39 }
 0xb4e   : > { %v4099_v43 = vmax.f32 %v4096_v54, 0.0 }
 0xb50   : > { %v4100_v44 = vpack.c.bf16 %v4099_v43, %v4099_v43  ;;  %v4097_v9 = vpop.f32.mrf.mxu3 }
 0xb51   : > { %v4084_v1 = vpop.f32.mrf.mxu2 }
 0xb52   : > { %4177 = vmatmul.bf16.vlgmr.msrb.gmra.mxu0 %v4100_v44 }
 0xbcf   : > { %v4178_v0 = vpop.f32.mrf.mxu0 }
 0xbd0   : > { %v4179_v2 = vadd.f32 %v6062_v10, %v4178_v0 }
 0xbd2   : > { %v4182_v47 = vmax.f32 %v4179_v2, 0.0 }
 0xbd4   : > { %v4183_v48 = vpack.c.bf16 %v4182_v47, %v4182_v47 }
 0xbd6   : > { %5456 = vmatmul.msk.bf16.vlgmr.msrb.gmra.mxu1 %vm4220_vm0, %v4183_v48 }
 0xbd7   : > { %v4180_v50 = vpop.f32.mrf.mxu0 }
 0xc53   : > { %v4233_v18 = vpop.f32.mrf.mxu1 }
 0xc54   : > { %v4234_v32 = vadd.f32 %v6063_v5, %v4233_v18 }
 0xc56   : > { %4237 = vst [vmem:[%s6631_s5] sm:$0xff] %v4234_v32 }
 0xc5b   : > { %v4235_v6 = vpop.f32.mrf.mxu1 }
 0xc5c PF: > { %s9962_s29 = sld [smem:[#allocation20_spill]]  ;;  %s9964_s27 = smov %s6344_s28 }
 0xc5d   : > { %s9963_s21 = sld [smem:[#allocation21_spill]] }
 0xc62   : > { %p29_p1 = scmp.ge.s32.totalorder %s9962_s29, 4  }
 0xc63   : > { %s9965_s28 = smov %s9963_s21 }
 0xc64   :  { %31 = sbr.rel (!%p29_p1) target bundleno = 17 (0x11), region = 271 }
 0xc69   :  { %4257 = vsyncpa [#allocation6], 1 }
 0xc6a   :  { %4259 = vsyncpa [#allocation6 + $0x1], 1 }
 0xc6b   :  { %4260 = vsyncpa [#allocation8], 1 }
 0xc6c   :  { %4261 = vsyncpa [#allocation11], 1 }
 0xc6d   :  { %4262 = vsyncpa [#allocation14], 1 }

</bundles_post_ra>
